<compile_context>
chip_gen: v7x
topology: tpu7x:2x2x1
jax: 0.10.0
libtpu: 0.0.40
codegen_flags: <defaults>
</compile_context>

<pallas_src>
import functools

import jax
import jax.numpy as jnp
from jax.experimental import pallas as pl
from jax.experimental.pallas import tpu as pltpu

_LANE = 128                       # pad channel dims to this -> lane-dense stores
_VMEM_LIMIT = 48 * 1024 * 1024    # headroom vs v7x's 64 MiB physical VMEM
_ACT_DTYPE = jnp.bfloat16         # activations / weights (f32 accumulation)

MODULE_KEYS = ['conv1', 'bn1', 'relu', 'maxpool',
               'layer1', 'layer2', 'layer3', 'layer4', 'avgpool', 'fc']


def _rup(c, m=_LANE):
    return ((c + m - 1) // m) * m


def _pick_tile(m, target=1024):
    """Largest multiple-of-8 divisor of m that is <= target (else the full m)."""
    if m <= target:
        return m
    for t in range(target, 8, -8):
        if m % t == 0:
            return t
    return m


# ----------------------------------------------------------------------------
# Fused conv (+BN +residual +ReLU) kernel.
#   grid = (M tiles, kh*kw reduction); f32 VMEM accumulator; epilogue applies
#   scale/shift (+identity) (+ReLU) and stores a lane-dense bf16 tile.
# ----------------------------------------------------------------------------

def _conv_fused_kernel(cols_ref, w_ref, s_ref, b_ref, *rest, relu, has_residual):
    if has_residual:
        res_ref, out_ref, acc_ref = rest
    else:
        out_ref, acc_ref = rest
    k = pl.program_id(1)

    @pl.when(k == 0)
    def _init():
        acc_ref[...] = jnp.zeros_like(acc_ref)

    acc_ref[...] += jnp.dot(cols_ref[0], w_ref[0],
                            preferred_element_type=jnp.float32)

    @pl.when(k == pl.num_programs(1) - 1)
    def _epilogue():
        y = acc_ref[...] * s_ref[...] + b_ref[...]
        if has_residual:
            y = y + res_ref[...].astype(jnp.float32)
        if relu:
            y = jnp.maximum(y, 0.0)
        out_ref[...] = y.astype(out_ref.dtype)


def conv_bn_act(x, w, scale, shift, *, stride, padding, relu, residual=None):
    """x: (N,H,W,Cin) bf16; w: (kh,kw,Cin,Coutp) bf16; scale/shift: (1,Coutp) f32;
    residual: (N,Ho,Wo,Coutp) bf16 or None.  Returns (N,Ho,Wo,Coutp) bf16."""
    kh, kw, cin, coutp = w.shape
    n, h, wdim, _ = x.shape
    ho = (h + 2 * padding - kh) // stride + 1
    wo = (wdim + 2 * padding - kw) // stride + 1
    m = n * ho * wo
    kk = kh * kw

    if kk == 1:
        xs = x if stride == 1 else x[:, ::stride, ::stride, :]
        cols = xs.reshape(1, m, cin)
    else:
        # TODO(synk): shifted-window stacking still duplicates the input kk x in
        # HBM for 3x3/7x7 convs; a production kernel would read x directly via
        # offset index_maps instead of materializing the shifted copies.
        xp = jnp.pad(x, ((0, 0), (padding, padding), (padding, padding), (0, 0)))
        slabs = [
            xp[:, i:i + stride * ho:stride, j:j + stride * wo:stride, :]
            .reshape(m, cin)
            for i in range(kh) for j in range(kw)
        ]
        cols = jnp.stack(slabs, axis=0)

    wmat = w.reshape(kk, cin, coutp)
    tm = _pick_tile(m)
    grid = (m // tm, kk)

    in_specs = [
        pl.BlockSpec((1, tm, cin), lambda i, k: (k, i, 0)),
        pl.BlockSpec((1, cin, coutp), lambda i, k: (k, 0, 0)),
        pl.BlockSpec((1, coutp), lambda i, k: (0, 0)),
        pl.BlockSpec((1, coutp), lambda i, k: (0, 0)),
    ]
    inputs = [cols, wmat, scale, shift]
    if residual is not None:
        in_specs.append(pl.BlockSpec((tm, coutp), lambda i, k: (i, 0)))
        inputs.append(residual.reshape(m, coutp))

    flops = 2 * m * cin * coutp * kk
    bytes_accessed = (cols.size + wmat.size + m * coutp) * 2 + 2 * coutp * 4
    if residual is not None:
        bytes_accessed += m * coutp * 2

    out = pl.pallas_call(
        functools.partial(_conv_fused_kernel, relu=relu,
                          has_residual=residual is not None),
        out_shape=jax.ShapeDtypeStruct((m, coutp), _ACT_DTYPE),
        grid_spec=pltpu.PrefetchScalarGridSpec(
            num_scalar_prefetch=0,
            grid=grid,
            in_specs=in_specs,
            out_specs=pl.BlockSpec((tm, coutp), lambda i, k: (i, 0)),
            scratch_shapes=[pltpu.VMEM((tm, coutp), jnp.float32)],
        ),
        compiler_params=pltpu.CompilerParams(
            dimension_semantics=("parallel", "arbitrary"),
            vmem_limit_bytes=_VMEM_LIMIT,
        ),
        cost_estimate=pl.CostEstimate(flops=flops, transcendentals=0,
                                      bytes_accessed=bytes_accessed),
    )(*inputs)
    return out.reshape(n, ho, wo, coutp)


# ----------------------------------------------------------------------------
# Standalone affine(+ReLU) kernel: only used when hooks on conv1/bn1 force the
# stem fusion to be split so pre-BN / pre-ReLU tensors can be captured.
# ----------------------------------------------------------------------------

def _affine_kernel(x_ref, s_ref, b_ref, o_ref, *, relu):
    y = x_ref[...].astype(jnp.float32) * s_ref[...] + b_ref[...]
    if relu:
        y = jnp.maximum(y, 0.0)
    o_ref[...] = y.astype(o_ref.dtype)


def affine(x, scale, shift, relu):
    n, h, w, c = x.shape
    flat = x.reshape(n * h * w, c)
    out = pl.pallas_call(
        functools.partial(_affine_kernel, relu=relu),
        out_shape=jax.ShapeDtypeStruct(flat.shape, x.dtype),
        in_specs=[pl.BlockSpec(memory_space=pltpu.MemorySpace.VMEM)] * 3,
        out_specs=pl.BlockSpec(memory_space=pltpu.MemorySpace.VMEM),
    )(flat, scale, shift)
    return out.reshape(n, h, w, c)


# ----------------------------------------------------------------------------
# 3x3 stride-2 maxpool (pad 1): single-pass max over 9 window offsets, fed by 4
# stride-phase views so the kernel only needs unit-stride static slices.
# ----------------------------------------------------------------------------

def _maxpool_kernel(p00_ref, p01_ref, p10_ref, p11_ref, o_ref, *, ho, wo):
    p00, p01 = p00_ref[...], p01_ref[...]
    p10, p11 = p10_ref[...], p11_ref[...]

    def sl(a, dh, dw):
        return a[:, dh:dh + ho, dw:dw + wo, :]

    y = sl(p00, 0, 0)
    for a, dh, dw in ((p00, 0, 1), (p00, 1, 0), (p00, 1, 1),
                      (p01, 0, 0), (p01, 1, 0),
                      (p10, 0, 0), (p10, 0, 1),
                      (p11, 0, 0)):
        y = jnp.maximum(y, sl(a, dh, dw))
    o_ref[...] = y


def maxpool_3x3_s2(x):
    n, h, w, c = x.shape
    ho = (h + 2 - 3) // 2 + 1
    wo = (w + 2 - 3) // 2 + 1
    neg = float(jnp.finfo(x.dtype).min)
    xp = jnp.pad(x, ((0, 0), (1, 1), (1, 1), (0, 0)), constant_values=neg)
    phases = [xp[:, a::2, b::2, :] for a in (0, 1) for b in (0, 1)]
    return pl.pallas_call(
        functools.partial(_maxpool_kernel, ho=ho, wo=wo),
        out_shape=jax.ShapeDtypeStruct((n, ho, wo, c), x.dtype),
        in_specs=[pl.BlockSpec(memory_space=pltpu.MemorySpace.VMEM)] * 4,
        out_specs=pl.BlockSpec(memory_space=pltpu.MemorySpace.VMEM),
    )(*phases)


# ----------------------------------------------------------------------------
# Global average pool.
# ----------------------------------------------------------------------------

def _avgpool_kernel(x_ref, o_ref):
    o_ref[...] = jnp.mean(x_ref[...].astype(jnp.float32), axis=1)


def global_avgpool(x):
    n, h, w, c = x.shape
    return pl.pallas_call(
        _avgpool_kernel,
        out_shape=jax.ShapeDtypeStruct((n, c), jnp.float32),
        in_specs=[pl.BlockSpec(memory_space=pltpu.MemorySpace.VMEM)],
        out_specs=pl.BlockSpec(memory_space=pltpu.MemorySpace.VMEM),
    )(x.reshape(n, h * w, c))


# ----------------------------------------------------------------------------
# Parameter padding to lane-dense channel counts (padded channels stay 0).
# ----------------------------------------------------------------------------

def _pad_w(w, cinp, coutp):
    kh, kw, cin, cout = w.shape
    return jnp.pad(w, ((0, 0), (0, 0), (0, cinp - cin),
                       (0, coutp - cout))).astype(_ACT_DTYPE)


def _pad_affine(sb, coutp):
    s, b = sb
    pad = coutp - s.shape[1]
    return (jnp.pad(s, ((0, 0), (0, pad))).astype(jnp.float32),
            jnp.pad(b, ((0, 0), (0, pad))).astype(jnp.float32))


# ----------------------------------------------------------------------------
# ResNet bottleneck (expansion=4), eval-mode BN folded to scale/shift; the
# residual add + final ReLU ride in the conv3 epilogue.
# ----------------------------------------------------------------------------

def bottleneck(x, p, stride, cin_pad):
    width = p['conv1_w'].shape[-1]
    out_c = p['conv3_w'].shape[-1]
    wp, outp = _rup(width), _rup(out_c)

    w1 = _pad_w(p['conv1_w'], cin_pad, wp)
    s1, b1 = _pad_affine(p['bn1'], wp)
    w2 = _pad_w(p['conv2_w'], wp, wp)
    s2, b2 = _pad_affine(p['bn2'], wp)
    w3 = _pad_w(p['conv3_w'], wp, outp)
    s3, b3 = _pad_affine(p['bn3'], outp)

    if 'down_w' in p:
        dw = _pad_w(p['down_w'], cin_pad, outp)
        ds, db = _pad_affine(p['down_bn'], outp)
        identity = conv_bn_act(x, dw, ds, db, stride=stride, padding=0,
                               relu=False)
    else:
        identity = x   # cin_pad == outp and spatial unchanged

    out = conv_bn_act(x, w1, s1, b1, stride=1, padding=0, relu=True)
    out = conv_bn_act(out, w2, s2, b2, stride=stride, padding=1, relu=True)
    out = conv_bn_act(out, w3, s3, b3, stride=1, padding=0, relu=True,
                      residual=identity)
    return out, out_c, outp


# ----------------------------------------------------------------------------
# NewModel.forward: run the backbone, capture hooked top-level module outputs
# into `selected_out` (PyTorch NCHW convention), return (out, selected_out).
# ----------------------------------------------------------------------------

@functools.partial(jax.jit, static_argnums=(2,))
def new_model_forward(params, x_nchw, output_layers):
    selected_out = {}

    def record(idx, val, channels=None):
        if idx in output_layers:
            v = val
            if v.ndim == 4:
                if channels is not None:
                    v = v[..., :channels]
                v = jnp.transpose(v, (0, 3, 1, 2))     # back to PyTorch NCHW
            selected_out[MODULE_KEYS[idx]] = v.astype(jnp.float32)

    x = jnp.transpose(x_nchw, (0, 2, 3, 1)).astype(_ACT_DTYPE)   # NCHW -> NHWC

    # ---- stem: conv1 / bn1 / relu / maxpool --------------------------------
    stem_c = params['conv1_w'].shape[-1]
    stem_cp = _rup(stem_c)
    w1 = _pad_w(params['conv1_w'], 3, stem_cp)
    s1, b1 = _pad_affine(params['bn1'], stem_cp)
    ones = jnp.ones((1, stem_cp), jnp.float32)
    zeros = jnp.zeros((1, stem_cp), jnp.float32)

    if (0 in output_layers) or (1 in output_layers):
        # hooks need pre-BN / pre-ReLU tensors -> split the stem fusion
        y = conv_bn_act(x, w1, ones, zeros, stride=2, padding=3, relu=False)
        record(0, y, stem_c)
        y = affine(y, s1, b1, relu=False)
        record(1, y, stem_c)
        y = affine(y, ones, zeros, relu=True)
    else:
        y = conv_bn_act(x, w1, s1, b1, stride=2, padding=3, relu=True)
    record(2, y, stem_c)

    x = maxpool_3x3_s2(y)
    record(3, x, stem_c)

    # ---- layer1..layer4 ----------------------------------------------------
    c_real, c_pad = stem_c, stem_cp
    for li, lname in enumerate(['layer1', 'layer2', 'layer3', 'layer4']):
        layer_stride = 1 if li == 0 else 2
        for bi, blk in enumerate(params[lname]):
            s = layer_stride if bi == 0 else 1
            x, c_real, c_pad = bottleneck(x, blk, s, c_pad)
        record(4 + li, x, c_real)

    # ---- avgpool / fc ------------------------------------------------------
    pooled = global_avgpool(x)                           # (N, c_pad) f32
    record(8, pooled.reshape(pooled.shape[0], 1, 1, -1), c_real)
    # Final fc is ~1.5 KFLOP: plain jnp inside the jitted program.
    out = pooled[:, :c_real] @ params['fc_w'] + params['fc_b']
    record(9, out)

    return out, selected_out


# ----------------------------------------------------------------------------
# Deterministic (synthetic) parameter construction.
# ----------------------------------------------------------------------------

def _conv_w(key, kh, kw, cin, cout):
    return (jax.random.normal(key, (kh, kw, cin, cout), jnp.float32)
            * (1.0 / (kh * kw * cin) ** 0.5))


def _bn_params(key, c, eps=1e-5):
    k1, k2, k3 = jax.random.split(key, 3)
    gamma = 1.0 + 0.05 * jax.random.normal(k1, (c,), jnp.float32)
    beta = 0.05 * jax.random.normal(k2, (c,), jnp.float32)
    mean = 0.05 * jax.random.normal(k3, (c,), jnp.float32)
    var = jnp.ones((c,), jnp.float32)
    scale = gamma / jnp.sqrt(var + eps)
    shift = beta - mean * scale
    return scale.reshape(1, c), shift.reshape(1, c)


def make_params(key, num_classes=3, stem=8, planes=(8, 16, 32, 64),
                blocks=(1, 2, 1, 1)):
    expansion = 4
    params = {}
    key, k1, k2 = jax.random.split(key, 3)
    params['conv1_w'] = _conv_w(k1, 7, 7, 3, stem)
    params['bn1'] = _bn_params(k2, stem)

    inplanes = stem
    for li, (width, nblk) in enumerate(zip(planes, blocks)):
        lname = 'layer%d' % (li + 1)
        layer = []
        layer_stride = 1 if li == 0 else 2
        for b in range(nblk):
            s = layer_stride if b == 0 else 1
            key, *ks = jax.random.split(key, 9)
            p = {
                'conv1_w': _conv_w(ks[0], 1, 1, inplanes, width),
                'bn1': _bn_params(ks[1], width),
                'conv2_w': _conv_w(ks[2], 3, 3, width, width),
                'bn2': _bn_params(ks[3], width),
                'conv3_w': _conv_w(ks[4], 1, 1, width, width * expansion),
                'bn3': _bn_params(ks[5], width * expansion),
            }
            if s != 1 or inplanes != width * expansion:
                p['down_w'] = _conv_w(ks[6], 1, 1, inplanes, width * expansion)
                p['down_bn'] = _bn_params(ks[7], width * expansion)
            layer.append(p)
            inplanes = width * expansion
        params[lname] = layer

    key, k1, k2 = jax.random.split(key, 3)
    params['fc_w'] = (jax.random.normal(k1, (inplanes, num_classes), jnp.float32)
                      * (1.0 / inplanes ** 0.5))
    params['fc_b'] = 0.01 * jax.random.normal(k2, (1, num_classes), jnp.float32)
    return params


if __name__ == "__main__":
    root = jax.random.PRNGKey(0)
    k_params, k_x = jax.random.split(root)

    params = make_params(k_params, num_classes=3)

    # small-shape analogue of torch.rand([1, 3, 384, 384]) -> (2, 3, 32, 32)
    x = jax.random.uniform(k_x, (2, 3, 32, 32), jnp.float32)

    # hook top-level modules 4, 7, 9 -> 'layer1', 'layer4', 'fc'
    out, selected = new_model_forward(params, x, (4, 7, 9))
    jax.block_until_ready(out)
    jax.tree_util.tree_map(jax.block_until_ready, selected)

    assert out.shape == (2, 3)
    assert set(selected.keys()) == {'layer1', 'layer4', 'fc'}
    assert selected['layer1'].shape == (2, 32, 8, 8)
    assert selected['layer4'].shape == (2, 256, 1, 1)
    assert selected['fc'].shape == (2, 3)

    # second hook config exercises the split-stem path (pre-BN / pre-ReLU hooks)
    out2, selected2 = new_model_forward(params, x, (0, 1, 3))
    jax.block_until_ready(out2)
    assert set(selected2.keys()) == {'conv1', 'bn1', 'maxpool'}
    assert selected2['conv1'].shape == (2, 8, 16, 16)

    print("KERNEL_OK")
</pallas_src>

<mosaic_0001>
module attributes {stable_mosaic.version = 11 : i64} {
  func.func @_conv_fused_kernel(%arg0: i32, %arg1: i32, %arg2: memref<1x512x3xbf16, #tpu.memory_space<vmem>>, %arg3: memref<1x3x128xbf16, #tpu.memory_space<vmem>>, %arg4: memref<1x128xf32, #tpu.memory_space<vmem>>, %arg5: memref<1x128xf32, #tpu.memory_space<vmem>>, %arg6: memref<512x128xbf16, #tpu.memory_space<vmem>>, %arg7: memref<512x128xf32, #tpu.memory_space<vmem>>) attributes {dimension_semantics = [#tpu.dimension_semantics<parallel>, #tpu.dimension_semantics<arbitrary>], iteration_bounds = array<i64: 1, 49>, scalar_prefetch = 0 : i64, scratch_operands = 1 : i64, tpu.core_type = #tpu.core_type<tc>, window_params = [{transform_indices = @transform_0, window_bounds = array<i64: 1, 512, 3>}, {transform_indices = @transform_1, window_bounds = array<i64: 1, 3, 128>}, {pipeline_mode = #tpu.pipeline_mode<synchronous>, transform_indices = @transform_2, window_bounds = array<i64: 1, 128>}, {pipeline_mode = #tpu.pipeline_mode<synchronous>, transform_indices = @transform_3, window_bounds = array<i64: 1, 128>}, {transform_indices = @transform_4, window_bounds = array<i64: 512, 128>}]} {
    %c0_i32 = arith.constant 0 : i32
    %0 = arith.cmpi eq, %arg1, %c0_i32 : i32
    %1 = arith.extui %0 : i1 to i32
    %c0_i32_0 = arith.constant 0 : i32
    %2 = arith.cmpi ne, %1, %c0_i32_0 : i32
    scf.if %2 {
      %cst_11 = arith.constant 0.000000e+00 : f32
      %14 = vector.broadcast %cst_11 : f32 to vector<512x128xf32>
      %c0_12 = arith.constant 0 : index
      %c0_13 = arith.constant 0 : index
      %15 = vector.load %arg7[%c0_12, %c0_13] : memref<512x128xf32, #tpu.memory_space<vmem>>, vector<512x128xf32>
      tpu.vector_store %arg7[%c0_12, %c0_13], %14 {strides = array<i32>} : memref<512x128xf32, #tpu.memory_space<vmem>>, vector<512x128xf32>,
    } else {
    }
    %c0 = arith.constant 0 : index
    %c0_1 = arith.constant 0 : index
    %3 = vector.load %arg7[%c0, %c0_1] : memref<512x128xf32, #tpu.memory_space<vmem>>, vector<512x128xf32>
    %c0_2 = arith.constant 0 : index
    %c0_3 = arith.constant 0 : index
    %c0_4 = arith.constant 0 : index
    %4 = vector.load %arg2[%c0_2, %c0_3, %c0_4] : memref<1x512x3xbf16, #tpu.memory_space<vmem>>, vector<1x512x3xbf16>
    %5 = vector.shape_cast %4 : vector<1x512x3xbf16> to vector<512x3xbf16>
    %c0_5 = arith.constant 0 : index
    %c0_6 = arith.constant 0 : index
    %c0_7 = arith.constant 0 : index
    %6 = vector.load %arg3[%c0_5, %c0_6, %c0_7] : memref<1x3x128xbf16, #tpu.memory_space<vmem>>, vector<1x3x128xbf16>
    %7 = vector.shape_cast %6 : vector<1x3x128xbf16> to vector<3x128xbf16>
    %cst = arith.constant dense<0.000000e+00> : vector<512x128xf32>
    %8 = tpu.matmul %5, %7, %cst {dimension_numbers = #tpu.dot_dimension_numbers<[1], [0], [0], [1], [0, 0, 1, 1], [], []>} : vector<512x3xbf16>, vector<3x128xbf16>, vector<512x128xf32> -> vector<512x128xf32>
    %9 = arith.addf %3, %8 : vector<512x128xf32>
    %c0_8 = arith.constant 0 : index
    %c0_9 = arith.constant 0 : index
    %10 = vector.load %arg7[%c0_8, %c0_9] : memref<512x128xf32, #tpu.memory_space<vmem>>, vector<512x128xf32>
    tpu.vector_store %arg7[%c0_8, %c0_9], %9 {strides = array<i32>} : memref<512x128xf32, #tpu.memory_space<vmem>>, vector<512x128xf32>,
    %c48_i32 = arith.constant 48 : i32
    %11 = arith.cmpi eq, %arg1, %c48_i32 : i32
    %12 = arith.extui %11 : i1 to i32
    %c0_i32_10 = arith.constant 0 : i32
    %13 = arith.cmpi ne, %12, %c0_i32_10 : i32
    scf.if %13 {
      %c0_11 = arith.constant 0 : index
      %c0_12 = arith.constant 0 : index
      %14 = vector.load %arg7[%c0_11, %c0_12] : memref<512x128xf32, #tpu.memory_space<vmem>>, vector<512x128xf32>
      %c0_13 = arith.constant 0 : index
      %c0_14 = arith.constant 0 : index
      %15 = vector.load %arg4[%c0_13, %c0_14] : memref<1x128xf32, #tpu.memory_space<vmem>>, vector<1x128xf32>
      %16 = vector.broadcast %15 : vector<1x128xf32> to vector<512x128xf32>
      %17 = arith.mulf %14, %16 : vector<512x128xf32>
      %c0_15 = arith.constant 0 : index
      %c0_16 = arith.constant 0 : index
      %18 = vector.load %arg5[%c0_15, %c0_16] : memref<1x128xf32, #tpu.memory_space<vmem>>, vector<1x128xf32>
      %19 = vector.broadcast %18 : vector<1x128xf32> to vector<512x128xf32>
      %20 = arith.addf %17, %19 : vector<512x128xf32>
      %cst_17 = arith.constant 0.000000e+00 : f32
      %21 = vector.broadcast %cst_17 : f32 to vector<512x128xf32>
      %22 = arith.maximumf %20, %21 : vector<512x128xf32>
      %23 = arith.truncf %22 : vector<512x128xf32> to vector<512x128xbf16>
      %c0_18 = arith.constant 0 : index
      %c0_19 = arith.constant 0 : index
      %24 = vector.load %arg6[%c0_18, %c0_19] : memref<512x128xbf16, #tpu.memory_space<vmem>>, vector<512x128xbf16>
      tpu.vector_store %arg6[%c0_18, %c0_19], %23 {strides = array<i32>} : memref<512x128xbf16, #tpu.memory_space<vmem>>, vector<512x128xbf16>,
    } else {
    }
    return
  }
  func.func @transform_0(%arg0: i32, %arg1: i32) -> (i32, i32, i32) {
    %c0_i32 = arith.constant 0 : i32
    %c0_i32_0 = arith.constant 0 : i32
    return %arg1, %arg0, %c0_i32 : i32, i32, i32
  }
  func.func @transform_1(%arg0: i32, %arg1: i32) -> (i32, i32, i32) {
    %c0_i32 = arith.constant 0 : i32
    %c0_i32_0 = arith.constant 0 : i32
    %c0_i32_1 = arith.constant 0 : i32
    return %arg1, %c0_i32, %c0_i32_0 : i32, i32, i32
  }
  func.func @transform_2(%arg0: i32, %arg1: i32) -> (i32, i32) {
    %c0_i32 = arith.constant 0 : i32
    %c0_i32_0 = arith.constant 0 : i32
    %c0_i32_1 = arith.constant 0 : i32
    return %c0_i32, %c0_i32_0 : i32, i32
  }
  func.func @transform_3(%arg0: i32, %arg1: i32) -> (i32, i32) {
    %c0_i32 = arith.constant 0 : i32
    %c0_i32_0 = arith.constant 0 : i32
    %c0_i32_1 = arith.constant 0 : i32
    return %c0_i32, %c0_i32_0 : i32, i32
  }
  func.func @transform_4(%arg0: i32, %arg1: i32) -> (i32, i32) {
    %c0_i32 = arith.constant 0 : i32
    %c0_i32_0 = arith.constant 0 : i32
    return %arg0, %c0_i32 : i32, i32
  }
}

module attributes {stable_mosaic.version = 11 : i64} {
  func.func @_maxpool_kernel(%arg0: memref<2x9x9x128xbf16, #tpu.memory_space<vmem>>, %arg1: memref<2x9x9x128xbf16, #tpu.memory_space<vmem>>, %arg2: memref<2x9x9x128xbf16, #tpu.memory_space<vmem>>, %arg3: memref<2x9x9x128xbf16, #tpu.memory_space<vmem>>, %arg4: memref<2x8x8x128xbf16, #tpu.memory_space<vmem>>) attributes {dimension_semantics = [], scalar_prefetch = 0 : i64, scratch_operands = 0 : i64, tpu.core_type = #tpu.core_type<tc>} {
    %c0 = arith.constant 0 : index
    %c0_0 = arith.constant 0 : index
    %c0_1 = arith.constant 0 : index
    %c0_2 = arith.constant 0 : index
    %0 = vector.load %arg0[%c0, %c0_0, %c0_1, %c0_2] : memref<2x9x9x128xbf16, #tpu.memory_space<vmem>>, vector<2x9x9x128xbf16>
    %c0_3 = arith.constant 0 : index
    %c0_4 = arith.constant 0 : index
    %c0_5 = arith.constant 0 : index
    %c0_6 = arith.constant 0 : index
    %1 = vector.load %arg1[%c0_3, %c0_4, %c0_5, %c0_6] : memref<2x9x9x128xbf16, #tpu.memory_space<vmem>>, vector<2x9x9x128xbf16>
    %c0_7 = arith.constant 0 : index
    %c0_8 = arith.constant 0 : index
    %c0_9 = arith.constant 0 : index
    %c0_10 = arith.constant 0 : index
    %2 = vector.load %arg2[%c0_7, %c0_8, %c0_9, %c0_10] : memref<2x9x9x128xbf16, #tpu.memory_space<vmem>>, vector<2x9x9x128xbf16>
    %c0_11 = arith.constant 0 : index
    %c0_12 = arith.constant 0 : index
    %c0_13 = arith.constant 0 : index
    %c0_14 = arith.constant 0 : index
    %3 = vector.load %arg3[%c0_11, %c0_12, %c0_13, %c0_14] : memref<2x9x9x128xbf16, #tpu.memory_space<vmem>>, vector<2x9x9x128xbf16>
    %4 = vector.extract_strided_slice %0 {offsets = [0, 0, 0, 0], sizes = [2, 8, 8, 128], strides = [1, 1, 1, 1]} : vector<2x9x9x128xbf16> to vector<2x8x8x128xbf16>
    %5 = vector.extract_strided_slice %0 {offsets = [0, 0, 1, 0], sizes = [2, 8, 8, 128], strides = [1, 1, 1, 1]} : vector<2x9x9x128xbf16> to vector<2x8x8x128xbf16>
    %6 = arith.maximumf %4, %5 : vector<2x8x8x128xbf16>
    %7 = vector.extract_strided_slice %0 {offsets = [0, 1, 0, 0], sizes = [2, 8, 8, 128], strides = [1, 1, 1, 1]} : vector<2x9x9x128xbf16> to vector<2x8x8x128xbf16>
    %8 = arith.maximumf %6, %7 : vector<2x8x8x128xbf16>
    %9 = vector.extract_strided_slice %0 {offsets = [0, 1, 1, 0], sizes = [2, 8, 8, 128], strides = [1, 1, 1, 1]} : vector<2x9x9x128xbf16> to vector<2x8x8x128xbf16>
    %10 = arith.maximumf %8, %9 : vector<2x8x8x128xbf16>
    %11 = vector.extract_strided_slice %1 {offsets = [0, 0, 0, 0], sizes = [2, 8, 8, 128], strides = [1, 1, 1, 1]} : vector<2x9x9x128xbf16> to vector<2x8x8x128xbf16>
    %12 = arith.maximumf %10, %11 : vector<2x8x8x128xbf16>
    %13 = vector.extract_strided_slice %1 {offsets = [0, 1, 0, 0], sizes = [2, 8, 8, 128], strides = [1, 1, 1, 1]} : vector<2x9x9x128xbf16> to vector<2x8x8x128xbf16>
    %14 = arith.maximumf %12, %13 : vector<2x8x8x128xbf16>
    %15 = vector.extract_strided_slice %2 {offsets = [0, 0, 0, 0], sizes = [2, 8, 8, 128], strides = [1, 1, 1, 1]} : vector<2x9x9x128xbf16> to vector<2x8x8x128xbf16>
    %16 = arith.maximumf %14, %15 : vector<2x8x8x128xbf16>
    %17 = vector.extract_strided_slice %2 {offsets = [0, 0, 1, 0], sizes = [2, 8, 8, 128], strides = [1, 1, 1, 1]} : vector<2x9x9x128xbf16> to vector<2x8x8x128xbf16>
    %18 = arith.maximumf %16, %17 : vector<2x8x8x128xbf16>
    %19 = vector.extract_strided_slice %3 {offsets = [0, 0, 0, 0], sizes = [2, 8, 8, 128], strides = [1, 1, 1, 1]} : vector<2x9x9x128xbf16> to vector<2x8x8x128xbf16>
    %20 = arith.maximumf %18, %19 : vector<2x8x8x128xbf16>
    %c0_15 = arith.constant 0 : index
    %c0_16 = arith.constant 0 : index
    %c0_17 = arith.constant 0 : index
    %c0_18 = arith.constant 0 : index
    %21 = vector.load %arg4[%c0_15, %c0_16, %c0_17, %c0_18] : memref<2x8x8x128xbf16, #tpu.memory_space<vmem>>, vector<2x8x8x128xbf16>
    tpu.vector_store %arg4[%c0_15, %c0_16, %c0_17, %c0_18], %20 {strides = array<i32>} : memref<2x8x8x128xbf16, #tpu.memory_space<vmem>>, vector<2x8x8x128xbf16>,
    return
  }
}

module attributes {stable_mosaic.version = 11 : i64} {
  func.func @_conv_fused_kernel(%arg0: i32, %arg1: i32, %arg2: memref<1x128x128xbf16, #tpu.memory_space<vmem>>, %arg3: memref<1x128x128xbf16, #tpu.memory_space<vmem>>, %arg4: memref<1x128xf32, #tpu.memory_space<vmem>>, %arg5: memref<1x128xf32, #tpu.memory_space<vmem>>, %arg6: memref<128x128xbf16, #tpu.memory_space<vmem>>, %arg7: memref<128x128xf32, #tpu.memory_space<vmem>>) attributes {dimension_semantics = [#tpu.dimension_semantics<parallel>, #tpu.dimension_semantics<arbitrary>], iteration_bounds = array<i64: 1, 1>, scalar_prefetch = 0 : i64, scratch_operands = 1 : i64, tpu.core_type = #tpu.core_type<tc>, window_params = [{transform_indices = @transform_0, window_bounds = array<i64: 1, 128, 128>}, {transform_indices = @transform_1, window_bounds = array<i64: 1, 128, 128>}, {pipeline_mode = #tpu.pipeline_mode<synchronous>, transform_indices = @transform_2, window_bounds = array<i64: 1, 128>}, {pipeline_mode = #tpu.pipeline_mode<synchronous>, transform_indices = @transform_3, window_bounds = array<i64: 1, 128>}, {transform_indices = @transform_4, window_bounds = array<i64: 128, 128>}]} {
    %c0_i32 = arith.constant 0 : i32
    %0 = arith.cmpi eq, %arg1, %c0_i32 : i32
    %1 = arith.extui %0 : i1 to i32
    %c0_i32_0 = arith.constant 0 : i32
    %2 = arith.cmpi ne, %1, %c0_i32_0 : i32
    scf.if %2 {
      %cst_12 = arith.constant 0.000000e+00 : f32
      %14 = vector.broadcast %cst_12 : f32 to vector<128x128xf32>
      %c0_13 = arith.constant 0 : index
      %c0_14 = arith.constant 0 : index
      %15 = vector.load %arg7[%c0_13, %c0_14] : memref<128x128xf32, #tpu.memory_space<vmem>>, vector<128x128xf32>
      tpu.vector_store %arg7[%c0_13, %c0_14], %14 {strides = array<i32>} : memref<128x128xf32, #tpu.memory_space<vmem>>, vector<128x128xf32>,
    } else {
    }
    %c0 = arith.constant 0 : index
    %c0_1 = arith.constant 0 : index
    %3 = vector.load %arg7[%c0, %c0_1] : memref<128x128xf32, #tpu.memory_space<vmem>>, vector<128x128xf32>
    %c0_2 = arith.constant 0 : index
    %c0_3 = arith.constant 0 : index
    %c0_4 = arith.constant 0 : index
    %4 = vector.load %arg2[%c0_2, %c0_3, %c0_4] : memref<1x128x128xbf16, #tpu.memory_space<vmem>>, vector<1x128x128xbf16>
    %5 = vector.shape_cast %4 : vector<1x128x128xbf16> to vector<128x128xbf16>
    %c0_5 = arith.constant 0 : index
    %c0_6 = arith.constant 0 : index
    %c0_7 = arith.constant 0 : index
    %6 = vector.load %arg3[%c0_5, %c0_6, %c0_7] : memref<1x128x128xbf16, #tpu.memory_space<vmem>>, vector<1x128x128xbf16>
    %7 = vector.shape_cast %6 : vector<1x128x128xbf16> to vector<128x128xbf16>
    %cst = arith.constant dense<0.000000e+00> : vector<128x128xf32>
    %8 = tpu.matmul %5, %7, %cst {dimension_numbers = #tpu.dot_dimension_numbers<[1], [0], [0], [1], [0, 0, 1, 1], [], []>} : vector<128x128xbf16>, vector<128x128xbf16>, vector<128x128xf32> -> vector<128x128xf32>
    %9 = arith.addf %3, %8 : vector<128x128xf32>
    %c0_8 = arith.constant 0 : index
    %c0_9 = arith.constant 0 : index
    %10 = vector.load %arg7[%c0_8, %c0_9] : memref<128x128xf32, #tpu.memory_space<vmem>>, vector<128x128xf32>
    tpu.vector_store %arg7[%c0_8, %c0_9], %9 {strides = array<i32>} : memref<128x128xf32, #tpu.memory_space<vmem>>, vector<128x128xf32>,
    %c0_i32_10 = arith.constant 0 : i32
    %11 = arith.cmpi eq, %arg1, %c0_i32_10 : i32
    %12 = arith.extui %11 : i1 to i32
    %c0_i32_11 = arith.constant 0 : i32
    %13 = arith.cmpi ne, %12, %c0_i32_11 : i32
    scf.if %13 {
      %c0_12 = arith.constant 0 : index
      %c0_13 = arith.constant 0 : index
      %14 = vector.load %arg7[%c0_12, %c0_13] : memref<128x128xf32, #tpu.memory_space<vmem>>, vector<128x128xf32>
      %c0_14 = arith.constant 0 : index
      %c0_15 = arith.constant 0 : index
      %15 = vector.load %arg4[%c0_14, %c0_15] : memref<1x128xf32, #tpu.memory_space<vmem>>, vector<1x128xf32>
      %16 = vector.broadcast %15 : vector<1x128xf32> to vector<128x128xf32>
      %17 = arith.mulf %14, %16 : vector<128x128xf32>
      %c0_16 = arith.constant 0 : index
      %c0_17 = arith.constant 0 : index
      %18 = vector.load %arg5[%c0_16, %c0_17] : memref<1x128xf32, #tpu.memory_space<vmem>>, vector<1x128xf32>
      %19 = vector.broadcast %18 : vector<1x128xf32> to vector<128x128xf32>
      %20 = arith.addf %17, %19 : vector<128x128xf32>
      %cst_18 = arith.constant 0.000000e+00 : f32
      %21 = vector.broadcast %cst_18 : f32 to vector<128x128xf32>
      %22 = arith.maximumf %20, %21 : vector<128x128xf32>
      %23 = arith.truncf %22 : vector<128x128xf32> to vector<128x128xbf16>
      %c0_19 = arith.constant 0 : index
      %c0_20 = arith.constant 0 : index
      %24 = vector.load %arg6[%c0_19, %c0_20] : memref<128x128xbf16, #tpu.memory_space<vmem>>, vector<128x128xbf16>
      tpu.vector_store %arg6[%c0_19, %c0_20], %23 {strides = array<i32>} : memref<128x128xbf16, #tpu.memory_space<vmem>>, vector<128x128xbf16>,
    } else {
    }
    return
  }
  func.func @transform_0(%arg0: i32, %arg1: i32) -> (i32, i32, i32) {
    %c0_i32 = arith.constant 0 : i32
    %c0_i32_0 = arith.constant 0 : i32
    return %arg1, %arg0, %c0_i32 : i32, i32, i32
  }
  func.func @transform_1(%arg0: i32, %arg1: i32) -> (i32, i32, i32) {
    %c0_i32 = arith.constant 0 : i32
    %c0_i32_0 = arith.constant 0 : i32
    %c0_i32_1 = arith.constant 0 : i32
    return %arg1, %c0_i32, %c0_i32_0 : i32, i32, i32
  }
  func.func @transform_2(%arg0: i32, %arg1: i32) -> (i32, i32) {
    %c0_i32 = arith.constant 0 : i32
    %c0_i32_0 = arith.constant 0 : i32
    %c0_i32_1 = arith.constant 0 : i32
    return %c0_i32, %c0_i32_0 : i32, i32
  }
  func.func @transform_3(%arg0: i32, %arg1: i32) -> (i32, i32) {
    %c0_i32 = arith.constant 0 : i32
    %c0_i32_0 = arith.constant 0 : i32
    %c0_i32_1 = arith.constant 0 : i32
    return %c0_i32, %c0_i32_0 : i32, i32
  }
  func.func @transform_4(%arg0: i32, %arg1: i32) -> (i32, i32) {
    %c0_i32 = arith.constant 0 : i32
    %c0_i32_0 = arith.constant 0 : i32
    return %arg0, %c0_i32 : i32, i32
  }
}

module attributes {stable_mosaic.version = 11 : i64} {
  func.func @_conv_fused_kernel(%arg0: i32, %arg1: i32, %arg2: memref<1x128x128xbf16, #tpu.memory_space<vmem>>, %arg3: memref<1x128x128xbf16, #tpu.memory_space<vmem>>, %arg4: memref<1x128xf32, #tpu.memory_space<vmem>>, %arg5: memref<1x128xf32, #tpu.memory_space<vmem>>, %arg6: memref<128x128xbf16, #tpu.memory_space<vmem>>, %arg7: memref<128x128xbf16, #tpu.memory_space<vmem>>, %arg8: memref<128x128xf32, #tpu.memory_space<vmem>>) attributes {dimension_semantics = [#tpu.dimension_semantics<parallel>, #tpu.dimension_semantics<arbitrary>], iteration_bounds = array<i64: 1, 1>, scalar_prefetch = 0 : i64, scratch_operands = 1 : i64, tpu.core_type = #tpu.core_type<tc>, window_params = [{transform_indices = @transform_0, window_bounds = array<i64: 1, 128, 128>}, {transform_indices = @transform_1, window_bounds = array<i64: 1, 128, 128>}, {pipeline_mode = #tpu.pipeline_mode<synchronous>, transform_indices = @transform_2, window_bounds = array<i64: 1, 128>}, {pipeline_mode = #tpu.pipeline_mode<synchronous>, transform_indices = @transform_3, window_bounds = array<i64: 1, 128>}, {transform_indices = @transform_4, window_bounds = array<i64: 128, 128>}, {transform_indices = @transform_5, window_bounds = array<i64: 128, 128>}]} {
    %c0_i32 = arith.constant 0 : i32
    %0 = arith.cmpi eq, %arg1, %c0_i32 : i32
    %1 = arith.extui %0 : i1 to i32
    %c0_i32_0 = arith.constant 0 : i32
    %2 = arith.cmpi ne, %1, %c0_i32_0 : i32
    scf.if %2 {
      %cst_12 = arith.constant 0.000000e+00 : f32
      %14 = vector.broadcast %cst_12 : f32 to vector<128x128xf32>
      %c0_13 = arith.constant 0 : index
      %c0_14 = arith.constant 0 : index
      %15 = vector.load %arg8[%c0_13, %c0_14] : memref<128x128xf32, #tpu.memory_space<vmem>>, vector<128x128xf32>
      tpu.vector_store %arg8[%c0_13, %c0_14], %14 {strides = array<i32>} : memref<128x128xf32, #tpu.memory_space<vmem>>, vector<128x128xf32>,
    } else {
    }
    %c0 = arith.constant 0 : index
    %c0_1 = arith.constant 0 : index
    %3 = vector.load %arg8[%c0, %c0_1] : memref<128x128xf32, #tpu.memory_space<vmem>>, vector<128x128xf32>
    %c0_2 = arith.constant 0 : index
    %c0_3 = arith.constant 0 : index
    %c0_4 = arith.constant 0 : index
    %4 = vector.load %arg2[%c0_2, %c0_3, %c0_4] : memref<1x128x128xbf16, #tpu.memory_space<vmem>>, vector<1x128x128xbf16>
    %5 = vector.shape_cast %4 : vector<1x128x128xbf16> to vector<128x128xbf16>
    %c0_5 = arith.constant 0 : index
    %c0_6 = arith.constant 0 : index
    %c0_7 = arith.constant 0 : index
    %6 = vector.load %arg3[%c0_5, %c0_6, %c0_7] : memref<1x128x128xbf16, #tpu.memory_space<vmem>>, vector<1x128x128xbf16>
    %7 = vector.shape_cast %6 : vector<1x128x128xbf16> to vector<128x128xbf16>
    %cst = arith.constant dense<0.000000e+00> : vector<128x128xf32>
    %8 = tpu.matmul %5, %7, %cst {dimension_numbers = #tpu.dot_dimension_numbers<[1], [0], [0], [1], [0, 0, 1, 1], [], []>} : vector<128x128xbf16>, vector<128x128xbf16>, vector<128x128xf32> -> vector<128x128xf32>
    %9 = arith.addf %3, %8 : vector<128x128xf32>
    %c0_8 = arith.constant 0 : index
    %c0_9 = arith.constant 0 : index
    %10 = vector.load %arg8[%c0_8, %c0_9] : memref<128x128xf32, #tpu.memory_space<vmem>>, vector<128x128xf32>
    tpu.vector_store %arg8[%c0_8, %c0_9], %9 {strides = array<i32>} : memref<128x128xf32, #tpu.memory_space<vmem>>, vector<128x128xf32>,
    %c0_i32_10 = arith.constant 0 : i32
    %11 = arith.cmpi eq, %arg1, %c0_i32_10 : i32
    %12 = arith.extui %11 : i1 to i32
    %c0_i32_11 = arith.constant 0 : i32
    %13 = arith.cmpi ne, %12, %c0_i32_11 : i32
    scf.if %13 {
      %c0_12 = arith.constant 0 : index
      %c0_13 = arith.constant 0 : index
      %14 = vector.load %arg8[%c0_12, %c0_13] : memref<128x128xf32, #tpu.memory_space<vmem>>, vector<128x128xf32>
      %c0_14 = arith.constant 0 : index
      %c0_15 = arith.constant 0 : index
      %15 = vector.load %arg4[%c0_14, %c0_15] : memref<1x128xf32, #tpu.memory_space<vmem>>, vector<1x128xf32>
      %16 = vector.broadcast %15 : vector<1x128xf32> to vector<128x128xf32>
      %17 = arith.mulf %14, %16 : vector<128x128xf32>
      %c0_16 = arith.constant 0 : index
      %c0_17 = arith.constant 0 : index
      %18 = vector.load %arg5[%c0_16, %c0_17] : memref<1x128xf32, #tpu.memory_space<vmem>>, vector<1x128xf32>
      %19 = vector.broadcast %18 : vector<1x128xf32> to vector<128x128xf32>
      %20 = arith.addf %17, %19 : vector<128x128xf32>
      %c0_18 = arith.constant 0 : index
      %c0_19 = arith.constant 0 : index
      %21 = vector.load %arg6[%c0_18, %c0_19] : memref<128x128xbf16, #tpu.memory_space<vmem>>, vector<128x128xbf16>
      %22 = arith.extf %21 : vector<128x128xbf16> to vector<128x128xf32>
      %23 = arith.addf %20, %22 : vector<128x128xf32>
      %cst_20 = arith.constant 0.000000e+00 : f32
      %24 = vector.broadcast %cst_20 : f32 to vector<128x128xf32>
      %25 = arith.maximumf %23, %24 : vector<128x128xf32>
      %26 = arith.truncf %25 : vector<128x128xf32> to vector<128x128xbf16>
      %c0_21 = arith.constant 0 : index
      %c0_22 = arith.constant 0 : index
      %27 = vector.load %arg7[%c0_21, %c0_22] : memref<128x128xbf16, #tpu.memory_space<vmem>>, vector<128x128xbf16>
      tpu.vector_store %arg7[%c0_21, %c0_22], %26 {strides = array<i32>} : memref<128x128xbf16, #tpu.memory_space<vmem>>, vector<128x128xbf16>,
    } else {
    }
    return
  }
  func.func @transform_0(%arg0: i32, %arg1: i32) -> (i32, i32, i32) {
    %c0_i32 = arith.constant 0 : i32
    %c0_i32_0 = arith.constant 0 : i32
    return %arg1, %arg0, %c0_i32 : i32, i32, i32
  }
  func.func @transform_1(%arg0: i32, %arg1: i32) -> (i32, i32, i32) {
    %c0_i32 = arith.constant 0 : i32
    %c0_i32_0 = arith.constant 0 : i32
    %c0_i32_1 = arith.constant 0 : i32
    return %arg1, %c0_i32, %c0_i32_0 : i32, i32, i32
  }
  func.func @transform_2(%arg0: i32, %arg1: i32) -> (i32, i32) {
    %c0_i32 = arith.constant 0 : i32
    %c0_i32_0 = arith.constant 0 : i32
    %c0_i32_1 = arith.constant 0 : i32
    return %c0_i32, %c0_i32_0 : i32, i32
  }
  func.func @transform_3(%arg0: i32, %arg1: i32) -> (i32, i32) {
    %c0_i32 = arith.constant 0 : i32
    %c0_i32_0 = arith.constant 0 : i32
    %c0_i32_1 = arith.constant 0 : i32
    return %c0_i32, %c0_i32_0 : i32, i32
  }
  func.func @transform_4(%arg0: i32, %arg1: i32) -> (i32, i32) {
    %c0_i32 = arith.constant 0 : i32
    %c0_i32_0 = arith.constant 0 : i32
    return %arg0, %c0_i32 : i32, i32
  }
  func.func @transform_5(%arg0: i32, %arg1: i32) -> (i32, i32) {
    %c0_i32 = arith.constant 0 : i32
    %c0_i32_0 = arith.constant 0 : i32
    return %arg0, %c0_i32 : i32, i32
  }
}

module attributes {stable_mosaic.version = 11 : i64} {
  func.func @_conv_fused_kernel(%arg0: i32, %arg1: i32, %arg2: memref<1x128x128xbf16, #tpu.memory_space<vmem>>, %arg3: memref<1x128x128xbf16, #tpu.memory_space<vmem>>, %arg4: memref<1x128xf32, #tpu.memory_space<vmem>>, %arg5: memref<1x128xf32, #tpu.memory_space<vmem>>, %arg6: memref<128x128xbf16, #tpu.memory_space<vmem>>, %arg7: memref<128x128xf32, #tpu.memory_space<vmem>>) attributes {dimension_semantics = [#tpu.dimension_semantics<parallel>, #tpu.dimension_semantics<arbitrary>], iteration_bounds = array<i64: 1, 1>, scalar_prefetch = 0 : i64, scratch_operands = 1 : i64, tpu.core_type = #tpu.core_type<tc>, window_params = [{transform_indices = @transform_0, window_bounds = array<i64: 1, 128, 128>}, {transform_indices = @transform_1, window_bounds = array<i64: 1, 128, 128>}, {pipeline_mode = #tpu.pipeline_mode<synchronous>, transform_indices = @transform_2, window_bounds = array<i64: 1, 128>}, {pipeline_mode = #tpu.pipeline_mode<synchronous>, transform_indices = @transform_3, window_bounds = array<i64: 1, 128>}, {transform_indices = @transform_4, window_bounds = array<i64: 128, 128>}]} {
    %c0_i32 = arith.constant 0 : i32
    %0 = arith.cmpi eq, %arg1, %c0_i32 : i32
    %1 = arith.extui %0 : i1 to i32
    %c0_i32_0 = arith.constant 0 : i32
    %2 = arith.cmpi ne, %1, %c0_i32_0 : i32
    scf.if %2 {
      %cst_12 = arith.constant 0.000000e+00 : f32
      %14 = vector.broadcast %cst_12 : f32 to vector<128x128xf32>
      %c0_13 = arith.constant 0 : index
      %c0_14 = arith.constant 0 : index
      %15 = vector.load %arg7[%c0_13, %c0_14] : memref<128x128xf32, #tpu.memory_space<vmem>>, vector<128x128xf32>
      tpu.vector_store %arg7[%c0_13, %c0_14], %14 {strides = array<i32>} : memref<128x128xf32, #tpu.memory_space<vmem>>, vector<128x128xf32>,
    } else {
    }
    %c0 = arith.constant 0 : index
    %c0_1 = arith.constant 0 : index
    %3 = vector.load %arg7[%c0, %c0_1] : memref<128x128xf32, #tpu.memory_space<vmem>>, vector<128x128xf32>
    %c0_2 = arith.constant 0 : index
    %c0_3 = arith.constant 0 : index
    %c0_4 = arith.constant 0 : index
    %4 = vector.load %arg2[%c0_2, %c0_3, %c0_4] : memref<1x128x128xbf16, #tpu.memory_space<vmem>>, vector<1x128x128xbf16>
    %5 = vector.shape_cast %4 : vector<1x128x128xbf16> to vector<128x128xbf16>
    %c0_5 = arith.constant 0 : index
    %c0_6 = arith.constant 0 : index
    %c0_7 = arith.constant 0 : index
    %6 = vector.load %arg3[%c0_5, %c0_6, %c0_7] : memref<1x128x128xbf16, #tpu.memory_space<vmem>>, vector<1x128x128xbf16>
    %7 = vector.shape_cast %6 : vector<1x128x128xbf16> to vector<128x128xbf16>
    %cst = arith.constant dense<0.000000e+00> : vector<128x128xf32>
    %8 = tpu.matmul %5, %7, %cst {dimension_numbers = #tpu.dot_dimension_numbers<[1], [0], [0], [1], [0, 0, 1, 1], [], []>} : vector<128x128xbf16>, vector<128x128xbf16>, vector<128x128xf32> -> vector<128x128xf32>
    %9 = arith.addf %3, %8 : vector<128x128xf32>
    %c0_8 = arith.constant 0 : index
    %c0_9 = arith.constant 0 : index
    %10 = vector.load %arg7[%c0_8, %c0_9] : memref<128x128xf32, #tpu.memory_space<vmem>>, vector<128x128xf32>
    tpu.vector_store %arg7[%c0_8, %c0_9], %9 {strides = array<i32>} : memref<128x128xf32, #tpu.memory_space<vmem>>, vector<128x128xf32>,
    %c0_i32_10 = arith.constant 0 : i32
    %11 = arith.cmpi eq, %arg1, %c0_i32_10 : i32
    %12 = arith.extui %11 : i1 to i32
    %c0_i32_11 = arith.constant 0 : i32
    %13 = arith.cmpi ne, %12, %c0_i32_11 : i32
    scf.if %13 {
      %c0_12 = arith.constant 0 : index
      %c0_13 = arith.constant 0 : index
      %14 = vector.load %arg7[%c0_12, %c0_13] : memref<128x128xf32, #tpu.memory_space<vmem>>, vector<128x128xf32>
      %c0_14 = arith.constant 0 : index
      %c0_15 = arith.constant 0 : index
      %15 = vector.load %arg4[%c0_14, %c0_15] : memref<1x128xf32, #tpu.memory_space<vmem>>, vector<1x128xf32>
      %16 = vector.broadcast %15 : vector<1x128xf32> to vector<128x128xf32>
      %17 = arith.mulf %14, %16 : vector<128x128xf32>
      %c0_16 = arith.constant 0 : index
      %c0_17 = arith.constant 0 : index
      %18 = vector.load %arg5[%c0_16, %c0_17] : memref<1x128xf32, #tpu.memory_space<vmem>>, vector<1x128xf32>
      %19 = vector.broadcast %18 : vector<1x128xf32> to vector<128x128xf32>
      %20 = arith.addf %17, %19 : vector<128x128xf32>
      %21 = arith.truncf %20 : vector<128x128xf32> to vector<128x128xbf16>
      %c0_18 = arith.constant 0 : index
      %c0_19 = arith.constant 0 : index
      %22 = vector.load %arg6[%c0_18, %c0_19] : memref<128x128xbf16, #tpu.memory_space<vmem>>, vector<128x128xbf16>
      tpu.vector_store %arg6[%c0_18, %c0_19], %21 {strides = array<i32>} : memref<128x128xbf16, #tpu.memory_space<vmem>>, vector<128x128xbf16>,
    } else {
    }
    return
  }
  func.func @transform_0(%arg0: i32, %arg1: i32) -> (i32, i32, i32) {
    %c0_i32 = arith.constant 0 : i32
    %c0_i32_0 = arith.constant 0 : i32
    return %arg1, %arg0, %c0_i32 : i32, i32, i32
  }
  func.func @transform_1(%arg0: i32, %arg1: i32) -> (i32, i32, i32) {
    %c0_i32 = arith.constant 0 : i32
    %c0_i32_0 = arith.constant 0 : i32
    %c0_i32_1 = arith.constant 0 : i32
    return %arg1, %c0_i32, %c0_i32_0 : i32, i32, i32
  }
  func.func @transform_2(%arg0: i32, %arg1: i32) -> (i32, i32) {
    %c0_i32 = arith.constant 0 : i32
    %c0_i32_0 = arith.constant 0 : i32
    %c0_i32_1 = arith.constant 0 : i32
    return %c0_i32, %c0_i32_0 : i32, i32
  }
  func.func @transform_3(%arg0: i32, %arg1: i32) -> (i32, i32) {
    %c0_i32 = arith.constant 0 : i32
    %c0_i32_0 = arith.constant 0 : i32
    %c0_i32_1 = arith.constant 0 : i32
    return %c0_i32, %c0_i32_0 : i32, i32
  }
  func.func @transform_4(%arg0: i32, %arg1: i32) -> (i32, i32) {
    %c0_i32 = arith.constant 0 : i32
    %c0_i32_0 = arith.constant 0 : i32
    return %arg0, %c0_i32 : i32, i32
  }
}

module attributes {stable_mosaic.version = 11 : i64} {
  func.func @_conv_fused_kernel(%arg0: i32, %arg1: i32, %arg2: memref<1x128x128xbf16, #tpu.memory_space<vmem>>, %arg3: memref<1x128x128xbf16, #tpu.memory_space<vmem>>, %arg4: memref<1x128xf32, #tpu.memory_space<vmem>>, %arg5: memref<1x128xf32, #tpu.memory_space<vmem>>, %arg6: memref<128x128xbf16, #tpu.memory_space<vmem>>, %arg7: memref<128x128xf32, #tpu.memory_space<vmem>>) attributes {dimension_semantics = [#tpu.dimension_semantics<parallel>, #tpu.dimension_semantics<arbitrary>], iteration_bounds = array<i64: 1, 9>, scalar_prefetch = 0 : i64, scratch_operands = 1 : i64, tpu.core_type = #tpu.core_type<tc>, window_params = [{transform_indices = @transform_0, window_bounds = array<i64: 1, 128, 128>}, {transform_indices = @transform_1, window_bounds = array<i64: 1, 128, 128>}, {pipeline_mode = #tpu.pipeline_mode<synchronous>, transform_indices = @transform_2, window_bounds = array<i64: 1, 128>}, {pipeline_mode = #tpu.pipeline_mode<synchronous>, transform_indices = @transform_3, window_bounds = array<i64: 1, 128>}, {transform_indices = @transform_4, window_bounds = array<i64: 128, 128>}]} {
    %c0_i32 = arith.constant 0 : i32
    %0 = arith.cmpi eq, %arg1, %c0_i32 : i32
    %1 = arith.extui %0 : i1 to i32
    %c0_i32_0 = arith.constant 0 : i32
    %2 = arith.cmpi ne, %1, %c0_i32_0 : i32
    scf.if %2 {
      %cst_11 = arith.constant 0.000000e+00 : f32
      %14 = vector.broadcast %cst_11 : f32 to vector<128x128xf32>
      %c0_12 = arith.constant 0 : index
      %c0_13 = arith.constant 0 : index
      %15 = vector.load %arg7[%c0_12, %c0_13] : memref<128x128xf32, #tpu.memory_space<vmem>>, vector<128x128xf32>
      tpu.vector_store %arg7[%c0_12, %c0_13], %14 {strides = array<i32>} : memref<128x128xf32, #tpu.memory_space<vmem>>, vector<128x128xf32>,
    } else {
    }
    %c0 = arith.constant 0 : index
    %c0_1 = arith.constant 0 : index
    %3 = vector.load %arg7[%c0, %c0_1] : memref<128x128xf32, #tpu.memory_space<vmem>>, vector<128x128xf32>
    %c0_2 = arith.constant 0 : index
    %c0_3 = arith.constant 0 : index
    %c0_4 = arith.constant 0 : index
    %4 = vector.load %arg2[%c0_2, %c0_3, %c0_4] : memref<1x128x128xbf16, #tpu.memory_space<vmem>>, vector<1x128x128xbf16>
    %5 = vector.shape_cast %4 : vector<1x128x128xbf16> to vector<128x128xbf16>
    %c0_5 = arith.constant 0 : index
    %c0_6 = arith.constant 0 : index
    %c0_7 = arith.constant 0 : index
    %6 = vector.load %arg3[%c0_5, %c0_6, %c0_7] : memref<1x128x128xbf16, #tpu.memory_space<vmem>>, vector<1x128x128xbf16>
    %7 = vector.shape_cast %6 : vector<1x128x128xbf16> to vector<128x128xbf16>
    %cst = arith.constant dense<0.000000e+00> : vector<128x128xf32>
    %8 = tpu.matmul %5, %7, %cst {dimension_numbers = #tpu.dot_dimension_numbers<[1], [0], [0], [1], [0, 0, 1, 1], [], []>} : vector<128x128xbf16>, vector<128x128xbf16>, vector<128x128xf32> -> vector<128x128xf32>
    %9 = arith.addf %3, %8 : vector<128x128xf32>
    %c0_8 = arith.constant 0 : index
    %c0_9 = arith.constant 0 : index
    %10 = vector.load %arg7[%c0_8, %c0_9] : memref<128x128xf32, #tpu.memory_space<vmem>>, vector<128x128xf32>
    tpu.vector_store %arg7[%c0_8, %c0_9], %9 {strides = array<i32>} : memref<128x128xf32, #tpu.memory_space<vmem>>, vector<128x128xf32>,
    %c8_i32 = arith.constant 8 : i32
    %11 = arith.cmpi eq, %arg1, %c8_i32 : i32
    %12 = arith.extui %11 : i1 to i32
    %c0_i32_10 = arith.constant 0 : i32
    %13 = arith.cmpi ne, %12, %c0_i32_10 : i32
    scf.if %13 {
      %c0_11 = arith.constant 0 : index
      %c0_12 = arith.constant 0 : index
      %14 = vector.load %arg7[%c0_11, %c0_12] : memref<128x128xf32, #tpu.memory_space<vmem>>, vector<128x128xf32>
      %c0_13 = arith.constant 0 : index
      %c0_14 = arith.constant 0 : index
      %15 = vector.load %arg4[%c0_13, %c0_14] : memref<1x128xf32, #tpu.memory_space<vmem>>, vector<1x128xf32>
      %16 = vector.broadcast %15 : vector<1x128xf32> to vector<128x128xf32>
      %17 = arith.mulf %14, %16 : vector<128x128xf32>
      %c0_15 = arith.constant 0 : index
      %c0_16 = arith.constant 0 : index
      %18 = vector.load %arg5[%c0_15, %c0_16] : memref<1x128xf32, #tpu.memory_space<vmem>>, vector<1x128xf32>
      %19 = vector.broadcast %18 : vector<1x128xf32> to vector<128x128xf32>
      %20 = arith.addf %17, %19 : vector<128x128xf32>
      %cst_17 = arith.constant 0.000000e+00 : f32
      %21 = vector.broadcast %cst_17 : f32 to vector<128x128xf32>
      %22 = arith.maximumf %20, %21 : vector<128x128xf32>
      %23 = arith.truncf %22 : vector<128x128xf32> to vector<128x128xbf16>
      %c0_18 = arith.constant 0 : index
      %c0_19 = arith.constant 0 : index
      %24 = vector.load %arg6[%c0_18, %c0_19] : memref<128x128xbf16, #tpu.memory_space<vmem>>, vector<128x128xbf16>
      tpu.vector_store %arg6[%c0_18, %c0_19], %23 {strides = array<i32>} : memref<128x128xbf16, #tpu.memory_space<vmem>>, vector<128x128xbf16>,
    } else {
    }
    return
  }
  func.func @transform_0(%arg0: i32, %arg1: i32) -> (i32, i32, i32) {
    %c0_i32 = arith.constant 0 : i32
    %c0_i32_0 = arith.constant 0 : i32
    return %arg1, %arg0, %c0_i32 : i32, i32, i32
  }
  func.func @transform_1(%arg0: i32, %arg1: i32) -> (i32, i32, i32) {
    %c0_i32 = arith.constant 0 : i32
    %c0_i32_0 = arith.constant 0 : i32
    %c0_i32_1 = arith.constant 0 : i32
    return %arg1, %c0_i32, %c0_i32_0 : i32, i32, i32
  }
  func.func @transform_2(%arg0: i32, %arg1: i32) -> (i32, i32) {
    %c0_i32 = arith.constant 0 : i32
    %c0_i32_0 = arith.constant 0 : i32
    %c0_i32_1 = arith.constant 0 : i32
    return %c0_i32, %c0_i32_0 : i32, i32
  }
  func.func @transform_3(%arg0: i32, %arg1: i32) -> (i32, i32) {
    %c0_i32 = arith.constant 0 : i32
    %c0_i32_0 = arith.constant 0 : i32
    %c0_i32_1 = arith.constant 0 : i32
    return %c0_i32, %c0_i32_0 : i32, i32
  }
  func.func @transform_4(%arg0: i32, %arg1: i32) -> (i32, i32) {
    %c0_i32 = arith.constant 0 : i32
    %c0_i32_0 = arith.constant 0 : i32
    return %arg0, %c0_i32 : i32, i32
  }
}

module attributes {stable_mosaic.version = 11 : i64} {
  func.func @_conv_fused_kernel(%arg0: i32, %arg1: i32, %arg2: memref<1x32x128xbf16, #tpu.memory_space<vmem>>, %arg3: memref<1x128x128xbf16, #tpu.memory_space<vmem>>, %arg4: memref<1x128xf32, #tpu.memory_space<vmem>>, %arg5: memref<1x128xf32, #tpu.memory_space<vmem>>, %arg6: memref<32x128xbf16, #tpu.memory_space<vmem>>, %arg7: memref<32x128xf32, #tpu.memory_space<vmem>>) attributes {dimension_semantics = [#tpu.dimension_semantics<parallel>, #tpu.dimension_semantics<arbitrary>], iteration_bounds = array<i64: 1, 9>, scalar_prefetch = 0 : i64, scratch_operands = 1 : i64, tpu.core_type = #tpu.core_type<tc>, window_params = [{transform_indices = @transform_0, window_bounds = array<i64: 1, 32, 128>}, {transform_indices = @transform_1, window_bounds = array<i64: 1, 128, 128>}, {pipeline_mode = #tpu.pipeline_mode<synchronous>, transform_indices = @transform_2, window_bounds = array<i64: 1, 128>}, {pipeline_mode = #tpu.pipeline_mode<synchronous>, transform_indices = @transform_3, window_bounds = array<i64: 1, 128>}, {transform_indices = @transform_4, window_bounds = array<i64: 32, 128>}]} {
    %c0_i32 = arith.constant 0 : i32
    %0 = arith.cmpi eq, %arg1, %c0_i32 : i32
    %1 = arith.extui %0 : i1 to i32
    %c0_i32_0 = arith.constant 0 : i32
    %2 = arith.cmpi ne, %1, %c0_i32_0 : i32
    scf.if %2 {
      %cst_11 = arith.constant 0.000000e+00 : f32
      %14 = vector.broadcast %cst_11 : f32 to vector<32x128xf32>
      %c0_12 = arith.constant 0 : index
      %c0_13 = arith.constant 0 : index
      %15 = vector.load %arg7[%c0_12, %c0_13] : memref<32x128xf32, #tpu.memory_space<vmem>>, vector<32x128xf32>
      tpu.vector_store %arg7[%c0_12, %c0_13], %14 {strides = array<i32>} : memref<32x128xf32, #tpu.memory_space<vmem>>, vector<32x128xf32>,
    } else {
    }
    %c0 = arith.constant 0 : index
    %c0_1 = arith.constant 0 : index
    %3 = vector.load %arg7[%c0, %c0_1] : memref<32x128xf32, #tpu.memory_space<vmem>>, vector<32x128xf32>
    %c0_2 = arith.constant 0 : index
    %c0_3 = arith.constant 0 : index
    %c0_4 = arith.constant 0 : index
    %4 = vector.load %arg2[%c0_2, %c0_3, %c0_4] : memref<1x32x128xbf16, #tpu.memory_space<vmem>>, vector<1x32x128xbf16>
    %5 = vector.shape_cast %4 : vector<1x32x128xbf16> to vector<32x128xbf16>
    %c0_5 = arith.constant 0 : index
    %c0_6 = arith.constant 0 : index
    %c0_7 = arith.constant 0 : index
    %6 = vector.load %arg3[%c0_5, %c0_6, %c0_7] : memref<1x128x128xbf16, #tpu.memory_space<vmem>>, vector<1x128x128xbf16>
    %7 = vector.shape_cast %6 : vector<1x128x128xbf16> to vector<128x128xbf16>
    %cst = arith.constant dense<0.000000e+00> : vector<32x128xf32>
    %8 = tpu.matmul %5, %7, %cst {dimension_numbers = #tpu.dot_dimension_numbers<[1], [0], [0], [1], [0, 0, 1, 1], [], []>} : vector<32x128xbf16>, vector<128x128xbf16>, vector<32x128xf32> -> vector<32x128xf32>
    %9 = arith.addf %3, %8 : vector<32x128xf32>
    %c0_8 = arith.constant 0 : index
    %c0_9 = arith.constant 0 : index
    %10 = vector.load %arg7[%c0_8, %c0_9] : memref<32x128xf32, #tpu.memory_space<vmem>>, vector<32x128xf32>
    tpu.vector_store %arg7[%c0_8, %c0_9], %9 {strides = array<i32>} : memref<32x128xf32, #tpu.memory_space<vmem>>, vector<32x128xf32>,
    %c8_i32 = arith.constant 8 : i32
    %11 = arith.cmpi eq, %arg1, %c8_i32 : i32
    %12 = arith.extui %11 : i1 to i32
    %c0_i32_10 = arith.constant 0 : i32
    %13 = arith.cmpi ne, %12, %c0_i32_10 : i32
    scf.if %13 {
      %c0_11 = arith.constant 0 : index
      %c0_12 = arith.constant 0 : index
      %14 = vector.load %arg7[%c0_11, %c0_12] : memref<32x128xf32, #tpu.memory_space<vmem>>, vector<32x128xf32>
      %c0_13 = arith.constant 0 : index
      %c0_14 = arith.constant 0 : index
      %15 = vector.load %arg4[%c0_13, %c0_14] : memref<1x128xf32, #tpu.memory_space<vmem>>, vector<1x128xf32>
      %16 = vector.broadcast %15 : vector<1x128xf32> to vector<32x128xf32>
      %17 = arith.mulf %14, %16 : vector<32x128xf32>
      %c0_15 = arith.constant 0 : index
      %c0_16 = arith.constant 0 : index
      %18 = vector.load %arg5[%c0_15, %c0_16] : memref<1x128xf32, #tpu.memory_space<vmem>>, vector<1x128xf32>
      %19 = vector.broadcast %18 : vector<1x128xf32> to vector<32x128xf32>
      %20 = arith.addf %17, %19 : vector<32x128xf32>
      %cst_17 = arith.constant 0.000000e+00 : f32
      %21 = vector.broadcast %cst_17 : f32 to vector<32x128xf32>
      %22 = arith.maximumf %20, %21 : vector<32x128xf32>
      %23 = arith.truncf %22 : vector<32x128xf32> to vector<32x128xbf16>
      %c0_18 = arith.constant 0 : index
      %c0_19 = arith.constant 0 : index
      %24 = vector.load %arg6[%c0_18, %c0_19] : memref<32x128xbf16, #tpu.memory_space<vmem>>, vector<32x128xbf16>
      tpu.vector_store %arg6[%c0_18, %c0_19], %23 {strides = array<i32>} : memref<32x128xbf16, #tpu.memory_space<vmem>>, vector<32x128xbf16>,
    } else {
    }
    return
  }
  func.func @transform_0(%arg0: i32, %arg1: i32) -> (i32, i32, i32) {
    %c0_i32 = arith.constant 0 : i32
    %c0_i32_0 = arith.constant 0 : i32
    return %arg1, %arg0, %c0_i32 : i32, i32, i32
  }
  func.func @transform_1(%arg0: i32, %arg1: i32) -> (i32, i32, i32) {
    %c0_i32 = arith.constant 0 : i32
    %c0_i32_0 = arith.constant 0 : i32
    %c0_i32_1 = arith.constant 0 : i32
    return %arg1, %c0_i32, %c0_i32_0 : i32, i32, i32
  }
  func.func @transform_2(%arg0: i32, %arg1: i32) -> (i32, i32) {
    %c0_i32 = arith.constant 0 : i32
    %c0_i32_0 = arith.constant 0 : i32
    %c0_i32_1 = arith.constant 0 : i32
    return %c0_i32, %c0_i32_0 : i32, i32
  }
  func.func @transform_3(%arg0: i32, %arg1: i32) -> (i32, i32) {
    %c0_i32 = arith.constant 0 : i32
    %c0_i32_0 = arith.constant 0 : i32
    %c0_i32_1 = arith.constant 0 : i32
    return %c0_i32, %c0_i32_0 : i32, i32
  }
  func.func @transform_4(%arg0: i32, %arg1: i32) -> (i32, i32) {
    %c0_i32 = arith.constant 0 : i32
    %c0_i32_0 = arith.constant 0 : i32
    return %arg0, %c0_i32 : i32, i32
  }
}

module attributes {stable_mosaic.version = 11 : i64} {
  func.func @_conv_fused_kernel(%arg0: i32, %arg1: i32, %arg2: memref<1x32x128xbf16, #tpu.memory_space<vmem>>, %arg3: memref<1x128x128xbf16, #tpu.memory_space<vmem>>, %arg4: memref<1x128xf32, #tpu.memory_space<vmem>>, %arg5: memref<1x128xf32, #tpu.memory_space<vmem>>, %arg6: memref<32x128xbf16, #tpu.memory_space<vmem>>, %arg7: memref<32x128xbf16, #tpu.memory_space<vmem>>, %arg8: memref<32x128xf32, #tpu.memory_space<vmem>>) attributes {dimension_semantics = [#tpu.dimension_semantics<parallel>, #tpu.dimension_semantics<arbitrary>], iteration_bounds = array<i64: 1, 1>, scalar_prefetch = 0 : i64, scratch_operands = 1 : i64, tpu.core_type = #tpu.core_type<tc>, window_params = [{transform_indices = @transform_0, window_bounds = array<i64: 1, 32, 128>}, {transform_indices = @transform_1, window_bounds = array<i64: 1, 128, 128>}, {pipeline_mode = #tpu.pipeline_mode<synchronous>, transform_indices = @transform_2, window_bounds = array<i64: 1, 128>}, {pipeline_mode = #tpu.pipeline_mode<synchronous>, transform_indices = @transform_3, window_bounds = array<i64: 1, 128>}, {transform_indices = @transform_4, window_bounds = array<i64: 32, 128>}, {transform_indices = @transform_5, window_bounds = array<i64: 32, 128>}]} {
    %c0_i32 = arith.constant 0 : i32
    %0 = arith.cmpi eq, %arg1, %c0_i32 : i32
    %1 = arith.extui %0 : i1 to i32
    %c0_i32_0 = arith.constant 0 : i32
    %2 = arith.cmpi ne, %1, %c0_i32_0 : i32
    scf.if %2 {
      %cst_12 = arith.constant 0.000000e+00 : f32
      %14 = vector.broadcast %cst_12 : f32 to vector<32x128xf32>
      %c0_13 = arith.constant 0 : index
      %c0_14 = arith.constant 0 : index
      %15 = vector.load %arg8[%c0_13, %c0_14] : memref<32x128xf32, #tpu.memory_space<vmem>>, vector<32x128xf32>
      tpu.vector_store %arg8[%c0_13, %c0_14], %14 {strides = array<i32>} : memref<32x128xf32, #tpu.memory_space<vmem>>, vector<32x128xf32>,
    } else {
    }
    %c0 = arith.constant 0 : index
    %c0_1 = arith.constant 0 : index
    %3 = vector.load %arg8[%c0, %c0_1] : memref<32x128xf32, #tpu.memory_space<vmem>>, vector<32x128xf32>
    %c0_2 = arith.constant 0 : index
    %c0_3 = arith.constant 0 : index
    %c0_4 = arith.constant 0 : index
    %4 = vector.load %arg2[%c0_2, %c0_3, %c0_4] : memref<1x32x128xbf16, #tpu.memory_space<vmem>>, vector<1x32x128xbf16>
    %5 = vector.shape_cast %4 : vector<1x32x128xbf16> to vector<32x128xbf16>
    %c0_5 = arith.constant 0 : index
    %c0_6 = arith.constant 0 : index
    %c0_7 = arith.constant 0 : index
    %6 = vector.load %arg3[%c0_5, %c0_6, %c0_7] : memref<1x128x128xbf16, #tpu.memory_space<vmem>>, vector<1x128x128xbf16>
    %7 = vector.shape_cast %6 : vector<1x128x128xbf16> to vector<128x128xbf16>
    %cst = arith.constant dense<0.000000e+00> : vector<32x128xf32>
    %8 = tpu.matmul %5, %7, %cst {dimension_numbers = #tpu.dot_dimension_numbers<[1], [0], [0], [1], [0, 0, 1, 1], [], []>} : vector<32x128xbf16>, vector<128x128xbf16>, vector<32x128xf32> -> vector<32x128xf32>
    %9 = arith.addf %3, %8 : vector<32x128xf32>
    %c0_8 = arith.constant 0 : index
    %c0_9 = arith.constant 0 : index
    %10 = vector.load %arg8[%c0_8, %c0_9] : memref<32x128xf32, #tpu.memory_space<vmem>>, vector<32x128xf32>
    tpu.vector_store %arg8[%c0_8, %c0_9], %9 {strides = array<i32>} : memref<32x128xf32, #tpu.memory_space<vmem>>, vector<32x128xf32>,
    %c0_i32_10 = arith.constant 0 : i32
    %11 = arith.cmpi eq, %arg1, %c0_i32_10 : i32
    %12 = arith.extui %11 : i1 to i32
    %c0_i32_11 = arith.constant 0 : i32
    %13 = arith.cmpi ne, %12, %c0_i32_11 : i32
    scf.if %13 {
      %c0_12 = arith.constant 0 : index
      %c0_13 = arith.constant 0 : index
      %14 = vector.load %arg8[%c0_12, %c0_13] : memref<32x128xf32, #tpu.memory_space<vmem>>, vector<32x128xf32>
      %c0_14 = arith.constant 0 : index
      %c0_15 = arith.constant 0 : index
      %15 = vector.load %arg4[%c0_14, %c0_15] : memref<1x128xf32, #tpu.memory_space<vmem>>, vector<1x128xf32>
      %16 = vector.broadcast %15 : vector<1x128xf32> to vector<32x128xf32>
      %17 = arith.mulf %14, %16 : vector<32x128xf32>
      %c0_16 = arith.constant 0 : index
      %c0_17 = arith.constant 0 : index
      %18 = vector.load %arg5[%c0_16, %c0_17] : memref<1x128xf32, #tpu.memory_space<vmem>>, vector<1x128xf32>
      %19 = vector.broadcast %18 : vector<1x128xf32> to vector<32x128xf32>
      %20 = arith.addf %17, %19 : vector<32x128xf32>
      %c0_18 = arith.constant 0 : index
      %c0_19 = arith.constant 0 : index
      %21 = vector.load %arg6[%c0_18, %c0_19] : memref<32x128xbf16, #tpu.memory_space<vmem>>, vector<32x128xbf16>
      %22 = arith.extf %21 : vector<32x128xbf16> to vector<32x128xf32>
      %23 = arith.addf %20, %22 : vector<32x128xf32>
      %cst_20 = arith.constant 0.000000e+00 : f32
      %24 = vector.broadcast %cst_20 : f32 to vector<32x128xf32>
      %25 = arith.maximumf %23, %24 : vector<32x128xf32>
      %26 = arith.truncf %25 : vector<32x128xf32> to vector<32x128xbf16>
      %c0_21 = arith.constant 0 : index
      %c0_22 = arith.constant 0 : index
      %27 = vector.load %arg7[%c0_21, %c0_22] : memref<32x128xbf16, #tpu.memory_space<vmem>>, vector<32x128xbf16>
      tpu.vector_store %arg7[%c0_21, %c0_22], %26 {strides = array<i32>} : memref<32x128xbf16, #tpu.memory_space<vmem>>, vector<32x128xbf16>,
    } else {
    }
    return
  }
  func.func @transform_0(%arg0: i32, %arg1: i32) -> (i32, i32, i32) {
    %c0_i32 = arith.constant 0 : i32
    %c0_i32_0 = arith.constant 0 : i32
    return %arg1, %arg0, %c0_i32 : i32, i32, i32
  }
  func.func @transform_1(%arg0: i32, %arg1: i32) -> (i32, i32, i32) {
    %c0_i32 = arith.constant 0 : i32
    %c0_i32_0 = arith.constant 0 : i32
    %c0_i32_1 = arith.constant 0 : i32
    return %arg1, %c0_i32, %c0_i32_0 : i32, i32, i32
  }
  func.func @transform_2(%arg0: i32, %arg1: i32) -> (i32, i32) {
    %c0_i32 = arith.constant 0 : i32
    %c0_i32_0 = arith.constant 0 : i32
    %c0_i32_1 = arith.constant 0 : i32
    return %c0_i32, %c0_i32_0 : i32, i32
  }
  func.func @transform_3(%arg0: i32, %arg1: i32) -> (i32, i32) {
    %c0_i32 = arith.constant 0 : i32
    %c0_i32_0 = arith.constant 0 : i32
    %c0_i32_1 = arith.constant 0 : i32
    return %c0_i32, %c0_i32_0 : i32, i32
  }
  func.func @transform_4(%arg0: i32, %arg1: i32) -> (i32, i32) {
    %c0_i32 = arith.constant 0 : i32
    %c0_i32_0 = arith.constant 0 : i32
    return %arg0, %c0_i32 : i32, i32
  }
  func.func @transform_5(%arg0: i32, %arg1: i32) -> (i32, i32) {
    %c0_i32 = arith.constant 0 : i32
    %c0_i32_0 = arith.constant 0 : i32
    return %arg0, %c0_i32 : i32, i32
  }
}

module attributes {stable_mosaic.version = 11 : i64} {
  func.func @_conv_fused_kernel(%arg0: i32, %arg1: i32, %arg2: memref<1x32x128xbf16, #tpu.memory_space<vmem>>, %arg3: memref<1x128x128xbf16, #tpu.memory_space<vmem>>, %arg4: memref<1x128xf32, #tpu.memory_space<vmem>>, %arg5: memref<1x128xf32, #tpu.memory_space<vmem>>, %arg6: memref<32x128xbf16, #tpu.memory_space<vmem>>, %arg7: memref<32x128xf32, #tpu.memory_space<vmem>>) attributes {dimension_semantics = [#tpu.dimension_semantics<parallel>, #tpu.dimension_semantics<arbitrary>], iteration_bounds = array<i64: 1, 1>, scalar_prefetch = 0 : i64, scratch_operands = 1 : i64, tpu.core_type = #tpu.core_type<tc>, window_params = [{transform_indices = @transform_0, window_bounds = array<i64: 1, 32, 128>}, {transform_indices = @transform_1, window_bounds = array<i64: 1, 128, 128>}, {pipeline_mode = #tpu.pipeline_mode<synchronous>, transform_indices = @transform_2, window_bounds = array<i64: 1, 128>}, {pipeline_mode = #tpu.pipeline_mode<synchronous>, transform_indices = @transform_3, window_bounds = array<i64: 1, 128>}, {transform_indices = @transform_4, window_bounds = array<i64: 32, 128>}]} {
    %c0_i32 = arith.constant 0 : i32
    %0 = arith.cmpi eq, %arg1, %c0_i32 : i32
    %1 = arith.extui %0 : i1 to i32
    %c0_i32_0 = arith.constant 0 : i32
    %2 = arith.cmpi ne, %1, %c0_i32_0 : i32
    scf.if %2 {
      %cst_12 = arith.constant 0.000000e+00 : f32
      %14 = vector.broadcast %cst_12 : f32 to vector<32x128xf32>
      %c0_13 = arith.constant 0 : index
      %c0_14 = arith.constant 0 : index
      %15 = vector.load %arg7[%c0_13, %c0_14] : memref<32x128xf32, #tpu.memory_space<vmem>>, vector<32x128xf32>
      tpu.vector_store %arg7[%c0_13, %c0_14], %14 {strides = array<i32>} : memref<32x128xf32, #tpu.memory_space<vmem>>, vector<32x128xf32>,
    } else {
    }
    %c0 = arith.constant 0 : index
    %c0_1 = arith.constant 0 : index
    %3 = vector.load %arg7[%c0, %c0_1] : memref<32x128xf32, #tpu.memory_space<vmem>>, vector<32x128xf32>
    %c0_2 = arith.constant 0 : index
    %c0_3 = arith.constant 0 : index
    %c0_4 = arith.constant 0 : index
    %4 = vector.load %arg2[%c0_2, %c0_3, %c0_4] : memref<1x32x128xbf16, #tpu.memory_space<vmem>>, vector<1x32x128xbf16>
    %5 = vector.shape_cast %4 : vector<1x32x128xbf16> to vector<32x128xbf16>
    %c0_5 = arith.constant 0 : index
    %c0_6 = arith.constant 0 : index
    %c0_7 = arith.constant 0 : index
    %6 = vector.load %arg3[%c0_5, %c0_6, %c0_7] : memref<1x128x128xbf16, #tpu.memory_space<vmem>>, vector<1x128x128xbf16>
    %7 = vector.shape_cast %6 : vector<1x128x128xbf16> to vector<128x128xbf16>
    %cst = arith.constant dense<0.000000e+00> : vector<32x128xf32>
    %8 = tpu.matmul %5, %7, %cst {dimension_numbers = #tpu.dot_dimension_numbers<[1], [0], [0], [1], [0, 0, 1, 1], [], []>} : vector<32x128xbf16>, vector<128x128xbf16>, vector<32x128xf32> -> vector<32x128xf32>
    %9 = arith.addf %3, %8 : vector<32x128xf32>
    %c0_8 = arith.constant 0 : index
    %c0_9 = arith.constant 0 : index
    %10 = vector.load %arg7[%c0_8, %c0_9] : memref<32x128xf32, #tpu.memory_space<vmem>>, vector<32x128xf32>
    tpu.vector_store %arg7[%c0_8, %c0_9], %9 {strides = array<i32>} : memref<32x128xf32, #tpu.memory_space<vmem>>, vector<32x128xf32>,
    %c0_i32_10 = arith.constant 0 : i32
    %11 = arith.cmpi eq, %arg1, %c0_i32_10 : i32
    %12 = arith.extui %11 : i1 to i32
    %c0_i32_11 = arith.constant 0 : i32
    %13 = arith.cmpi ne, %12, %c0_i32_11 : i32
    scf.if %13 {
      %c0_12 = arith.constant 0 : index
      %c0_13 = arith.constant 0 : index
      %14 = vector.load %arg7[%c0_12, %c0_13] : memref<32x128xf32, #tpu.memory_space<vmem>>, vector<32x128xf32>
      %c0_14 = arith.constant 0 : index
      %c0_15 = arith.constant 0 : index
      %15 = vector.load %arg4[%c0_14, %c0_15] : memref<1x128xf32, #tpu.memory_space<vmem>>, vector<1x128xf32>
      %16 = vector.broadcast %15 : vector<1x128xf32> to vector<32x128xf32>
      %17 = arith.mulf %14, %16 : vector<32x128xf32>
      %c0_16 = arith.constant 0 : index
      %c0_17 = arith.constant 0 : index
      %18 = vector.load %arg5[%c0_16, %c0_17] : memref<1x128xf32, #tpu.memory_space<vmem>>, vector<1x128xf32>
      %19 = vector.broadcast %18 : vector<1x128xf32> to vector<32x128xf32>
      %20 = arith.addf %17, %19 : vector<32x128xf32>
      %21 = arith.truncf %20 : vector<32x128xf32> to vector<32x128xbf16>
      %c0_18 = arith.constant 0 : index
      %c0_19 = arith.constant 0 : index
      %22 = vector.load %arg6[%c0_18, %c0_19] : memref<32x128xbf16, #tpu.memory_space<vmem>>, vector<32x128xbf16>
      tpu.vector_store %arg6[%c0_18, %c0_19], %21 {strides = array<i32>} : memref<32x128xbf16, #tpu.memory_space<vmem>>, vector<32x128xbf16>,
    } else {
    }
    return
  }
  func.func @transform_0(%arg0: i32, %arg1: i32) -> (i32, i32, i32) {
    %c0_i32 = arith.constant 0 : i32
    %c0_i32_0 = arith.constant 0 : i32
    return %arg1, %arg0, %c0_i32 : i32, i32, i32
  }
  func.func @transform_1(%arg0: i32, %arg1: i32) -> (i32, i32, i32) {
    %c0_i32 = arith.constant 0 : i32
    %c0_i32_0 = arith.constant 0 : i32
    %c0_i32_1 = arith.constant 0 : i32
    return %arg1, %c0_i32, %c0_i32_0 : i32, i32, i32
  }
  func.func @transform_2(%arg0: i32, %arg1: i32) -> (i32, i32) {
    %c0_i32 = arith.constant 0 : i32
    %c0_i32_0 = arith.constant 0 : i32
    %c0_i32_1 = arith.constant 0 : i32
    return %c0_i32, %c0_i32_0 : i32, i32
  }
  func.func @transform_3(%arg0: i32, %arg1: i32) -> (i32, i32) {
    %c0_i32 = arith.constant 0 : i32
    %c0_i32_0 = arith.constant 0 : i32
    %c0_i32_1 = arith.constant 0 : i32
    return %c0_i32, %c0_i32_0 : i32, i32
  }
  func.func @transform_4(%arg0: i32, %arg1: i32) -> (i32, i32) {
    %c0_i32 = arith.constant 0 : i32
    %c0_i32_0 = arith.constant 0 : i32
    return %arg0, %c0_i32 : i32, i32
  }
}

module attributes {stable_mosaic.version = 11 : i64} {
  func.func @_conv_fused_kernel(%arg0: i32, %arg1: i32, %arg2: memref<1x32x128xbf16, #tpu.memory_space<vmem>>, %arg3: memref<1x128x128xbf16, #tpu.memory_space<vmem>>, %arg4: memref<1x128xf32, #tpu.memory_space<vmem>>, %arg5: memref<1x128xf32, #tpu.memory_space<vmem>>, %arg6: memref<32x128xbf16, #tpu.memory_space<vmem>>, %arg7: memref<32x128xf32, #tpu.memory_space<vmem>>) attributes {dimension_semantics = [#tpu.dimension_semantics<parallel>, #tpu.dimension_semantics<arbitrary>], iteration_bounds = array<i64: 1, 1>, scalar_prefetch = 0 : i64, scratch_operands = 1 : i64, tpu.core_type = #tpu.core_type<tc>, window_params = [{transform_indices = @transform_0, window_bounds = array<i64: 1, 32, 128>}, {transform_indices = @transform_1, window_bounds = array<i64: 1, 128, 128>}, {pipeline_mode = #tpu.pipeline_mode<synchronous>, transform_indices = @transform_2, window_bounds = array<i64: 1, 128>}, {pipeline_mode = #tpu.pipeline_mode<synchronous>, transform_indices = @transform_3, window_bounds = array<i64: 1, 128>}, {transform_indices = @transform_4, window_bounds = array<i64: 32, 128>}]} {
    %c0_i32 = arith.constant 0 : i32
    %0 = arith.cmpi eq, %arg1, %c0_i32 : i32
    %1 = arith.extui %0 : i1 to i32
    %c0_i32_0 = arith.constant 0 : i32
    %2 = arith.cmpi ne, %1, %c0_i32_0 : i32
    scf.if %2 {
      %cst_12 = arith.constant 0.000000e+00 : f32
      %14 = vector.broadcast %cst_12 : f32 to vector<32x128xf32>
      %c0_13 = arith.constant 0 : index
      %c0_14 = arith.constant 0 : index
      %15 = vector.load %arg7[%c0_13, %c0_14] : memref<32x128xf32, #tpu.memory_space<vmem>>, vector<32x128xf32>
      tpu.vector_store %arg7[%c0_13, %c0_14], %14 {strides = array<i32>} : memref<32x128xf32, #tpu.memory_space<vmem>>, vector<32x128xf32>,
    } else {
    }
    %c0 = arith.constant 0 : index
    %c0_1 = arith.constant 0 : index
    %3 = vector.load %arg7[%c0, %c0_1] : memref<32x128xf32, #tpu.memory_space<vmem>>, vector<32x128xf32>
    %c0_2 = arith.constant 0 : index
    %c0_3 = arith.constant 0 : index
    %c0_4 = arith.constant 0 : index
    %4 = vector.load %arg2[%c0_2, %c0_3, %c0_4] : memref<1x32x128xbf16, #tpu.memory_space<vmem>>, vector<1x32x128xbf16>
    %5 = vector.shape_cast %4 : vector<1x32x128xbf16> to vector<32x128xbf16>
    %c0_5 = arith.constant 0 : index
    %c0_6 = arith.constant 0 : index
    %c0_7 = arith.constant 0 : index
    %6 = vector.load %arg3[%c0_5, %c0_6, %c0_7] : memref<1x128x128xbf16, #tpu.memory_space<vmem>>, vector<1x128x128xbf16>
    %7 = vector.shape_cast %6 : vector<1x128x128xbf16> to vector<128x128xbf16>
    %cst = arith.constant dense<0.000000e+00> : vector<32x128xf32>
    %8 = tpu.matmul %5, %7, %cst {dimension_numbers = #tpu.dot_dimension_numbers<[1], [0], [0], [1], [0, 0, 1, 1], [], []>} : vector<32x128xbf16>, vector<128x128xbf16>, vector<32x128xf32> -> vector<32x128xf32>
    %9 = arith.addf %3, %8 : vector<32x128xf32>
    %c0_8 = arith.constant 0 : index
    %c0_9 = arith.constant 0 : index
    %10 = vector.load %arg7[%c0_8, %c0_9] : memref<32x128xf32, #tpu.memory_space<vmem>>, vector<32x128xf32>
    tpu.vector_store %arg7[%c0_8, %c0_9], %9 {strides = array<i32>} : memref<32x128xf32, #tpu.memory_space<vmem>>, vector<32x128xf32>,
    %c0_i32_10 = arith.constant 0 : i32
    %11 = arith.cmpi eq, %arg1, %c0_i32_10 : i32
    %12 = arith.extui %11 : i1 to i32
    %c0_i32_11 = arith.constant 0 : i32
    %13 = arith.cmpi ne, %12, %c0_i32_11 : i32
    scf.if %13 {
      %c0_12 = arith.constant 0 : index
      %c0_13 = arith.constant 0 : index
      %14 = vector.load %arg7[%c0_12, %c0_13] : memref<32x128xf32, #tpu.memory_space<vmem>>, vector<32x128xf32>
      %c0_14 = arith.constant 0 : index
      %c0_15 = arith.constant 0 : index
      %15 = vector.load %arg4[%c0_14, %c0_15] : memref<1x128xf32, #tpu.memory_space<vmem>>, vector<1x128xf32>
      %16 = vector.broadcast %15 : vector<1x128xf32> to vector<32x128xf32>
      %17 = arith.mulf %14, %16 : vector<32x128xf32>
      %c0_16 = arith.constant 0 : index
      %c0_17 = arith.constant 0 : index
      %18 = vector.load %arg5[%c0_16, %c0_17] : memref<1x128xf32, #tpu.memory_space<vmem>>, vector<1x128xf32>
      %19 = vector.broadcast %18 : vector<1x128xf32> to vector<32x128xf32>
      %20 = arith.addf %17, %19 : vector<32x128xf32>
      %cst_18 = arith.constant 0.000000e+00 : f32
      %21 = vector.broadcast %cst_18 : f32 to vector<32x128xf32>
      %22 = arith.maximumf %20, %21 : vector<32x128xf32>
      %23 = arith.truncf %22 : vector<32x128xf32> to vector<32x128xbf16>
      %c0_19 = arith.constant 0 : index
      %c0_20 = arith.constant 0 : index
      %24 = vector.load %arg6[%c0_19, %c0_20] : memref<32x128xbf16, #tpu.memory_space<vmem>>, vector<32x128xbf16>
      tpu.vector_store %arg6[%c0_19, %c0_20], %23 {strides = array<i32>} : memref<32x128xbf16, #tpu.memory_space<vmem>>, vector<32x128xbf16>,
    } else {
    }
    return
  }
  func.func @transform_0(%arg0: i32, %arg1: i32) -> (i32, i32, i32) {
    %c0_i32 = arith.constant 0 : i32
    %c0_i32_0 = arith.constant 0 : i32
    return %arg1, %arg0, %c0_i32 : i32, i32, i32
  }
  func.func @transform_1(%arg0: i32, %arg1: i32) -> (i32, i32, i32) {
    %c0_i32 = arith.constant 0 : i32
    %c0_i32_0 = arith.constant 0 : i32
    %c0_i32_1 = arith.constant 0 : i32
    return %arg1, %c0_i32, %c0_i32_0 : i32, i32, i32
  }
  func.func @transform_2(%arg0: i32, %arg1: i32) -> (i32, i32) {
    %c0_i32 = arith.constant 0 : i32
    %c0_i32_0 = arith.constant 0 : i32
    %c0_i32_1 = arith.constant 0 : i32
    return %c0_i32, %c0_i32_0 : i32, i32
  }
  func.func @transform_3(%arg0: i32, %arg1: i32) -> (i32, i32) {
    %c0_i32 = arith.constant 0 : i32
    %c0_i32_0 = arith.constant 0 : i32
    %c0_i32_1 = arith.constant 0 : i32
    return %c0_i32, %c0_i32_0 : i32, i32
  }
  func.func @transform_4(%arg0: i32, %arg1: i32) -> (i32, i32) {
    %c0_i32 = arith.constant 0 : i32
    %c0_i32_0 = arith.constant 0 : i32
    return %arg0, %c0_i32 : i32, i32
  }
}

module attributes {stable_mosaic.version = 11 : i64} {
  func.func @_conv_fused_kernel(%arg0: i32, %arg1: i32, %arg2: memref<1x8x128xbf16, #tpu.memory_space<vmem>>, %arg3: memref<1x128x128xbf16, #tpu.memory_space<vmem>>, %arg4: memref<1x128xf32, #tpu.memory_space<vmem>>, %arg5: memref<1x128xf32, #tpu.memory_space<vmem>>, %arg6: memref<8x128xbf16, #tpu.memory_space<vmem>>, %arg7: memref<8x128xf32, #tpu.memory_space<vmem>>) attributes {dimension_semantics = [#tpu.dimension_semantics<parallel>, #tpu.dimension_semantics<arbitrary>], iteration_bounds = array<i64: 1, 9>, scalar_prefetch = 0 : i64, scratch_operands = 1 : i64, tpu.core_type = #tpu.core_type<tc>, window_params = [{transform_indices = @transform_0, window_bounds = array<i64: 1, 8, 128>}, {transform_indices = @transform_1, window_bounds = array<i64: 1, 128, 128>}, {pipeline_mode = #tpu.pipeline_mode<synchronous>, transform_indices = @transform_2, window_bounds = array<i64: 1, 128>}, {pipeline_mode = #tpu.pipeline_mode<synchronous>, transform_indices = @transform_3, window_bounds = array<i64: 1, 128>}, {transform_indices = @transform_4, window_bounds = array<i64: 8, 128>}]} {
    %c0_i32 = arith.constant 0 : i32
    %0 = arith.cmpi eq, %arg1, %c0_i32 : i32
    %1 = arith.extui %0 : i1 to i32
    %c0_i32_0 = arith.constant 0 : i32
    %2 = arith.cmpi ne, %1, %c0_i32_0 : i32
    scf.if %2 {
      %cst_11 = arith.constant 0.000000e+00 : f32
      %14 = vector.broadcast %cst_11 : f32 to vector<8x128xf32>
      %c0_12 = arith.constant 0 : index
      %c0_13 = arith.constant 0 : index
      %15 = vector.load %arg7[%c0_12, %c0_13] : memref<8x128xf32, #tpu.memory_space<vmem>>, vector<8x128xf32>
      tpu.vector_store %arg7[%c0_12, %c0_13], %14 {strides = array<i32>} : memref<8x128xf32, #tpu.memory_space<vmem>>, vector<8x128xf32>,
    } else {
    }
    %c0 = arith.constant 0 : index
    %c0_1 = arith.constant 0 : index
    %3 = vector.load %arg7[%c0, %c0_1] : memref<8x128xf32, #tpu.memory_space<vmem>>, vector<8x128xf32>
    %c0_2 = arith.constant 0 : index
    %c0_3 = arith.constant 0 : index
    %c0_4 = arith.constant 0 : index
    %4 = vector.load %arg2[%c0_2, %c0_3, %c0_4] : memref<1x8x128xbf16, #tpu.memory_space<vmem>>, vector<1x8x128xbf16>
    %5 = vector.shape_cast %4 : vector<1x8x128xbf16> to vector<8x128xbf16>
    %c0_5 = arith.constant 0 : index
    %c0_6 = arith.constant 0 : index
    %c0_7 = arith.constant 0 : index
    %6 = vector.load %arg3[%c0_5, %c0_6, %c0_7] : memref<1x128x128xbf16, #tpu.memory_space<vmem>>, vector<1x128x128xbf16>
    %7 = vector.shape_cast %6 : vector<1x128x128xbf16> to vector<128x128xbf16>
    %cst = arith.constant dense<0.000000e+00> : vector<8x128xf32>
    %8 = tpu.matmul %5, %7, %cst {dimension_numbers = #tpu.dot_dimension_numbers<[1], [0], [0], [1], [0, 0, 1, 1], [], []>} : vector<8x128xbf16>, vector<128x128xbf16>, vector<8x128xf32> -> vector<8x128xf32>
    %9 = arith.addf %3, %8 : vector<8x128xf32>
    %c0_8 = arith.constant 0 : index
    %c0_9 = arith.constant 0 : index
    %10 = vector.load %arg7[%c0_8, %c0_9] : memref<8x128xf32, #tpu.memory_space<vmem>>, vector<8x128xf32>
    tpu.vector_store %arg7[%c0_8, %c0_9], %9 {strides = array<i32>} : memref<8x128xf32, #tpu.memory_space<vmem>>, vector<8x128xf32>,
    %c8_i32 = arith.constant 8 : i32
    %11 = arith.cmpi eq, %arg1, %c8_i32 : i32
    %12 = arith.extui %11 : i1 to i32
    %c0_i32_10 = arith.constant 0 : i32
    %13 = arith.cmpi ne, %12, %c0_i32_10 : i32
    scf.if %13 {
      %c0_11 = arith.constant 0 : index
      %c0_12 = arith.constant 0 : index
      %14 = vector.load %arg7[%c0_11, %c0_12] : memref<8x128xf32, #tpu.memory_space<vmem>>, vector<8x128xf32>
      %c0_13 = arith.constant 0 : index
      %c0_14 = arith.constant 0 : index
      %15 = vector.load %arg4[%c0_13, %c0_14] : memref<1x128xf32, #tpu.memory_space<vmem>>, vector<1x128xf32>
      %16 = vector.broadcast %15 : vector<1x128xf32> to vector<8x128xf32>
      %17 = arith.mulf %14, %16 : vector<8x128xf32>
      %c0_15 = arith.constant 0 : index
      %c0_16 = arith.constant 0 : index
      %18 = vector.load %arg5[%c0_15, %c0_16] : memref<1x128xf32, #tpu.memory_space<vmem>>, vector<1x128xf32>
      %19 = vector.broadcast %18 : vector<1x128xf32> to vector<8x128xf32>
      %20 = arith.addf %17, %19 : vector<8x128xf32>
      %cst_17 = arith.constant 0.000000e+00 : f32
      %21 = vector.broadcast %cst_17 : f32 to vector<8x128xf32>
      %22 = arith.maximumf %20, %21 : vector<8x128xf32>
      %23 = arith.truncf %22 : vector<8x128xf32> to vector<8x128xbf16>
      %c0_18 = arith.constant 0 : index
      %c0_19 = arith.constant 0 : index
      %24 = vector.load %arg6[%c0_18, %c0_19] : memref<8x128xbf16, #tpu.memory_space<vmem>>, vector<8x128xbf16>
      tpu.vector_store %arg6[%c0_18, %c0_19], %23 {strides = array<i32>} : memref<8x128xbf16, #tpu.memory_space<vmem>>, vector<8x128xbf16>,
    } else {
    }
    return
  }
  func.func @transform_0(%arg0: i32, %arg1: i32) -> (i32, i32, i32) {
    %c0_i32 = arith.constant 0 : i32
    %c0_i32_0 = arith.constant 0 : i32
    return %arg1, %arg0, %c0_i32 : i32, i32, i32
  }
  func.func @transform_1(%arg0: i32, %arg1: i32) -> (i32, i32, i32) {
    %c0_i32 = arith.constant 0 : i32
    %c0_i32_0 = arith.constant 0 : i32
    %c0_i32_1 = arith.constant 0 : i32
    return %arg1, %c0_i32, %c0_i32_0 : i32, i32, i32
  }
  func.func @transform_2(%arg0: i32, %arg1: i32) -> (i32, i32) {
    %c0_i32 = arith.constant 0 : i32
    %c0_i32_0 = arith.constant 0 : i32
    %c0_i32_1 = arith.constant 0 : i32
    return %c0_i32, %c0_i32_0 : i32, i32
  }
  func.func @transform_3(%arg0: i32, %arg1: i32) -> (i32, i32) {
    %c0_i32 = arith.constant 0 : i32
    %c0_i32_0 = arith.constant 0 : i32
    %c0_i32_1 = arith.constant 0 : i32
    return %c0_i32, %c0_i32_0 : i32, i32
  }
  func.func @transform_4(%arg0: i32, %arg1: i32) -> (i32, i32) {
    %c0_i32 = arith.constant 0 : i32
    %c0_i32_0 = arith.constant 0 : i32
    return %arg0, %c0_i32 : i32, i32
  }
}

module attributes {stable_mosaic.version = 11 : i64} {
  func.func @_conv_fused_kernel(%arg0: i32, %arg1: i32, %arg2: memref<1x8x128xbf16, #tpu.memory_space<vmem>>, %arg3: memref<1x128x128xbf16, #tpu.memory_space<vmem>>, %arg4: memref<1x128xf32, #tpu.memory_space<vmem>>, %arg5: memref<1x128xf32, #tpu.memory_space<vmem>>, %arg6: memref<8x128xbf16, #tpu.memory_space<vmem>>, %arg7: memref<8x128xf32, #tpu.memory_space<vmem>>) attributes {dimension_semantics = [#tpu.dimension_semantics<parallel>, #tpu.dimension_semantics<arbitrary>], iteration_bounds = array<i64: 1, 1>, scalar_prefetch = 0 : i64, scratch_operands = 1 : i64, tpu.core_type = #tpu.core_type<tc>, window_params = [{transform_indices = @transform_0, window_bounds = array<i64: 1, 8, 128>}, {transform_indices = @transform_1, window_bounds = array<i64: 1, 128, 128>}, {pipeline_mode = #tpu.pipeline_mode<synchronous>, transform_indices = @transform_2, window_bounds = array<i64: 1, 128>}, {pipeline_mode = #tpu.pipeline_mode<synchronous>, transform_indices = @transform_3, window_bounds = array<i64: 1, 128>}, {transform_indices = @transform_4, window_bounds = array<i64: 8, 128>}]} {
    %c0_i32 = arith.constant 0 : i32
    %0 = arith.cmpi eq, %arg1, %c0_i32 : i32
    %1 = arith.extui %0 : i1 to i32
    %c0_i32_0 = arith.constant 0 : i32
    %2 = arith.cmpi ne, %1, %c0_i32_0 : i32
    scf.if %2 {
      %cst_12 = arith.constant 0.000000e+00 : f32
      %14 = vector.broadcast %cst_12 : f32 to vector<8x128xf32>
      %c0_13 = arith.constant 0 : index
      %c0_14 = arith.constant 0 : index
      %15 = vector.load %arg7[%c0_13, %c0_14] : memref<8x128xf32, #tpu.memory_space<vmem>>, vector<8x128xf32>
      tpu.vector_store %arg7[%c0_13, %c0_14], %14 {strides = array<i32>} : memref<8x128xf32, #tpu.memory_space<vmem>>, vector<8x128xf32>,
    } else {
    }
    %c0 = arith.constant 0 : index
    %c0_1 = arith.constant 0 : index
    %3 = vector.load %arg7[%c0, %c0_1] : memref<8x128xf32, #tpu.memory_space<vmem>>, vector<8x128xf32>
    %c0_2 = arith.constant 0 : index
    %c0_3 = arith.constant 0 : index
    %c0_4 = arith.constant 0 : index
    %4 = vector.load %arg2[%c0_2, %c0_3, %c0_4] : memref<1x8x128xbf16, #tpu.memory_space<vmem>>, vector<1x8x128xbf16>
    %5 = vector.shape_cast %4 : vector<1x8x128xbf16> to vector<8x128xbf16>
    %c0_5 = arith.constant 0 : index
    %c0_6 = arith.constant 0 : index
    %c0_7 = arith.constant 0 : index
    %6 = vector.load %arg3[%c0_5, %c0_6, %c0_7] : memref<1x128x128xbf16, #tpu.memory_space<vmem>>, vector<1x128x128xbf16>
    %7 = vector.shape_cast %6 : vector<1x128x128xbf16> to vector<128x128xbf16>
    %cst = arith.constant dense<0.000000e+00> : vector<8x128xf32>
    %8 = tpu.matmul %5, %7, %cst {dimension_numbers = #tpu.dot_dimension_numbers<[1], [0], [0], [1], [0, 0, 1, 1], [], []>} : vector<8x128xbf16>, vector<128x128xbf16>, vector<8x128xf32> -> vector<8x128xf32>
    %9 = arith.addf %3, %8 : vector<8x128xf32>
    %c0_8 = arith.constant 0 : index
    %c0_9 = arith.constant 0 : index
    %10 = vector.load %arg7[%c0_8, %c0_9] : memref<8x128xf32, #tpu.memory_space<vmem>>, vector<8x128xf32>
    tpu.vector_store %arg7[%c0_8, %c0_9], %9 {strides = array<i32>} : memref<8x128xf32, #tpu.memory_space<vmem>>, vector<8x128xf32>,
    %c0_i32_10 = arith.constant 0 : i32
    %11 = arith.cmpi eq, %arg1, %c0_i32_10 : i32
    %12 = arith.extui %11 : i1 to i32
    %c0_i32_11 = arith.constant 0 : i32
    %13 = arith.cmpi ne, %12, %c0_i32_11 : i32
    scf.if %13 {
      %c0_12 = arith.constant 0 : index
      %c0_13 = arith.constant 0 : index
      %14 = vector.load %arg7[%c0_12, %c0_13] : memref<8x128xf32, #tpu.memory_space<vmem>>, vector<8x128xf32>
      %c0_14 = arith.constant 0 : index
      %c0_15 = arith.constant 0 : index
      %15 = vector.load %arg4[%c0_14, %c0_15] : memref<1x128xf32, #tpu.memory_space<vmem>>, vector<1x128xf32>
      %16 = vector.broadcast %15 : vector<1x128xf32> to vector<8x128xf32>
      %17 = arith.mulf %14, %16 : vector<8x128xf32>
      %c0_16 = arith.constant 0 : index
      %c0_17 = arith.constant 0 : index
      %18 = vector.load %arg5[%c0_16, %c0_17] : memref<1x128xf32, #tpu.memory_space<vmem>>, vector<1x128xf32>
      %19 = vector.broadcast %18 : vector<1x128xf32> to vector<8x128xf32>
      %20 = arith.addf %17, %19 : vector<8x128xf32>
      %21 = arith.truncf %20 : vector<8x128xf32> to vector<8x128xbf16>
      %c0_18 = arith.constant 0 : index
      %c0_19 = arith.constant 0 : index
      %22 = vector.load %arg6[%c0_18, %c0_19] : memref<8x128xbf16, #tpu.memory_space<vmem>>, vector<8x128xbf16>
      tpu.vector_store %arg6[%c0_18, %c0_19], %21 {strides = array<i32>} : memref<8x128xbf16, #tpu.memory_space<vmem>>, vector<8x128xbf16>,
    } else {
    }
    return
  }
  func.func @transform_0(%arg0: i32, %arg1: i32) -> (i32, i32, i32) {
    %c0_i32 = arith.constant 0 : i32
    %c0_i32_0 = arith.constant 0 : i32
    return %arg1, %arg0, %c0_i32 : i32, i32, i32
  }
  func.func @transform_1(%arg0: i32, %arg1: i32) -> (i32, i32, i32) {
    %c0_i32 = arith.constant 0 : i32
    %c0_i32_0 = arith.constant 0 : i32
    %c0_i32_1 = arith.constant 0 : i32
    return %arg1, %c0_i32, %c0_i32_0 : i32, i32, i32
  }
  func.func @transform_2(%arg0: i32, %arg1: i32) -> (i32, i32) {
    %c0_i32 = arith.constant 0 : i32
    %c0_i32_0 = arith.constant 0 : i32
    %c0_i32_1 = arith.constant 0 : i32
    return %c0_i32, %c0_i32_0 : i32, i32
  }
  func.func @transform_3(%arg0: i32, %arg1: i32) -> (i32, i32) {
    %c0_i32 = arith.constant 0 : i32
    %c0_i32_0 = arith.constant 0 : i32
    %c0_i32_1 = arith.constant 0 : i32
    return %c0_i32, %c0_i32_0 : i32, i32
  }
  func.func @transform_4(%arg0: i32, %arg1: i32) -> (i32, i32) {
    %c0_i32 = arith.constant 0 : i32
    %c0_i32_0 = arith.constant 0 : i32
    return %arg0, %c0_i32 : i32, i32
  }
}

module attributes {stable_mosaic.version = 11 : i64} {
  func.func @_conv_fused_kernel(%arg0: i32, %arg1: i32, %arg2: memref<1x8x128xbf16, #tpu.memory_space<vmem>>, %arg3: memref<1x128x128xbf16, #tpu.memory_space<vmem>>, %arg4: memref<1x128xf32, #tpu.memory_space<vmem>>, %arg5: memref<1x128xf32, #tpu.memory_space<vmem>>, %arg6: memref<8x128xbf16, #tpu.memory_space<vmem>>, %arg7: memref<8x128xbf16, #tpu.memory_space<vmem>>, %arg8: memref<8x128xf32, #tpu.memory_space<vmem>>) attributes {dimension_semantics = [#tpu.dimension_semantics<parallel>, #tpu.dimension_semantics<arbitrary>], iteration_bounds = array<i64: 1, 1>, scalar_prefetch = 0 : i64, scratch_operands = 1 : i64, tpu.core_type = #tpu.core_type<tc>, window_params = [{transform_indices = @transform_0, window_bounds = array<i64: 1, 8, 128>}, {transform_indices = @transform_1, window_bounds = array<i64: 1, 128, 128>}, {pipeline_mode = #tpu.pipeline_mode<synchronous>, transform_indices = @transform_2, window_bounds = array<i64: 1, 128>}, {pipeline_mode = #tpu.pipeline_mode<synchronous>, transform_indices = @transform_3, window_bounds = array<i64: 1, 128>}, {transform_indices = @transform_4, window_bounds = array<i64: 8, 128>}, {transform_indices = @transform_5, window_bounds = array<i64: 8, 128>}]} {
    %c0_i32 = arith.constant 0 : i32
    %0 = arith.cmpi eq, %arg1, %c0_i32 : i32
    %1 = arith.extui %0 : i1 to i32
    %c0_i32_0 = arith.constant 0 : i32
    %2 = arith.cmpi ne, %1, %c0_i32_0 : i32
    scf.if %2 {
      %cst_12 = arith.constant 0.000000e+00 : f32
      %14 = vector.broadcast %cst_12 : f32 to vector<8x128xf32>
      %c0_13 = arith.constant 0 : index
      %c0_14 = arith.constant 0 : index
      %15 = vector.load %arg8[%c0_13, %c0_14] : memref<8x128xf32, #tpu.memory_space<vmem>>, vector<8x128xf32>
      tpu.vector_store %arg8[%c0_13, %c0_14], %14 {strides = array<i32>} : memref<8x128xf32, #tpu.memory_space<vmem>>, vector<8x128xf32>,
    } else {
    }
    %c0 = arith.constant 0 : index
    %c0_1 = arith.constant 0 : index
    %3 = vector.load %arg8[%c0, %c0_1] : memref<8x128xf32, #tpu.memory_space<vmem>>, vector<8x128xf32>
    %c0_2 = arith.constant 0 : index
    %c0_3 = arith.constant 0 : index
    %c0_4 = arith.constant 0 : index
    %4 = vector.load %arg2[%c0_2, %c0_3, %c0_4] : memref<1x8x128xbf16, #tpu.memory_space<vmem>>, vector<1x8x128xbf16>
    %5 = vector.shape_cast %4 : vector<1x8x128xbf16> to vector<8x128xbf16>
    %c0_5 = arith.constant 0 : index
    %c0_6 = arith.constant 0 : index
    %c0_7 = arith.constant 0 : index
    %6 = vector.load %arg3[%c0_5, %c0_6, %c0_7] : memref<1x128x128xbf16, #tpu.memory_space<vmem>>, vector<1x128x128xbf16>
    %7 = vector.shape_cast %6 : vector<1x128x128xbf16> to vector<128x128xbf16>
    %cst = arith.constant dense<0.000000e+00> : vector<8x128xf32>
    %8 = tpu.matmul %5, %7, %cst {dimension_numbers = #tpu.dot_dimension_numbers<[1], [0], [0], [1], [0, 0, 1, 1], [], []>} : vector<8x128xbf16>, vector<128x128xbf16>, vector<8x128xf32> -> vector<8x128xf32>
    %9 = arith.addf %3, %8 : vector<8x128xf32>
    %c0_8 = arith.constant 0 : index
    %c0_9 = arith.constant 0 : index
    %10 = vector.load %arg8[%c0_8, %c0_9] : memref<8x128xf32, #tpu.memory_space<vmem>>, vector<8x128xf32>
    tpu.vector_store %arg8[%c0_8, %c0_9], %9 {strides = array<i32>} : memref<8x128xf32, #tpu.memory_space<vmem>>, vector<8x128xf32>,
    %c0_i32_10 = arith.constant 0 : i32
    %11 = arith.cmpi eq, %arg1, %c0_i32_10 : i32
    %12 = arith.extui %11 : i1 to i32
    %c0_i32_11 = arith.constant 0 : i32
    %13 = arith.cmpi ne, %12, %c0_i32_11 : i32
    scf.if %13 {
      %c0_12 = arith.constant 0 : index
      %c0_13 = arith.constant 0 : index
      %14 = vector.load %arg8[%c0_12, %c0_13] : memref<8x128xf32, #tpu.memory_space<vmem>>, vector<8x128xf32>
      %c0_14 = arith.constant 0 : index
      %c0_15 = arith.constant 0 : index
      %15 = vector.load %arg4[%c0_14, %c0_15] : memref<1x128xf32, #tpu.memory_space<vmem>>, vector<1x128xf32>
      %16 = vector.broadcast %15 : vector<1x128xf32> to vector<8x128xf32>
      %17 = arith.mulf %14, %16 : vector<8x128xf32>
      %c0_16 = arith.constant 0 : index
      %c0_17 = arith.constant 0 : index
      %18 = vector.load %arg5[%c0_16, %c0_17] : memref<1x128xf32, #tpu.memory_space<vmem>>, vector<1x128xf32>
      %19 = vector.broadcast %18 : vector<1x128xf32> to vector<8x128xf32>
      %20 = arith.addf %17, %19 : vector<8x128xf32>
      %c0_18 = arith.constant 0 : index
      %c0_19 = arith.constant 0 : index
      %21 = vector.load %arg6[%c0_18, %c0_19] : memref<8x128xbf16, #tpu.memory_space<vmem>>, vector<8x128xbf16>
      %22 = arith.extf %21 : vector<8x128xbf16> to vector<8x128xf32>
      %23 = arith.addf %20, %22 : vector<8x128xf32>
      %cst_20 = arith.constant 0.000000e+00 : f32
      %24 = vector.broadcast %cst_20 : f32 to vector<8x128xf32>
      %25 = arith.maximumf %23, %24 : vector<8x128xf32>
      %26 = arith.truncf %25 : vector<8x128xf32> to vector<8x128xbf16>
      %c0_21 = arith.constant 0 : index
      %c0_22 = arith.constant 0 : index
      %27 = vector.load %arg7[%c0_21, %c0_22] : memref<8x128xbf16, #tpu.memory_space<vmem>>, vector<8x128xbf16>
      tpu.vector_store %arg7[%c0_21, %c0_22], %26 {strides = array<i32>} : memref<8x128xbf16, #tpu.memory_space<vmem>>, vector<8x128xbf16>,
    } else {
    }
    return
  }
  func.func @transform_0(%arg0: i32, %arg1: i32) -> (i32, i32, i32) {
    %c0_i32 = arith.constant 0 : i32
    %c0_i32_0 = arith.constant 0 : i32
    return %arg1, %arg0, %c0_i32 : i32, i32, i32
  }
  func.func @transform_1(%arg0: i32, %arg1: i32) -> (i32, i32, i32) {
    %c0_i32 = arith.constant 0 : i32
    %c0_i32_0 = arith.constant 0 : i32
    %c0_i32_1 = arith.constant 0 : i32
    return %arg1, %c0_i32, %c0_i32_0 : i32, i32, i32
  }
  func.func @transform_2(%arg0: i32, %arg1: i32) -> (i32, i32) {
    %c0_i32 = arith.constant 0 : i32
    %c0_i32_0 = arith.constant 0 : i32
    %c0_i32_1 = arith.constant 0 : i32
    return %c0_i32, %c0_i32_0 : i32, i32
  }
  func.func @transform_3(%arg0: i32, %arg1: i32) -> (i32, i32) {
    %c0_i32 = arith.constant 0 : i32
    %c0_i32_0 = arith.constant 0 : i32
    %c0_i32_1 = arith.constant 0 : i32
    return %c0_i32, %c0_i32_0 : i32, i32
  }
  func.func @transform_4(%arg0: i32, %arg1: i32) -> (i32, i32) {
    %c0_i32 = arith.constant 0 : i32
    %c0_i32_0 = arith.constant 0 : i32
    return %arg0, %c0_i32 : i32, i32
  }
  func.func @transform_5(%arg0: i32, %arg1: i32) -> (i32, i32) {
    %c0_i32 = arith.constant 0 : i32
    %c0_i32_0 = arith.constant 0 : i32
    return %arg0, %c0_i32 : i32, i32
  }
}

module attributes {stable_mosaic.version = 11 : i64} {
  func.func @_conv_fused_kernel(%arg0: i32, %arg1: i32, %arg2: memref<1x8x128xbf16, #tpu.memory_space<vmem>>, %arg3: memref<1x128x128xbf16, #tpu.memory_space<vmem>>, %arg4: memref<1x128xf32, #tpu.memory_space<vmem>>, %arg5: memref<1x128xf32, #tpu.memory_space<vmem>>, %arg6: memref<8x128xbf16, #tpu.memory_space<vmem>>, %arg7: memref<8x128xf32, #tpu.memory_space<vmem>>) attributes {dimension_semantics = [#tpu.dimension_semantics<parallel>, #tpu.dimension_semantics<arbitrary>], iteration_bounds = array<i64: 1, 1>, scalar_prefetch = 0 : i64, scratch_operands = 1 : i64, tpu.core_type = #tpu.core_type<tc>, window_params = [{transform_indices = @transform_0, window_bounds = array<i64: 1, 8, 128>}, {transform_indices = @transform_1, window_bounds = array<i64: 1, 128, 128>}, {pipeline_mode = #tpu.pipeline_mode<synchronous>, transform_indices = @transform_2, window_bounds = array<i64: 1, 128>}, {pipeline_mode = #tpu.pipeline_mode<synchronous>, transform_indices = @transform_3, window_bounds = array<i64: 1, 128>}, {transform_indices = @transform_4, window_bounds = array<i64: 8, 128>}]} {
    %c0_i32 = arith.constant 0 : i32
    %0 = arith.cmpi eq, %arg1, %c0_i32 : i32
    %1 = arith.extui %0 : i1 to i32
    %c0_i32_0 = arith.constant 0 : i32
    %2 = arith.cmpi ne, %1, %c0_i32_0 : i32
    scf.if %2 {
      %cst_12 = arith.constant 0.000000e+00 : f32
      %14 = vector.broadcast %cst_12 : f32 to vector<8x128xf32>
      %c0_13 = arith.constant 0 : index
      %c0_14 = arith.constant 0 : index
      %15 = vector.load %arg7[%c0_13, %c0_14] : memref<8x128xf32, #tpu.memory_space<vmem>>, vector<8x128xf32>
      tpu.vector_store %arg7[%c0_13, %c0_14], %14 {strides = array<i32>} : memref<8x128xf32, #tpu.memory_space<vmem>>, vector<8x128xf32>,
    } else {
    }
    %c0 = arith.constant 0 : index
    %c0_1 = arith.constant 0 : index
    %3 = vector.load %arg7[%c0, %c0_1] : memref<8x128xf32, #tpu.memory_space<vmem>>, vector<8x128xf32>
    %c0_2 = arith.constant 0 : index
    %c0_3 = arith.constant 0 : index
    %c0_4 = arith.constant 0 : index
    %4 = vector.load %arg2[%c0_2, %c0_3, %c0_4] : memref<1x8x128xbf16, #tpu.memory_space<vmem>>, vector<1x8x128xbf16>
    %5 = vector.shape_cast %4 : vector<1x8x128xbf16> to vector<8x128xbf16>
    %c0_5 = arith.constant 0 : index
    %c0_6 = arith.constant 0 : index
    %c0_7 = arith.constant 0 : index
    %6 = vector.load %arg3[%c0_5, %c0_6, %c0_7] : memref<1x128x128xbf16, #tpu.memory_space<vmem>>, vector<1x128x128xbf16>
    %7 = vector.shape_cast %6 : vector<1x128x128xbf16> to vector<128x128xbf16>
    %cst = arith.constant dense<0.000000e+00> : vector<8x128xf32>
    %8 = tpu.matmul %5, %7, %cst {dimension_numbers = #tpu.dot_dimension_numbers<[1], [0], [0], [1], [0, 0, 1, 1], [], []>} : vector<8x128xbf16>, vector<128x128xbf16>, vector<8x128xf32> -> vector<8x128xf32>
    %9 = arith.addf %3, %8 : vector<8x128xf32>
    %c0_8 = arith.constant 0 : index
    %c0_9 = arith.constant 0 : index
    %10 = vector.load %arg7[%c0_8, %c0_9] : memref<8x128xf32, #tpu.memory_space<vmem>>, vector<8x128xf32>
    tpu.vector_store %arg7[%c0_8, %c0_9], %9 {strides = array<i32>} : memref<8x128xf32, #tpu.memory_space<vmem>>, vector<8x128xf32>,
    %c0_i32_10 = arith.constant 0 : i32
    %11 = arith.cmpi eq, %arg1, %c0_i32_10 : i32
    %12 = arith.extui %11 : i1 to i32
    %c0_i32_11 = arith.constant 0 : i32
    %13 = arith.cmpi ne, %12, %c0_i32_11 : i32
    scf.if %13 {
      %c0_12 = arith.constant 0 : index
      %c0_13 = arith.constant 0 : index
      %14 = vector.load %arg7[%c0_12, %c0_13] : memref<8x128xf32, #tpu.memory_space<vmem>>, vector<8x128xf32>
      %c0_14 = arith.constant 0 : index
      %c0_15 = arith.constant 0 : index
      %15 = vector.load %arg4[%c0_14, %c0_15] : memref<1x128xf32, #tpu.memory_space<vmem>>, vector<1x128xf32>
      %16 = vector.broadcast %15 : vector<1x128xf32> to vector<8x128xf32>
      %17 = arith.mulf %14, %16 : vector<8x128xf32>
      %c0_16 = arith.constant 0 : index
      %c0_17 = arith.constant 0 : index
      %18 = vector.load %arg5[%c0_16, %c0_17] : memref<1x128xf32, #tpu.memory_space<vmem>>, vector<1x128xf32>
      %19 = vector.broadcast %18 : vector<1x128xf32> to vector<8x128xf32>
      %20 = arith.addf %17, %19 : vector<8x128xf32>
      %cst_18 = arith.constant 0.000000e+00 : f32
      %21 = vector.broadcast %cst_18 : f32 to vector<8x128xf32>
      %22 = arith.maximumf %20, %21 : vector<8x128xf32>
      %23 = arith.truncf %22 : vector<8x128xf32> to vector<8x128xbf16>
      %c0_19 = arith.constant 0 : index
      %c0_20 = arith.constant 0 : index
      %24 = vector.load %arg6[%c0_19, %c0_20] : memref<8x128xbf16, #tpu.memory_space<vmem>>, vector<8x128xbf16>
      tpu.vector_store %arg6[%c0_19, %c0_20], %23 {strides = array<i32>} : memref<8x128xbf16, #tpu.memory_space<vmem>>, vector<8x128xbf16>,
    } else {
    }
    return
  }
  func.func @transform_0(%arg0: i32, %arg1: i32) -> (i32, i32, i32) {
    %c0_i32 = arith.constant 0 : i32
    %c0_i32_0 = arith.constant 0 : i32
    return %arg1, %arg0, %c0_i32 : i32, i32, i32
  }
  func.func @transform_1(%arg0: i32, %arg1: i32) -> (i32, i32, i32) {
    %c0_i32 = arith.constant 0 : i32
    %c0_i32_0 = arith.constant 0 : i32
    %c0_i32_1 = arith.constant 0 : i32
    return %arg1, %c0_i32, %c0_i32_0 : i32, i32, i32
  }
  func.func @transform_2(%arg0: i32, %arg1: i32) -> (i32, i32) {
    %c0_i32 = arith.constant 0 : i32
    %c0_i32_0 = arith.constant 0 : i32
    %c0_i32_1 = arith.constant 0 : i32
    return %c0_i32, %c0_i32_0 : i32, i32
  }
  func.func @transform_3(%arg0: i32, %arg1: i32) -> (i32, i32) {
    %c0_i32 = arith.constant 0 : i32
    %c0_i32_0 = arith.constant 0 : i32
    %c0_i32_1 = arith.constant 0 : i32
    return %c0_i32, %c0_i32_0 : i32, i32
  }
  func.func @transform_4(%arg0: i32, %arg1: i32) -> (i32, i32) {
    %c0_i32 = arith.constant 0 : i32
    %c0_i32_0 = arith.constant 0 : i32
    return %arg0, %c0_i32 : i32, i32
  }
}

module attributes {stable_mosaic.version = 11 : i64} {
  func.func @_conv_fused_kernel(%arg0: i32, %arg1: i32, %arg2: memref<1x2x128xbf16, #tpu.memory_space<vmem>>, %arg3: memref<1x128x128xbf16, #tpu.memory_space<vmem>>, %arg4: memref<1x128xf32, #tpu.memory_space<vmem>>, %arg5: memref<1x128xf32, #tpu.memory_space<vmem>>, %arg6: memref<2x128xbf16, #tpu.memory_space<vmem>>, %arg7: memref<2x128xf32, #tpu.memory_space<vmem>>) attributes {dimension_semantics = [#tpu.dimension_semantics<parallel>, #tpu.dimension_semantics<arbitrary>], iteration_bounds = array<i64: 1, 9>, scalar_prefetch = 0 : i64, scratch_operands = 1 : i64, tpu.core_type = #tpu.core_type<tc>, window_params = [{transform_indices = @transform_0, window_bounds = array<i64: 1, 2, 128>}, {transform_indices = @transform_1, window_bounds = array<i64: 1, 128, 128>}, {pipeline_mode = #tpu.pipeline_mode<synchronous>, transform_indices = @transform_2, window_bounds = array<i64: 1, 128>}, {pipeline_mode = #tpu.pipeline_mode<synchronous>, transform_indices = @transform_3, window_bounds = array<i64: 1, 128>}, {transform_indices = @transform_4, window_bounds = array<i64: 2, 128>}]} {
    %c0_i32 = arith.constant 0 : i32
    %0 = arith.cmpi eq, %arg1, %c0_i32 : i32
    %1 = arith.extui %0 : i1 to i32
    %c0_i32_0 = arith.constant 0 : i32
    %2 = arith.cmpi ne, %1, %c0_i32_0 : i32
    scf.if %2 {
      %cst_11 = arith.constant 0.000000e+00 : f32
      %14 = vector.broadcast %cst_11 : f32 to vector<2x128xf32>
      %c0_12 = arith.constant 0 : index
      %c0_13 = arith.constant 0 : index
      %15 = vector.load %arg7[%c0_12, %c0_13] : memref<2x128xf32, #tpu.memory_space<vmem>>, vector<2x128xf32>
      tpu.vector_store %arg7[%c0_12, %c0_13], %14 {strides = array<i32>} : memref<2x128xf32, #tpu.memory_space<vmem>>, vector<2x128xf32>,
    } else {
    }
    %c0 = arith.constant 0 : index
    %c0_1 = arith.constant 0 : index
    %3 = vector.load %arg7[%c0, %c0_1] : memref<2x128xf32, #tpu.memory_space<vmem>>, vector<2x128xf32>
    %c0_2 = arith.constant 0 : index
    %c0_3 = arith.constant 0 : index
    %c0_4 = arith.constant 0 : index
    %4 = vector.load %arg2[%c0_2, %c0_3, %c0_4] : memref<1x2x128xbf16, #tpu.memory_space<vmem>>, vector<1x2x128xbf16>
    %5 = vector.shape_cast %4 : vector<1x2x128xbf16> to vector<2x128xbf16>
    %c0_5 = arith.constant 0 : index
    %c0_6 = arith.constant 0 : index
    %c0_7 = arith.constant 0 : index
    %6 = vector.load %arg3[%c0_5, %c0_6, %c0_7] : memref<1x128x128xbf16, #tpu.memory_space<vmem>>, vector<1x128x128xbf16>
    %7 = vector.shape_cast %6 : vector<1x128x128xbf16> to vector<128x128xbf16>
    %cst = arith.constant dense<0.000000e+00> : vector<2x128xf32>
    %8 = tpu.matmul %5, %7, %cst {dimension_numbers = #tpu.dot_dimension_numbers<[1], [0], [0], [1], [0, 0, 1, 1], [], []>} : vector<2x128xbf16>, vector<128x128xbf16>, vector<2x128xf32> -> vector<2x128xf32>
    %9 = arith.addf %3, %8 : vector<2x128xf32>
    %c0_8 = arith.constant 0 : index
    %c0_9 = arith.constant 0 : index
    %10 = vector.load %arg7[%c0_8, %c0_9] : memref<2x128xf32, #tpu.memory_space<vmem>>, vector<2x128xf32>
    tpu.vector_store %arg7[%c0_8, %c0_9], %9 {strides = array<i32>} : memref<2x128xf32, #tpu.memory_space<vmem>>, vector<2x128xf32>,
    %c8_i32 = arith.constant 8 : i32
    %11 = arith.cmpi eq, %arg1, %c8_i32 : i32
    %12 = arith.extui %11 : i1 to i32
    %c0_i32_10 = arith.constant 0 : i32
    %13 = arith.cmpi ne, %12, %c0_i32_10 : i32
    scf.if %13 {
      %c0_11 = arith.constant 0 : index
      %c0_12 = arith.constant 0 : index
      %14 = vector.load %arg7[%c0_11, %c0_12] : memref<2x128xf32, #tpu.memory_space<vmem>>, vector<2x128xf32>
      %c0_13 = arith.constant 0 : index
      %c0_14 = arith.constant 0 : index
      %15 = vector.load %arg4[%c0_13, %c0_14] : memref<1x128xf32, #tpu.memory_space<vmem>>, vector<1x128xf32>
      %16 = vector.broadcast %15 : vector<1x128xf32> to vector<2x128xf32>
      %17 = arith.mulf %14, %16 : vector<2x128xf32>
      %c0_15 = arith.constant 0 : index
      %c0_16 = arith.constant 0 : index
      %18 = vector.load %arg5[%c0_15, %c0_16] : memref<1x128xf32, #tpu.memory_space<vmem>>, vector<1x128xf32>
      %19 = vector.broadcast %18 : vector<1x128xf32> to vector<2x128xf32>
      %20 = arith.addf %17, %19 : vector<2x128xf32>
      %cst_17 = arith.constant 0.000000e+00 : f32
      %21 = vector.broadcast %cst_17 : f32 to vector<2x128xf32>
      %22 = arith.maximumf %20, %21 : vector<2x128xf32>
      %23 = arith.truncf %22 : vector<2x128xf32> to vector<2x128xbf16>
      %c0_18 = arith.constant 0 : index
      %c0_19 = arith.constant 0 : index
      %24 = vector.load %arg6[%c0_18, %c0_19] : memref<2x128xbf16, #tpu.memory_space<vmem>>, vector<2x128xbf16>
      tpu.vector_store %arg6[%c0_18, %c0_19], %23 {strides = array<i32>} : memref<2x128xbf16, #tpu.memory_space<vmem>>, vector<2x128xbf16>,
    } else {
    }
    return
  }
  func.func @transform_0(%arg0: i32, %arg1: i32) -> (i32, i32, i32) {
    %c0_i32 = arith.constant 0 : i32
    %c0_i32_0 = arith.constant 0 : i32
    return %arg1, %arg0, %c0_i32 : i32, i32, i32
  }
  func.func @transform_1(%arg0: i32, %arg1: i32) -> (i32, i32, i32) {
    %c0_i32 = arith.constant 0 : i32
    %c0_i32_0 = arith.constant 0 : i32
    %c0_i32_1 = arith.constant 0 : i32
    return %arg1, %c0_i32, %c0_i32_0 : i32, i32, i32
  }
  func.func @transform_2(%arg0: i32, %arg1: i32) -> (i32, i32) {
    %c0_i32 = arith.constant 0 : i32
    %c0_i32_0 = arith.constant 0 : i32
    %c0_i32_1 = arith.constant 0 : i32
    return %c0_i32, %c0_i32_0 : i32, i32
  }
  func.func @transform_3(%arg0: i32, %arg1: i32) -> (i32, i32) {
    %c0_i32 = arith.constant 0 : i32
    %c0_i32_0 = arith.constant 0 : i32
    %c0_i32_1 = arith.constant 0 : i32
    return %c0_i32, %c0_i32_0 : i32, i32
  }
  func.func @transform_4(%arg0: i32, %arg1: i32) -> (i32, i32) {
    %c0_i32 = arith.constant 0 : i32
    %c0_i32_0 = arith.constant 0 : i32
    return %arg0, %c0_i32 : i32, i32
  }
}

module attributes {stable_mosaic.version = 11 : i64} {
  func.func @_conv_fused_kernel(%arg0: i32, %arg1: i32, %arg2: memref<1x2x128xbf16, #tpu.memory_space<vmem>>, %arg3: memref<1x128x256xbf16, #tpu.memory_space<vmem>>, %arg4: memref<1x256xf32, #tpu.memory_space<vmem>>, %arg5: memref<1x256xf32, #tpu.memory_space<vmem>>, %arg6: memref<2x256xbf16, #tpu.memory_space<vmem>>, %arg7: memref<2x256xf32, #tpu.memory_space<vmem>>) attributes {dimension_semantics = [#tpu.dimension_semantics<parallel>, #tpu.dimension_semantics<arbitrary>], iteration_bounds = array<i64: 1, 1>, scalar_prefetch = 0 : i64, scratch_operands = 1 : i64, tpu.core_type = #tpu.core_type<tc>, window_params = [{transform_indices = @transform_0, window_bounds = array<i64: 1, 2, 128>}, {transform_indices = @transform_1, window_bounds = array<i64: 1, 128, 256>}, {pipeline_mode = #tpu.pipeline_mode<synchronous>, transform_indices = @transform_2, window_bounds = array<i64: 1, 256>}, {pipeline_mode = #tpu.pipeline_mode<synchronous>, transform_indices = @transform_3, window_bounds = array<i64: 1, 256>}, {transform_indices = @transform_4, window_bounds = array<i64: 2, 256>}]} {
    %c0_i32 = arith.constant 0 : i32
    %0 = arith.cmpi eq, %arg1, %c0_i32 : i32
    %1 = arith.extui %0 : i1 to i32
    %c0_i32_0 = arith.constant 0 : i32
    %2 = arith.cmpi ne, %1, %c0_i32_0 : i32
    scf.if %2 {
      %cst_12 = arith.constant 0.000000e+00 : f32
      %14 = vector.broadcast %cst_12 : f32 to vector<2x256xf32>
      %c0_13 = arith.constant 0 : index
      %c0_14 = arith.constant 0 : index
      %15 = vector.load %arg7[%c0_13, %c0_14] : memref<2x256xf32, #tpu.memory_space<vmem>>, vector<2x256xf32>
      tpu.vector_store %arg7[%c0_13, %c0_14], %14 {strides = array<i32>} : memref<2x256xf32, #tpu.memory_space<vmem>>, vector<2x256xf32>,
    } else {
    }
    %c0 = arith.constant 0 : index
    %c0_1 = arith.constant 0 : index
    %3 = vector.load %arg7[%c0, %c0_1] : memref<2x256xf32, #tpu.memory_space<vmem>>, vector<2x256xf32>
    %c0_2 = arith.constant 0 : index
    %c0_3 = arith.constant 0 : index
    %c0_4 = arith.constant 0 : index
    %4 = vector.load %arg2[%c0_2, %c0_3, %c0_4] : memref<1x2x128xbf16, #tpu.memory_space<vmem>>, vector<1x2x128xbf16>
    %5 = vector.shape_cast %4 : vector<1x2x128xbf16> to vector<2x128xbf16>
    %c0_5 = arith.constant 0 : index
    %c0_6 = arith.constant 0 : index
    %c0_7 = arith.constant 0 : index
    %6 = vector.load %arg3[%c0_5, %c0_6, %c0_7] : memref<1x128x256xbf16, #tpu.memory_space<vmem>>, vector<1x128x256xbf16>
    %7 = vector.shape_cast %6 : vector<1x128x256xbf16> to vector<128x256xbf16>
    %cst = arith.constant dense<0.000000e+00> : vector<2x256xf32>
    %8 = tpu.matmul %5, %7, %cst {dimension_numbers = #tpu.dot_dimension_numbers<[1], [0], [0], [1], [0, 0, 1, 1], [], []>} : vector<2x128xbf16>, vector<128x256xbf16>, vector<2x256xf32> -> vector<2x256xf32>
    %9 = arith.addf %3, %8 : vector<2x256xf32>
    %c0_8 = arith.constant 0 : index
    %c0_9 = arith.constant 0 : index
    %10 = vector.load %arg7[%c0_8, %c0_9] : memref<2x256xf32, #tpu.memory_space<vmem>>, vector<2x256xf32>
    tpu.vector_store %arg7[%c0_8, %c0_9], %9 {strides = array<i32>} : memref<2x256xf32, #tpu.memory_space<vmem>>, vector<2x256xf32>,
    %c0_i32_10 = arith.constant 0 : i32
    %11 = arith.cmpi eq, %arg1, %c0_i32_10 : i32
    %12 = arith.extui %11 : i1 to i32
    %c0_i32_11 = arith.constant 0 : i32
    %13 = arith.cmpi ne, %12, %c0_i32_11 : i32
    scf.if %13 {
      %c0_12 = arith.constant 0 : index
      %c0_13 = arith.constant 0 : index
      %14 = vector.load %arg7[%c0_12, %c0_13] : memref<2x256xf32, #tpu.memory_space<vmem>>, vector<2x256xf32>
      %c0_14 = arith.constant 0 : index
      %c0_15 = arith.constant 0 : index
      %15 = vector.load %arg4[%c0_14, %c0_15] : memref<1x256xf32, #tpu.memory_space<vmem>>, vector<1x256xf32>
      %16 = vector.broadcast %15 : vector<1x256xf32> to vector<2x256xf32>
      %17 = arith.mulf %14, %16 : vector<2x256xf32>
      %c0_16 = arith.constant 0 : index
      %c0_17 = arith.constant 0 : index
      %18 = vector.load %arg5[%c0_16, %c0_17] : memref<1x256xf32, #tpu.memory_space<vmem>>, vector<1x256xf32>
      %19 = vector.broadcast %18 : vector<1x256xf32> to vector<2x256xf32>
      %20 = arith.addf %17, %19 : vector<2x256xf32>
      %21 = arith.truncf %20 : vector<2x256xf32> to vector<2x256xbf16>
      %c0_18 = arith.constant 0 : index
      %c0_19 = arith.constant 0 : index
      %22 = vector.load %arg6[%c0_18, %c0_19] : memref<2x256xbf16, #tpu.memory_space<vmem>>, vector<2x256xbf16>
      tpu.vector_store %arg6[%c0_18, %c0_19], %21 {strides = array<i32>} : memref<2x256xbf16, #tpu.memory_space<vmem>>, vector<2x256xbf16>,
    } else {
    }
    return
  }
  func.func @transform_0(%arg0: i32, %arg1: i32) -> (i32, i32, i32) {
    %c0_i32 = arith.constant 0 : i32
    %c0_i32_0 = arith.constant 0 : i32
    return %arg1, %arg0, %c0_i32 : i32, i32, i32
  }
  func.func @transform_1(%arg0: i32, %arg1: i32) -> (i32, i32, i32) {
    %c0_i32 = arith.constant 0 : i32
    %c0_i32_0 = arith.constant 0 : i32
    %c0_i32_1 = arith.constant 0 : i32
    return %arg1, %c0_i32, %c0_i32_0 : i32, i32, i32
  }
  func.func @transform_2(%arg0: i32, %arg1: i32) -> (i32, i32) {
    %c0_i32 = arith.constant 0 : i32
    %c0_i32_0 = arith.constant 0 : i32
    %c0_i32_1 = arith.constant 0 : i32
    return %c0_i32, %c0_i32_0 : i32, i32
  }
  func.func @transform_3(%arg0: i32, %arg1: i32) -> (i32, i32) {
    %c0_i32 = arith.constant 0 : i32
    %c0_i32_0 = arith.constant 0 : i32
    %c0_i32_1 = arith.constant 0 : i32
    return %c0_i32, %c0_i32_0 : i32, i32
  }
  func.func @transform_4(%arg0: i32, %arg1: i32) -> (i32, i32) {
    %c0_i32 = arith.constant 0 : i32
    %c0_i32_0 = arith.constant 0 : i32
    return %arg0, %c0_i32 : i32, i32
  }
}

module attributes {stable_mosaic.version = 11 : i64} {
  func.func @_conv_fused_kernel(%arg0: i32, %arg1: i32, %arg2: memref<1x2x128xbf16, #tpu.memory_space<vmem>>, %arg3: memref<1x128x256xbf16, #tpu.memory_space<vmem>>, %arg4: memref<1x256xf32, #tpu.memory_space<vmem>>, %arg5: memref<1x256xf32, #tpu.memory_space<vmem>>, %arg6: memref<2x256xbf16, #tpu.memory_space<vmem>>, %arg7: memref<2x256xbf16, #tpu.memory_space<vmem>>, %arg8: memref<2x256xf32, #tpu.memory_space<vmem>>) attributes {dimension_semantics = [#tpu.dimension_semantics<parallel>, #tpu.dimension_semantics<arbitrary>], iteration_bounds = array<i64: 1, 1>, scalar_prefetch = 0 : i64, scratch_operands = 1 : i64, tpu.core_type = #tpu.core_type<tc>, window_params = [{transform_indices = @transform_0, window_bounds = array<i64: 1, 2, 128>}, {transform_indices = @transform_1, window_bounds = array<i64: 1, 128, 256>}, {pipeline_mode = #tpu.pipeline_mode<synchronous>, transform_indices = @transform_2, window_bounds = array<i64: 1, 256>}, {pipeline_mode = #tpu.pipeline_mode<synchronous>, transform_indices = @transform_3, window_bounds = array<i64: 1, 256>}, {transform_indices = @transform_4, window_bounds = array<i64: 2, 256>}, {transform_indices = @transform_5, window_bounds = array<i64: 2, 256>}]} {
    %c0_i32 = arith.constant 0 : i32
    %0 = arith.cmpi eq, %arg1, %c0_i32 : i32
    %1 = arith.extui %0 : i1 to i32
    %c0_i32_0 = arith.constant 0 : i32
    %2 = arith.cmpi ne, %1, %c0_i32_0 : i32
    scf.if %2 {
      %cst_12 = arith.constant 0.000000e+00 : f32
      %14 = vector.broadcast %cst_12 : f32 to vector<2x256xf32>
      %c0_13 = arith.constant 0 : index
      %c0_14 = arith.constant 0 : index
      %15 = vector.load %arg8[%c0_13, %c0_14] : memref<2x256xf32, #tpu.memory_space<vmem>>, vector<2x256xf32>
      tpu.vector_store %arg8[%c0_13, %c0_14], %14 {strides = array<i32>} : memref<2x256xf32, #tpu.memory_space<vmem>>, vector<2x256xf32>,
    } else {
    }
    %c0 = arith.constant 0 : index
    %c0_1 = arith.constant 0 : index
    %3 = vector.load %arg8[%c0, %c0_1] : memref<2x256xf32, #tpu.memory_space<vmem>>, vector<2x256xf32>
    %c0_2 = arith.constant 0 : index
    %c0_3 = arith.constant 0 : index
    %c0_4 = arith.constant 0 : index
    %4 = vector.load %arg2[%c0_2, %c0_3, %c0_4] : memref<1x2x128xbf16, #tpu.memory_space<vmem>>, vector<1x2x128xbf16>
    %5 = vector.shape_cast %4 : vector<1x2x128xbf16> to vector<2x128xbf16>
    %c0_5 = arith.constant 0 : index
    %c0_6 = arith.constant 0 : index
    %c0_7 = arith.constant 0 : index
    %6 = vector.load %arg3[%c0_5, %c0_6, %c0_7] : memref<1x128x256xbf16, #tpu.memory_space<vmem>>, vector<1x128x256xbf16>
    %7 = vector.shape_cast %6 : vector<1x128x256xbf16> to vector<128x256xbf16>
    %cst = arith.constant dense<0.000000e+00> : vector<2x256xf32>
    %8 = tpu.matmul %5, %7, %cst {dimension_numbers = #tpu.dot_dimension_numbers<[1], [0], [0], [1], [0, 0, 1, 1], [], []>} : vector<2x128xbf16>, vector<128x256xbf16>, vector<2x256xf32> -> vector<2x256xf32>
    %9 = arith.addf %3, %8 : vector<2x256xf32>
    %c0_8 = arith.constant 0 : index
    %c0_9 = arith.constant 0 : index
    %10 = vector.load %arg8[%c0_8, %c0_9] : memref<2x256xf32, #tpu.memory_space<vmem>>, vector<2x256xf32>
    tpu.vector_store %arg8[%c0_8, %c0_9], %9 {strides = array<i32>} : memref<2x256xf32, #tpu.memory_space<vmem>>, vector<2x256xf32>,
    %c0_i32_10 = arith.constant 0 : i32
    %11 = arith.cmpi eq, %arg1, %c0_i32_10 : i32
    %12 = arith.extui %11 : i1 to i32
    %c0_i32_11 = arith.constant 0 : i32
    %13 = arith.cmpi ne, %12, %c0_i32_11 : i32
    scf.if %13 {
      %c0_12 = arith.constant 0 : index
      %c0_13 = arith.constant 0 : index
      %14 = vector.load %arg8[%c0_12, %c0_13] : memref<2x256xf32, #tpu.memory_space<vmem>>, vector<2x256xf32>
      %c0_14 = arith.constant 0 : index
      %c0_15 = arith.constant 0 : index
      %15 = vector.load %arg4[%c0_14, %c0_15] : memref<1x256xf32, #tpu.memory_space<vmem>>, vector<1x256xf32>
      %16 = vector.broadcast %15 : vector<1x256xf32> to vector<2x256xf32>
      %17 = arith.mulf %14, %16 : vector<2x256xf32>
      %c0_16 = arith.constant 0 : index
      %c0_17 = arith.constant 0 : index
      %18 = vector.load %arg5[%c0_16, %c0_17] : memref<1x256xf32, #tpu.memory_space<vmem>>, vector<1x256xf32>
      %19 = vector.broadcast %18 : vector<1x256xf32> to vector<2x256xf32>
      %20 = arith.addf %17, %19 : vector<2x256xf32>
      %c0_18 = arith.constant 0 : index
      %c0_19 = arith.constant 0 : index
      %21 = vector.load %arg6[%c0_18, %c0_19] : memref<2x256xbf16, #tpu.memory_space<vmem>>, vector<2x256xbf16>
      %22 = arith.extf %21 : vector<2x256xbf16> to vector<2x256xf32>
      %23 = arith.addf %20, %22 : vector<2x256xf32>
      %cst_20 = arith.constant 0.000000e+00 : f32
      %24 = vector.broadcast %cst_20 : f32 to vector<2x256xf32>
      %25 = arith.maximumf %23, %24 : vector<2x256xf32>
      %26 = arith.truncf %25 : vector<2x256xf32> to vector<2x256xbf16>
      %c0_21 = arith.constant 0 : index
      %c0_22 = arith.constant 0 : index
      %27 = vector.load %arg7[%c0_21, %c0_22] : memref<2x256xbf16, #tpu.memory_space<vmem>>, vector<2x256xbf16>
      tpu.vector_store %arg7[%c0_21, %c0_22], %26 {strides = array<i32>} : memref<2x256xbf16, #tpu.memory_space<vmem>>, vector<2x256xbf16>,
    } else {
    }
    return
  }
  func.func @transform_0(%arg0: i32, %arg1: i32) -> (i32, i32, i32) {
    %c0_i32 = arith.constant 0 : i32
    %c0_i32_0 = arith.constant 0 : i32
    return %arg1, %arg0, %c0_i32 : i32, i32, i32
  }
  func.func @transform_1(%arg0: i32, %arg1: i32) -> (i32, i32, i32) {
    %c0_i32 = arith.constant 0 : i32
    %c0_i32_0 = arith.constant 0 : i32
    %c0_i32_1 = arith.constant 0 : i32
    return %arg1, %c0_i32, %c0_i32_0 : i32, i32, i32
  }
  func.func @transform_2(%arg0: i32, %arg1: i32) -> (i32, i32) {
    %c0_i32 = arith.constant 0 : i32
    %c0_i32_0 = arith.constant 0 : i32
    %c0_i32_1 = arith.constant 0 : i32
    return %c0_i32, %c0_i32_0 : i32, i32
  }
  func.func @transform_3(%arg0: i32, %arg1: i32) -> (i32, i32) {
    %c0_i32 = arith.constant 0 : i32
    %c0_i32_0 = arith.constant 0 : i32
    %c0_i32_1 = arith.constant 0 : i32
    return %c0_i32, %c0_i32_0 : i32, i32
  }
  func.func @transform_4(%arg0: i32, %arg1: i32) -> (i32, i32) {
    %c0_i32 = arith.constant 0 : i32
    %c0_i32_0 = arith.constant 0 : i32
    return %arg0, %c0_i32 : i32, i32
  }
  func.func @transform_5(%arg0: i32, %arg1: i32) -> (i32, i32) {
    %c0_i32 = arith.constant 0 : i32
    %c0_i32_0 = arith.constant 0 : i32
    return %arg0, %c0_i32 : i32, i32
  }
}

module attributes {stable_mosaic.version = 11 : i64} {
  func.func @_avgpool_kernel(%arg0: memref<2x1x256xbf16, #tpu.memory_space<vmem>>, %arg1: memref<2x256xf32, #tpu.memory_space<vmem>>) attributes {dimension_semantics = [], scalar_prefetch = 0 : i64, scratch_operands = 0 : i64, tpu.core_type = #tpu.core_type<tc>} {
    %c0 = arith.constant 0 : index
    %c0_0 = arith.constant 0 : index
    %c0_1 = arith.constant 0 : index
    %0 = vector.load %arg0[%c0, %c0_0, %c0_1] : memref<2x1x256xbf16, #tpu.memory_space<vmem>>, vector<2x1x256xbf16>
    %1 = arith.extf %0 : vector<2x1x256xbf16> to vector<2x1x256xf32>
    %cst = arith.constant dense<0.000000e+00> : vector<2x256xf32>
    %2 = vector.multi_reduction <add>, %1, %cst [1] : vector<2x1x256xf32> to vector<2x256xf32>
    %cst_2 = arith.constant 1.000000e+00 : f32
    %3 = vector.broadcast %cst_2 : f32 to vector<2x256xf32>
    %4 = arith.divf %2, %3 : vector<2x256xf32>
    %c0_3 = arith.constant 0 : index
    %c0_4 = arith.constant 0 : index
    %5 = vector.load %arg1[%c0_3, %c0_4] : memref<2x256xf32, #tpu.memory_space<vmem>>, vector<2x256xf32>
    tpu.vector_store %arg1[%c0_3, %c0_4], %4 {strides = array<i32>} : memref<2x256xf32, #tpu.memory_space<vmem>>, vector<2x256xf32>,
    return
  }
}

</mosaic_0001>

<bundles_post_ra>
// kernel: new_model_forward.25
= control target key start
LH: loop header
LB: loop body
LE: loop exit
PB: predicated region body
PF: predicated region fallthrough
CT: control target
= control target key end

     0   :  { %s774_s1 = inlined_call_operand.vmem [shape: bf16[1,128,128], index: 1, kind: input, shape index: {}]   ;;  %s775_s0 = inlined_call_operand.vmem [shape: bf16[1,128,128], index: 0, kind: input, shape index: {}]   ;;  %s776_s2 = inlined_call_operand.vmem [shape: f32[1,128], index: 2, kind: input, shape index: {}]   ;;  %s777_s3 = inlined_call_operand.vmem [shape: f32[1,128], index: 3, kind: input, shape index: {}]   ;;  %s778_s4 = inlined_call_operand.vmem [shape: bf16[128,128], index: 4, kind: output, shape index: {}]  }
   0x1   :  { %v637_v0 = vld [vmem:[%s774_s1] sm:$0xff]   ;;  %v638_v1 = vld [vmem:[%s774_s1 + $0x8] sm:$0xff]   ;;  %v639_v2 = vld [vmem:[%s774_s1 + $0x10] sm:$0xff]  }
   0x2   :  { %589 = vmatprep.subr.bf16.mxu0 %v637_v0  ;;  %621 = vmatprep.subr.bf16.mxu1 %v637_v0  ;;  %v640_v3 = vld [vmem:[%s774_s1 + $0x18] sm:$0xff]   ;;  %v645_v4 = vld [vmem:[%s775_s0] sm:$0xff]   ;;  %v642_v7 = vld [vmem:[%s774_s1 + $0x28] sm:$0xff]  }
   0x3   :  { %590 = vmatpush3.bf16.msra.mxu0 %v637_v0  ;;  %629 = vmatpush3.bf16.msra.mxu1 %v637_v0  ;;  %v646_v5 = vld [vmem:[%s775_s0 + $0x20] sm:$0xff]   ;;  %v643_v8 = vld [vmem:[%s774_s1 + $0x30] sm:$0xff]   ;;  %v644_v9 = vld [vmem:[%s774_s1 + $0x38] sm:$0xff]  }
   0x4   :  { %591 = vmatprep.subr.bf16.mxu0 %v638_v1  ;;  %622 = vmatprep.subr.bf16.mxu1 %v638_v1  ;;  %v641_v6 = vld [vmem:[%s774_s1 + $0x20] sm:$0xff]   ;;  %v647_v10 = vld [vmem:[%s775_s0 + $0x8] sm:$0xff]   ;;  %v649_v12 = vld [vmem:[%s775_s0 + $0x10] sm:$0xff]  }
   0x5   :  { %605 = vmatprep.mubr.bf16.mxu0 %v645_v4  ;;  %613 = vmatprep.mubr.bf16.mxu1 %v646_v5  ;;  %v648_v11 = vld [vmem:[%s775_s0 + $0x28] sm:$0xff]   ;;  %v650_v13 = vld [vmem:[%s775_s0 + $0x30] sm:$0xff]   ;;  %v651_v14 = vld [vmem:[%s775_s0 + $0x18] sm:$0xff]  }
   0x6   :  { %v652_v15 = vld [vmem:[%s775_s0 + $0x38] sm:$0xff]   ;;  %v492_v16 = vld [vmem:[%s776_s2] ss:$0 sm:$0xff] }
   0x7   :  { %592 = vmatpush3.bf16.msra.mxu0 %v638_v1  ;;  %630 = vmatpush3.bf16.msra.mxu1 %v638_v1  ;;  %v732_v18 = vld [vmem:[%s777_s3] ss:$0 sm:$0xff] }
   0x8   :  { %593 = vmatprep.subr.bf16.mxu0 %v639_v2  ;;  %623 = vmatprep.subr.bf16.mxu1 %v639_v2 }
   0xb   :  { %594 = vmatpush3.bf16.msra.mxu0 %v639_v2  ;;  %631 = vmatpush3.bf16.msra.mxu1 %v639_v2 }
   0xc   :  { %595 = vmatprep.subr.bf16.mxu0 %v640_v3  ;;  %624 = vmatprep.subr.bf16.mxu1 %v640_v3 }
   0xf   :  { %596 = vmatpush3.bf16.msra.mxu0 %v640_v3  ;;  %632 = vmatpush3.bf16.msra.mxu1 %v640_v3 }
  0x10   :  { %597 = vmatprep.subr.bf16.mxu0 %v641_v6  ;;  %625 = vmatprep.subr.bf16.mxu1 %v641_v6 }
  0x13   :  { %598 = vmatpush3.bf16.msra.mxu0 %v641_v6  ;;  %633 = vmatpush3.bf16.msra.mxu1 %v641_v6 }
  0x14   :  { %599 = vmatprep.subr.bf16.mxu0 %v642_v7  ;;  %626 = vmatprep.subr.bf16.mxu1 %v642_v7 }
  0x17   :  { %600 = vmatpush3.bf16.msra.mxu0 %v642_v7  ;;  %634 = vmatpush3.bf16.msra.mxu1 %v642_v7 }
  0x18   :  { %601 = vmatprep.subr.bf16.mxu0 %v643_v8  ;;  %627 = vmatprep.subr.bf16.mxu1 %v643_v8 }
  0x1b   :  { %602 = vmatpush3.bf16.msra.mxu0 %v643_v8  ;;  %635 = vmatpush3.bf16.msra.mxu1 %v643_v8 }
  0x1c   :  { %603 = vmatprep.subr.bf16.mxu0 %v644_v9  ;;  %628 = vmatprep.subr.bf16.mxu1 %v644_v9 }
  0x1f   :  { %604 = vmatpush3.bf16.msra.mxu0 %v644_v9  ;;  %636 = vmatpush3.bf16.msra.mxu1 %v644_v9 }
  0x22   :  { %606 = vmatmul.mubr.bf16.vlgmr.msra.gmra.mrb[0].mxu0 %v647_v10  ;;  %614 = vmatmul.mubr.bf16.vlgmr.msra.gmra.mrb[0].mxu1 %v648_v11 }
  0x23   :  { %609 = vmatprep.mubr.bf16.mxu0 %v649_v12  ;;  %617 = vmatprep.mubr.bf16.mxu1 %v650_v13 }
  0x2a   :  { %610 = vmatmul.mubr.bf16.gmra.mrb[4].mxu0 %v651_v14  ;;  %618 = vmatmul.mubr.bf16.gmra.mrb[4].mxu1 %v652_v15 }
  0xf5   :  { %v607_v17 = vpop.f32.mrb[0].mxu0  ;;  %v615_v19 = vpop.f32.mrb[0].mxu1 }
  0xf6   :  { %v339_v20 = vmul.f32 %v607_v17, %v492_v16  ;;  %v347_v21 = vmul.f32 %v615_v19, %v492_v16  ;;  %v216_v22 = vpop.f32.mrb[1].mxu0  ;;  %v248_v23 = vpop.f32.mrb[1].mxu1 }
  0xf7   :  { %v337_v24 = vmul.f32 %v492_v16, %v216_v22  ;;  %v345_v25 = vmul.f32 %v492_v16, %v248_v23  ;;  %v608_v26 = vpop.f32.mrb[2].mxu0  ;;  %v616_v27 = vpop.f32.mrb[2].mxu1 }
  0xf8   :  { %v362_v28 = vadd.f32 %v732_v18, %v339_v20  ;;  %v370_v29 = vadd.f32 %v732_v18, %v347_v21  ;;  %v340_v30 = vmul.f32 %v608_v26, %v492_v16  ;;  %v348_v31 = vmul.f32 %v616_v27, %v492_v16  ;;  %v219_v32 = vpop.f32.mrb[3].mxu0  ;;  %v251_v33 = vpop.f32.mrb[3].mxu1 }
  0xf9   :  { %v360_v34 = vadd.f32 %v732_v18, %v337_v24  ;;  %v368_v35 = vadd.f32 %v732_v18, %v345_v25  ;;  %v338_v36 = vmul.f32 %v492_v16, %v219_v32  ;;  %v346_v37 = vmul.f32 %v492_v16, %v251_v33 }
  0xfa   :  { %v363_v38 = vadd.f32 %v732_v18, %v340_v30  ;;  %v371_v39 = vadd.f32 %v732_v18, %v348_v31  ;;  %v378_v42 = vmax.f32 %v362_v28, 0.0  ;;  %v386_v43 = vmax.f32 %v370_v29, 0.0 }
  0xfb   :  { %v361_v40 = vadd.f32 %v732_v18, %v338_v36  ;;  %v369_v41 = vadd.f32 %v732_v18, %v346_v37  ;;  %v376_v46 = vmax.f32 %v360_v34, 0.0  ;;  %v384_v47 = vmax.f32 %v368_v35, 0.0 }
  0xfc   :  { %v379_v44 = vmax.f32 %v363_v38, 0.0  ;;  %v387_v45 = vmax.f32 %v371_v39, 0.0 }
  0xfd   :  { %v377_v48 = vmax.f32 %v361_v40, 0.0  ;;  %v385_v49 = vmax.f32 %v369_v41, 0.0  ;;  %v611_v50 = vpop.f32.mrb[4].mxu0  ;;  %v619_v51 = vpop.f32.mrb[4].mxu1 }
  0xfe   :  { %v534_v52 = vpack.c.bf16 %v379_v44, %v378_v42  ;;  %v554_v53 = vpack.c.bf16 %v387_v45, %v386_v43  ;;  %v343_v54 = vmul.f32 %v611_v50, %v492_v16  ;;  %v351_v55 = vmul.f32 %v619_v51, %v492_v16  ;;  %v232_v56 = vpop.f32.mrb[5].mxu0  ;;  %v264_v57 = vpop.f32.mrb[5].mxu1 }
  0xff   :  { %v529_v58 = vpack.c.bf16 %v377_v48, %v376_v46  ;;  %v549_v59 = vpack.c.bf16 %v385_v49, %v384_v47  ;;  %v341_v60 = vmul.f32 %v492_v16, %v232_v56  ;;  %v349_v61 = vmul.f32 %v492_v16, %v264_v57  ;;  %v612_v62 = vpop.f32.mrb[6].mxu0  ;;  %v620_v63 = vpop.f32.mrb[6].mxu1 }
 0x100   :  { %566 = vst [vmem:[%s778_s4 + $0x8] sm:$0xff] %v534_v52   ;;  %570 = vst [vmem:[%s778_s4 + $0x28] sm:$0xff] %v554_v53   ;;  %v366_v0 = vadd.f32 %v732_v18, %v343_v54  ;;  %v374_v1 = vadd.f32 %v732_v18, %v351_v55  ;;  %v344_v2 = vmul.f32 %v612_v62, %v492_v16  ;;  %v235_v4 = vpop.f32.mrb[7].mxu0  ;;  %v267_v5 = vpop.f32.mrb[7].mxu1 }
 0x101   :  { %v352_v3 = vmul.f32 %v620_v63, %v492_v16  ;;  %530 = vst [vmem:[%s778_s4] sm:$0xff] %v529_v58   ;;  %569 = vst [vmem:[%s778_s4 + $0x20] sm:$0xff] %v549_v59   ;;  %v364_v6 = vadd.f32 %v732_v18, %v341_v60  ;;  %v372_v7 = vadd.f32 %v732_v18, %v349_v61 }
 0x102   :  { %v342_v8 = vmul.f32 %v492_v16, %v235_v4  ;;  %v350_v9 = vmul.f32 %v492_v16, %v267_v5  ;;  %v367_v10 = vadd.f32 %v732_v18, %v344_v2  ;;  %v382_v14 = vmax.f32 %v366_v0, 0.0 }
 0x103   :  { %v375_v11 = vadd.f32 %v732_v18, %v352_v3  ;;  %v390_v15 = vmax.f32 %v374_v1, 0.0  ;;  %v380_v20 = vmax.f32 %v364_v6, 0.0  ;;  %v388_v21 = vmax.f32 %v372_v7, 0.0 }
 0x104   :  { %v365_v12 = vadd.f32 %v732_v18, %v342_v8  ;;  %v373_v13 = vadd.f32 %v732_v18, %v350_v9  ;;  %v383_v17 = vmax.f32 %v367_v10, 0.0 }
 0x105   :  { %v391_v19 = vmax.f32 %v375_v11, 0.0 }
 0x106   :  { %v381_v22 = vmax.f32 %v365_v12, 0.0  ;;  %v389_v23 = vmax.f32 %v373_v13, 0.0  ;;  %v544_v24 = vpack.c.bf16 %v383_v17, %v382_v14 }
 0x107   :  { %v564_v25 = vpack.c.bf16 %v391_v19, %v390_v15 }
 0x108   :  { %v539_v26 = vpack.c.bf16 %v381_v22, %v380_v20  ;;  %v559_v16 = vpack.c.bf16 %v389_v23, %v388_v21  ;;  %568 = vst [vmem:[%s778_s4 + $0x18] sm:$0xff] %v544_v24  }
 0x109   :  { %572 = vst [vmem:[%s778_s4 + $0x38] sm:$0xff] %v564_v25  }
 0x10a   :  { %567 = vst [vmem:[%s778_s4 + $0x10] sm:$0xff] %v539_v26   ;;  %571 = vst [vmem:[%s778_s4 + $0x30] sm:$0xff] %v559_v16  }

// kernel: new_model_forward.23
= control target key start
LH: loop header
LB: loop body
LE: loop exit
PB: predicated region body
PF: predicated region fallthrough
CT: control target
= control target key end

     0   :  { %vm119_vm0 = vsmask.f32 3328  ;;  %vm120_vm1 = vsmask.f32 7440  ;;  %s1712_s0 = inlined_call_operand.vmem [shape: bf16[2,9,9,128], index: 0, kind: input, shape index: {}]   ;;  %s1713_s1 = inlined_call_operand.vmem [shape: bf16[2,9,9,128], index: 1, kind: input, shape index: {}]   ;;  %s1714_s2 = inlined_call_operand.vmem [shape: bf16[2,9,9,128], index: 2, kind: input, shape index: {}]   ;;  %s1715_s3 = inlined_call_operand.vmem [shape: bf16[2,9,9,128], index: 3, kind: input, shape index: {}]   ;;  %s1716_s4 = inlined_call_operand.vmem [shape: bf16[2,8,8,128], index: 4, kind: output, shape index: {}]  }
   0x1   :  { %v863_v0 = vld [vmem:[%s1712_s0 + $0x48] sm:$0xf]  ;;  %v868_v1 = vld [vmem:[%s1712_s0 + $0x50] sm:$0xf]  ;;  %v878_v3 = vld [vmem:[%s1712_s0 + $0x38] sm:$0xf] }
   0x2   :  { %v873_v2 = vld [vmem:[%s1712_s0 + $0x30] sm:$0xf]  ;;  %v883_v4 = vld [vmem:[%s1712_s0 + $0x58] sm:$0xf]  ;;  %v370_v6 = vmax.bf16 %v868_v1, %v863_v0  ;;  %v62_v9 = vld [vmem:[%s1713_s1 + $0x48] sm:$0xf] }
   0x3   :  { %v368_v5 = vmax.bf16 %v878_v3, %v873_v2  ;;  %v371_v7 = vmax.bf16 %v883_v4, %v868_v1  ;;  %v894_v8 = vld [vmem:[%s1713_s1 + $0x30] sm:$0xf]  ;;  %v906_v14 = vld [vmem:[%s1713_s1 + $0x38] sm:$0xf]  ;;  %v923_v20 = vld [vmem:[%s1714_s2 + $0x48] sm:$0xf] }
   0x4   :  { %v63_v10 = vld [vmem:[%s1713_s1 + $0x50] sm:$0xf]  ;;  %v386_v12 = vmax.bf16 %v370_v6, %v62_v9  ;;  %v911_v15 = vld [vmem:[%s1713_s1 + $0x58] sm:$0xf]  ;;  %v942_v25 = vld [vmem:[%s1712_s0] sm:$0xf] }
   0x5   :  { %v384_v11 = vmax.bf16 %v368_v5, %v894_v8  ;;  %v387_v13 = vmax.bf16 %v371_v7, %v63_v10  ;;  %v918_v19 = vld [vmem:[%s1714_s2 + $0x30] sm:$0xf]  ;;  %v18_v26 = vld [vmem:[%s1712_s0 + $0x4] sm:$0x1]  ;;  %v955_v28 = vld [vmem:[%s1712_s0 + $0x8] sm:$0xf] }
   0x6   :  { %v432_v17 = vmax.bf16 %v386_v12, %v63_v10  ;;  %v928_v21 = vld [vmem:[%s1714_s2 + $0x50] sm:$0xf]  ;;  %v960_v29 = vld [vmem:[%s1715_s3 + $0x48] sm:$0xf]  ;;  %v20_v31 = vld [vmem:[%s1712_s0 + $0xc] sm:$0x1] }
   0x7   :  { %v430_v16 = vmax.bf16 %v384_v11, %v906_v14  ;;  %v433_v18 = vmax.bf16 %v387_v13, %v911_v15  ;;  %v950_v27 = vld [vmem:[%s1715_s3 + $0x30] sm:$0xf]  ;;  %v22_v33 = vld [vmem:[%s1712_s0 + $0x14] sm:$0x1]  ;;  %v987_v37 = vld [vmem:[%s1712_s0 + $0x18] sm:$0xf] }
   0x8   :  { %v934_v23 = vmax.bf16 %v432_v17, %v923_v20  ;;  %v965_v30 = vld [vmem:[%s1715_s3 + $0x50] sm:$0xf]  ;;  %v123_v38 = vshrl.u32 %v942_v25, 16  ;;  %v126_v39 = vshll.u32 %v942_v25, 16  ;;  %v132_v40 = vshll.u32 %v18_v26, 16  ;;  %vm1012_vm2 = vmor %vm119_vm0, %vm120_vm1 }
   0x9   :  { %v931_v22 = vmax.bf16 %v430_v16, %v918_v19  ;;  %v937_v24 = vmax.bf16 %v433_v18, %v928_v21  ;;  %v973_v32 = vld [vmem:[%s1712_s0 + $0x10] sm:$0xf]  ;;  %v137_v41 = vshrl.u32 %v955_v28, 16  ;;  %v24_v42 = vld [vmem:[%s1712_s0 + $0x1c] sm:$0x1]  ;;  %v140_v43 = vshll.u32 %v955_v28, 16 }
   0xa   :  { %v464_v35 = vmax.bf16 %v934_v23, %v960_v29  ;;  %v146_v44 = vshll.u32 %v20_v31, 16  ;;  %v151_v45 = vshrl.u32 %v973_v32, 16  ;;  %v154_v46 = vshll.u32 %v973_v32, 16  ;;  %v1001_v47 = vld [vmem:[%s1712_s0 + $0x20] sm:$0xf] }
   0xb   :  { %v462_v34 = vmax.bf16 %v931_v22, %v950_v27  ;;  %v465_v36 = vmax.bf16 %v937_v24, %v965_v30  ;;  %v125_v48 = vrot.slane %v123_v38, 4  ;;  %v128_v49 = vrot.slane %v126_v39, 5  ;;  %v26_v60 = vld [vmem:[%s1712_s0 + $0x24] sm:$0x1]  ;;  %v1020_v7 = vld [vmem:[%s1712_s0 + $0x28] sm:$0xf] }
   0xc   :  { %v1003_v50 = vrot.slane %v132_v40, 5  ;;  %v139_v51 = vrot.slane %v137_v41, 4  ;;  %v142_v52 = vrot.slane %v140_v43, 5  ;;  %v148_v53 = vrot.slane %v146_v44, 5  ;;  %v28_v13 = vld [vmem:[%s1712_s0 + $0x2c] sm:$0x1] }
   0xd   :  { %v153_v54 = vrot.slane %v151_v45, 4  ;;  %v156_v55 = vrot.slane %v154_v46, 5  ;;  %v129_v56 = vor.u32 %v128_v49, %v125_v48  ;;  %v160_v57 = vshll.u32 %v22_v33, 16  ;;  %v30_v40 = vld [vmem:[%s1712_s0 + $0x34] sm:$0x1] }
   0xe   :  { %v165_v58 = vshrl.u32 %v987_v37, 16  ;;  %v168_v59 = vshll.u32 %v987_v37, 16  ;;  %v143_v62 = vor.u32 %v142_v52, %v139_v51  ;;  %v174_v5 = vshll.u32 %v24_v42, 16  ;;  %v32_v51 = vld [vmem:[%s1712_s0 + $0x3c] sm:$0x1] }
   0xf   :  { %v157_v63 = vor.u32 %v156_v55, %v153_v54  ;;  %v179_v6 = vshrl.u32 %v1001_v47, 16  ;;  %v1022_v9 = vrot.slane %v129_v56, 4  ;;  %v162_v10 = vrot.slane %v160_v57, 5 }
  0x10   :  { %v167_v11 = vrot.slane %v165_v58, 4  ;;  %v170_v12 = vrot.slane %v168_v59, 5  ;;  %v144_v16 = vrot.slane %v143_v62, 4  ;;  %v176_v18 = vrot.slane %v174_v5, 5 }
  0x11   :  { %v158_v17 = vrot.slane %v157_v63, 4  ;;  %v181_v26 = vrot.slane %v179_v6, 4  ;;  %v135_v31 = vsel %vm1012_vm2, %v1022_v9, %v1003_v50  ;;  %v182_v38 = vshll.u32 %v1001_v47, 16  ;;  %v36_v6 = vld [vmem:[%s1712_s0 + $0x4c] sm:$0x1] }
  0x12   :  { %v171_v33 = vor.u32 %v170_v12, %v167_v11  ;;  %v188_v39 = vshll.u32 %v26_v60, 16  ;;  %v1037_v41 = vsel %vm1012_vm2, %v144_v16, %v148_v53  ;;  %v193_v43 = vshrl.u32 %v1020_v7, 16 }
  0x13   :  { %v1041_v42 = vsel %vm1012_vm2, %v158_v17, %v162_v10  ;;  %v196_v44 = vshll.u32 %v1020_v7, 16  ;;  %v184_v46 = vrot.slane %v182_v38, 5  ;;  %v202_v49 = vshll.u32 %v28_v13, 16 }
  0x14   :  { %v172_v45 = vrot.slane %v171_v33, 4  ;;  %v190_v48 = vrot.slane %v188_v39, 5  ;;  %v195_v52 = vrot.slane %v193_v43, 4  ;;  %v207_v53 = vshrl.u32 %v873_v2, 16  ;;  %v38_v33 = vld [vmem:[%s1712_s0 + $0x54] sm:$0x1] }
  0x15   :  { %v198_v54 = vrot.slane %v196_v44, 5  ;;  %v210_v55 = vshll.u32 %v873_v2, 16  ;;  %v185_v57 = vor.u32 %v184_v46, %v181_v26  ;;  %v204_v58 = vrot.slane %v202_v49, 5 }
  0x16   :  { %v1052_v56 = vsel %vm1012_vm2, %v172_v45, %v176_v18  ;;  %v216_v59 = vshll.u32 %v30_v40, 16  ;;  %v209_v62 = vrot.slane %v207_v53, 4  ;;  %v221_v5 = vshrl.u32 %v878_v3, 16 }
  0x17   :  { %v199_v60 = vor.u32 %v198_v54, %v195_v52  ;;  %v212_v63 = vrot.slane %v210_v55, 5  ;;  %v186_v10 = vrot.slane %v185_v57, 4  ;;  %v224_v12 = vshll.u32 %v878_v3, 16 }
  0x18   :  { %v218_v11 = vrot.slane %v216_v59, 5  ;;  %v230_v13 = vshll.u32 %v32_v51, 16  ;;  %v223_v18 = vrot.slane %v221_v5, 4  ;;  %v235_v26 = vshrl.u32 %v863_v0, 16  ;;  %v40_v51 = vld [vmem:[%s1712_s0 + $0x5c] sm:$0x1] }
  0x19   :  { %v200_v16 = vrot.slane %v199_v60, 4  ;;  %v213_v17 = vor.u32 %v212_v63, %v209_v62  ;;  %v1065_v38 = vsel %vm1012_vm2, %v186_v10, %v190_v48  ;;  %v226_v39 = vrot.slane %v224_v12, 5  ;;  %v42_v5 = vld [vmem:[%s1712_s0 + $0x64] sm:$0x1] }
  0x1a   :  { %v232_v40 = vrot.slane %v230_v13, 5  ;;  %v238_v43 = vshll.u32 %v863_v0, 16  ;;  %v237_v46 = vrot.slane %v235_v26, 4  ;;  %v244_v49 = vshll.u32 %v36_v6, 16  ;;  %v1080_v0 = vld [vmem:[%s1712_s0 + $0x60] sm:$0xf] }
  0x1b   :  { %v1070_v44 = vsel %vm1012_vm2, %v200_v16, %v204_v58  ;;  %v214_v45 = vrot.slane %v213_v17, 4  ;;  %v227_v52 = vor.u32 %v226_v39, %v223_v18  ;;  %v249_v48 = vshrl.u32 %v868_v1, 16  ;;  %v44_v17 = vld [vmem:[%s1712_s0 + $0x6c] sm:$0x1] }
  0x1c   :  { %v240_v54 = vrot.slane %v238_v43, 5  ;;  %v252_v53 = vshll.u32 %v868_v1, 16  ;;  %v246_v57 = vrot.slane %v244_v49, 5  ;;  %v258_v58 = vshll.u32 %v38_v33, 16 }
  0x1d   :  { %v1084_v55 = vsel %vm1012_vm2, %v214_v45, %v218_v11  ;;  %v263_v59 = vshrl.u32 %v883_v4, 16  ;;  %v228_v1 = vrot.slane %v227_v52, 4  ;;  %v251_v63 = vrot.slane %v249_v48, 4 }
  0x1e   :  { %v1091_v60 = vmax.bf16 %v462_v34, %v1084_v55  ;;  %v241_v62 = vor.u32 %v240_v54, %v237_v46  ;;  %v254_v6 = vrot.slane %v252_v53, 5  ;;  %v260_v10 = vrot.slane %v258_v58, 5  ;;  %v1105_v34 = vld [vmem:[%s1712_s0 + $0x68] sm:$0xf] }
  0x1f   :  { %v265_v11 = vrot.slane %v263_v59, 4  ;;  %v266_v12 = vshll.u32 %v883_v4, 16  ;;  %v1099_v13 = vsel %vm1012_vm2, %v228_v1, %v232_v40  ;;  %v272_v22 = vshll.u32 %v40_v51, 16  ;;  %v1116_v40 = vld [vmem:[%s1712_s0 + $0x70] sm:$0xf] }
  0x20   :  { %v242_v16 = vrot.slane %v241_v62, 4  ;;  %v277_v27 = vshrl.u32 %v1080_v0, 16  ;;  %v734_v18 = vmax.bf16 %v1091_v60, %v1099_v13  ;;  %v255_v26 = vor.u32 %v254_v6, %v251_v63  ;;  %v1138_v63 = vld [vmem:[%s1712_s0 + $0x78] sm:$0xf] }
  0x21   :  { %v268_v33 = vrot.slane %v266_v12, 5  ;;  %v280_v39 = vshll.u32 %v1080_v0, 16  ;;  %v274_v45 = vrot.slane %v272_v22, 5  ;;  %v286_v49 = vshll.u32 %v42_v5, 16  ;;  %v48_v5 = vld [vmem:[%s1712_s0 + $0x7c] sm:$0x1] }
  0x22   :  { %v247_v43 = vsel %vm1012_vm2, %v242_v16, %v246_v57  ;;  %v279_v46 = vrot.slane %v277_v27, 4  ;;  %v256_v52 = vrot.slane %v255_v26, 4  ;;  %v291_v58 = vshrl.u32 %v1105_v34, 16  ;;  %v46_v57 = vld [vmem:[%s1712_s0 + $0x74] sm:$0x1] }
  0x23   :  { %v1123_v51 = vmax.bf16 %v464_v35, %v247_v43  ;;  %v269_v54 = vor.u32 %v268_v33, %v265_v11  ;;  %v282_v48 = vrot.slane %v280_v39, 5  ;;  %v288_v53 = vrot.slane %v286_v49, 5  ;;  %v1154_v16 = vld [vmem:[%s1712_s0 + $0x80] sm:$0xf]  ;;  %v50_v39 = vld [vmem:[%s1712_s0 + $0x84] sm:$0x1] }
  0x24   :  { %v294_v59 = vshll.u32 %v1105_v34, 16  ;;  %v300_v1 = vshll.u32 %v44_v17, 16  ;;  %v1132_v62 = vsel %vm1012_vm2, %v256_v52, %v260_v10  ;;  %v305_v35 = vshrl.u32 %v1116_v40, 16 }
  0x25   :  { %v270_v23 = vrot.slane %v269_v54, 4  ;;  %v283_v29 = vor.u32 %v282_v48, %v279_v46  ;;  %v1147_v6 = vmax.bf16 %v465_v36, %v1132_v62  ;;  %v293_v11 = vrot.slane %v291_v58, 4 }
  0x26   :  { %v296_v12 = vrot.slane %v294_v59, 5  ;;  %v302_v17 = vrot.slane %v300_v1, 5  ;;  %v307_v26 = vrot.slane %v305_v35, 4  ;;  %v308_v36 = vshll.u32 %v1116_v40, 16 }
  0x27   :  { %v1158_v22 = vsel %vm1012_vm2, %v270_v23, %v274_v45  ;;  %v284_v27 = vrot.slane %v283_v29, 4  ;;  %v314_v33 = vshll.u32 %v46_v57, 16  ;;  %v319_v45 = vshrl.u32 %v1138_v63, 16 }
  0x28   :  { %v297_v30 = vor.u32 %v296_v12, %v293_v11  ;;  %v322_v46 = vshll.u32 %v1138_v63, 16  ;;  %v328_v49 = vshll.u32 %v48_v5, 16  ;;  %v310_v54 = vrot.slane %v308_v36, 5 }
  0x29   :  { %v1168_v43 = vsel %vm1012_vm2, %v284_v27, %v288_v53  ;;  %v316_v48 = vrot.slane %v314_v33, 5  ;;  %v333_v58 = vshrl.u32 %v1154_v16, 16  ;;  %v321_v59 = vrot.slane %v319_v45, 4 }
  0x2a   :  { %v298_v52 = vrot.slane %v297_v30, 4  ;;  %v324_v1 = vrot.slane %v322_v46, 5  ;;  %v330_v57 = vrot.slane %v328_v49, 5  ;;  %v336_v23 = vshll.u32 %v1154_v16, 16 }
  0x2b   :  { %v311_v53 = vor.u32 %v310_v54, %v307_v26  ;;  %v335_v35 = vrot.slane %v333_v58, 4  ;;  %v342_v11 = vshll.u32 %v50_v39, 16  ;;  %v362_v5 = vmax.bf16 %v135_v31, %v942_v25 }
  0x2c   :  { %v1176_v29 = vsel %vm1012_vm2, %v298_v52, %v302_v17  ;;  %v325_v12 = vor.u32 %v324_v1, %v321_v59  ;;  %v338_v27 = vrot.slane %v336_v23, 5  ;;  %v363_v30 = vmax.bf16 %v1037_v41, %v955_v28  ;;  %v34_v23 = vld [vmem:[%s1712_s0 + $0x44] sm:$0x1] }
  0x2d   :  { %v312_v36 = vrot.slane %v311_v53, 4  ;;  %v344_v33 = vrot.slane %v342_v11, 5  ;;  %v364_v17 = vmax.bf16 %v1041_v42, %v973_v32  ;;  %v365_v26 = vmax.bf16 %v1052_v56, %v987_v37  ;;  %v51_v53 = vld [vmem:[%s1712_s0 + $0x88] sm:$0xf] }
  0x2e   :  { %v326_v39 = vrot.slane %v325_v12, 4  ;;  %v339_v45 = vor.u32 %v338_v27, %v335_v35  ;;  %v366_v46 = vmax.bf16 %v1065_v38, %v1001_v47  ;;  %v367_v50 = vmax.bf16 %v1070_v44, %v1020_v7 }
  0x2f   :  { %v1196_v25 = vsel %vm1012_vm2, %v312_v36, %v316_v48  ;;  %v369_v9 = vmax.bf16 %v1099_v13, %v878_v3  ;;  %v372_v31 = vmax.bf16 %v1158_v22, %v883_v4  ;;  %v373_v49 = vmax.bf16 %v1168_v43, %v1080_v0  ;;  %v33_v3 = vld [vmem:[%s1712_s0 + $0x40] sm:$0xf]  ;;  %v96_v13 = vld [vmem:[%s1714_s2 + $0x6c] sm:$0x1] }
  0x30   :  { %v1206_v52 = vsel %vm1012_vm2, %v326_v39, %v330_v57  ;;  %v340_v54 = vrot.slane %v339_v45, 4  ;;  %v374_v58 = vmax.bf16 %v1176_v29, %v1105_v34  ;;  %v375_v48 = vmax.bf16 %v1196_v25, %v1116_v40 }
  0x31   :  { %v376_v4 = vmax.bf16 %v1206_v52, %v1138_v63  ;;  %v378_v59 = vmax.bf16 %v362_v5, %v955_v28  ;;  %v379_v1 = vmax.bf16 %v363_v30, %v973_v32  ;;  %v380_v57 = vmax.bf16 %v364_v17, %v987_v37  ;;  %v52_v37 = vld [vmem:[%s1712_s0 + $0x8c] sm:$0x1] }
  0x32   :  { %v1228_v35 = vsel %vm1012_vm2, %v340_v54, %v344_v33  ;;  %v381_v11 = vmax.bf16 %v365_v26, %v1001_v47  ;;  %v382_v28 = vmax.bf16 %v366_v46, %v1020_v7  ;;  %v383_v32 = vmax.bf16 %v367_v50, %v873_v2 }
  0x33   :  { %v377_v12 = vmax.bf16 %v1228_v35, %v1154_v16  ;;  %v385_v27 = vmax.bf16 %v369_v9, %v33_v3  ;;  %v388_v5 = vmax.bf16 %v372_v31, %v1080_v0  ;;  %v389_v30 = vmax.bf16 %v373_v49, %v1105_v34 }
  0x34   :  { %v390_v36 = vmax.bf16 %v374_v58, %v1116_v40  ;;  %v391_v47 = vmax.bf16 %v375_v48, %v1138_v63  ;;  %v392_v7 = vmax.bf16 %v376_v4, %v1154_v16  ;;  %v395_v33 = vshrl.u32 %v33_v3, 16  ;;  %v53_v40 = vld [vmem:[%s1713_s1] sm:$0xf]  ;;  %v54_v63 = vld [vmem:[%s1713_s1 + $0x8] sm:$0xf] }
  0x35   :  { %v393_v2 = vmax.bf16 %v377_v12, %v51_v53  ;;  %v398_v17 = vshll.u32 %v33_v3, 16  ;;  %v404_v26 = vshll.u32 %v34_v23, 16  ;;  %v409_v39 = vshrl.u32 %v51_v53, 16  ;;  %v1266_v3 = vld [vmem:[%s1713_s1 + $0x20] sm:$0xf] }
  0x36   :  { %v397_v45 = vrot.slane %v395_v33, 4  ;;  %v412_v46 = vshll.u32 %v51_v53, 16  ;;  %v418_v50 = vshll.u32 %v52_v37, 16  ;;  %v424_v9 = vmax.bf16 %v378_v59, %v1037_v41  ;;  %v1256_v41 = vld [vmem:[%s1713_s1 + $0x10] sm:$0xf] }
  0x37   :  { %v400_v54 = vrot.slane %v398_v17, 5  ;;  %v406_v0 = vrot.slane %v404_v26, 5  ;;  %v411_v31 = vrot.slane %v409_v39, 4  ;;  %v425_v34 = vmax.bf16 %v379_v1, %v1041_v42  ;;  %v1261_v42 = vld [vmem:[%s1713_s1 + $0x18] sm:$0xf] }
  0x38   :  { %v414_v16 = vrot.slane %v412_v46, 5  ;;  %v420_v49 = vrot.slane %v418_v50, 5  ;;  %v426_v58 = vmax.bf16 %v380_v57, %v1052_v56  ;;  %v427_v48 = vmax.bf16 %v381_v11, %v1065_v38  ;;  %v1274_v1 = vld [vmem:[%s1713_s1 + $0x28] sm:$0xf]  ;;  %v1279_v57 = vld [vmem:[%s1713_s1 + $0x60] sm:$0xf] }
  0x39   :  { %v401_v4 = vor.u32 %v400_v54, %v397_v45  ;;  %v428_v56 = vmax.bf16 %v382_v28, %v1070_v44  ;;  %v429_v38 = vmax.bf16 %v383_v32, %v1084_v55  ;;  %v434_v59 = vmax.bf16 %v388_v5, %v1168_v43  ;;  %v1287_v55 = vld [vmem:[%s1713_s1 + $0x68] sm:$0xf]  ;;  %v1292_v43 = vld [vmem:[%s1713_s1 + $0x70] sm:$0xf]  ;;  %v69_v33 = vld [vmem:[%s1713_s1 + $0x80] sm:$0xf] }
  0x3a   :  { %v415_v23 = vor.u32 %v414_v16, %v411_v31  ;;  %v435_v53 = vmax.bf16 %v389_v30, %v1176_v29  ;;  %v436_v11 = vmax.bf16 %v390_v36, %v1196_v25  ;;  %v437_v44 = vmax.bf16 %v391_v47, %v1206_v52  ;;  %v68_v29 = vld [vmem:[%s1713_s1 + $0x78] sm:$0xf]  ;;  %v61_v46 = vld [vmem:[%s1713_s1 + $0x40] sm:$0xf] }
  0x3b   :  { %v402_v28 = vrot.slane %v401_v4, 4  ;;  %v438_v32 = vmax.bf16 %v392_v7, %v1228_v35  ;;  %v440_v37 = vmax.bf16 %v424_v9, %v53_v40  ;;  %v441_v12 = vmax.bf16 %v425_v34, %v54_v63 }
  0x3c   :  { %v416_v25 = vrot.slane %v415_v23, 4  ;;  %v442_v52 = vmax.bf16 %v426_v58, %v1256_v41  ;;  %v443_v5 = vmax.bf16 %v427_v48, %v1261_v42  ;;  %v444_v30 = vmax.bf16 %v428_v56, %v1266_v3  ;;  %v72_v48 = vld [vmem:[%s1714_s2 + $0x4] sm:$0x1]  ;;  %v1370_v23 = vld [vmem:[%s1714_s2 + $0x58] sm:$0xf] }
  0x3d   :  { %v407_v36 = vsel %vm1012_vm2, %v402_v28, %v406_v0  ;;  %v445_v47 = vmax.bf16 %v429_v38, %v1274_v1  ;;  %v450_v35 = vmax.bf16 %v434_v59, %v911_v15  ;;  %v451_v7 = vmax.bf16 %v435_v53, %v1279_v57  ;;  %v70_v0 = vld [vmem:[%s1713_s1 + $0x88] sm:$0xf] }
  0x3e   :  { %v421_v17 = vsel %vm1012_vm2, %v416_v25, %v420_v49  ;;  %v431_v26 = vmax.bf16 %v407_v36, %v385_v27  ;;  %v452_v39 = vmax.bf16 %v436_v11, %v1287_v55  ;;  %v453_v45 = vmax.bf16 %v437_v44, %v1292_v43  ;;  %v1388_v28 = vld [vmem:[%s1714_s2 + $0x68] sm:$0xf] }
  0x3f   :  { %v439_v50 = vmax.bf16 %v421_v17, %v393_v2  ;;  %v454_v15 = vmax.bf16 %v438_v32, %v68_v29  ;;  %v1316_v9 = vmax.bf16 %v440_v37, %v54_v63  ;;  %v457_v54 = vmax.bf16 %v441_v12, %v1256_v41  ;;  %v1329_v2 = vld [vmem:[%s1714_s2] sm:$0xf]  ;;  %v73_v63 = vld [vmem:[%s1714_s2 + $0x8] sm:$0xf]  ;;  %v74_v41 = vld [vmem:[%s1714_s2 + $0xc] sm:$0x1] }
  0x40   :  { %v447_v27 = vmax.bf16 %v431_v26, %v906_v14  ;;  %v458_v31 = vmax.bf16 %v442_v52, %v1261_v42  ;;  %v459_v34 = vmax.bf16 %v443_v5, %v1266_v3  ;;  %v460_v40 = vmax.bf16 %v444_v30, %v1274_v1  ;;  %v75_v42 = vld [vmem:[%s1714_s2 + $0x10] sm:$0xf]  ;;  %v1352_v3 = vld [vmem:[%s1714_s2 + $0x20] sm:$0xf]  ;;  %v1360_v1 = vld [vmem:[%s1714_s2 + $0x28] sm:$0xf] }
  0x41   :  { %v455_v16 = vmax.bf16 %v439_v50, %v69_v33  ;;  %v461_v49 = vmax.bf16 %v445_v47, %v894_v8  ;;  %v466_v14 = vmax.bf16 %v450_v35, %v1279_v57  ;;  %v467_v58 = vmax.bf16 %v451_v7, %v1287_v55  ;;  %v77_v8 = vld [vmem:[%s1714_s2 + $0x18] sm:$0xf]  ;;  %v1393_v32 = vld [vmem:[%s1714_s2 + $0x70] sm:$0xf]  ;;  %v1413_v5 = vld [vmem:[%s1714_s2 + $0x80] sm:$0xf] }
  0x42   :  { %v1354_v4 = vmax.bf16 %v447_v27, %v61_v46  ;;  %v468_v56 = vmax.bf16 %v452_v39, %v1292_v43  ;;  %v469_v38 = vmax.bf16 %v453_v45, %v68_v29  ;;  %v470_v59 = vmax.bf16 %v454_v15, %v69_v33  ;;  %v1365_v57 = vld [vmem:[%s1714_s2 + $0x38] sm:$0xf]  ;;  %v1383_v43 = vld [vmem:[%s1714_s2 + $0x60] sm:$0xf]  ;;  %v76_v39 = vld [vmem:[%s1714_s2 + $0x14] sm:$0x1] }
  0x43   :  { %v1372_v53 = vmax.bf16 %v455_v16, %v70_v0  ;;  %v1376_v44 = vmax.bf16 %v457_v54, %v73_v63  ;;  %v1378_v55 = vmax.bf16 %v458_v31, %v75_v42  ;;  %v1395_v37 = vmax.bf16 %v459_v34, %v77_v8  ;;  %v1408_v52 = vld [vmem:[%s1714_s2 + $0x78] sm:$0xf]  ;;  %v78_v54 = vld [vmem:[%s1714_s2 + $0x1c] sm:$0x1] }
  0x44   :  { %v1398_v12 = vmax.bf16 %v460_v40, %v1352_v3  ;;  %v1401_v29 = vmax.bf16 %v461_v49, %v1360_v1  ;;  %v1416_v30 = vmax.bf16 %v466_v14, %v1370_v23  ;;  %v1419_v36 = vmax.bf16 %v467_v58, %v1383_v43 }
  0x45   :  { %v1422_v47 = vmax.bf16 %v468_v56, %v1388_v28  ;;  %v1425_v35 = vmax.bf16 %v469_v38, %v1393_v32  ;;  %v1428_v7 = vmax.bf16 %v470_v59, %v1408_v52  ;;  %v489_v17 = vshrl.u32 %v1329_v2, 16 }
  0x46   :  { %v492_v26 = vshll.u32 %v1329_v2, 16  ;;  %v498_v45 = vshll.u32 %v72_v48, 16  ;;  %v503_v46 = vshrl.u32 %v73_v63, 16  ;;  %v506_v50 = vshll.u32 %v73_v63, 16 }
  0x47   :  { %v512_v15 = vshll.u32 %v74_v41, 16  ;;  %v491_v0 = vrot.slane %v489_v17, 4  ;;  %v517_v31 = vshrl.u32 %v75_v42, 16  ;;  %v520_v34 = vshll.u32 %v75_v42, 16  ;;  %v80_v17 = vld [vmem:[%s1714_s2 + $0x24] sm:$0x1] }
  0x48   :  { %v494_v27 = vrot.slane %v492_v26, 5  ;;  %v1440_v40 = vrot.slane %v498_v45, 5  ;;  %v505_v16 = vrot.slane %v503_v46, 4  ;;  %v508_v49 = vrot.slane %v506_v50, 5  ;;  %v82_v50 = vld [vmem:[%s1714_s2 + $0x2c] sm:$0x1] }
  0x49   :  { %v1442_v14 = vrot.slane %v512_v15, 5  ;;  %v519_v56 = vrot.slane %v517_v31, 4  ;;  %v522_v48 = vrot.slane %v520_v34, 5  ;;  %v526_v38 = vshll.u32 %v76_v39, 16 }
  0x4a   :  { %v495_v58 = vor.u32 %v494_v27, %v491_v0  ;;  %v509_v63 = vor.u32 %v508_v49, %v505_v16  ;;  %v531_v41 = vshrl.u32 %v77_v8, 16  ;;  %v534_v59 = vshll.u32 %v77_v8, 16 }
  0x4b   :  { %v540_v33 = vshll.u32 %v78_v54, 16  ;;  %v523_v42 = vor.u32 %v522_v48, %v519_v56  ;;  %v1449_v45 = vrot.slane %v526_v38, 5  ;;  %v545_v46 = vshrl.u32 %v1352_v3, 16  ;;  %v84_v56 = vld [vmem:[%s1714_s2 + $0x34] sm:$0x1] }
  0x4c   :  { %v1447_v26 = vrot.slane %v495_v58, 4  ;;  %v1455_v39 = vrot.slane %v509_v63, 4  ;;  %v533_v15 = vrot.slane %v531_v41, 4  ;;  %v536_v8 = vrot.slane %v534_v59, 5 }
  0x4d   :  { %v1457_v54 = vrot.slane %v540_v33, 5  ;;  %v1463_v27 = vrot.slane %v523_v42, 4  ;;  %v547_v31 = vrot.slane %v545_v46, 4  ;;  %v548_v34 = vshll.u32 %v1352_v3, 16  ;;  %v86_v46 = vld [vmem:[%s1714_s2 + $0x3c] sm:$0x1] }
  0x4e   :  { %v537_v49 = vor.u32 %v536_v8, %v533_v15  ;;  %v554_v58 = vshll.u32 %v80_v17, 16  ;;  %v559_v33 = vshrl.u32 %v1360_v1, 16  ;;  %v562_v3 = vshll.u32 %v1360_v1, 16 }
  0x4f   :  { %v550_v38 = vrot.slane %v548_v34, 5  ;;  %v568_v63 = vshll.u32 %v82_v50, 16  ;;  %v573_v42 = vshrl.u32 %v918_v19, 16  ;;  %v576_v34 = vshll.u32 %v918_v19, 16 }
  0x50   :  { %v1479_v41 = vrot.slane %v537_v49, 4  ;;  %v1481_v59 = vrot.slane %v554_v58, 5  ;;  %v561_v17 = vrot.slane %v559_v33, 4  ;;  %v564_v8 = vrot.slane %v562_v3, 5  ;;  %v88_v33 = vld [vmem:[%s1714_s2 + $0x4c] sm:$0x1] }
  0x51   :  { %v551_v15 = vor.u32 %v550_v38, %v547_v31  ;;  %v1487_v25 = vrot.slane %v568_v63, 5  ;;  %v575_v50 = vrot.slane %v573_v42, 4  ;;  %v582_v49 = vshll.u32 %v84_v56, 16  ;;  %v90_v56 = vld [vmem:[%s1714_s2 + $0x54] sm:$0x1] }
  0x52   :  { %v587_v58 = vshrl.u32 %v1365_v57, 16  ;;  %v565_v31 = vor.u32 %v564_v8, %v561_v17  ;;  %v578_v38 = vrot.slane %v576_v34, 5  ;;  %v590_v3 = vshll.u32 %v1365_v57, 16 }
  0x53   :  { %v1498_v48 = vrot.slane %v551_v15, 4  ;;  %v584_v19 = vrot.slane %v582_v49, 5  ;;  %v596_v16 = vshll.u32 %v86_v46, 16  ;;  %v601_v0 = vshrl.u32 %v923_v20, 16 }
  0x54   :  { %v589_v63 = vrot.slane %v587_v58, 4  ;;  %v1509_v15 = vrot.slane %v565_v31, 4  ;;  %v579_v17 = vor.u32 %v578_v38, %v575_v50  ;;  %v592_v8 = vrot.slane %v590_v3, 5  ;;  %v92_v50 = vld [vmem:[%s1714_s2 + $0x5c] sm:$0x1] }
  0x55   :  { %v1511_v34 = vrot.slane %v596_v16, 5  ;;  %v603_v49 = vrot.slane %v601_v0, 4  ;;  %v604_v46 = vshll.u32 %v923_v20, 16  ;;  %v610_v58 = vshll.u32 %v88_v33, 16 }
  0x56   :  { %v580_v11 = vrot.slane %v579_v17, 4  ;;  %v593_v24 = vor.u32 %v592_v8, %v589_v63  ;;  %v615_v10 = vshrl.u32 %v928_v21, 16  ;;  %v618_v0 = vshll.u32 %v928_v21, 16  ;;  %v94_v63 = vld [vmem:[%s1714_s2 + $0x64] sm:$0x1] }
  0x57   :  { %v606_v31 = vrot.slane %v604_v46, 5  ;;  %v612_v16 = vrot.slane %v610_v58, 5  ;;  %v624_v38 = vshll.u32 %v90_v56, 16  ;;  %v629_v17 = vshrl.u32 %v1370_v23, 16 }
  0x58   :  { %v585_v20 = vsel %vm1012_vm2, %v580_v11, %v584_v19  ;;  %v1525_v33 = vrot.slane %v593_v24, 4  ;;  %v617_v3 = vrot.slane %v615_v10, 4  ;;  %v620_v21 = vrot.slane %v618_v0, 5 }
  0x59   :  { %v1534_v8 = vmax.bf16 %v734_v18, %v585_v20  ;;  %v607_v46 = vor.u32 %v606_v31, %v603_v49  ;;  %v626_v56 = vrot.slane %v624_v38, 5  ;;  %v631_v10 = vrot.slane %v629_v17, 4 }
  0x5a   :  { %v599_v24 = vsel %vm1012_vm2, %v1525_v33, %v1511_v34  ;;  %v632_v11 = vshll.u32 %v1370_v23, 16  ;;  %v638_v19 = vshll.u32 %v92_v50, 16  ;;  %v621_v1 = vor.u32 %v620_v21, %v617_v3 }
  0x5b   :  { %v608_v58 = vrot.slane %v607_v46, 4  ;;  %v643_v42 = vshrl.u32 %v1383_v43, 16  ;;  %v646_v60 = vshll.u32 %v1383_v43, 16  ;;  %v652_v31 = vshll.u32 %v94_v63, 16  ;;  %v98_v43 = vld [vmem:[%s1714_s2 + $0x74] sm:$0x1] }
  0x5c   :  { %v634_v18 = vrot.slane %v632_v11, 5  ;;  %v1546_v49 = vrot.slane %v638_v19, 5  ;;  %v657_v0 = vshrl.u32 %v1388_v28, 16  ;;  %v622_v50 = vrot.slane %v621_v1, 4 }
  0x5d   :  { %v613_v23 = vsel %vm1012_vm2, %v608_v58, %v612_v16  ;;  %v645_v38 = vrot.slane %v643_v42, 4  ;;  %v648_v20 = vrot.slane %v646_v60, 5  ;;  %v1719_v3 = vmax.bf16 %v1123_v51, %v1132_v62 }
  0x5e   :  { %v635_v46 = vor.u32 %v634_v18, %v631_v10  ;;  %v654_v21 = vrot.slane %v652_v31, 5  ;;  %v659_v63 = vrot.slane %v657_v0, 4  ;;  %v627_v11 = vsel %vm1012_vm2, %v622_v50, %v626_v56  ;;  %v100_v10 = vld [vmem:[%s1714_s2 + $0x7c] sm:$0x1] }
  0x5f   :  { %v1557_v17 = vmax.bf16 %v1719_v3, %v613_v23  ;;  %v649_v19 = vor.u32 %v648_v20, %v645_v38  ;;  %v660_v1 = vshll.u32 %v1388_v28, 16  ;;  %v666_v42 = vshll.u32 %v96_v13, 16  ;;  %v102_v28 = vld [vmem:[%s1714_s2 + $0x84] sm:$0x1] }
  0x60   :  { %v1720_v16 = vmax.bf16 %v1147_v6, %v1158_v22  ;;  %v636_v60 = vrot.slane %v635_v46, 4  ;;  %v671_v51 = vshrl.u32 %v1393_v32, 16  ;;  %v674_v62 = vshll.u32 %v1393_v32, 16 }
  0x61   :  { %v650_v18 = vrot.slane %v649_v19, 4  ;;  %v662_v56 = vrot.slane %v660_v1, 5  ;;  %v668_v31 = vrot.slane %v666_v42, 5  ;;  %v680_v0 = vshll.u32 %v98_v43, 16 }
  0x62   :  { %v1565_v58 = vmax.bf16 %v1720_v16, %v627_v11  ;;  %v641_v6 = vsel %vm1012_vm2, %v636_v60, %v1546_v49  ;;  %v673_v22 = vrot.slane %v671_v51, 4  ;;  %v676_v13 = vrot.slane %v674_v62, 5 }
  0x63   :  { %v685_v32 = vshrl.u32 %v1408_v52, 16  ;;  %v655_v23 = vsel %vm1012_vm2, %v650_v18, %v654_v21  ;;  %v663_v50 = vor.u32 %v662_v56, %v659_v63  ;;  %v682_v38 = vrot.slane %v680_v0, 5  ;;  %v103_v0 = vld [vmem:[%s1715_s3] sm:$0xf] }
  0x64   :  { %v688_v20 = vshll.u32 %v1408_v52, 16  ;;  %v677_v43 = vor.u32 %v676_v13, %v673_v22  ;;  %v694_v46 = vshll.u32 %v100_v10, 16  ;;  %v699_v11 = vshrl.u32 %v1413_v5, 16 }
  0x65   :  { %v687_v3 = vrot.slane %v685_v32, 4  ;;  %v664_v19 = vrot.slane %v663_v50, 4  ;;  %v702_v49 = vshll.u32 %v1413_v5, 16  ;;  %v708_v42 = vshll.u32 %v102_v28, 16  ;;  %v106_v50 = vld [vmem:[%s1715_s3 + $0x18] sm:$0xf] }
  0x66   :  { %v690_v1 = vrot.slane %v688_v20, 5  ;;  %v678_v16 = vrot.slane %v677_v43, 4  ;;  %v696_v60 = vrot.slane %v694_v46, 5  ;;  %v701_v51 = vrot.slane %v699_v11, 4  ;;  %v118_v43 = vld [vmem:[%s1715_s3 + $0x80] sm:$0xf] }
  0x67   :  { %v1721_v21 = vmax.bf16 %v1316_v9, %v1329_v2  ;;  %v1722_v52 = vsel %vm1012_vm2, %v1447_v26, %v1440_v40  ;;  %v669_v62 = vsel %vm1012_vm2, %v664_v19, %v668_v31  ;;  %v704_v18 = vrot.slane %v702_v49, 5  ;;  %v104_v9 = vld [vmem:[%s1715_s3 + $0x8] sm:$0xf]  ;;  %v105_v2 = vld [vmem:[%s1715_s3 + $0x10] sm:$0xf] }
  0x68   :  { %v691_v10 = vor.u32 %v690_v1, %v687_v3  ;;  %v710_v56 = vrot.slane %v708_v42, 5  ;;  %v683_v40 = vsel %vm1012_vm2, %v678_v16, %v682_v38  ;;  %v1723_v26 = vsel %vm1012_vm2, %v1455_v39, %v1442_v14  ;;  %v114_v38 = vld [vmem:[%s1715_s3 + $0x60] sm:$0xf] }
  0x69   :  { %v728_v63 = vmax.bf16 %v1722_v52, %v1721_v21  ;;  %v729_v31 = vmax.bf16 %v1723_v26, %v1376_v44  ;;  %v1724_v28 = vsel %vm1012_vm2, %v1463_v27, %v1449_v45  ;;  %v1725_v13 = vsel %vm1012_vm2, %v1479_v41, %v1457_v54  ;;  %v107_v44 = vld [vmem:[%s1715_s3 + $0x20] sm:$0xf]  ;;  %v108_v27 = vld [vmem:[%s1715_s3 + $0x28] sm:$0xf]  ;;  %v110_v41 = vld [vmem:[%s1715_s3 + $0x38] sm:$0xf] }
  0x6a   :  { %v730_v22 = vmax.bf16 %v1724_v28, %v1378_v55  ;;  %v731_v32 = vmax.bf16 %v1725_v13, %v1395_v37  ;;  %v692_v14 = vrot.slane %v691_v10, 4  ;;  %v705_v39 = vor.u32 %v704_v18, %v701_v51 }
  0x6b   :  { %v1726_v55 = vsel %vm1012_vm2, %v1498_v48, %v1481_v59  ;;  %v1727_v37 = vsel %vm1012_vm2, %v1509_v15, %v1487_v25  ;;  %v113_v48 = vld [vmem:[%s1715_s3 + $0x58] sm:$0xf]  ;;  %v738_v25 = vmax.bf16 %v641_v6, %v1416_v30  ;;  %v739_v59 = vmax.bf16 %v655_v23, %v1419_v36  ;;  %v116_v30 = vld [vmem:[%s1715_s3 + $0x70] sm:$0xf] }
  0x6c   :  { %v732_v45 = vmax.bf16 %v1726_v55, %v1398_v12  ;;  %v733_v54 = vmax.bf16 %v1727_v37, %v1401_v29  ;;  %v1728_v12 = vmax.bf16 %v1354_v4, %v1365_v57  ;;  %v740_v15 = vmax.bf16 %v669_v62, %v1422_v47  ;;  %v115_v4 = vld [vmem:[%s1715_s3 + $0x68] sm:$0xf]  ;;  %v117_v36 = vld [vmem:[%s1715_s3 + $0x78] sm:$0xf] }
  0x6d   :  { %v697_v57 = vsel %vm1012_vm2, %v692_v14, %v696_v60  ;;  %v706_v20 = vrot.slane %v705_v39, 4  ;;  %v741_v34 = vmax.bf16 %v683_v40, %v1425_v35  ;;  %v744_v33 = vmax.bf16 %v728_v63, %v103_v0 }
  0x6e   :  { %v735_v29 = vmax.bf16 %v599_v24, %v1728_v12  ;;  %v742_v47 = vmax.bf16 %v697_v57, %v1428_v7  ;;  %v745_v24 = vmax.bf16 %v729_v31, %v104_v9  ;;  %v746_v6 = vmax.bf16 %v730_v22, %v105_v2 }
  0x6f   :  { %v747_v23 = vmax.bf16 %v731_v32, %v106_v50  ;;  %v711_v35 = vsel %vm1012_vm2, %v706_v20, %v710_v56  ;;  %v748_v3 = vmax.bf16 %v732_v45, %v107_v44  ;;  %v749_v46 = vmax.bf16 %v733_v54, %v108_v27 }
  0x70   :  { %v751_v11 = vmax.bf16 %v735_v29, %v110_v41  ;;  %v1729_v19 = vmax.bf16 %v1372_v53, %v1413_v5  ;;  %v754_v49 = vmax.bf16 %v738_v25, %v113_v48  ;;  %v755_v42 = vmax.bf16 %v739_v59, %v114_v38 }
  0x71   :  { %v756_v7 = vmax.bf16 %v740_v15, %v115_v4  ;;  %v757_v16 = vmax.bf16 %v741_v34, %v116_v30  ;;  %v758_v60 = vmax.bf16 %v742_v47, %v117_v36  ;;  %v820_v51 = vcombine.low %v744_v33, %v745_v24 }
  0x72   :  { %v743_v1 = vmax.bf16 %v711_v35, %v1729_v19  ;;  %v821_v21 = vcombine.low %v746_v6, %v747_v23  ;;  %v823_v63 = vcombine.low %v748_v3, %v749_v46  ;;  %v825_v62 = vcombine.low %v1534_v8, %v751_v11 }
  0x73   :  { %v827_v61 = vcombine.low %v1557_v17, %v1565_v58  ;;  %784 = vst [vmem:[%s1716_s4] sm:$0xff] %v820_v51   ;;  %v829_v53 = vcombine.low %v754_v49, %v755_v42  ;;  %v831_v5 = vcombine.low %v756_v7, %v757_v16 }
  0x74   :  { %v759_v52 = vmax.bf16 %v743_v1, %v118_v43  ;;  %822 = vst [vmem:[%s1716_s4 + $0x8] sm:$0xff] %v821_v21   ;;  %824 = vst [vmem:[%s1716_s4 + $0x10] sm:$0xff] %v823_v63  }
  0x75   :  { %826 = vst [vmem:[%s1716_s4 + $0x18] sm:$0xff] %v825_v62   ;;  %828 = vst [vmem:[%s1716_s4 + $0x20] sm:$0xff] %v827_v61  }
  0x76   :  { %v833_v8 = vcombine.low %v758_v60, %v759_v52  ;;  %830 = vst [vmem:[%s1716_s4 + $0x28] sm:$0xff] %v829_v53   ;;  %832 = vst [vmem:[%s1716_s4 + $0x30] sm:$0xff] %v831_v5  }
  0x78   :  { %834 = vst [vmem:[%s1716_s4 + $0x38] sm:$0xff] %v833_v8  }

// kernel: new_model_forward.22
= control target key start
LH: loop header
LB: loop body
LE: loop exit
PB: predicated region body
PF: predicated region fallthrough
CT: control target
= control target key end

     0   :  { %s2406_s15 = smov 0   ;;  %s2408_s16 = smov 0   ;;  %s2812_s0 = inlined_call_operand.vmem [shape: bf16[49,512,3], index: 0, kind: input, shape index: {}]   ;;  %s2813_s1 = inlined_call_operand.vmem [shape: bf16[49,3,128], index: 1, kind: input, shape index: {}]   ;;  %s2814_s2 = inlined_call_operand.vmem [shape: f32[1,128], index: 2, kind: input, shape index: {}]   ;;  %s2815_s3 = inlined_call_operand.vmem [shape: f32[1,128], index: 3, kind: input, shape index: {}]   ;;  %s2816_s4 = inlined_call_operand.vmem [shape: bf16[512,128], index: 4, kind: output, shape index: {}]  }
   0x1   :  { %s2410_s17 = smov 0  }
   0x2 LB: > { %s23_s18 = sadd.s32 1, %s2373_s16  ;;  %p1800_p0 = scmp.ge.s32.totalorder %s2377_s17, 1  ;;  %s2377_s17 = sphi %s2410_s17, %s14_s17   ;;  %s2373_s16 = sphi %s2408_s16, %s2818_s16   ;;  %s2369_s15 = sphi %s2406_s15, %s2817_s15  }
   0x3   : > { %p24_p1 = scmp.ge.s32.totalorder %s23_s18, 49  ;;  %p190_p2 = scmp.lt.s32.totalorder %s2377_s17, 50 }
   0x5   : > { %s2820_s18 = smov (%p24_p1, %s23_s18), 0  ;;  %p191_p3 = pnand %p1800_p0, %p190_p2 }
   0x6   : > { %p225_p4 = scmp.lt.s32.totalorder (!%p191_p3), %s2369_s15, 48  ;;  %p1804_p5 = scmp.ne.s32.totalorder (!%p191_p3), %s2369_s15, 0 }
   0x7   : > { %194 = sbr.rel (%p191_p3) target bundleno = 383 (0x17f), region = 36 }
   0xe   : > { %s226_s19 = scalar_select %p225_p4, %s2369_s15, 48 }
   0xf   : > { %248 = sbr.rel (%p1804_p5) target bundleno = 48 (0x30), region = 40  ;;  %v2379_v0 = vmov (!%p1804_p5), 0.0  }
  0x10   : > { %s1940_s20 = sshll.u32 %s226_s19, 8  ;;  %s1803_s21 = sshll.u32 %s226_s19, 1  ;;  %249 = vst [vmem:[#allocation2] sm:$0xff] (!%p1804_p5), %v2379_v0  ;;  %250 = vst [vmem:[#allocation2 + $0x8] sm:$0xff] (!%p1804_p5), %v2379_v0 }
  0x11   : > { %s2431_s24 = scalar_lea.vmem %s2812_s0, %s1940_s20  ;;  %s2436_s27 = scalar_lea.vmem %s2813_s1, %s1803_s21  ;;  %251 = vst [vmem:[#allocation2 + $0x10] sm:$0xff] (!%p1804_p5), %v2379_v0  ;;  %252 = vst [vmem:[#allocation2 + $0x18] sm:$0xff] (!%p1804_p5), %v2379_v0 }
  0x12   : > { %253 = vst [vmem:[#allocation2 + $0x20] sm:$0xff] (!%p1804_p5), %v2379_v0  ;;  %254 = vst [vmem:[#allocation2 + $0x28] sm:$0xff] (!%p1804_p5), %v2379_v0 }
  0x13   : > { %255 = vst [vmem:[#allocation2 + $0x30] sm:$0xff] (!%p1804_p5), %v2379_v0  ;;  %256 = vst [vmem:[#allocation2 + $0x38] sm:$0xff] (!%p1804_p5), %v2379_v0 }
  0x14   : > { %257 = vst [vmem:[#allocation2 + $0x40] sm:$0xff] (!%p1804_p5), %v2379_v0  ;;  %258 = vst [vmem:[#allocation2 + $0x48] sm:$0xff] (!%p1804_p5), %v2379_v0 }
  0x15   : > { %259 = vst [vmem:[#allocation2 + $0x50] sm:$0xff] (!%p1804_p5), %v2379_v0  ;;  %260 = vst [vmem:[#allocation2 + $0x58] sm:$0xff] (!%p1804_p5), %v2379_v0 }
  0x16   : > { %261 = vst [vmem:[#allocation2 + $0x60] sm:$0xff] %v2379_v0  ;;  %262 = vst [vmem:[#allocation2 + $0x68] sm:$0xff] %v2379_v0 }
  0x17   : > { %263 = vst [vmem:[#allocation2 + $0x70] sm:$0xff] %v2379_v0  ;;  %264 = vst [vmem:[#allocation2 + $0x78] sm:$0xff] %v2379_v0 }
  0x18   : > { %265 = vst [vmem:[#allocation2 + $0x80] sm:$0xff] %v2379_v0  ;;  %266 = vst [vmem:[#allocation2 + $0x88] sm:$0xff] %v2379_v0 }
  0x19   : > { %267 = vst [vmem:[#allocation2 + $0x90] sm:$0xff] %v2379_v0  ;;  %268 = vst [vmem:[#allocation2 + $0x98] sm:$0xff] %v2379_v0 }
  0x1a   : > { %269 = vst [vmem:[#allocation2 + $0xa0] sm:$0xff] %v2379_v0  ;;  %270 = vst [vmem:[#allocation2 + $0xa8] sm:$0xff] %v2379_v0 }
  0x1b   : > { %271 = vst [vmem:[#allocation2 + $0xb0] sm:$0xff] %v2379_v0  ;;  %272 = vst [vmem:[#allocation2 + $0xb8] sm:$0xff] %v2379_v0 }
  0x1c   : > { %273 = vst [vmem:[#allocation2 + $0xc0] sm:$0xff] %v2379_v0  ;;  %274 = vst [vmem:[#allocation2 + $0xc8] sm:$0xff] %v2379_v0 }
  0x1d   : > { %275 = vst [vmem:[#allocation2 + $0xd0] sm:$0xff] %v2379_v0  ;;  %276 = vst [vmem:[#allocation2 + $0xd8] sm:$0xff] %v2379_v0 }
  0x1e   : > { %277 = vst [vmem:[#allocation2 + $0xe0] sm:$0xff] %v2379_v0  ;;  %278 = vst [vmem:[#allocation2 + $0xe8] sm:$0xff] %v2379_v0 }
  0x1f   : > { %279 = vst [vmem:[#allocation2 + $0xf0] sm:$0xff] %v2379_v0  ;;  %280 = vst [vmem:[#allocation2 + $0xf8] sm:$0xff] %v2379_v0 }
  0x20   : > { %281 = vst [vmem:[#allocation2 + $0x100] sm:$0xff] %v2379_v0  ;;  %282 = vst [vmem:[#allocation2 + $0x108] sm:$0xff] %v2379_v0 }
  0x21   : > { %283 = vst [vmem:[#allocation2 + $0x110] sm:$0xff] %v2379_v0  ;;  %284 = vst [vmem:[#allocation2 + $0x118] sm:$0xff] %v2379_v0 }
  0x22   : > { %285 = vst [vmem:[#allocation2 + $0x120] sm:$0xff] %v2379_v0  ;;  %286 = vst [vmem:[#allocation2 + $0x128] sm:$0xff] %v2379_v0 }
  0x23   : > { %287 = vst [vmem:[#allocation2 + $0x130] sm:$0xff] %v2379_v0  ;;  %288 = vst [vmem:[#allocation2 + $0x138] sm:$0xff] %v2379_v0 }
  0x24   : > { %289 = vst [vmem:[#allocation2 + $0x140] sm:$0xff] %v2379_v0  ;;  %290 = vst [vmem:[#allocation2 + $0x148] sm:$0xff] %v2379_v0 }
  0x25   : > { %291 = vst [vmem:[#allocation2 + $0x150] sm:$0xff] %v2379_v0  ;;  %292 = vst [vmem:[#allocation2 + $0x158] sm:$0xff] %v2379_v0 }
  0x26   : > { %293 = vst [vmem:[#allocation2 + $0x160] sm:$0xff] %v2379_v0  ;;  %294 = vst [vmem:[#allocation2 + $0x168] sm:$0xff] %v2379_v0 }
  0x27   : > { %295 = vst [vmem:[#allocation2 + $0x170] sm:$0xff] %v2379_v0  ;;  %296 = vst [vmem:[#allocation2 + $0x178] sm:$0xff] %v2379_v0 }
  0x28   : > { %297 = vst [vmem:[#allocation2 + $0x180] sm:$0xff] %v2379_v0  ;;  %298 = vst [vmem:[#allocation2 + $0x188] sm:$0xff] %v2379_v0 }
  0x29   : > { %299 = vst [vmem:[#allocation2 + $0x190] sm:$0xff] %v2379_v0  ;;  %300 = vst [vmem:[#allocation2 + $0x198] sm:$0xff] %v2379_v0 }
  0x2a   : > { %301 = vst [vmem:[#allocation2 + $0x1a0] sm:$0xff] %v2379_v0  ;;  %302 = vst [vmem:[#allocation2 + $0x1a8] sm:$0xff] %v2379_v0 }
  0x2b   : > { %303 = vst [vmem:[#allocation2 + $0x1b0] sm:$0xff] %v2379_v0  ;;  %304 = vst [vmem:[#allocation2 + $0x1b8] sm:$0xff] %v2379_v0 }
  0x2c   : > { %305 = vst [vmem:[#allocation2 + $0x1c0] sm:$0xff] %v2379_v0  ;;  %306 = vst [vmem:[#allocation2 + $0x1c8] sm:$0xff] %v2379_v0 }
  0x2d   : > { %307 = vst [vmem:[#allocation2 + $0x1d0] sm:$0xff] %v2379_v0  ;;  %308 = vst [vmem:[#allocation2 + $0x1d8] sm:$0xff] %v2379_v0 }
  0x2e   : > { %309 = vst [vmem:[#allocation2 + $0x1e0] sm:$0xff] %v2379_v0  ;;  %310 = vst [vmem:[#allocation2 + $0x1e8] sm:$0xff] %v2379_v0 }
  0x2f   : > { %311 = vst [vmem:[#allocation2 + $0x1f0] sm:$0xff] %v2379_v0  ;;  %312 = vst [vmem:[#allocation2 + $0x1f8] sm:$0xff] %v2379_v0 }
  0x30 PF: > { %v441_v1 = vld [vmem:[%s2436_s27] sm:$0x3]  ;;  %vm699_vm0 = vcmask 1040384   ;;  %vm700_vm1 = vcmask 1041408   ;;  %v2380_v3 = vmov 65535   ;;  %vm602_vm2 = vcmask 23552  }
  0x31   : > { %v2323_v2 = vld [vmem:[%s2431_s24] sm:$0xff]   ;;  %v701_v4 = vsel %vm699_vm0, 4294967295, %v2380_v3  ;;  %v2325_v8 = vld [vmem:[%s2431_s24 + $0x8] sm:$0xff]   ;;  %v2327_v10 = vld [vmem:[%s2431_s24 + $0x10] sm:$0xff]   ;;  %p1869_p6 = scmp.ne.s32.totalorder %s2369_s15, 48 }
  0x32   : > { %v702_v5 = vsel %vm700_vm1, %v701_v4, 0  ;;  %2231 = vmatprep.mubr.msk.bf16.mxu0 %vm602_vm2, %v2323_v2  ;;  %v2324_v6 = vld [vmem:[%s2431_s24 + $0x80] sm:$0xff]   ;;  %v2326_v9 = vld [vmem:[%s2431_s24 + $0x88] sm:$0xff]   ;;  %v2328_v11 = vld [vmem:[%s2431_s24 + $0x90] sm:$0xff]  }
  0x33   : > { %v704_v7 = vand.u32 %v702_v5, %v441_v1  ;;  %2263 = vmatprep.mubr.msk.bf16.mxu1 %vm602_vm2, %v2324_v6  ;;  %v2329_v12 = vld [vmem:[%s2431_s24 + $0x18] sm:$0xff]   ;;  %v2331_v14 = vld [vmem:[%s2431_s24 + $0x20] sm:$0xff]   ;;  %v2333_v16 = vld [vmem:[%s2431_s24 + $0x28] sm:$0xff]  }
  0x34   : > { %v2330_v13 = vld [vmem:[%s2431_s24 + $0x98] sm:$0xff]   ;;  %v2332_v15 = vld [vmem:[%s2431_s24 + $0xa0] sm:$0xff]   ;;  %v2334_v17 = vld [vmem:[%s2431_s24 + $0xa8] sm:$0xff]  }
  0x35   : > { %2229 = vmatprep.subr.bf16.mxu0 %v704_v7  ;;  %2295 = vmatprep.subr.bf16.mxu1 %v704_v7  ;;  %v2335_v18 = vld [vmem:[%s2431_s24 + $0x30] sm:$0xff]   ;;  %v2337_v20 = vld [vmem:[%s2431_s24 + $0x38] sm:$0xff]   ;;  %v2339_v22 = vld [vmem:[%s2431_s24 + $0x40] sm:$0xff]  }
  0x36   : > { %2230 = vmatpush3.bf16.msra.mxu0 %v704_v7  ;;  %2296 = vmatpush3.bf16.msra.mxu1 %v704_v7  ;;  %v2336_v19 = vld [vmem:[%s2431_s24 + $0xb0] sm:$0xff]   ;;  %v2338_v21 = vld [vmem:[%s2431_s24 + $0xb8] sm:$0xff]   ;;  %v2340_v23 = vld [vmem:[%s2431_s24 + $0xc0] sm:$0xff]  }
  0x37   : > { %v2341_v24 = vld [vmem:[%s2431_s24 + $0x48] sm:$0xff]   ;;  %v2343_v26 = vld [vmem:[%s2431_s24 + $0x50] sm:$0xff]   ;;  %v2345_v28 = vld [vmem:[%s2431_s24 + $0x58] sm:$0xff]  }
  0x38   : > { %v2342_v25 = vld [vmem:[%s2431_s24 + $0xc8] sm:$0xff]   ;;  %v2344_v27 = vld [vmem:[%s2431_s24 + $0xd0] sm:$0xff]   ;;  %v2346_v29 = vld [vmem:[%s2431_s24 + $0xd8] sm:$0xff]  }
  0x39   : > { %2232 = vmatmul.mubr.msk.bf16.vlgmr.msra.gmra.mrb[0].mxu0 %vm602_vm2, %v2325_v8  ;;  %2264 = vmatmul.mubr.msk.bf16.vlgmr.msra.gmra.mrb[0].mxu1 %vm602_vm2, %v2326_v9  ;;  %v2347_v30 = vld [vmem:[%s2431_s24 + $0x60] sm:$0xff]   ;;  %v2349_v32 = vld [vmem:[%s2431_s24 + $0x68] sm:$0xff]   ;;  %v2351_v34 = vld [vmem:[%s2431_s24 + $0x70] sm:$0xff]  }
  0x3a   : > { %2235 = vmatprep.mubr.msk.bf16.mxu0 %vm602_vm2, %v2327_v10  ;;  %2267 = vmatprep.mubr.msk.bf16.mxu1 %vm602_vm2, %v2328_v11  ;;  %v2348_v31 = vld [vmem:[%s2431_s24 + $0xe0] sm:$0xff]   ;;  %v2350_v33 = vld [vmem:[%s2431_s24 + $0xe8] sm:$0xff]   ;;  %v2352_v35 = vld [vmem:[%s2431_s24 + $0xf0] sm:$0xff]  }
  0x3b   : > { %v2353_v36 = vld [vmem:[%s2431_s24 + $0x78] sm:$0xff]   ;;  %v315_v38 = vld [vmem:[#allocation2 + $0x10] sm:$0xff]  ;;  %v313_v40 = vld [vmem:[#allocation2] sm:$0xff] }
  0x3c   : > { %v2354_v37 = vld [vmem:[%s2431_s24 + $0xf8] sm:$0xff]   ;;  %v347_v39 = vld [vmem:[#allocation2 + $0x110] sm:$0xff]  ;;  %v345_v41 = vld [vmem:[#allocation2 + $0x100] sm:$0xff] }
  0x3d   : > { %v316_v44 = vld [vmem:[#allocation2 + $0x18] sm:$0xff]  ;;  %v314_v50 = vld [vmem:[#allocation2 + $0x8] sm:$0xff]  ;;  %v319_v62 = vld [vmem:[#allocation2 + $0x30] sm:$0xff] }
  0x3e   : > { %v348_v45 = vld [vmem:[#allocation2 + $0x118] sm:$0xff]  ;;  %v346_v51 = vld [vmem:[#allocation2 + $0x108] sm:$0xff]  ;;  %v351_v63 = vld [vmem:[#allocation2 + $0x130] sm:$0xff] }
  0x3f   : > { %v317_v0 = vld [vmem:[#allocation2 + $0x20] sm:$0xff]  ;;  %v320_v4 = vld [vmem:[#allocation2 + $0x38] sm:$0xff]  ;;  %v318_v10 = vld [vmem:[#allocation2 + $0x28] sm:$0xff] }
  0x40   : > { %v349_v1 = vld [vmem:[#allocation2 + $0x120] sm:$0xff]  ;;  %v352_v5 = vld [vmem:[#allocation2 + $0x138] sm:$0xff]  ;;  %v350_v11 = vld [vmem:[#allocation2 + $0x128] sm:$0xff] }
  0x41   : > { %2236 = vmatmul.mubr.msk.bf16.gmra.mrb[4].mxu0 %vm602_vm2, %v2329_v12  ;;  %2268 = vmatmul.mubr.msk.bf16.gmra.mrb[4].mxu1 %vm602_vm2, %v2330_v13 }
  0x42   : > { %2239 = vmatprep.mubr.msk.bf16.mxu0 %vm602_vm2, %v2331_v14  ;;  %2271 = vmatprep.mubr.msk.bf16.mxu1 %vm602_vm2, %v2332_v15 }
  0x49   : > { %2240 = vmatmul.mubr.msk.bf16.gmra.mrb[8].mxu0 %vm602_vm2, %v2333_v16  ;;  %2272 = vmatmul.mubr.msk.bf16.gmra.mrb[8].mxu1 %vm602_vm2, %v2334_v17 }
  0x4a   : > { %2243 = vmatprep.mubr.msk.bf16.mxu0 %vm602_vm2, %v2335_v18  ;;  %2275 = vmatprep.mubr.msk.bf16.mxu1 %vm602_vm2, %v2336_v19 }
  0x51   : > { %2244 = vmatmul.mubr.msk.bf16.gmra.mrb[12].mxu0 %vm602_vm2, %v2337_v20  ;;  %2276 = vmatmul.mubr.msk.bf16.gmra.mrb[12].mxu1 %vm602_vm2, %v2338_v21 }
  0x52   : > { %2247 = vmatprep.mubr.msk.bf16.mxu0 %vm602_vm2, %v2339_v22  ;;  %2279 = vmatprep.mubr.msk.bf16.mxu1 %vm602_vm2, %v2340_v23  ;;  %v323_v22 = vld [vmem:[#allocation2 + $0x50] sm:$0xff] }
  0x53   : > { %v355_v23 = vld [vmem:[#allocation2 + $0x150] sm:$0xff] }
  0x59   : > { %2248 = vmatmul.mubr.msk.bf16.gmra.mrb[16].mxu0 %vm602_vm2, %v2341_v24  ;;  %2280 = vmatmul.mubr.msk.bf16.gmra.mrb[16].mxu1 %vm602_vm2, %v2342_v25  ;;  %v321_v24 = vld [vmem:[#allocation2 + $0x40] sm:$0xff] }
  0x5a   : > { %2251 = vmatprep.mubr.msk.bf16.mxu0 %vm602_vm2, %v2343_v26  ;;  %2283 = vmatprep.mubr.msk.bf16.mxu1 %vm602_vm2, %v2344_v27  ;;  %v353_v25 = vld [vmem:[#allocation2 + $0x140] sm:$0xff] }
  0x61   : > { %2252 = vmatmul.mubr.msk.bf16.gmra.mrb[20].mxu0 %vm602_vm2, %v2345_v28  ;;  %2284 = vmatmul.mubr.msk.bf16.gmra.mrb[20].mxu1 %vm602_vm2, %v2346_v29  ;;  %v324_v28 = vld [vmem:[#allocation2 + $0x58] sm:$0xff] }
  0x62   : > { %2255 = vmatprep.mubr.msk.bf16.mxu0 %vm602_vm2, %v2347_v30  ;;  %2287 = vmatprep.mubr.msk.bf16.mxu1 %vm602_vm2, %v2348_v31  ;;  %v356_v29 = vld [vmem:[#allocation2 + $0x158] sm:$0xff] }
  0x69   : > { %2256 = vmatmul.mubr.msk.bf16.gmra.mrb[24].mxu0 %vm602_vm2, %v2349_v32  ;;  %2288 = vmatmul.mubr.msk.bf16.gmra.mrb[24].mxu1 %vm602_vm2, %v2350_v33 }
  0x6a   : > { %2259 = vmatprep.mubr.msk.bf16.mxu0 %vm602_vm2, %v2351_v34  ;;  %2291 = vmatprep.mubr.msk.bf16.mxu1 %vm602_vm2, %v2352_v35  ;;  %v322_v34 = vld [vmem:[#allocation2 + $0x48] sm:$0xff] }
  0x6b   : > { %v354_v35 = vld [vmem:[#allocation2 + $0x148] sm:$0xff] }
  0x71   : > { %2260 = vmatmul.mubr.msk.bf16.gmra.mrb[28].mxu0 %vm602_vm2, %v2353_v36  ;;  %2292 = vmatmul.mubr.msk.bf16.gmra.mrb[28].mxu1 %vm602_vm2, %v2354_v37 }
 0x10c   : > { %v2233_v42 = vpop.f32.mrb[0].mxu0  ;;  %v2265_v43 = vpop.f32.mrb[0].mxu1 }
 0x10d   : > { %v997_v46 = vadd.f32 %v2233_v42, %v315_v38  ;;  %v1029_v47 = vadd.f32 %v2265_v43, %v347_v39  ;;  %v740_v48 = vpop.f32.mrb[1].mxu0  ;;  %v868_v49 = vpop.f32.mrb[1].mxu1 }
 0x10e   : > { %v995_v52 = vadd.f32 %v740_v48, %v313_v40  ;;  %v1027_v53 = vadd.f32 %v868_v49, %v345_v41  ;;  %v2234_v54 = vpop.f32.mrb[2].mxu0  ;;  %v2266_v55 = vpop.f32.mrb[2].mxu1  ;;  %v325_v48 = vld [vmem:[#allocation2 + $0x60] sm:$0xff] }
 0x10f   : > { %1061 = vst [vmem:[#allocation2 + $0x10] sm:$0xff] %v997_v46  ;;  %1093 = vst [vmem:[#allocation2 + $0x110] sm:$0xff] %v1029_v47  ;;  %v998_v56 = vadd.f32 %v2234_v54, %v316_v44  ;;  %v1030_v57 = vadd.f32 %v2266_v55, %v348_v45  ;;  %v743_v58 = vpop.f32.mrb[3].mxu0  ;;  %v871_v59 = vpop.f32.mrb[3].mxu1  ;;  %v327_v46 = vld [vmem:[#allocation2 + $0x70] sm:$0xff]  ;;  %v357_v49 = vld [vmem:[#allocation2 + $0x160] sm:$0xff] }
 0x110   : > { %1059 = vst [vmem:[#allocation2] sm:$0xff] %v995_v52  ;;  %1091 = vst [vmem:[#allocation2 + $0x100] sm:$0xff] %v1027_v53  ;;  %v996_v60 = vadd.f32 %v743_v58, %v314_v50  ;;  %v1028_v61 = vadd.f32 %v871_v59, %v346_v51  ;;  %v359_v47 = vld [vmem:[#allocation2 + $0x170] sm:$0xff]  ;;  %v328_v52 = vld [vmem:[#allocation2 + $0x78] sm:$0xff] }
 0x111   : > { %1062 = vst [vmem:[#allocation2 + $0x18] sm:$0xff] %v998_v56  ;;  %1094 = vst [vmem:[#allocation2 + $0x118] sm:$0xff] %v1030_v57  ;;  %v360_v53 = vld [vmem:[#allocation2 + $0x178] sm:$0xff]  ;;  %v326_v58 = vld [vmem:[#allocation2 + $0x68] sm:$0xff] }
 0x112   : > { %1060 = vst [vmem:[#allocation2 + $0x8] sm:$0xff] %v996_v60  ;;  %1092 = vst [vmem:[#allocation2 + $0x108] sm:$0xff] %v1028_v61  ;;  %v358_v59 = vld [vmem:[#allocation2 + $0x168] sm:$0xff] }
 0x114   : > { %v2237_v2 = vpop.f32.mrb[4].mxu0  ;;  %v2269_v3 = vpop.f32.mrb[4].mxu1 }
 0x115   : > { %v1001_v6 = vadd.f32 %v2237_v2, %v319_v62  ;;  %v1033_v7 = vadd.f32 %v2269_v3, %v351_v63  ;;  %v756_v8 = vpop.f32.mrb[5].mxu0  ;;  %v884_v9 = vpop.f32.mrb[5].mxu1 }
 0x116   : > { %v999_v12 = vadd.f32 %v756_v8, %v317_v0  ;;  %v1031_v13 = vadd.f32 %v884_v9, %v349_v1  ;;  %v2238_v14 = vpop.f32.mrb[6].mxu0  ;;  %v2270_v15 = vpop.f32.mrb[6].mxu1  ;;  %v329_v8 = vld [vmem:[#allocation2 + $0x80] sm:$0xff] }
 0x117   : > { %1065 = vst [vmem:[#allocation2 + $0x30] sm:$0xff] %v1001_v6  ;;  %1097 = vst [vmem:[#allocation2 + $0x130] sm:$0xff] %v1033_v7  ;;  %v1002_v16 = vadd.f32 %v2238_v14, %v320_v4  ;;  %v1034_v17 = vadd.f32 %v2270_v15, %v352_v5  ;;  %v759_v18 = vpop.f32.mrb[7].mxu0  ;;  %v887_v19 = vpop.f32.mrb[7].mxu1  ;;  %v331_v6 = vld [vmem:[#allocation2 + $0x90] sm:$0xff]  ;;  %v361_v9 = vld [vmem:[#allocation2 + $0x180] sm:$0xff] }
 0x118   : > { %1063 = vst [vmem:[#allocation2 + $0x20] sm:$0xff] %v999_v12  ;;  %1095 = vst [vmem:[#allocation2 + $0x120] sm:$0xff] %v1031_v13  ;;  %v1000_v20 = vadd.f32 %v759_v18, %v318_v10  ;;  %v1032_v21 = vadd.f32 %v887_v19, %v350_v11  ;;  %v363_v7 = vld [vmem:[#allocation2 + $0x190] sm:$0xff]  ;;  %v332_v12 = vld [vmem:[#allocation2 + $0x98] sm:$0xff] }
 0x119   : > { %1066 = vst [vmem:[#allocation2 + $0x38] sm:$0xff] %v1002_v16  ;;  %1098 = vst [vmem:[#allocation2 + $0x138] sm:$0xff] %v1034_v17  ;;  %v364_v13 = vld [vmem:[#allocation2 + $0x198] sm:$0xff]  ;;  %v330_v18 = vld [vmem:[#allocation2 + $0x88] sm:$0xff] }
 0x11a   : > { %1064 = vst [vmem:[#allocation2 + $0x28] sm:$0xff] %v1000_v20  ;;  %1096 = vst [vmem:[#allocation2 + $0x128] sm:$0xff] %v1032_v21  ;;  %v362_v19 = vld [vmem:[#allocation2 + $0x188] sm:$0xff] }
 0x11c   : > { %v2241_v26 = vpop.f32.mrb[8].mxu0  ;;  %v2273_v27 = vpop.f32.mrb[8].mxu1 }
 0x11d   : > { %v1005_v30 = vadd.f32 %v2241_v26, %v323_v22  ;;  %v1037_v31 = vadd.f32 %v2273_v27, %v355_v23  ;;  %v772_v32 = vpop.f32.mrb[9].mxu0  ;;  %v900_v33 = vpop.f32.mrb[9].mxu1 }
 0x11e   : > { %v1003_v36 = vadd.f32 %v772_v32, %v321_v24  ;;  %v1035_v37 = vadd.f32 %v900_v33, %v353_v25  ;;  %v2242_v38 = vpop.f32.mrb[10].mxu0  ;;  %v2274_v39 = vpop.f32.mrb[10].mxu1  ;;  %v333_v32 = vld [vmem:[#allocation2 + $0xa0] sm:$0xff] }
 0x11f   : > { %1069 = vst [vmem:[#allocation2 + $0x50] sm:$0xff] %v1005_v30  ;;  %1101 = vst [vmem:[#allocation2 + $0x150] sm:$0xff] %v1037_v31  ;;  %v1006_v40 = vadd.f32 %v2242_v38, %v324_v28  ;;  %v1038_v41 = vadd.f32 %v2274_v39, %v356_v29  ;;  %v775_v42 = vpop.f32.mrb[11].mxu0  ;;  %v903_v43 = vpop.f32.mrb[11].mxu1  ;;  %v335_v30 = vld [vmem:[#allocation2 + $0xb0] sm:$0xff]  ;;  %v365_v33 = vld [vmem:[#allocation2 + $0x1a0] sm:$0xff] }
 0x120   : > { %1067 = vst [vmem:[#allocation2 + $0x40] sm:$0xff] %v1003_v36  ;;  %1099 = vst [vmem:[#allocation2 + $0x140] sm:$0xff] %v1035_v37  ;;  %v1004_v44 = vadd.f32 %v775_v42, %v322_v34  ;;  %v1036_v45 = vadd.f32 %v903_v43, %v354_v35  ;;  %v367_v31 = vld [vmem:[#allocation2 + $0x1b0] sm:$0xff]  ;;  %v336_v36 = vld [vmem:[#allocation2 + $0xb8] sm:$0xff] }
 0x121   : > { %1070 = vst [vmem:[#allocation2 + $0x58] sm:$0xff] %v1006_v40  ;;  %1102 = vst [vmem:[#allocation2 + $0x158] sm:$0xff] %v1038_v41  ;;  %v368_v37 = vld [vmem:[#allocation2 + $0x1b8] sm:$0xff]  ;;  %v334_v42 = vld [vmem:[#allocation2 + $0xa8] sm:$0xff] }
 0x122   : > { %1068 = vst [vmem:[#allocation2 + $0x48] sm:$0xff] %v1004_v44  ;;  %1100 = vst [vmem:[#allocation2 + $0x148] sm:$0xff] %v1036_v45  ;;  %v366_v43 = vld [vmem:[#allocation2 + $0x1a8] sm:$0xff] }
 0x124   : > { %v2245_v50 = vpop.f32.mrb[12].mxu0  ;;  %v2277_v51 = vpop.f32.mrb[12].mxu1 }
 0x125   : > { %v1009_v54 = vadd.f32 %v2245_v50, %v327_v46  ;;  %v1041_v55 = vadd.f32 %v2277_v51, %v359_v47  ;;  %v788_v56 = vpop.f32.mrb[13].mxu0  ;;  %v916_v57 = vpop.f32.mrb[13].mxu1 }
 0x126   : > { %v1007_v60 = vadd.f32 %v788_v56, %v325_v48  ;;  %v1039_v61 = vadd.f32 %v916_v57, %v357_v49  ;;  %v2246_v62 = vpop.f32.mrb[14].mxu0  ;;  %v2278_v63 = vpop.f32.mrb[14].mxu1  ;;  %v337_v56 = vld [vmem:[#allocation2 + $0xc0] sm:$0xff] }
 0x127   : > { %1073 = vst [vmem:[#allocation2 + $0x70] sm:$0xff] %v1009_v54  ;;  %1105 = vst [vmem:[#allocation2 + $0x170] sm:$0xff] %v1041_v55  ;;  %v1010_v0 = vadd.f32 %v2246_v62, %v328_v52  ;;  %v1042_v1 = vadd.f32 %v2278_v63, %v360_v53  ;;  %v791_v2 = vpop.f32.mrb[15].mxu0  ;;  %v919_v3 = vpop.f32.mrb[15].mxu1  ;;  %v339_v54 = vld [vmem:[#allocation2 + $0xd0] sm:$0xff]  ;;  %v369_v57 = vld [vmem:[#allocation2 + $0x1c0] sm:$0xff] }
 0x128   : > { %1071 = vst [vmem:[#allocation2 + $0x60] sm:$0xff] %v1007_v60  ;;  %1103 = vst [vmem:[#allocation2 + $0x160] sm:$0xff] %v1039_v61  ;;  %v1008_v4 = vadd.f32 %v791_v2, %v326_v58  ;;  %v1040_v5 = vadd.f32 %v919_v3, %v358_v59  ;;  %v371_v55 = vld [vmem:[#allocation2 + $0x1d0] sm:$0xff]  ;;  %v340_v60 = vld [vmem:[#allocation2 + $0xd8] sm:$0xff] }
 0x129   : > { %1074 = vst [vmem:[#allocation2 + $0x78] sm:$0xff] %v1010_v0  ;;  %1106 = vst [vmem:[#allocation2 + $0x178] sm:$0xff] %v1042_v1  ;;  %v372_v61 = vld [vmem:[#allocation2 + $0x1d8] sm:$0xff]  ;;  %v338_v2 = vld [vmem:[#allocation2 + $0xc8] sm:$0xff] }
 0x12a   : > { %1072 = vst [vmem:[#allocation2 + $0x68] sm:$0xff] %v1008_v4  ;;  %1104 = vst [vmem:[#allocation2 + $0x168] sm:$0xff] %v1040_v5  ;;  %v370_v3 = vld [vmem:[#allocation2 + $0x1c8] sm:$0xff] }
 0x12c   : > { %v2249_v10 = vpop.f32.mrb[16].mxu0  ;;  %v2281_v11 = vpop.f32.mrb[16].mxu1 }
 0x12d   : > { %v1013_v14 = vadd.f32 %v2249_v10, %v331_v6  ;;  %v1045_v15 = vadd.f32 %v2281_v11, %v363_v7  ;;  %v804_v16 = vpop.f32.mrb[17].mxu0  ;;  %v932_v17 = vpop.f32.mrb[17].mxu1 }
 0x12e   : > { %v1011_v20 = vadd.f32 %v804_v16, %v329_v8  ;;  %v1043_v21 = vadd.f32 %v932_v17, %v361_v9  ;;  %v2250_v22 = vpop.f32.mrb[18].mxu0  ;;  %v2282_v23 = vpop.f32.mrb[18].mxu1  ;;  %v341_v16 = vld [vmem:[#allocation2 + $0xe0] sm:$0xff] }
 0x12f   : > { %1077 = vst [vmem:[#allocation2 + $0x90] sm:$0xff] %v1013_v14  ;;  %1109 = vst [vmem:[#allocation2 + $0x190] sm:$0xff] %v1045_v15  ;;  %v1014_v24 = vadd.f32 %v2250_v22, %v332_v12  ;;  %v1046_v25 = vadd.f32 %v2282_v23, %v364_v13  ;;  %v807_v26 = vpop.f32.mrb[19].mxu0  ;;  %v935_v27 = vpop.f32.mrb[19].mxu1  ;;  %v343_v14 = vld [vmem:[#allocation2 + $0xf0] sm:$0xff]  ;;  %v373_v17 = vld [vmem:[#allocation2 + $0x1e0] sm:$0xff] }
 0x130   : > { %1075 = vst [vmem:[#allocation2 + $0x80] sm:$0xff] %v1011_v20  ;;  %1107 = vst [vmem:[#allocation2 + $0x180] sm:$0xff] %v1043_v21  ;;  %v1012_v28 = vadd.f32 %v807_v26, %v330_v18  ;;  %v1044_v29 = vadd.f32 %v935_v27, %v362_v19  ;;  %v375_v15 = vld [vmem:[#allocation2 + $0x1f0] sm:$0xff]  ;;  %v344_v20 = vld [vmem:[#allocation2 + $0xf8] sm:$0xff] }
 0x131   : > { %1078 = vst [vmem:[#allocation2 + $0x98] sm:$0xff] %v1014_v24  ;;  %1110 = vst [vmem:[#allocation2 + $0x198] sm:$0xff] %v1046_v25  ;;  %v376_v21 = vld [vmem:[#allocation2 + $0x1f8] sm:$0xff]  ;;  %v342_v26 = vld [vmem:[#allocation2 + $0xe8] sm:$0xff] }
 0x132   : > { %1076 = vst [vmem:[#allocation2 + $0x88] sm:$0xff] %v1012_v28  ;;  %1108 = vst [vmem:[#allocation2 + $0x188] sm:$0xff] %v1044_v29  ;;  %v374_v27 = vld [vmem:[#allocation2 + $0x1e8] sm:$0xff] }
 0x134   : > { %v2253_v34 = vpop.f32.mrb[20].mxu0  ;;  %v2285_v35 = vpop.f32.mrb[20].mxu1 }
 0x135   : > { %v1017_v38 = vadd.f32 %v2253_v34, %v335_v30  ;;  %v1049_v39 = vadd.f32 %v2285_v35, %v367_v31  ;;  %v820_v40 = vpop.f32.mrb[21].mxu0  ;;  %v948_v41 = vpop.f32.mrb[21].mxu1 }
 0x136   : > { %v1015_v44 = vadd.f32 %v820_v40, %v333_v32  ;;  %v1047_v45 = vadd.f32 %v948_v41, %v365_v33  ;;  %v2254_v46 = vpop.f32.mrb[22].mxu0  ;;  %v2286_v47 = vpop.f32.mrb[22].mxu1  ;;  %v2572_v40 = vld [vmem:[%s2814_s2] ss:$0 sm:$0xff] (!%p1869_p6) }
 0x137   : > { %1081 = vst [vmem:[#allocation2 + $0xb0] sm:$0xff] %v1017_v38  ;;  %1113 = vst [vmem:[#allocation2 + $0x1b0] sm:$0xff] %v1049_v39  ;;  %v1018_v48 = vadd.f32 %v2254_v46, %v336_v36  ;;  %v1050_v49 = vadd.f32 %v2286_v47, %v368_v37  ;;  %v823_v50 = vpop.f32.mrb[23].mxu0  ;;  %v951_v51 = vpop.f32.mrb[23].mxu1  ;;  %v1127_v38 = vld [vmem:[#allocation2] sm:$0xff] (!%p1869_p6)  ;;  %v1128_v39 = vld [vmem:[#allocation2 + $0x8] sm:$0xff] (!%p1869_p6) }
 0x138   : > { %1079 = vst [vmem:[#allocation2 + $0xa0] sm:$0xff] %v1015_v44  ;;  %1111 = vst [vmem:[#allocation2 + $0x1a0] sm:$0xff] %v1047_v45  ;;  %v1016_v52 = vadd.f32 %v823_v50, %v334_v42  ;;  %v1048_v53 = vadd.f32 %v951_v51, %v366_v43  ;;  %v1198_v41 = vmul.f32 (!%p1869_p6), %v2572_v40, %v1127_v38  ;;  %v2579_v43 = vld [vmem:[%s2815_s3] ss:$0 sm:$0xff] (!%p1869_p6)  ;;  %v1129_v44 = vld [vmem:[#allocation2 + $0x10] sm:$0xff] (!%p1869_p6) }
 0x139   : > { %1082 = vst [vmem:[#allocation2 + $0xb8] sm:$0xff] %v1018_v48  ;;  %1114 = vst [vmem:[#allocation2 + $0x1b8] sm:$0xff] %v1050_v49  ;;  %v1199_v42 = vmul.f32 (!%p1869_p6), %v2572_v40, %v1128_v39  ;;  %v1130_v45 = vld [vmem:[#allocation2 + $0x18] sm:$0xff] (!%p1869_p6)  ;;  %v1200_v46 = vmul.f32 (!%p1869_p6), %v2572_v40, %v1129_v44  ;;  %v1131_v48 = vld [vmem:[#allocation2 + $0x20] sm:$0xff] (!%p1869_p6) }
 0x13a   : > { %1080 = vst [vmem:[#allocation2 + $0xa8] sm:$0xff] %v1016_v52  ;;  %1112 = vst [vmem:[#allocation2 + $0x1a8] sm:$0xff] %v1048_v53  ;;  %v1201_v47 = vmul.f32 (!%p1869_p6), %v2572_v40, %v1130_v45  ;;  %v1132_v49 = vld [vmem:[#allocation2 + $0x28] sm:$0xff] (!%p1869_p6)  ;;  %v1133_v50 = vld [vmem:[#allocation2 + $0x30] sm:$0xff] (!%p1869_p6)  ;;  %v1269_v51 = vadd.f32 (!%p1869_p6), %v2579_v43, %v1198_v41  ;;  %v1202_v53 = vmul.f32 (!%p1869_p6), %v2572_v40, %v1131_v48 }
 0x13b   : > { %v1270_v52 = vadd.f32 (!%p1869_p6), %v2579_v43, %v1199_v42  ;;  %v1145_v44 = vld [vmem:[#allocation2 + $0x90] sm:$0xff] (!%p1869_p6)  ;;  %v1146_v45 = vld [vmem:[#allocation2 + $0x98] sm:$0xff] (!%p1869_p6) }
 0x13c   : > { %v2257_v58 = vpop.f32.mrb[24].mxu0  ;;  %v2289_v59 = vpop.f32.mrb[24].mxu1 }
 0x13d   : > { %v1021_v62 = vadd.f32 %v2257_v58, %v339_v54  ;;  %v1053_v63 = vadd.f32 %v2289_v59, %v371_v55  ;;  %v836_v0 = vpop.f32.mrb[25].mxu0  ;;  %v964_v1 = vpop.f32.mrb[25].mxu1  ;;  %v1203_v54 = vmul.f32 (!%p1869_p6), %v2572_v40, %v1132_v49  ;;  %v1134_v55 = vld [vmem:[#allocation2 + $0x38] sm:$0xff] (!%p1869_p6)  ;;  %v1204_v58 = vmul.f32 (!%p1869_p6), %v2572_v40, %v1133_v50 }
 0x13e   : > { %v1019_v4 = vadd.f32 %v836_v0, %v337_v56  ;;  %v1051_v5 = vadd.f32 %v964_v1, %v369_v57  ;;  %v2258_v6 = vpop.f32.mrb[26].mxu0  ;;  %v2290_v7 = vpop.f32.mrb[26].mxu1  ;;  %v1271_v56 = vadd.f32 (!%p1869_p6), %v2579_v43, %v1200_v46  ;;  %v1272_v57 = vadd.f32 (!%p1869_p6), %v2579_v43, %v1201_v47  ;;  %v1136_v1 = vld [vmem:[#allocation2 + $0x48] sm:$0xff] (!%p1869_p6) }
 0x13f   : > { %1085 = vst [vmem:[#allocation2 + $0xd0] sm:$0xff] %v1021_v62  ;;  %1117 = vst [vmem:[#allocation2 + $0x1d0] sm:$0xff] %v1053_v63  ;;  %v1022_v8 = vadd.f32 %v2258_v6, %v340_v60  ;;  %v1054_v9 = vadd.f32 %v2290_v7, %v372_v61  ;;  %v839_v10 = vpop.f32.mrb[27].mxu0  ;;  %v967_v11 = vpop.f32.mrb[27].mxu1  ;;  %v1205_v59 = vmul.f32 (!%p1869_p6), %v2572_v40, %v1134_v55  ;;  %v1135_v60 = vld [vmem:[#allocation2 + $0x40] sm:$0xff] (!%p1869_p6)  ;;  %v1333_v61 = vmax.f32 (!%p1869_p6), %v1269_v51, 0.0 }
 0x140   : > { %1083 = vst [vmem:[#allocation2 + $0xc0] sm:$0xff] %v1019_v4  ;;  %1115 = vst [vmem:[#allocation2 + $0x1c0] sm:$0xff] %v1051_v5  ;;  %v1020_v12 = vadd.f32 %v839_v10, %v338_v2  ;;  %v1052_v13 = vadd.f32 %v967_v11, %v370_v3  ;;  %v1334_v62 = vmax.f32 (!%p1869_p6), %v1270_v52, 0.0  ;;  %v1273_v63 = vadd.f32 (!%p1869_p6), %v2579_v43, %v1202_v53  ;;  %v1137_v6 = vld [vmem:[#allocation2 + $0x50] sm:$0xff] (!%p1869_p6)  ;;  %v1138_v7 = vld [vmem:[#allocation2 + $0x58] sm:$0xff] (!%p1869_p6) }
 0x141   : > { %1086 = vst [vmem:[#allocation2 + $0xd8] sm:$0xff] %v1022_v8  ;;  %1118 = vst [vmem:[#allocation2 + $0x1d8] sm:$0xff] %v1054_v9  ;;  %v1274_v0 = vadd.f32 (!%p1869_p6), %v2579_v43, %v1203_v54  ;;  %v1335_v2 = vmax.f32 (!%p1869_p6), %v1271_v56, 0.0  ;;  %v1336_v3 = vmax.f32 (!%p1869_p6), %v1272_v57, 0.0  ;;  %v1275_v4 = vadd.f32 (!%p1869_p6), %v2579_v43, %v1204_v58  ;;  %v1147_v50 = vld [vmem:[#allocation2 + $0xa0] sm:$0xff] (!%p1869_p6)  ;;  %v1148_v51 = vld [vmem:[#allocation2 + $0xa8] sm:$0xff] (!%p1869_p6) }
 0x142   : > { %1084 = vst [vmem:[#allocation2 + $0xc8] sm:$0xff] %v1020_v12  ;;  %1116 = vst [vmem:[#allocation2 + $0x1c8] sm:$0xff] %v1052_v13  ;;  %v1276_v5 = vadd.f32 (!%p1869_p6), %v2579_v43, %v1205_v59  ;;  %v2008_v8 = vpack.c.bf16 (!%p1869_p6), %v1334_v62, %v1333_v61  ;;  %v1337_v9 = vmax.f32 (!%p1869_p6), %v1273_v63, 0.0  ;;  %v1206_v11 = vmul.f32 (!%p1869_p6), %v2572_v40, %v1135_v60  ;;  %v1139_v12 = vld [vmem:[#allocation2 + $0x60] sm:$0xff] (!%p1869_p6)  ;;  %v1140_v13 = vld [vmem:[#allocation2 + $0x68] sm:$0xff] (!%p1869_p6) }
 0x143   : > { %v1338_v10 = vmax.f32 (!%p1869_p6), %v1274_v0, 0.0  ;;  %v1149_v56 = vld [vmem:[#allocation2 + $0xb0] sm:$0xff] (!%p1869_p6)  ;;  %v1216_v59 = vmul.f32 (!%p1869_p6), %v2572_v40, %v1145_v44  ;;  %v1217_v60 = vmul.f32 (!%p1869_p6), %v2572_v40, %v1146_v45  ;;  %v1150_v61 = vld [vmem:[#allocation2 + $0xb8] sm:$0xff] (!%p1869_p6)  ;;  %v1218_v0 = vmul.f32 (!%p1869_p6), %v2572_v40, %v1147_v50 }
 0x144   : > { %v2261_v18 = vpop.f32.mrb[28].mxu0  ;;  %v2293_v19 = vpop.f32.mrb[28].mxu1  ;;  %1126 = sbr.rel (%p1869_p6) target bundleno = 383 (0x17f), region = 44  ;;  %2009 = vst [vmem:[%s2816_s4] sm:$0xff] (!%p1869_p6), %v2008_v8  }
 0x145   : > { %v1025_v22 = vadd.f32 %v2261_v18, %v343_v14  ;;  %v1057_v23 = vadd.f32 %v2293_v19, %v375_v15  ;;  %v852_v24 = vpop.f32.mrb[29].mxu0  ;;  %v980_v25 = vpop.f32.mrb[29].mxu1  ;;  %v2013_v14 = vpack.c.bf16 (!%p1869_p6), %v1336_v3, %v1335_v2  ;;  %v1339_v15 = vmax.f32 (!%p1869_p6), %v1275_v4, 0.0  ;;  %v1141_v18 = vld [vmem:[#allocation2 + $0x70] sm:$0xff] (!%p1869_p6) }
 0x146   : > { %v1023_v28 = vadd.f32 %v852_v24, %v341_v16  ;;  %v1055_v29 = vadd.f32 %v980_v25, %v373_v17  ;;  %v2262_v30 = vpop.f32.mrb[30].mxu0  ;;  %v2294_v31 = vpop.f32.mrb[30].mxu1  ;;  %v1340_v16 = vmax.f32 (!%p1869_p6), %v1276_v5, 0.0  ;;  %v1207_v17 = vmul.f32 (!%p1869_p6), %v2572_v40, %v1136_v1 }
 0x147   : > { %1089 = vst [vmem:[#allocation2 + $0xf0] sm:$0xff] %v1025_v22  ;;  %1121 = vst [vmem:[#allocation2 + $0x1f0] sm:$0xff] %v1057_v23  ;;  %v1026_v32 = vadd.f32 %v2262_v30, %v344_v20  ;;  %v1058_v33 = vadd.f32 %v2294_v31, %v376_v21  ;;  %v855_v34 = vpop.f32.mrb[31].mxu0  ;;  %v983_v35 = vpop.f32.mrb[31].mxu1  ;;  %v2018_v19 = vpack.c.bf16 (!%p1869_p6), %v1338_v10, %v1337_v9  ;;  %v1142_v23 = vld [vmem:[#allocation2 + $0x78] sm:$0xff] (!%p1869_p6)  ;;  %v1151_v2 = vld [vmem:[#allocation2 + $0xc0] sm:$0xff] (!%p1869_p6) }
 0x148   : > { %1087 = vst [vmem:[#allocation2 + $0xe0] sm:$0xff] %v1023_v28  ;;  %1119 = vst [vmem:[#allocation2 + $0x1e0] sm:$0xff] %v1055_v29  ;;  %v1024_v36 = vadd.f32 %v855_v34, %v342_v26  ;;  %v1056_v37 = vadd.f32 %v983_v35, %v374_v27  ;;  %v1277_v20 = vadd.f32 (!%p1869_p6), %v2579_v43, %v1206_v11  ;;  %v1143_v28 = vld [vmem:[#allocation2 + $0x80] sm:$0xff] (!%p1869_p6) }
 0x149   : > { %1090 = vst [vmem:[#allocation2 + $0xf8] sm:$0xff] %v1026_v32  ;;  %1122 = vst [vmem:[#allocation2 + $0x1f8] sm:$0xff] %v1058_v33  ;;  %v1208_v21 = vmul.f32 (!%p1869_p6), %v2572_v40, %v1137_v6  ;;  %v1209_v22 = vmul.f32 (!%p1869_p6), %v2572_v40, %v1138_v7  ;;  %v2023_v24 = vpack.c.bf16 (!%p1869_p6), %v1340_v16, %v1339_v15  ;;  %v1152_v11 = vld [vmem:[#allocation2 + $0xc8] sm:$0xff] (!%p1869_p6)  ;;  %v1153_v16 = vld [vmem:[#allocation2 + $0xd0] sm:$0xff] (!%p1869_p6) }
 0x14a   : > { %1088 = vst [vmem:[#allocation2 + $0xe8] sm:$0xff] %v1024_v36  ;;  %1120 = vst [vmem:[#allocation2 + $0x1e8] sm:$0xff] %v1056_v37  ;;  %v1278_v25 = vadd.f32 (!%p1869_p6), %v2579_v43, %v1207_v17  ;;  %v1210_v26 = vmul.f32 (!%p1869_p6), %v2572_v40, %v1139_v12  ;;  %v1211_v27 = vmul.f32 (!%p1869_p6), %v2572_v40, %v1140_v13  ;;  %v1341_v29 = vmax.f32 (!%p1869_p6), %v1277_v20, 0.0  ;;  %v1144_v37 = vld [vmem:[#allocation2 + $0x88] sm:$0xff] (!%p1869_p6)  ;;  %v1154_v17 = vld [vmem:[#allocation2 + $0xd8] sm:$0xff] (!%p1869_p6) }
 0x14b   : > { %2165 = vst [vmem:[%s2816_s4 + $0x8] sm:$0xff] %v2013_v14   ;;  %2166 = vst [vmem:[%s2816_s4 + $0x10] sm:$0xff] %v2018_v19   ;;  %v1279_v30 = vadd.f32 %v2579_v43, %v1208_v21  ;;  %v1280_v31 = vadd.f32 %v2579_v43, %v1209_v22  ;;  %v1212_v32 = vmul.f32 %v2572_v40, %v1141_v18 }
 0x14c   : > { %2167 = vst [vmem:[%s2816_s4 + $0x18] sm:$0xff] %v2023_v24   ;;  %v1342_v33 = vmax.f32 %v1278_v25, 0.0  ;;  %v1281_v34 = vadd.f32 %v2579_v43, %v1210_v26  ;;  %v1282_v35 = vadd.f32 %v2579_v43, %v1211_v27  ;;  %v1213_v36 = vmul.f32 %v2572_v40, %v1142_v23 }
 0x14d   : > { %v1343_v38 = vmax.f32 %v1279_v30, 0.0  ;;  %v1344_v39 = vmax.f32 %v1280_v31, 0.0  ;;  %v1283_v41 = vadd.f32 %v2579_v43, %v1212_v32  ;;  %v1214_v42 = vmul.f32 %v2572_v40, %v1143_v28 }
 0x14e   : > { %v2028_v46 = vpack.c.bf16 %v1342_v33, %v1341_v29  ;;  %v1345_v47 = vmax.f32 %v1281_v34, 0.0  ;;  %v1346_v48 = vmax.f32 %v1282_v35, 0.0  ;;  %v1284_v49 = vadd.f32 %v2579_v43, %v1213_v36  ;;  %v1157_v28 = vld [vmem:[#allocation2 + $0xf0] sm:$0xff] }
 0x14f   : > { %v2033_v52 = vpack.c.bf16 %v1344_v39, %v1343_v38  ;;  %v1347_v53 = vmax.f32 %v1283_v41, 0.0  ;;  %v1215_v54 = vmul.f32 %v2572_v40, %v1144_v37  ;;  %v1285_v55 = vadd.f32 %v2579_v43, %v1214_v42  ;;  %v1155_v22 = vld [vmem:[#allocation2 + $0xe0] sm:$0xff] }
 0x150   : > { %2168 = vst [vmem:[%s2816_s4 + $0x20] sm:$0xff] %v2028_v46   ;;  %v2038_v57 = vpack.c.bf16 %v1346_v48, %v1345_v47  ;;  %v1348_v58 = vmax.f32 %v1284_v49, 0.0  ;;  %v1219_v1 = vmul.f32 %v2572_v40, %v1148_v51  ;;  %v1287_v4 = vadd.f32 %v2579_v43, %v1216_v59  ;;  %v1158_v33 = vld [vmem:[#allocation2 + $0xf8] sm:$0xff]  ;;  %v1159_v38 = vld [vmem:[#allocation2 + $0x100] sm:$0xff]  ;;  %v1160_v49 = vld [vmem:[#allocation2 + $0x108] sm:$0xff] }
 0x151   : > { %2169 = vst [vmem:[%s2816_s4 + $0x28] sm:$0xff] %v2033_v52   ;;  %v1286_v62 = vadd.f32 %v2579_v43, %v1215_v54  ;;  %v1349_v63 = vmax.f32 %v1285_v55, 0.0  ;;  %v1288_v5 = vadd.f32 %v2579_v43, %v1217_v60  ;;  %v1220_v6 = vmul.f32 %v2572_v40, %v1149_v56  ;;  %v1156_v23 = vld [vmem:[#allocation2 + $0xe8] sm:$0xff]  ;;  %v1161_v54 = vld [vmem:[#allocation2 + $0x110] sm:$0xff]  ;;  %v1162_v55 = vld [vmem:[#allocation2 + $0x118] sm:$0xff] }
 0x152   : > { %2170 = vst [vmem:[%s2816_s4 + $0x30] sm:$0xff] %v2038_v57   ;;  %v2043_v3 = vpack.c.bf16 %v1348_v58, %v1347_v53  ;;  %v1289_v8 = vadd.f32 %v2579_v43, %v1218_v0  ;;  %v1290_v9 = vadd.f32 %v2579_v43, %v1219_v1  ;;  %v1221_v10 = vmul.f32 %v2572_v40, %v1150_v61  ;;  %v1163_v60 = vld [vmem:[#allocation2 + $0x120] sm:$0xff]  ;;  %v1164_v61 = vld [vmem:[#allocation2 + $0x128] sm:$0xff] }
 0x153   : > { %v1350_v7 = vmax.f32 %v1286_v62, 0.0  ;;  %v1351_v12 = vmax.f32 %v1287_v4, 0.0  ;;  %v1352_v13 = vmax.f32 %v1288_v5, 0.0  ;;  %v1291_v14 = vadd.f32 %v2579_v43, %v1220_v6 }
 0x154   : > { %2171 = vst [vmem:[%s2816_s4 + $0x38] sm:$0xff] %v2043_v3   ;;  %v1222_v15 = vmul.f32 %v2572_v40, %v1151_v2  ;;  %v1353_v19 = vmax.f32 %v1289_v8, 0.0  ;;  %v1354_v20 = vmax.f32 %v1290_v9, 0.0  ;;  %v1292_v21 = vadd.f32 %v2579_v43, %v1221_v10  ;;  %v1165_v2 = vld [vmem:[#allocation2 + $0x130] sm:$0xff] }
 0x155   : > { %v2048_v18 = vpack.c.bf16 %v1350_v7, %v1349_v63  ;;  %v2053_v24 = vpack.c.bf16 %v1352_v13, %v1351_v12  ;;  %v1355_v25 = vmax.f32 %v1291_v14, 0.0  ;;  %v1223_v26 = vmul.f32 %v2572_v40, %v1152_v11  ;;  %v1166_v7 = vld [vmem:[#allocation2 + $0x138] sm:$0xff]  ;;  %v1167_v12 = vld [vmem:[#allocation2 + $0x140] sm:$0xff] }
 0x156   : > { %v1293_v27 = vadd.f32 %v2579_v43, %v1222_v15  ;;  %v2058_v29 = vpack.c.bf16 %v1354_v20, %v1353_v19  ;;  %v1356_v30 = vmax.f32 %v1292_v21, 0.0  ;;  %v1224_v31 = vmul.f32 %v2572_v40, %v1153_v16  ;;  %v1168_v21 = vld [vmem:[#allocation2 + $0x148] sm:$0xff] }
 0x157   : > { %2172 = vst [vmem:[%s2816_s4 + $0x40] sm:$0xff] %v2048_v18   ;;  %v1225_v32 = vmul.f32 %v2572_v40, %v1154_v17  ;;  %2173 = vst [vmem:[%s2816_s4 + $0x48] sm:$0xff] %v2053_v24   ;;  %v1294_v34 = vadd.f32 %v2579_v43, %v1223_v26  ;;  %v1226_v36 = vmul.f32 %v2572_v40, %v1155_v22  ;;  %v1169_v26 = vld [vmem:[#allocation2 + $0x150] sm:$0xff] }
 0x158   : > { %v1357_v35 = vmax.f32 %v1293_v27, 0.0  ;;  %v1227_v37 = vmul.f32 %v2572_v40, %v1156_v23  ;;  %2174 = vst [vmem:[%s2816_s4 + $0x50] sm:$0xff] %v2058_v29   ;;  %v2063_v39 = vpack.c.bf16 %v1356_v30, %v1355_v25  ;;  %v1295_v41 = vadd.f32 %v2579_v43, %v1224_v31  ;;  %v1170_v27 = vld [vmem:[#allocation2 + $0x158] sm:$0xff] }
 0x159   : > { %v1296_v42 = vadd.f32 %v2579_v43, %v1225_v32  ;;  %v1228_v44 = vmul.f32 %v2572_v40, %v1157_v28  ;;  %v1358_v45 = vmax.f32 %v1294_v34, 0.0  ;;  %v1297_v46 = vadd.f32 %v2579_v43, %v1226_v36  ;;  %v1171_v32 = vld [vmem:[#allocation2 + $0x160] sm:$0xff] }
 0x15a   : > { %v1298_v47 = vadd.f32 %v2579_v43, %v1227_v37  ;;  %v1229_v48 = vmul.f32 %v2572_v40, %v1158_v33  ;;  %2175 = vst [vmem:[%s2816_s4 + $0x58] sm:$0xff] %v2063_v39   ;;  %v1359_v50 = vmax.f32 %v1295_v41, 0.0  ;;  %v1230_v53 = vmul.f32 %v2572_v40, %v1159_v38  ;;  %v1172_v33 = vld [vmem:[#allocation2 + $0x168] sm:$0xff]  ;;  %v1173_v38 = vld [vmem:[#allocation2 + $0x170] sm:$0xff] }
 0x15b   : > { %v1360_v51 = vmax.f32 %v1296_v42, 0.0  ;;  %v1299_v52 = vadd.f32 %v2579_v43, %v1228_v44  ;;  %v2068_v56 = vpack.c.bf16 %v1358_v45, %v1357_v35  ;;  %v1361_v57 = vmax.f32 %v1297_v46, 0.0  ;;  %v1174_v45 = vld [vmem:[#allocation2 + $0x178] sm:$0xff] }
 0x15c   : > { %v1362_v58 = vmax.f32 %v1298_v47, 0.0  ;;  %v1300_v59 = vadd.f32 %v2579_v43, %v1229_v48  ;;  %v1231_v0 = vmul.f32 %v2572_v40, %v1160_v49  ;;  %v1301_v1 = vadd.f32 %v2579_v43, %v1230_v53 }
 0x15d   : > { %v2073_v62 = vpack.c.bf16 %v1360_v51, %v1359_v50  ;;  %v1363_v63 = vmax.f32 %v1299_v52, 0.0  ;;  %2176 = vst [vmem:[%s2816_s4 + $0x60] sm:$0xff] %v2068_v56   ;;  %v1232_v5 = vmul.f32 %v2572_v40, %v1161_v54  ;;  %v1233_v6 = vmul.f32 %v2572_v40, %v1162_v55  ;;  %v1175_v50 = vld [vmem:[#allocation2 + $0x180] sm:$0xff] }
 0x15e   : > { %v2078_v3 = vpack.c.bf16 %v1362_v58, %v1361_v57  ;;  %v1364_v4 = vmax.f32 %v1300_v59, 0.0  ;;  %v1302_v8 = vadd.f32 %v2579_v43, %v1231_v0  ;;  %v1365_v9 = vmax.f32 %v1301_v1, 0.0  ;;  %v1176_v59 = vld [vmem:[#allocation2 + $0x188] sm:$0xff]  ;;  %v1177_v0 = vld [vmem:[#allocation2 + $0x190] sm:$0xff]  ;;  %v1178_v1 = vld [vmem:[#allocation2 + $0x198] sm:$0xff] }
 0x15f   : > { %2177 = vst [vmem:[%s2816_s4 + $0x68] sm:$0xff] %v2073_v62   ;;  %v1234_v10 = vmul.f32 %v2572_v40, %v1163_v60  ;;  %v1235_v11 = vmul.f32 %v2572_v40, %v1164_v61  ;;  %v1303_v14 = vadd.f32 %v2579_v43, %v1232_v5  ;;  %v1304_v15 = vadd.f32 %v2579_v43, %v1233_v6  ;;  %v1179_v6 = vld [vmem:[#allocation2 + $0x1a0] sm:$0xff] }
 0x160   : > { %2178 = vst [vmem:[%s2816_s4 + $0x70] sm:$0xff] %v2078_v3   ;;  %v2083_v13 = vpack.c.bf16 %v1364_v4, %v1363_v63  ;;  %v1236_v16 = vmul.f32 %v2572_v40, %v1165_v2  ;;  %v1366_v17 = vmax.f32 %v1302_v8, 0.0  ;;  %v1237_v20 = vmul.f32 %v2572_v40, %v1166_v7  ;;  %v1180_v7 = vld [vmem:[#allocation2 + $0x1a8] sm:$0xff] }
 0x161   : > { %v1305_v18 = vadd.f32 %v2579_v43, %v1234_v10  ;;  %v1306_v19 = vadd.f32 %v2579_v43, %v1235_v11  ;;  %v1367_v22 = vmax.f32 %v1303_v14, 0.0  ;;  %v1368_v23 = vmax.f32 %v1304_v15, 0.0 }
 0x162   : > { %2179 = vst [vmem:[%s2816_s4 + $0x78] sm:$0xff] %v2083_v13   ;;  %v1307_v24 = vadd.f32 %v2579_v43, %v1236_v16  ;;  %v1238_v25 = vmul.f32 %v2572_v40, %v1167_v12  ;;  %v2088_v28 = vpack.c.bf16 %v1366_v17, %v1365_v9  ;;  %v1308_v31 = vadd.f32 %v2579_v43, %v1237_v20  ;;  %v1181_v12 = vld [vmem:[#allocation2 + $0x1b0] sm:$0xff]  ;;  %v1182_v17 = vld [vmem:[#allocation2 + $0x1b8] sm:$0xff] }
 0x163   : > { %v1369_v29 = vmax.f32 %v1305_v18, 0.0  ;;  %v1370_v30 = vmax.f32 %v1306_v19, 0.0  ;;  %v2093_v34 = vpack.c.bf16 %v1368_v23, %v1367_v22  ;;  %v1239_v36 = vmul.f32 %v2572_v40, %v1168_v21  ;;  %v1183_v22 = vld [vmem:[#allocation2 + $0x1c0] sm:$0xff] }
 0x164   : > { %v1371_v35 = vmax.f32 %v1307_v24, 0.0  ;;  %v1309_v37 = vadd.f32 %v2579_v43, %v1238_v25  ;;  %2180 = vst [vmem:[%s2816_s4 + $0x80] sm:$0xff] %v2088_v28   ;;  %v1372_v41 = vmax.f32 %v1308_v31, 0.0  ;;  %v1240_v42 = vmul.f32 %v2572_v40, %v1169_v26  ;;  %v1184_v31 = vld [vmem:[#allocation2 + $0x1c8] sm:$0xff] }
 0x165   : > { %v2098_v39 = vpack.c.bf16 %v1370_v30, %v1369_v29  ;;  %v1241_v44 = vmul.f32 %v2572_v40, %v1170_v27  ;;  %2181 = vst [vmem:[%s2816_s4 + $0x88] sm:$0xff] %v2093_v34   ;;  %v1310_v46 = vadd.f32 %v2579_v43, %v1239_v36  ;;  %v1242_v48 = vmul.f32 %v2572_v40, %v1171_v32  ;;  %v1185_v36 = vld [vmem:[#allocation2 + $0x1d0] sm:$0xff] }
 0x166   : > { %v1373_v47 = vmax.f32 %v1309_v37, 0.0  ;;  %v1243_v49 = vmul.f32 %v2572_v40, %v1172_v33  ;;  %v2103_v51 = vpack.c.bf16 %v1372_v41, %v1371_v35  ;;  %v1311_v52 = vadd.f32 %v2579_v43, %v1240_v42  ;;  %v1186_v37 = vld [vmem:[#allocation2 + $0x1d8] sm:$0xff] }
 0x167   : > { %2182 = vst [vmem:[%s2816_s4 + $0x90] sm:$0xff] %v2098_v39   ;;  %v1312_v53 = vadd.f32 %v2579_v43, %v1241_v44  ;;  %v1244_v54 = vmul.f32 %v2572_v40, %v1173_v38  ;;  %v1374_v55 = vmax.f32 %v1310_v46, 0.0  ;;  %v1313_v56 = vadd.f32 %v2579_v43, %v1242_v48  ;;  %v1187_v44 = vld [vmem:[#allocation2 + $0x1e0] sm:$0xff] }
 0x168   : > { %v1314_v57 = vadd.f32 %v2579_v43, %v1243_v49  ;;  %v1245_v58 = vmul.f32 %v2572_v40, %v1174_v45  ;;  %2183 = vst [vmem:[%s2816_s4 + $0x98] sm:$0xff] %v2103_v51   ;;  %v1375_v60 = vmax.f32 %v1311_v52, 0.0  ;;  %v1246_v63 = vmul.f32 %v2572_v40, %v1175_v50  ;;  %v1188_v45 = vld [vmem:[#allocation2 + $0x1e8] sm:$0xff]  ;;  %v1189_v50 = vld [vmem:[#allocation2 + $0x1f0] sm:$0xff] }
 0x169   : > { %v1376_v61 = vmax.f32 %v1312_v53, 0.0  ;;  %v1315_v62 = vadd.f32 %v2579_v43, %v1244_v54  ;;  %v2108_v2 = vpack.c.bf16 %v1374_v55, %v1373_v47  ;;  %v1377_v3 = vmax.f32 %v1313_v56, 0.0  ;;  %v1190_v55 = vld [vmem:[#allocation2 + $0x1f8] sm:$0xff] }
 0x16a   : > { %v1378_v4 = vmax.f32 %v1314_v57, 0.0  ;;  %v1316_v5 = vadd.f32 %v2579_v43, %v1245_v58  ;;  %v1247_v10 = vmul.f32 %v2572_v40, %v1176_v59  ;;  %v1317_v11 = vadd.f32 %v2579_v43, %v1246_v63 }
 0x16b   : > { %v2113_v8 = vpack.c.bf16 %v1376_v61, %v1375_v60  ;;  %v1379_v9 = vmax.f32 %v1315_v62, 0.0  ;;  %2184 = vst [vmem:[%s2816_s4 + $0xa0] sm:$0xff] %v2108_v2   ;;  %v1248_v15 = vmul.f32 %v2572_v40, %v1177_v0  ;;  %v1249_v16 = vmul.f32 %v2572_v40, %v1178_v1 }
 0x16c   : > { %v2118_v13 = vpack.c.bf16 %v1378_v4, %v1377_v3  ;;  %v1380_v14 = vmax.f32 %v1316_v5, 0.0  ;;  %v1318_v18 = vadd.f32 %v2579_v43, %v1247_v10  ;;  %v1381_v19 = vmax.f32 %v1317_v11, 0.0 }
 0x16d   : > { %2185 = vst [vmem:[%s2816_s4 + $0xa8] sm:$0xff] %v2113_v8   ;;  %v1250_v20 = vmul.f32 %v2572_v40, %v1179_v6  ;;  %v1251_v21 = vmul.f32 %v2572_v40, %v1180_v7  ;;  %v1319_v24 = vadd.f32 %v2579_v43, %v1248_v15  ;;  %v1320_v25 = vadd.f32 %v2579_v43, %v1249_v16 }
 0x16e   : > { %2186 = vst [vmem:[%s2816_s4 + $0xb0] sm:$0xff] %v2118_v13   ;;  %v2123_v23 = vpack.c.bf16 %v1380_v14, %v1379_v9  ;;  %v1252_v26 = vmul.f32 %v2572_v40, %v1181_v12  ;;  %v1382_v27 = vmax.f32 %v1318_v18, 0.0  ;;  %v1253_v30 = vmul.f32 %v2572_v40, %v1182_v17 }
 0x16f   : > { %v1321_v28 = vadd.f32 %v2579_v43, %v1250_v20  ;;  %v1322_v29 = vadd.f32 %v2579_v43, %v1251_v21  ;;  %v1383_v32 = vmax.f32 %v1319_v24, 0.0  ;;  %v1384_v33 = vmax.f32 %v1320_v25, 0.0 }
 0x170   : > { %2187 = vst [vmem:[%s2816_s4 + $0xb8] sm:$0xff] %v2123_v23   ;;  %v1323_v34 = vadd.f32 %v2579_v43, %v1252_v26  ;;  %v1254_v35 = vmul.f32 %v2572_v40, %v1183_v22  ;;  %v2128_v38 = vpack.c.bf16 %v1382_v27, %v1381_v19  ;;  %v1324_v42 = vadd.f32 %v2579_v43, %v1253_v30 }
 0x171   : > { %v1385_v39 = vmax.f32 %v1321_v28, 0.0  ;;  %v1386_v41 = vmax.f32 %v1322_v29, 0.0  ;;  %v2133_v46 = vpack.c.bf16 %v1384_v33, %v1383_v32  ;;  %v1255_v48 = vmul.f32 %v2572_v40, %v1184_v31 }
 0x172   : > { %v1387_v47 = vmax.f32 %v1323_v34, 0.0  ;;  %v1325_v49 = vadd.f32 %v2579_v43, %v1254_v35  ;;  %2188 = vst [vmem:[%s2816_s4 + $0xc0] sm:$0xff] %v2128_v38   ;;  %v1388_v52 = vmax.f32 %v1324_v42, 0.0  ;;  %v1256_v53 = vmul.f32 %v2572_v40, %v1185_v36 }
 0x173   : > { %v2138_v51 = vpack.c.bf16 %v1386_v41, %v1385_v39  ;;  %v1257_v54 = vmul.f32 %v2572_v40, %v1186_v37  ;;  %2189 = vst [vmem:[%s2816_s4 + $0xc8] sm:$0xff] %v2133_v46   ;;  %v1326_v56 = vadd.f32 %v2579_v43, %v1255_v48  ;;  %v1258_v58 = vmul.f32 %v2572_v40, %v1187_v44 }
 0x174   : > { %v1389_v57 = vmax.f32 %v1325_v49, 0.0  ;;  %v1259_v59 = vmul.f32 %v2572_v40, %v1188_v45  ;;  %v2143_v60 = vpack.c.bf16 %v1388_v52, %v1387_v47  ;;  %v1327_v61 = vadd.f32 %v2579_v43, %v1256_v53 }
 0x175   : > { %2190 = vst [vmem:[%s2816_s4 + $0xd0] sm:$0xff] %v2138_v51   ;;  %v1328_v62 = vadd.f32 %v2579_v43, %v1257_v54  ;;  %v1260_v63 = vmul.f32 %v2572_v40, %v1189_v50  ;;  %v1390_v0 = vmax.f32 %v1326_v56, 0.0  ;;  %v1329_v1 = vadd.f32 %v2579_v43, %v1258_v58 }
 0x176   : > { %v1330_v2 = vadd.f32 %v2579_v43, %v1259_v59  ;;  %v1261_v3 = vmul.f32 %v2572_v40, %v1190_v55  ;;  %2191 = vst [vmem:[%s2816_s4 + $0xd8] sm:$0xff] %v2143_v60   ;;  %v1391_v4 = vmax.f32 %v1327_v61, 0.0 }
 0x177   : > { %v1392_v5 = vmax.f32 %v1328_v62, 0.0  ;;  %v1331_v6 = vadd.f32 %v2579_v43, %v1260_v63  ;;  %v2148_v7 = vpack.c.bf16 %v1390_v0, %v1389_v57  ;;  %v1393_v8 = vmax.f32 %v1329_v1, 0.0 }
 0x178   : > { %v1394_v9 = vmax.f32 %v1330_v2, 0.0  ;;  %v1332_v10 = vadd.f32 %v2579_v43, %v1261_v3 }
 0x179   : > { %v2153_v11 = vpack.c.bf16 %v1392_v5, %v1391_v4  ;;  %v1395_v12 = vmax.f32 %v1331_v6, 0.0  ;;  %2192 = vst [vmem:[%s2816_s4 + $0xe0] sm:$0xff] %v2148_v7  }
 0x17a   : > { %v2158_v40 = vpack.c.bf16 %v1394_v9, %v1393_v8  ;;  %v1396_v13 = vmax.f32 %v1332_v10, 0.0 }
 0x17b   : > { %2193 = vst [vmem:[%s2816_s4 + $0xe8] sm:$0xff] %v2153_v11  }
 0x17c   : > { %2194 = vst [vmem:[%s2816_s4 + $0xf0] sm:$0xff] %v2158_v40   ;;  %v2163_v14 = vpack.c.bf16 %v1396_v13, %v1395_v12 }
 0x17e   : > { %2195 = vst [vmem:[%s2816_s4 + $0xf8] sm:$0xff] %v2163_v14  }
 0x17f PF: > { %s14_s17 = sadd.s32 1, %s2377_s17   ;;  %s2817_s15 = smov %s2373_s16 }
 0x180   : > { %p11_p7 = scmp.ge.s32.totalorder %s14_s17, 51   ;;  %s2818_s16 = smov %s2820_s18 }
 0x182   :  { %13 = sbr.rel (!%p11_p7) target bundleno = 2 (0x2), region = 77 }

// kernel: new_model_forward.27
= control target key start
LH: loop header
LB: loop body
LE: loop exit
PB: predicated region body
PF: predicated region fallthrough
CT: control target
= control target key end

     0   :  { %s935_s1 = inlined_call_operand.vmem [shape: bf16[1,128,128], index: 1, kind: input, shape index: {}]   ;;  %s936_s0 = inlined_call_operand.vmem [shape: bf16[1,128,128], index: 0, kind: input, shape index: {}]   ;;  %s937_s4 = inlined_call_operand.vmem [shape: bf16[128,128], index: 4, kind: input, shape index: {}]   ;;  %s938_s2 = inlined_call_operand.vmem [shape: f32[1,128], index: 2, kind: input, shape index: {}]   ;;  %s939_s3 = inlined_call_operand.vmem [shape: f32[1,128], index: 3, kind: input, shape index: {}]   ;;  %s940_s5 = inlined_call_operand.vmem [shape: bf16[128,128], index: 5, kind: output, shape index: {}]  }
   0x1   :  { %v727_v0 = vld [vmem:[%s935_s1] sm:$0xff]   ;;  %v728_v1 = vld [vmem:[%s935_s1 + $0x8] sm:$0xff]   ;;  %v729_v2 = vld [vmem:[%s935_s1 + $0x10] sm:$0xff]  }
   0x2   :  { %679 = vmatprep.subr.bf16.mxu0 %v727_v0  ;;  %711 = vmatprep.subr.bf16.mxu1 %v727_v0  ;;  %v730_v3 = vld [vmem:[%s935_s1 + $0x18] sm:$0xff]   ;;  %v735_v4 = vld [vmem:[%s936_s0] sm:$0xff]   ;;  %v732_v7 = vld [vmem:[%s935_s1 + $0x28] sm:$0xff]  }
   0x3   :  { %680 = vmatpush3.bf16.msra.mxu0 %v727_v0  ;;  %719 = vmatpush3.bf16.msra.mxu1 %v727_v0  ;;  %v736_v5 = vld [vmem:[%s936_s0 + $0x20] sm:$0xff]   ;;  %v733_v8 = vld [vmem:[%s935_s1 + $0x30] sm:$0xff]   ;;  %v734_v9 = vld [vmem:[%s935_s1 + $0x38] sm:$0xff]  }
   0x4   :  { %681 = vmatprep.subr.bf16.mxu0 %v728_v1  ;;  %712 = vmatprep.subr.bf16.mxu1 %v728_v1  ;;  %v731_v6 = vld [vmem:[%s935_s1 + $0x20] sm:$0xff]   ;;  %v737_v10 = vld [vmem:[%s936_s0 + $0x8] sm:$0xff]   ;;  %v739_v12 = vld [vmem:[%s936_s0 + $0x10] sm:$0xff]  }
   0x5   :  { %695 = vmatprep.mubr.bf16.mxu0 %v735_v4  ;;  %703 = vmatprep.mubr.bf16.mxu1 %v736_v5  ;;  %v738_v11 = vld [vmem:[%s936_s0 + $0x28] sm:$0xff]   ;;  %v740_v13 = vld [vmem:[%s936_s0 + $0x30] sm:$0xff]   ;;  %v741_v14 = vld [vmem:[%s936_s0 + $0x18] sm:$0xff]  }
   0x6   :  { %v742_v15 = vld [vmem:[%s936_s0 + $0x38] sm:$0xff]   ;;  %v649_v16 = vld [vmem:[%s937_s4 + $0x8] sm:$0xff]   ;;  %v578_v18 = vld [vmem:[%s937_s4] sm:$0xff]  }
   0x7   :  { %682 = vmatpush3.bf16.msra.mxu0 %v728_v1  ;;  %720 = vmatpush3.bf16.msra.mxu1 %v728_v1  ;;  %v653_v17 = vld [vmem:[%s937_s4 + $0x28] sm:$0xff]   ;;  %v652_v19 = vld [vmem:[%s937_s4 + $0x20] sm:$0xff]   ;;  %v841_v21 = vld [vmem:[%s937_s4 + $0x18] sm:$0xff]   ;;  %v583_v23 = vunpack.c.l.bf16 %v649_v16  ;;  %v579_v25 = vunpack.c.l.bf16 %v578_v18  ;;  %v584_v32 = vunpack.c.h.bf16 %v649_v16  ;;  %v580_v34 = vunpack.c.h.bf16 %v578_v18 }
   0x8   :  { %683 = vmatprep.subr.bf16.mxu0 %v729_v2  ;;  %713 = vmatprep.subr.bf16.mxu1 %v729_v2  ;;  %v836_v20 = vld [vmem:[%s938_s2] ss:$0 sm:$0xff]  ;;  %v846_v22 = vld [vmem:[%s937_s4 + $0x38] sm:$0xff]   ;;  %v599_v24 = vunpack.c.l.bf16 %v653_v17  ;;  %v595_v26 = vunpack.c.l.bf16 %v652_v19  ;;  %v851_v27 = vld [vmem:[%s937_s4 + $0x10] sm:$0xff]   ;;  %v600_v33 = vunpack.c.h.bf16 %v653_v17  ;;  %v596_v35 = vunpack.c.h.bf16 %v652_v19 }
   0x9   :  { %v856_v28 = vld [vmem:[%s937_s4 + $0x30] sm:$0xff]   ;;  %v861_v30 = vld [vmem:[%s939_s3] ss:$0 sm:$0xff]  ;;  %v591_v40 = vunpack.c.l.bf16 %v841_v21  ;;  %v607_v41 = vunpack.c.l.bf16 %v846_v22  ;;  %v587_v46 = vunpack.c.l.bf16 %v851_v27 }
   0xa   :  { %v603_v47 = vunpack.c.l.bf16 %v856_v28 }
   0xb   :  { %684 = vmatpush3.bf16.msra.mxu0 %v729_v2  ;;  %721 = vmatpush3.bf16.msra.mxu1 %v729_v2 }
   0xc   :  { %685 = vmatprep.subr.bf16.mxu0 %v730_v3  ;;  %714 = vmatprep.subr.bf16.mxu1 %v730_v3 }
   0xf   :  { %686 = vmatpush3.bf16.msra.mxu0 %v730_v3  ;;  %722 = vmatpush3.bf16.msra.mxu1 %v730_v3 }
  0x10   :  { %687 = vmatprep.subr.bf16.mxu0 %v731_v6  ;;  %715 = vmatprep.subr.bf16.mxu1 %v731_v6 }
  0x13   :  { %688 = vmatpush3.bf16.msra.mxu0 %v731_v6  ;;  %723 = vmatpush3.bf16.msra.mxu1 %v731_v6 }
  0x14   :  { %689 = vmatprep.subr.bf16.mxu0 %v732_v7  ;;  %716 = vmatprep.subr.bf16.mxu1 %v732_v7 }
  0x17   :  { %690 = vmatpush3.bf16.msra.mxu0 %v732_v7  ;;  %724 = vmatpush3.bf16.msra.mxu1 %v732_v7 }
  0x18   :  { %691 = vmatprep.subr.bf16.mxu0 %v733_v8  ;;  %717 = vmatprep.subr.bf16.mxu1 %v733_v8 }
  0x1b   :  { %692 = vmatpush3.bf16.msra.mxu0 %v733_v8  ;;  %725 = vmatpush3.bf16.msra.mxu1 %v733_v8 }
  0x1c   :  { %693 = vmatprep.subr.bf16.mxu0 %v734_v9  ;;  %718 = vmatprep.subr.bf16.mxu1 %v734_v9 }
  0x1f   :  { %694 = vmatpush3.bf16.msra.mxu0 %v734_v9  ;;  %726 = vmatpush3.bf16.msra.mxu1 %v734_v9 }
  0x22   :  { %696 = vmatmul.mubr.bf16.vlgmr.msra.gmra.mrb[0].mxu0 %v737_v10  ;;  %704 = vmatmul.mubr.bf16.vlgmr.msra.gmra.mrb[0].mxu1 %v738_v11 }
  0x23   :  { %699 = vmatprep.mubr.bf16.mxu0 %v739_v12  ;;  %707 = vmatprep.mubr.bf16.mxu1 %v740_v13 }
  0x2a   :  { %700 = vmatmul.mubr.bf16.gmra.mrb[4].mxu0 %v741_v14  ;;  %708 = vmatmul.mubr.bf16.gmra.mrb[4].mxu1 %v742_v15 }
  0xf5   :  { %v697_v29 = vpop.f32.mrb[0].mxu0  ;;  %v705_v31 = vpop.f32.mrb[0].mxu1 }
  0xf6   :  { %v342_v36 = vmul.f32 %v697_v29, %v836_v20  ;;  %v350_v37 = vmul.f32 %v705_v31, %v836_v20  ;;  %v219_v38 = vpop.f32.mrb[1].mxu0  ;;  %v251_v39 = vpop.f32.mrb[1].mxu1 }
  0xf7   :  { %v340_v42 = vmul.f32 %v836_v20, %v219_v38  ;;  %v348_v43 = vmul.f32 %v836_v20, %v251_v39  ;;  %v698_v44 = vpop.f32.mrb[2].mxu0  ;;  %v706_v45 = vpop.f32.mrb[2].mxu1 }
  0xf8   :  { %v365_v48 = vadd.f32 %v861_v30, %v342_v36  ;;  %v373_v49 = vadd.f32 %v861_v30, %v350_v37  ;;  %v343_v50 = vmul.f32 %v698_v44, %v836_v20  ;;  %v351_v51 = vmul.f32 %v706_v45, %v836_v20  ;;  %v222_v52 = vpop.f32.mrb[3].mxu0  ;;  %v254_v53 = vpop.f32.mrb[3].mxu1 }
  0xf9   :  { %v363_v54 = vadd.f32 %v861_v30, %v340_v42  ;;  %v371_v55 = vadd.f32 %v861_v30, %v348_v43  ;;  %v341_v56 = vmul.f32 %v836_v20, %v222_v52  ;;  %v349_v57 = vmul.f32 %v836_v20, %v254_v53 }
  0xfa   :  { %v413_v58 = vadd.f32 %v583_v23, %v365_v48  ;;  %v421_v59 = vadd.f32 %v599_v24, %v373_v49  ;;  %v366_v60 = vadd.f32 %v861_v30, %v343_v50  ;;  %v374_v61 = vadd.f32 %v861_v30, %v351_v51 }
  0xfb   :  { %v411_v62 = vadd.f32 %v579_v25, %v363_v54  ;;  %v419_v63 = vadd.f32 %v595_v26, %v371_v55  ;;  %v364_v0 = vadd.f32 %v861_v30, %v341_v56  ;;  %v372_v1 = vadd.f32 %v861_v30, %v349_v57 }
  0xfc   :  { %v429_v2 = vmax.f32 %v413_v58, 0.0  ;;  %v437_v3 = vmax.f32 %v421_v59, 0.0  ;;  %v414_v4 = vadd.f32 %v584_v32, %v366_v60  ;;  %v422_v5 = vadd.f32 %v600_v33, %v374_v61 }
  0xfd   :  { %v427_v6 = vmax.f32 %v411_v62, 0.0  ;;  %v435_v7 = vmax.f32 %v419_v63, 0.0  ;;  %v412_v8 = vadd.f32 %v580_v34, %v364_v0  ;;  %v420_v9 = vadd.f32 %v596_v35, %v372_v1  ;;  %v701_v10 = vpop.f32.mrb[4].mxu0  ;;  %v709_v11 = vpop.f32.mrb[4].mxu1 }
  0xfe   :  { %v430_v12 = vmax.f32 %v414_v4, 0.0  ;;  %v438_v13 = vmax.f32 %v422_v5, 0.0  ;;  %v346_v14 = vmul.f32 %v701_v10, %v836_v20  ;;  %v354_v15 = vmul.f32 %v709_v11, %v836_v20  ;;  %v235_v16 = vpop.f32.mrb[5].mxu0  ;;  %v267_v17 = vpop.f32.mrb[5].mxu1 }
  0xff   :  { %v428_v18 = vmax.f32 %v412_v8, 0.0  ;;  %v436_v19 = vmax.f32 %v420_v9, 0.0  ;;  %v344_v23 = vmul.f32 %v836_v20, %v235_v16  ;;  %v352_v24 = vmul.f32 %v836_v20, %v267_v17  ;;  %v702_v25 = vpop.f32.mrb[6].mxu0  ;;  %v710_v26 = vpop.f32.mrb[6].mxu1 }
 0x100   :  { %v617_v29 = vpack.c.bf16 %v430_v12, %v429_v2  ;;  %v637_v31 = vpack.c.bf16 %v438_v13, %v437_v3  ;;  %v369_v32 = vadd.f32 %v861_v30, %v346_v14  ;;  %v377_v33 = vadd.f32 %v861_v30, %v354_v15  ;;  %v238_v34 = vpop.f32.mrb[7].mxu0  ;;  %v270_v35 = vpop.f32.mrb[7].mxu1 }
 0x101   :  { %v612_v36 = vpack.c.bf16 %v428_v18, %v427_v6  ;;  %v632_v37 = vpack.c.bf16 %v436_v19, %v435_v7  ;;  %v367_v38 = vadd.f32 %v861_v30, %v344_v23  ;;  %v375_v39 = vadd.f32 %v861_v30, %v352_v24 }
 0x102   :  { %656 = vst [vmem:[%s940_s5 + $0x8] sm:$0xff] %v617_v29   ;;  %660 = vst [vmem:[%s940_s5 + $0x28] sm:$0xff] %v637_v31   ;;  %v347_v42 = vmul.f32 %v702_v25, %v836_v20  ;;  %v592_v43 = vunpack.c.h.bf16 %v841_v21  ;;  %v355_v44 = vmul.f32 %v710_v26, %v836_v20  ;;  %v608_v45 = vunpack.c.h.bf16 %v846_v22 }
 0x103   :  { %613 = vst [vmem:[%s940_s5] sm:$0xff] %v612_v36   ;;  %659 = vst [vmem:[%s940_s5 + $0x20] sm:$0xff] %v632_v37   ;;  %v345_v48 = vmul.f32 %v836_v20, %v238_v34  ;;  %v588_v49 = vunpack.c.h.bf16 %v851_v27  ;;  %v353_v50 = vmul.f32 %v836_v20, %v270_v35  ;;  %v604_v51 = vunpack.c.h.bf16 %v856_v28 }
 0x104   :  { %v417_v52 = vadd.f32 %v591_v40, %v369_v32  ;;  %v425_v53 = vadd.f32 %v607_v41, %v377_v33  ;;  %v370_v54 = vadd.f32 %v861_v30, %v347_v42  ;;  %v378_v55 = vadd.f32 %v861_v30, %v355_v44 }
 0x105   :  { %v415_v56 = vadd.f32 %v587_v46, %v367_v38  ;;  %v423_v57 = vadd.f32 %v603_v47, %v375_v39  ;;  %v368_v20 = vadd.f32 %v861_v30, %v345_v48  ;;  %v376_v58 = vadd.f32 %v861_v30, %v353_v50 }
 0x106   :  { %v418_v59 = vadd.f32 %v592_v43, %v370_v54  ;;  %v426_v21 = vadd.f32 %v608_v45, %v378_v55  ;;  %v433_v22 = vmax.f32 %v417_v52, 0.0  ;;  %v441_v41 = vmax.f32 %v425_v53, 0.0 }
 0x107   :  { %v416_v40 = vadd.f32 %v588_v49, %v368_v20  ;;  %v424_v60 = vadd.f32 %v604_v51, %v376_v58  ;;  %v431_v63 = vmax.f32 %v415_v56, 0.0  ;;  %v439_v0 = vmax.f32 %v423_v57, 0.0 }
 0x108   :  { %v434_v61 = vmax.f32 %v418_v59, 0.0  ;;  %v442_v62 = vmax.f32 %v426_v21, 0.0 }
 0x109   :  { %v432_v1 = vmax.f32 %v416_v40, 0.0  ;;  %v440_v27 = vmax.f32 %v424_v60, 0.0 }
 0x10a   :  { %v627_v46 = vpack.c.bf16 %v434_v61, %v433_v22  ;;  %v647_v2 = vpack.c.bf16 %v442_v62, %v441_v41 }
 0x10b   :  { %v622_v28 = vpack.c.bf16 %v432_v1, %v431_v63  ;;  %v642_v47 = vpack.c.bf16 %v440_v27, %v439_v0 }
 0x10c   :  { %658 = vst [vmem:[%s940_s5 + $0x18] sm:$0xff] %v627_v46   ;;  %662 = vst [vmem:[%s940_s5 + $0x38] sm:$0xff] %v647_v2  }
 0x10d   :  { %657 = vst [vmem:[%s940_s5 + $0x10] sm:$0xff] %v622_v28   ;;  %661 = vst [vmem:[%s940_s5 + $0x30] sm:$0xff] %v642_v47  }

// kernel: new_model_forward.24
= control target key start
LH: loop header
LB: loop body
LE: loop exit
PB: predicated region body
PF: predicated region fallthrough
CT: control target
= control target key end

     0   :  { %s740_s1 = inlined_call_operand.vmem [shape: bf16[1,128,128], index: 1, kind: input, shape index: {}]   ;;  %s741_s0 = inlined_call_operand.vmem [shape: bf16[1,128,128], index: 0, kind: input, shape index: {}]   ;;  %s742_s2 = inlined_call_operand.vmem [shape: f32[1,128], index: 2, kind: input, shape index: {}]   ;;  %s743_s3 = inlined_call_operand.vmem [shape: f32[1,128], index: 3, kind: input, shape index: {}]   ;;  %s744_s4 = inlined_call_operand.vmem [shape: bf16[128,128], index: 4, kind: output, shape index: {}]  }
   0x1   :  { %v621_v0 = vld [vmem:[%s740_s1] sm:$0xff]   ;;  %v622_v1 = vld [vmem:[%s740_s1 + $0x8] sm:$0xff]   ;;  %v623_v2 = vld [vmem:[%s740_s1 + $0x10] sm:$0xff]  }
   0x2   :  { %573 = vmatprep.subr.bf16.mxu0 %v621_v0  ;;  %605 = vmatprep.subr.bf16.mxu1 %v621_v0  ;;  %v624_v3 = vld [vmem:[%s740_s1 + $0x18] sm:$0xff]   ;;  %v629_v4 = vld [vmem:[%s741_s0] sm:$0xff]   ;;  %v626_v7 = vld [vmem:[%s740_s1 + $0x28] sm:$0xff]  }
   0x3   :  { %574 = vmatpush3.bf16.msra.mxu0 %v621_v0  ;;  %613 = vmatpush3.bf16.msra.mxu1 %v621_v0  ;;  %v630_v5 = vld [vmem:[%s741_s0 + $0x20] sm:$0xff]   ;;  %v627_v8 = vld [vmem:[%s740_s1 + $0x30] sm:$0xff]   ;;  %v628_v9 = vld [vmem:[%s740_s1 + $0x38] sm:$0xff]  }
   0x4   :  { %575 = vmatprep.subr.bf16.mxu0 %v622_v1  ;;  %606 = vmatprep.subr.bf16.mxu1 %v622_v1  ;;  %v625_v6 = vld [vmem:[%s740_s1 + $0x20] sm:$0xff]   ;;  %v631_v10 = vld [vmem:[%s741_s0 + $0x8] sm:$0xff]   ;;  %v633_v12 = vld [vmem:[%s741_s0 + $0x10] sm:$0xff]  }
   0x5   :  { %589 = vmatprep.mubr.bf16.mxu0 %v629_v4  ;;  %597 = vmatprep.mubr.bf16.mxu1 %v630_v5  ;;  %v632_v11 = vld [vmem:[%s741_s0 + $0x28] sm:$0xff]   ;;  %v634_v13 = vld [vmem:[%s741_s0 + $0x30] sm:$0xff]   ;;  %v635_v14 = vld [vmem:[%s741_s0 + $0x18] sm:$0xff]  }
   0x6   :  { %v636_v15 = vld [vmem:[%s741_s0 + $0x38] sm:$0xff]   ;;  %v476_v16 = vld [vmem:[%s742_s2] ss:$0 sm:$0xff] }
   0x7   :  { %576 = vmatpush3.bf16.msra.mxu0 %v622_v1  ;;  %614 = vmatpush3.bf16.msra.mxu1 %v622_v1  ;;  %v477_v23 = vld [vmem:[%s743_s3] ss:$0 sm:$0xff] }
   0x8   :  { %577 = vmatprep.subr.bf16.mxu0 %v623_v2  ;;  %607 = vmatprep.subr.bf16.mxu1 %v623_v2 }
   0xb   :  { %578 = vmatpush3.bf16.msra.mxu0 %v623_v2  ;;  %615 = vmatpush3.bf16.msra.mxu1 %v623_v2 }
   0xc   :  { %579 = vmatprep.subr.bf16.mxu0 %v624_v3  ;;  %608 = vmatprep.subr.bf16.mxu1 %v624_v3 }
   0xf   :  { %580 = vmatpush3.bf16.msra.mxu0 %v624_v3  ;;  %616 = vmatpush3.bf16.msra.mxu1 %v624_v3 }
  0x10   :  { %581 = vmatprep.subr.bf16.mxu0 %v625_v6  ;;  %609 = vmatprep.subr.bf16.mxu1 %v625_v6 }
  0x13   :  { %582 = vmatpush3.bf16.msra.mxu0 %v625_v6  ;;  %617 = vmatpush3.bf16.msra.mxu1 %v625_v6 }
  0x14   :  { %583 = vmatprep.subr.bf16.mxu0 %v626_v7  ;;  %610 = vmatprep.subr.bf16.mxu1 %v626_v7 }
  0x17   :  { %584 = vmatpush3.bf16.msra.mxu0 %v626_v7  ;;  %618 = vmatpush3.bf16.msra.mxu1 %v626_v7 }
  0x18   :  { %585 = vmatprep.subr.bf16.mxu0 %v627_v8  ;;  %611 = vmatprep.subr.bf16.mxu1 %v627_v8 }
  0x1b   :  { %586 = vmatpush3.bf16.msra.mxu0 %v627_v8  ;;  %619 = vmatpush3.bf16.msra.mxu1 %v627_v8 }
  0x1c   :  { %587 = vmatprep.subr.bf16.mxu0 %v628_v9  ;;  %612 = vmatprep.subr.bf16.mxu1 %v628_v9 }
  0x1f   :  { %588 = vmatpush3.bf16.msra.mxu0 %v628_v9  ;;  %620 = vmatpush3.bf16.msra.mxu1 %v628_v9 }
  0x22   :  { %590 = vmatmul.mubr.bf16.vlgmr.msra.gmra.mrb[0].mxu0 %v631_v10  ;;  %598 = vmatmul.mubr.bf16.vlgmr.msra.gmra.mrb[0].mxu1 %v632_v11 }
  0x23   :  { %593 = vmatprep.mubr.bf16.mxu0 %v633_v12  ;;  %601 = vmatprep.mubr.bf16.mxu1 %v634_v13 }
  0x2a   :  { %594 = vmatmul.mubr.bf16.gmra.mrb[4].mxu0 %v635_v14  ;;  %602 = vmatmul.mubr.bf16.gmra.mrb[4].mxu1 %v636_v15 }
  0xf5   :  { %v591_v17 = vpop.f32.mrb[0].mxu0  ;;  %v599_v18 = vpop.f32.mrb[0].mxu1 }
  0xf6   :  { %v339_v19 = vmul.f32 %v591_v17, %v476_v16  ;;  %v347_v20 = vmul.f32 %v599_v18, %v476_v16  ;;  %v216_v21 = vpop.f32.mrb[1].mxu0  ;;  %v248_v22 = vpop.f32.mrb[1].mxu1 }
  0xf7   :  { %v337_v24 = vmul.f32 %v476_v16, %v216_v21  ;;  %v345_v25 = vmul.f32 %v476_v16, %v248_v22  ;;  %v592_v26 = vpop.f32.mrb[2].mxu0  ;;  %v600_v27 = vpop.f32.mrb[2].mxu1 }
  0xf8   :  { %v340_v28 = vmul.f32 %v592_v26, %v476_v16  ;;  %v348_v29 = vmul.f32 %v600_v27, %v476_v16  ;;  %v219_v30 = vpop.f32.mrb[3].mxu0  ;;  %v251_v31 = vpop.f32.mrb[3].mxu1  ;;  %v362_v34 = vadd.f32 %v477_v23, %v339_v19  ;;  %v370_v35 = vadd.f32 %v477_v23, %v347_v20 }
  0xf9   :  { %v338_v32 = vmul.f32 %v476_v16, %v219_v30  ;;  %v346_v33 = vmul.f32 %v476_v16, %v251_v31  ;;  %v360_v38 = vadd.f32 %v477_v23, %v337_v24  ;;  %v368_v39 = vadd.f32 %v477_v23, %v345_v25 }
  0xfa   :  { %v363_v36 = vadd.f32 %v477_v23, %v340_v28  ;;  %v371_v37 = vadd.f32 %v477_v23, %v348_v29 }
  0xfb   :  { %v361_v40 = vadd.f32 %v477_v23, %v338_v32  ;;  %v369_v41 = vadd.f32 %v477_v23, %v346_v33 }
  0xfc   :  { %v518_v42 = vpack.c.bf16 %v363_v36, %v362_v34  ;;  %v538_v43 = vpack.c.bf16 %v371_v37, %v370_v35 }
  0xfd   :  { %v513_v44 = vpack.c.bf16 %v361_v40, %v360_v38  ;;  %v533_v45 = vpack.c.bf16 %v369_v41, %v368_v39  ;;  %v595_v46 = vpop.f32.mrb[4].mxu0  ;;  %v603_v47 = vpop.f32.mrb[4].mxu1 }
  0xfe   :  { %550 = vst [vmem:[%s744_s4 + $0x8] sm:$0xff] %v518_v42   ;;  %554 = vst [vmem:[%s744_s4 + $0x28] sm:$0xff] %v538_v43   ;;  %v343_v48 = vmul.f32 %v595_v46, %v476_v16  ;;  %v351_v49 = vmul.f32 %v603_v47, %v476_v16  ;;  %v232_v50 = vpop.f32.mrb[5].mxu0  ;;  %v264_v51 = vpop.f32.mrb[5].mxu1 }
  0xff   :  { %514 = vst [vmem:[%s744_s4] sm:$0xff] %v513_v44   ;;  %553 = vst [vmem:[%s744_s4 + $0x20] sm:$0xff] %v533_v45   ;;  %v341_v52 = vmul.f32 %v476_v16, %v232_v50  ;;  %v349_v53 = vmul.f32 %v476_v16, %v264_v51  ;;  %v596_v54 = vpop.f32.mrb[6].mxu0  ;;  %v604_v55 = vpop.f32.mrb[6].mxu1 }
 0x100   :  { %v344_v56 = vmul.f32 %v596_v54, %v476_v16  ;;  %v352_v57 = vmul.f32 %v604_v55, %v476_v16  ;;  %v235_v58 = vpop.f32.mrb[7].mxu0  ;;  %v267_v59 = vpop.f32.mrb[7].mxu1  ;;  %v366_v62 = vadd.f32 %v477_v23, %v343_v48  ;;  %v374_v63 = vadd.f32 %v477_v23, %v351_v49 }
 0x101   :  { %v342_v60 = vmul.f32 %v476_v16, %v235_v58  ;;  %v350_v61 = vmul.f32 %v476_v16, %v267_v59  ;;  %v364_v2 = vadd.f32 %v477_v23, %v341_v52  ;;  %v372_v3 = vadd.f32 %v477_v23, %v349_v53 }
 0x102   :  { %v367_v0 = vadd.f32 %v477_v23, %v344_v56  ;;  %v375_v1 = vadd.f32 %v477_v23, %v352_v57 }
 0x103   :  { %v365_v4 = vadd.f32 %v477_v23, %v342_v60  ;;  %v373_v5 = vadd.f32 %v477_v23, %v350_v61 }
 0x104   :  { %v528_v6 = vpack.c.bf16 %v367_v0, %v366_v62  ;;  %v548_v7 = vpack.c.bf16 %v375_v1, %v374_v63 }
 0x105   :  { %v523_v8 = vpack.c.bf16 %v365_v4, %v364_v2  ;;  %v543_v9 = vpack.c.bf16 %v373_v5, %v372_v3 }
 0x106   :  { %552 = vst [vmem:[%s744_s4 + $0x18] sm:$0xff] %v528_v6   ;;  %556 = vst [vmem:[%s744_s4 + $0x38] sm:$0xff] %v548_v7  }
 0x107   :  { %551 = vst [vmem:[%s744_s4 + $0x10] sm:$0xff] %v523_v8   ;;  %555 = vst [vmem:[%s744_s4 + $0x30] sm:$0xff] %v543_v9  }

// kernel: new_model_forward.26
= control target key start
LH: loop header
LB: loop body
LE: loop exit
PB: predicated region body
PF: predicated region fallthrough
CT: control target
= control target key end

     0   :  { %s1051_s15 = smov 0   ;;  %s1053_s16 = smov 0   ;;  %s1176_s0 = inlined_call_operand.vmem [shape: bf16[9,128,128], index: 0, kind: input, shape index: {}]   ;;  %s1177_s1 = inlined_call_operand.vmem [shape: bf16[9,128,128], index: 1, kind: input, shape index: {}]   ;;  %s1178_s2 = inlined_call_operand.vmem [shape: f32[1,128], index: 2, kind: input, shape index: {}]   ;;  %s1179_s3 = inlined_call_operand.vmem [shape: f32[1,128], index: 3, kind: input, shape index: {}]   ;;  %s1180_s4 = inlined_call_operand.vmem [shape: bf16[128,128], index: 4, kind: output, shape index: {}]  }
   0x1   :  { %s1055_s17 = smov 0  }
   0x2 LB: > { %s23_s18 = sadd.s32 1, %s1019_s16  ;;  %p786_p0 = scmp.ge.s32.totalorder %s1023_s17, 1  ;;  %s1023_s17 = sphi %s1055_s17, %s14_s17   ;;  %s1019_s16 = sphi %s1053_s16, %s1182_s16   ;;  %s1015_s15 = sphi %s1051_s15, %s1181_s15  }
   0x3   : > { %p24_p1 = scmp.ge.s32.totalorder %s23_s18, 9  ;;  %p191_p2 = scmp.lt.s32.totalorder %s1023_s17, 10 }
   0x5   : > { %s1184_s18 = smov (%p24_p1, %s23_s18), 0  ;;  %p192_p3 = pnand %p786_p0, %p191_p2 }
   0x6   : > { %p227_p4 = scmp.lt.s32.totalorder (!%p192_p3), %s1015_s15, 8  ;;  %p791_p5 = scmp.ne.s32.totalorder (!%p192_p3), %s1015_s15, 0 }
   0x7   : > { %195 = sbr.rel (%p192_p3) target bundleno = 300 (0x12c), region = 36 }
   0xe   : > { %s228_s19 = scalar_select %p227_p4, %s1015_s15, 8 }
   0xf   : > { %251 = sbr.rel (%p791_p5) target bundleno = 24 (0x18), region = 40  ;;  %v1025_v0 = vmov (!%p791_p5), 0.0  }
  0x10   : > { %s831_s20 = sshll.u32 %s228_s19, 6  ;;  %252 = vst [vmem:[#allocation2] sm:$0xff] (!%p791_p5), %v1025_v0  ;;  %253 = vst [vmem:[#allocation2 + $0x8] sm:$0xff] (!%p791_p5), %v1025_v0 }
  0x11   : > { %s1076_s23 = scalar_lea.vmem %s1176_s0, %s831_s20  ;;  %s1081_s26 = scalar_lea.vmem %s1177_s1, %s831_s20  ;;  %254 = vst [vmem:[#allocation2 + $0x10] sm:$0xff] (!%p791_p5), %v1025_v0  ;;  %255 = vst [vmem:[#allocation2 + $0x18] sm:$0xff] (!%p791_p5), %v1025_v0 }
  0x12   : > { %256 = vst [vmem:[#allocation2 + $0x20] sm:$0xff] (!%p791_p5), %v1025_v0  ;;  %257 = vst [vmem:[#allocation2 + $0x28] sm:$0xff] (!%p791_p5), %v1025_v0 }
  0x13   : > { %258 = vst [vmem:[#allocation2 + $0x30] sm:$0xff] (!%p791_p5), %v1025_v0  ;;  %259 = vst [vmem:[#allocation2 + $0x38] sm:$0xff] (!%p791_p5), %v1025_v0 }
  0x14   : > { %260 = vst [vmem:[#allocation2 + $0x40] sm:$0xff] (!%p791_p5), %v1025_v0  ;;  %261 = vst [vmem:[#allocation2 + $0x48] sm:$0xff] (!%p791_p5), %v1025_v0 }
  0x15   : > { %262 = vst [vmem:[#allocation2 + $0x50] sm:$0xff] (!%p791_p5), %v1025_v0  ;;  %263 = vst [vmem:[#allocation2 + $0x58] sm:$0xff] (!%p791_p5), %v1025_v0 }
  0x16   : > { %264 = vst [vmem:[#allocation2 + $0x60] sm:$0xff] %v1025_v0  ;;  %265 = vst [vmem:[#allocation2 + $0x68] sm:$0xff] %v1025_v0 }
  0x17   : > { %266 = vst [vmem:[#allocation2 + $0x70] sm:$0xff] %v1025_v0  ;;  %267 = vst [vmem:[#allocation2 + $0x78] sm:$0xff] %v1025_v0 }
  0x18 PF: > { %v985_v1 = vld [vmem:[%s1081_s26] sm:$0xff]   ;;  %v986_v2 = vld [vmem:[%s1081_s26 + $0x8] sm:$0xff]   ;;  %v987_v3 = vld [vmem:[%s1081_s26 + $0x10] sm:$0xff]   ;;  %p808_p6 = scmp.ne.s32.totalorder %s1015_s15, 8 }
  0x19   : > { %912 = vmatprep.subr.bf16.mxu0 %v985_v1  ;;  %944 = vmatprep.subr.bf16.mxu1 %v985_v1  ;;  %v988_v4 = vld [vmem:[%s1081_s26 + $0x18] sm:$0xff]   ;;  %v993_v5 = vld [vmem:[%s1076_s23] sm:$0xff]   ;;  %v990_v8 = vld [vmem:[%s1081_s26 + $0x28] sm:$0xff]  }
  0x1a   : > { %913 = vmatpush3.bf16.msra.mxu0 %v985_v1  ;;  %952 = vmatpush3.bf16.msra.mxu1 %v985_v1  ;;  %v994_v6 = vld [vmem:[%s1076_s23 + $0x20] sm:$0xff]   ;;  %v991_v9 = vld [vmem:[%s1081_s26 + $0x30] sm:$0xff]   ;;  %v992_v10 = vld [vmem:[%s1081_s26 + $0x38] sm:$0xff]  }
  0x1b   : > { %914 = vmatprep.subr.bf16.mxu0 %v986_v2  ;;  %945 = vmatprep.subr.bf16.mxu1 %v986_v2  ;;  %v989_v7 = vld [vmem:[%s1081_s26 + $0x20] sm:$0xff]   ;;  %v995_v11 = vld [vmem:[%s1076_s23 + $0x8] sm:$0xff]   ;;  %v997_v13 = vld [vmem:[%s1076_s23 + $0x10] sm:$0xff]  }
  0x1c   : > { %928 = vmatprep.mubr.bf16.mxu0 %v993_v5  ;;  %936 = vmatprep.mubr.bf16.mxu1 %v994_v6  ;;  %v996_v12 = vld [vmem:[%s1076_s23 + $0x28] sm:$0xff]   ;;  %v998_v14 = vld [vmem:[%s1076_s23 + $0x30] sm:$0xff]   ;;  %v999_v15 = vld [vmem:[%s1076_s23 + $0x18] sm:$0xff]  }
  0x1d   : > { %v1000_v16 = vld [vmem:[%s1076_s23 + $0x38] sm:$0xff]   ;;  %v270_v17 = vld [vmem:[#allocation2 + $0x10] sm:$0xff]  ;;  %v268_v19 = vld [vmem:[#allocation2] sm:$0xff] }
  0x1e   : > { %915 = vmatpush3.bf16.msra.mxu0 %v986_v2  ;;  %953 = vmatpush3.bf16.msra.mxu1 %v986_v2  ;;  %v278_v18 = vld [vmem:[#allocation2 + $0x50] sm:$0xff]  ;;  %v276_v20 = vld [vmem:[#allocation2 + $0x40] sm:$0xff]  ;;  %v271_v23 = vld [vmem:[#allocation2 + $0x18] sm:$0xff] }
  0x1f   : > { %916 = vmatprep.subr.bf16.mxu0 %v987_v3  ;;  %946 = vmatprep.subr.bf16.mxu1 %v987_v3  ;;  %v279_v24 = vld [vmem:[#allocation2 + $0x58] sm:$0xff]  ;;  %v269_v29 = vld [vmem:[#allocation2 + $0x8] sm:$0xff]  ;;  %v274_v41 = vld [vmem:[#allocation2 + $0x30] sm:$0xff] }
  0x20   : > { %v277_v30 = vld [vmem:[#allocation2 + $0x48] sm:$0xff]  ;;  %v282_v42 = vld [vmem:[#allocation2 + $0x70] sm:$0xff]  ;;  %v272_v43 = vld [vmem:[#allocation2 + $0x20] sm:$0xff] }
  0x21   : > { %v280_v44 = vld [vmem:[#allocation2 + $0x60] sm:$0xff]  ;;  %v275_v47 = vld [vmem:[#allocation2 + $0x38] sm:$0xff]  ;;  %v273_v53 = vld [vmem:[#allocation2 + $0x28] sm:$0xff] }
  0x22   : > { %917 = vmatpush3.bf16.msra.mxu0 %v987_v3  ;;  %954 = vmatpush3.bf16.msra.mxu1 %v987_v3  ;;  %v283_v48 = vld [vmem:[#allocation2 + $0x78] sm:$0xff]  ;;  %v281_v54 = vld [vmem:[#allocation2 + $0x68] sm:$0xff]  ;;  %v1104_v3 = vld [vmem:[%s1178_s2] ss:$0 sm:$0xff] (!%p808_p6) }
  0x23   : > { %918 = vmatprep.subr.bf16.mxu0 %v988_v4  ;;  %947 = vmatprep.subr.bf16.mxu1 %v988_v4  ;;  %v1111_v6 = vld [vmem:[%s1179_s3] ss:$0 sm:$0xff] (!%p808_p6) }
  0x26   : > { %919 = vmatpush3.bf16.msra.mxu0 %v988_v4  ;;  %955 = vmatpush3.bf16.msra.mxu1 %v988_v4 }
  0x27   : > { %920 = vmatprep.subr.bf16.mxu0 %v989_v7  ;;  %948 = vmatprep.subr.bf16.mxu1 %v989_v7 }
  0x2a   : > { %921 = vmatpush3.bf16.msra.mxu0 %v989_v7  ;;  %956 = vmatpush3.bf16.msra.mxu1 %v989_v7 }
  0x2b   : > { %922 = vmatprep.subr.bf16.mxu0 %v990_v8  ;;  %949 = vmatprep.subr.bf16.mxu1 %v990_v8 }
  0x2e   : > { %923 = vmatpush3.bf16.msra.mxu0 %v990_v8  ;;  %957 = vmatpush3.bf16.msra.mxu1 %v990_v8 }
  0x2f   : > { %924 = vmatprep.subr.bf16.mxu0 %v991_v9  ;;  %950 = vmatprep.subr.bf16.mxu1 %v991_v9 }
  0x32   : > { %925 = vmatpush3.bf16.msra.mxu0 %v991_v9  ;;  %958 = vmatpush3.bf16.msra.mxu1 %v991_v9 }
  0x33   : > { %926 = vmatprep.subr.bf16.mxu0 %v992_v10  ;;  %951 = vmatprep.subr.bf16.mxu1 %v992_v10 }
  0x36   : > { %927 = vmatpush3.bf16.msra.mxu0 %v992_v10  ;;  %959 = vmatpush3.bf16.msra.mxu1 %v992_v10 }
  0x39   : > { %929 = vmatmul.mubr.bf16.vlgmr.msra.gmra.mrb[0].mxu0 %v995_v11  ;;  %937 = vmatmul.mubr.bf16.vlgmr.msra.gmra.mrb[0].mxu1 %v996_v12 }
  0x3a   : > { %932 = vmatprep.mubr.bf16.mxu0 %v997_v13  ;;  %940 = vmatprep.mubr.bf16.mxu1 %v998_v14 }
  0x41   : > { %933 = vmatmul.mubr.bf16.gmra.mrb[4].mxu0 %v999_v15  ;;  %941 = vmatmul.mubr.bf16.gmra.mrb[4].mxu1 %v1000_v16 }
 0x10c   : > { %v930_v21 = vpop.f32.mrb[0].mxu0  ;;  %v938_v22 = vpop.f32.mrb[0].mxu1 }
 0x10d   : > { %v511_v25 = vadd.f32 %v930_v21, %v270_v17  ;;  %v519_v26 = vadd.f32 %v938_v22, %v278_v18  ;;  %v446_v27 = vpop.f32.mrb[1].mxu0  ;;  %v478_v28 = vpop.f32.mrb[1].mxu1 }
 0x10e   : > { %v509_v31 = vadd.f32 %v446_v27, %v268_v19  ;;  %v517_v32 = vadd.f32 %v478_v28, %v276_v20  ;;  %v931_v33 = vpop.f32.mrb[2].mxu0  ;;  %v939_v34 = vpop.f32.mrb[2].mxu1 }
 0x10f   : > { %527 = vst [vmem:[#allocation2 + $0x10] sm:$0xff] %v511_v25  ;;  %535 = vst [vmem:[#allocation2 + $0x50] sm:$0xff] %v519_v26  ;;  %v512_v35 = vadd.f32 %v931_v33, %v271_v23  ;;  %v520_v36 = vadd.f32 %v939_v34, %v279_v24  ;;  %v449_v37 = vpop.f32.mrb[3].mxu0  ;;  %v481_v38 = vpop.f32.mrb[3].mxu1 }
 0x110   : > { %525 = vst [vmem:[#allocation2] sm:$0xff] %v509_v31  ;;  %533 = vst [vmem:[#allocation2 + $0x40] sm:$0xff] %v517_v32  ;;  %v510_v39 = vadd.f32 %v449_v37, %v269_v29  ;;  %v518_v40 = vadd.f32 %v481_v38, %v277_v30 }
 0x111   : > { %528 = vst [vmem:[#allocation2 + $0x18] sm:$0xff] %v512_v35  ;;  %536 = vst [vmem:[#allocation2 + $0x58] sm:$0xff] %v520_v36 }
 0x112   : > { %526 = vst [vmem:[#allocation2 + $0x8] sm:$0xff] %v510_v39  ;;  %534 = vst [vmem:[#allocation2 + $0x48] sm:$0xff] %v518_v40 }
 0x114   : > { %v934_v45 = vpop.f32.mrb[4].mxu0  ;;  %v942_v46 = vpop.f32.mrb[4].mxu1  ;;  %544 = sbr.rel (%p808_p6) target bundleno = 300 (0x12c), region = 44 }
 0x115   : > { %v515_v49 = vadd.f32 %v934_v45, %v274_v41  ;;  %v523_v50 = vadd.f32 %v942_v46, %v282_v42  ;;  %v462_v51 = vpop.f32.mrb[5].mxu0  ;;  %v494_v52 = vpop.f32.mrb[5].mxu1 }
 0x116   : > { %v513_v55 = vadd.f32 %v462_v51, %v272_v43  ;;  %v521_v56 = vadd.f32 %v494_v52, %v280_v44  ;;  %v935_v57 = vpop.f32.mrb[6].mxu0  ;;  %v943_v58 = vpop.f32.mrb[6].mxu1  ;;  %v547_v7 = vld [vmem:[#allocation2 + $0x10] sm:$0xff] (!%p808_p6) }
 0x117   : > { %531 = vst [vmem:[#allocation2 + $0x30] sm:$0xff] %v515_v49  ;;  %539 = vst [vmem:[#allocation2 + $0x70] sm:$0xff] %v523_v50  ;;  %v516_v59 = vadd.f32 %v935_v57, %v275_v47  ;;  %v524_v60 = vadd.f32 %v943_v58, %v283_v48  ;;  %v465_v61 = vpop.f32.mrb[7].mxu0  ;;  %v497_v62 = vpop.f32.mrb[7].mxu1  ;;  %v545_v1 = vld [vmem:[#allocation2] sm:$0xff] (!%p808_p6)  ;;  %v570_v9 = vmul.f32 (!%p808_p6), %v1104_v3, %v547_v7  ;;  %v555_v33 = vld [vmem:[#allocation2 + $0x50] sm:$0xff] (!%p808_p6) }
 0x118   : > { %529 = vst [vmem:[#allocation2 + $0x20] sm:$0xff] %v513_v55  ;;  %537 = vst [vmem:[#allocation2 + $0x60] sm:$0xff] %v521_v56  ;;  %v514_v63 = vadd.f32 %v465_v61, %v273_v53  ;;  %v522_v0 = vadd.f32 %v497_v62, %v281_v54  ;;  %v568_v4 = vmul.f32 (!%p808_p6), %v1104_v3, %v545_v1  ;;  %v548_v8 = vld [vmem:[#allocation2 + $0x18] sm:$0xff] (!%p808_p6)  ;;  %v553_v23 = vld [vmem:[#allocation2 + $0x40] sm:$0xff] (!%p808_p6) }
 0x119   : > { %532 = vst [vmem:[#allocation2 + $0x38] sm:$0xff] %v516_v59  ;;  %540 = vst [vmem:[#allocation2 + $0x78] sm:$0xff] %v524_v60  ;;  %v546_v2 = vld [vmem:[#allocation2 + $0x8] sm:$0xff] (!%p808_p6)  ;;  %v571_v10 = vmul.f32 (!%p808_p6), %v1104_v3, %v548_v8  ;;  %v593_v19 = vadd.f32 (!%p808_p6), %v1111_v6, %v570_v9  ;;  %v556_v34 = vld [vmem:[#allocation2 + $0x58] sm:$0xff] (!%p808_p6)  ;;  %v576_v38 = vmul.f32 (!%p808_p6), %v1104_v3, %v553_v23 }
 0x11a   : > { %530 = vst [vmem:[#allocation2 + $0x28] sm:$0xff] %v514_v63  ;;  %538 = vst [vmem:[#allocation2 + $0x68] sm:$0xff] %v522_v0  ;;  %v569_v5 = vmul.f32 (!%p808_p6), %v1104_v3, %v546_v2  ;;  %v591_v14 = vadd.f32 (!%p808_p6), %v1111_v6, %v568_v4  ;;  %v554_v28 = vld [vmem:[#allocation2 + $0x48] sm:$0xff] (!%p808_p6)  ;;  %v578_v48 = vmul.f32 (!%p808_p6), %v1104_v3, %v555_v33 }
 0x11b   : > { %v594_v20 = vadd.f32 %v1111_v6, %v571_v10  ;;  %v609_v29 = vmax.f32 %v593_v19, 0.0  ;;  %v577_v44 = vmul.f32 %v1104_v3, %v554_v28  ;;  %v599_v47 = vadd.f32 %v1111_v6, %v576_v38 }
 0x11c   : > { %v592_v15 = vadd.f32 %v1111_v6, %v569_v5  ;;  %v607_v24 = vmax.f32 %v591_v14, 0.0  ;;  %v579_v49 = vmul.f32 %v1104_v3, %v556_v34  ;;  %v601_v56 = vadd.f32 %v1111_v6, %v578_v48 }
 0x11d   : > { %v610_v30 = vmax.f32 %v594_v20, 0.0  ;;  %v600_v52 = vadd.f32 %v1111_v6, %v577_v44  ;;  %v615_v55 = vmax.f32 %v599_v47, 0.0 }
 0x11e   : > { %v551_v13 = vld [vmem:[#allocation2 + $0x30] sm:$0xff]  ;;  %v608_v25 = vmax.f32 %v592_v15, 0.0  ;;  %v602_v57 = vadd.f32 %v1111_v6, %v579_v49  ;;  %v617_v63 = vmax.f32 %v601_v56, 0.0 }
 0x11f   : > { %v549_v11 = vld [vmem:[#allocation2 + $0x20] sm:$0xff]  ;;  %v574_v21 = vmul.f32 %v1104_v3, %v551_v13  ;;  %v857_v41 = vpack.c.bf16 %v610_v30, %v609_v29  ;;  %v559_v45 = vld [vmem:[#allocation2 + $0x70] sm:$0xff]  ;;  %v616_v59 = vmax.f32 %v600_v52, 0.0 }
 0x120   : > { %v572_v16 = vmul.f32 %v1104_v3, %v549_v11  ;;  %v552_v18 = vld [vmem:[#allocation2 + $0x38] sm:$0xff]  ;;  %v852_v35 = vpack.c.bf16 %v608_v25, %v607_v24  ;;  %v557_v39 = vld [vmem:[#allocation2 + $0x60] sm:$0xff]  ;;  %v582_v58 = vmul.f32 %v1104_v3, %v559_v45  ;;  %v618_v0 = vmax.f32 %v602_v57, 0.0 }
 0x121   : > { %v550_v12 = vld [vmem:[#allocation2 + $0x28] sm:$0xff]  ;;  %v575_v22 = vmul.f32 %v1104_v3, %v552_v18  ;;  %v597_v31 = vadd.f32 %v1111_v6, %v574_v21  ;;  %v560_v50 = vld [vmem:[#allocation2 + $0x78] sm:$0xff]  ;;  %889 = vst [vmem:[%s1180_s4 + $0x8] sm:$0xff] %v857_v41   ;;  %v580_v53 = vmul.f32 %v1104_v3, %v557_v39  ;;  %v872_v2 = vpack.c.bf16 %v616_v59, %v615_v55 }
 0x122   : > { %v573_v17 = vmul.f32 %v1104_v3, %v550_v12  ;;  %v595_v26 = vadd.f32 %v1111_v6, %v572_v16  ;;  %v558_v40 = vld [vmem:[#allocation2 + $0x68] sm:$0xff]  ;;  %853 = vst [vmem:[%s1180_s4] sm:$0xff] %v852_v35   ;;  %v583_v62 = vmul.f32 %v1104_v3, %v560_v50  ;;  %v605_v1 = vadd.f32 %v1111_v6, %v582_v58 }
 0x123   : > { %v598_v32 = vadd.f32 %v1111_v6, %v575_v22  ;;  %v613_v42 = vmax.f32 %v597_v31, 0.0  ;;  %v581_v54 = vmul.f32 %v1104_v3, %v558_v40  ;;  %v603_v60 = vadd.f32 %v1111_v6, %v580_v53  ;;  %892 = vst [vmem:[%s1180_s4 + $0x20] sm:$0xff] %v872_v2  }
 0x124   : > { %v596_v27 = vadd.f32 %v1111_v6, %v573_v17  ;;  %v611_v36 = vmax.f32 %v595_v26, 0.0  ;;  %v606_v7 = vadd.f32 %v1111_v6, %v583_v62  ;;  %v877_v8 = vpack.c.bf16 %v618_v0, %v617_v63 }
 0x125   : > { %v614_v43 = vmax.f32 %v598_v32, 0.0  ;;  %v604_v61 = vadd.f32 %v1111_v6, %v581_v54  ;;  %v619_v4 = vmax.f32 %v603_v60, 0.0  ;;  %v621_v9 = vmax.f32 %v605_v1, 0.0 }
 0x126   : > { %v612_v37 = vmax.f32 %v596_v27, 0.0  ;;  %v622_v11 = vmax.f32 %v606_v7, 0.0  ;;  %893 = vst [vmem:[%s1180_s4 + $0x28] sm:$0xff] %v877_v8  }
 0x127   : > { %v867_v51 = vpack.c.bf16 %v614_v43, %v613_v42  ;;  %v620_v5 = vmax.f32 %v604_v61, 0.0 }
 0x128   : > { %v862_v46 = vpack.c.bf16 %v612_v37, %v611_v36  ;;  %v887_v3 = vpack.c.bf16 %v622_v11, %v621_v9 }
 0x129   : > { %891 = vst [vmem:[%s1180_s4 + $0x18] sm:$0xff] %v867_v51   ;;  %v882_v10 = vpack.c.bf16 %v620_v5, %v619_v4 }
 0x12a   : > { %890 = vst [vmem:[%s1180_s4 + $0x10] sm:$0xff] %v862_v46   ;;  %895 = vst [vmem:[%s1180_s4 + $0x38] sm:$0xff] %v887_v3  }
 0x12b   : > { %894 = vst [vmem:[%s1180_s4 + $0x30] sm:$0xff] %v882_v10  }
 0x12c PF: > { %s14_s17 = sadd.s32 1, %s1023_s17   ;;  %s1181_s15 = smov %s1019_s16 }
 0x12d   : > { %p11_p7 = scmp.ge.s32.totalorder %s14_s17, 11   ;;  %s1182_s16 = smov %s1184_s18 }
 0x12f   :  { %13 = sbr.rel (!%p11_p7) target bundleno = 2 (0x2), region = 77 }

// kernel: new_model_forward.30
= control target key start
LH: loop header
LB: loop body
LE: loop exit
PB: predicated region body
PF: predicated region fallthrough
CT: control target
= control target key end

     0   :  { %s693_s15 = smov 0   ;;  %s695_s16 = smov 0   ;;  %s758_s0 = inlined_call_operand.vmem [shape: bf16[9,32,128], index: 0, kind: input, shape index: {}]   ;;  %s759_s1 = inlined_call_operand.vmem [shape: bf16[9,128,128], index: 1, kind: input, shape index: {}]   ;;  %s760_s2 = inlined_call_operand.vmem [shape: f32[1,128], index: 2, kind: input, shape index: {}]   ;;  %s761_s3 = inlined_call_operand.vmem [shape: f32[1,128], index: 3, kind: input, shape index: {}]   ;;  %s762_s4 = inlined_call_operand.vmem [shape: bf16[32,128], index: 4, kind: output, shape index: {}]  }
   0x1   :  { %s697_s17 = smov 0  }
   0x2 LB: > { %s23_s18 = sadd.s32 1, %s661_s16  ;;  %p534_p0 = scmp.ge.s32.totalorder %s665_s17, 1  ;;  %s665_s17 = sphi %s697_s17, %s14_s17   ;;  %s661_s16 = sphi %s695_s16, %s764_s16   ;;  %s657_s15 = sphi %s693_s15, %s763_s15  }
   0x3   : > { %p24_p1 = scmp.ge.s32.totalorder %s23_s18, 9  ;;  %p191_p2 = scmp.lt.s32.totalorder %s665_s17, 10 }
   0x5   : > { %s766_s18 = smov (%p24_p1, %s23_s18), 0  ;;  %p192_p3 = pnand %p534_p0, %p191_p2 }
   0x6   : > { %p227_p4 = scmp.lt.s32.totalorder (!%p192_p3), %s657_s15, 8  ;;  %p539_p5 = scmp.ne.s32.totalorder (!%p192_p3), %s657_s15, 0 }
   0x7   : > { %195 = sbr.rel (%p192_p3) target bundleno = 289 (0x121), region = 36 }
   0xe   : > { %s228_s19 = scalar_select %p227_p4, %s657_s15, 8 }
   0xf   : > { %251 = sbr.rel (%p539_p5) target bundleno = 22 (0x16), region = 40  ;;  %v667_v0 = vmov (!%p539_p5), 0.0  }
  0x10   : > { %s561_s20 = sshll.u32 %s228_s19, 4  ;;  %s562_s21 = sshll.u32 %s228_s19, 6  ;;  %252 = vst [vmem:[#allocation2] sm:$0xff] (!%p539_p5), %v667_v0  ;;  %253 = vst [vmem:[#allocation2 + $0x8] sm:$0xff] (!%p539_p5), %v667_v0 }
  0x11   : > { %s718_s24 = scalar_lea.vmem %s758_s0, %s561_s20  ;;  %s723_s27 = scalar_lea.vmem %s759_s1, %s562_s21  ;;  %254 = vst [vmem:[#allocation2 + $0x10] sm:$0xff] (!%p539_p5), %v667_v0  ;;  %255 = vst [vmem:[#allocation2 + $0x18] sm:$0xff] (!%p539_p5), %v667_v0 }
  0x16 PF: > { %v633_v1 = vld [vmem:[%s723_s27] sm:$0xff]   ;;  %v634_v2 = vld [vmem:[%s723_s27 + $0x8] sm:$0xff]   ;;  %v635_v3 = vld [vmem:[%s723_s27 + $0x10] sm:$0xff]   ;;  %p550_p6 = scmp.ne.s32.totalorder %s657_s15, 8 }
  0x17   : > { %588 = vmatprep.subr.bf16.mxu0 %v633_v1  ;;  %v636_v4 = vld [vmem:[%s723_s27 + $0x18] sm:$0xff]   ;;  %v641_v5 = vld [vmem:[%s718_s24] sm:$0xff]   ;;  %v638_v7 = vld [vmem:[%s723_s27 + $0x28] sm:$0xff]  }
  0x18   : > { %589 = vmatpush3.bf16.msra.mxu0 %v633_v1  ;;  %604 = vmatprep.mubr.bf16.mxu0 %v641_v5  ;;  %v637_v6 = vld [vmem:[%s723_s27 + $0x20] sm:$0xff]   ;;  %v639_v8 = vld [vmem:[%s723_s27 + $0x30] sm:$0xff]   ;;  %v640_v9 = vld [vmem:[%s723_s27 + $0x38] sm:$0xff]  }
  0x19   : > { %590 = vmatprep.subr.bf16.mxu0 %v634_v2  ;;  %v642_v10 = vld [vmem:[%s718_s24 + $0x8] sm:$0xff]   ;;  %v258_v11 = vld [vmem:[#allocation2 + $0x10] sm:$0xff]  ;;  %v256_v12 = vld [vmem:[#allocation2] sm:$0xff] }
  0x1a   : > { %v259_v14 = vld [vmem:[#allocation2 + $0x18] sm:$0xff]  ;;  %v257_v17 = vld [vmem:[#allocation2 + $0x8] sm:$0xff]  ;;  %v551_v25 = vld [vmem:[%s760_s2] ss:$0 sm:$0xff] (!%p550_p6) }
  0x1b   : > { %v552_v28 = vld [vmem:[%s761_s3] ss:$0 sm:$0xff] (!%p550_p6) }
  0x1c   : > { %591 = vmatpush3.bf16.msra.mxu0 %v634_v2 }
  0x1d   : > { %592 = vmatprep.subr.bf16.mxu0 %v635_v3 }
  0x20   : > { %593 = vmatpush3.bf16.msra.mxu0 %v635_v3 }
  0x21   : > { %594 = vmatprep.subr.bf16.mxu0 %v636_v4 }
  0x24   : > { %595 = vmatpush3.bf16.msra.mxu0 %v636_v4 }
  0x25   : > { %596 = vmatprep.subr.bf16.mxu0 %v637_v6 }
  0x28   : > { %597 = vmatpush3.bf16.msra.mxu0 %v637_v6 }
  0x29   : > { %598 = vmatprep.subr.bf16.mxu0 %v638_v7 }
  0x2c   : > { %599 = vmatpush3.bf16.msra.mxu0 %v638_v7 }
  0x2d   : > { %600 = vmatprep.subr.bf16.mxu0 %v639_v8 }
  0x30   : > { %601 = vmatpush3.bf16.msra.mxu0 %v639_v8 }
  0x31   : > { %602 = vmatprep.subr.bf16.mxu0 %v640_v9 }
  0x34   : > { %603 = vmatpush3.bf16.msra.mxu0 %v640_v9 }
  0x37   : > { %605 = vmatmul.mubr.bf16.vlgmr.msra.gmra.mrb[0].mxu0 %v642_v10 }
 0x10a   : > { %v606_v13 = vpop.f32.mrb[0].mxu0  ;;  %400 = sbr.rel (%p550_p6) target bundleno = 289 (0x121), region = 44 }
 0x10b   : > { %v391_v15 = vadd.f32 %v606_v13, %v258_v11  ;;  %v374_v16 = vpop.f32.mrb[1].mxu0 }
 0x10c   : > { %v389_v18 = vadd.f32 %v374_v16, %v256_v12  ;;  %v607_v19 = vpop.f32.mrb[2].mxu0 }
 0x10d   : > { %395 = vst [vmem:[#allocation2 + $0x10] sm:$0xff] %v391_v15  ;;  %v392_v20 = vadd.f32 %v607_v19, %v259_v14  ;;  %v377_v21 = vpop.f32.mrb[3].mxu0 }
 0x10e   : > { %393 = vst [vmem:[#allocation2] sm:$0xff] %v389_v18  ;;  %v390_v22 = vadd.f32 %v377_v21, %v257_v17 }
 0x10f   : > { %396 = vst [vmem:[#allocation2 + $0x18] sm:$0xff] %v392_v20 }
 0x110   : > { %394 = vst [vmem:[#allocation2 + $0x8] sm:$0xff] %v390_v22 }
 0x114   : > { %v403_v29 = vld [vmem:[#allocation2 + $0x10] sm:$0xff] }
 0x115   : > { %v401_v23 = vld [vmem:[#allocation2] sm:$0xff]  ;;  %v414_v31 = vmul.f32 %v551_v25, %v403_v29 }
 0x116   : > { %v412_v26 = vmul.f32 %v551_v25, %v401_v23  ;;  %v404_v30 = vld [vmem:[#allocation2 + $0x18] sm:$0xff] }
 0x117   : > { %v402_v24 = vld [vmem:[#allocation2 + $0x8] sm:$0xff]  ;;  %v415_v32 = vmul.f32 %v551_v25, %v404_v30  ;;  %v425_v35 = vadd.f32 %v552_v28, %v414_v31 }
 0x118   : > { %v413_v27 = vmul.f32 %v551_v25, %v402_v24  ;;  %v423_v33 = vadd.f32 %v552_v28, %v412_v26 }
 0x119   : > { %v426_v36 = vadd.f32 %v552_v28, %v415_v32  ;;  %v429_v39 = vmax.f32 %v425_v35, 0.0 }
 0x11a   : > { %v424_v34 = vadd.f32 %v552_v28, %v413_v27  ;;  %v427_v37 = vmax.f32 %v423_v33, 0.0 }
 0x11b   : > { %v430_v40 = vmax.f32 %v426_v36, 0.0 }
 0x11c   : > { %v428_v38 = vmax.f32 %v424_v34, 0.0 }
 0x11d   : > { %v575_v42 = vpack.c.bf16 %v430_v40, %v429_v39 }
 0x11e   : > { %v570_v41 = vpack.c.bf16 %v428_v38, %v427_v37 }
 0x11f   : > { %577 = vst [vmem:[%s762_s4 + $0x8] sm:$0xff] %v575_v42  }
 0x120   : > { %571 = vst [vmem:[%s762_s4] sm:$0xff] %v570_v41  }
 0x121 PF: > { %s14_s17 = sadd.s32 1, %s665_s17   ;;  %s763_s15 = smov %s661_s16 }
 0x122   : > { %p11_p7 = scmp.ge.s32.totalorder %s14_s17, 11   ;;  %s764_s16 = smov %s766_s18 }
 0x124   :  { %13 = sbr.rel (!%p11_p7) target bundleno = 2 (0x2), region = 77 }

// kernel: new_model_forward.28
= control target key start
LH: loop header
LB: loop body
LE: loop exit
PB: predicated region body
PF: predicated region fallthrough
CT: control target
= control target key end

     0   :  { %s358_s1 = inlined_call_operand.vmem [shape: bf16[1,128,128], index: 1, kind: input, shape index: {}]   ;;  %s359_s0 = inlined_call_operand.vmem [shape: bf16[1,32,128], index: 0, kind: input, shape index: {}]   ;;  %s360_s2 = inlined_call_operand.vmem [shape: f32[1,128], index: 2, kind: input, shape index: {}]   ;;  %s361_s3 = inlined_call_operand.vmem [shape: f32[1,128], index: 3, kind: input, shape index: {}]   ;;  %s362_s4 = inlined_call_operand.vmem [shape: bf16[32,128], index: 4, kind: output, shape index: {}]  }
   0x1   :  { %v281_v0 = vld [vmem:[%s358_s1] sm:$0xff]   ;;  %v282_v1 = vld [vmem:[%s358_s1 + $0x8] sm:$0xff]   ;;  %v283_v2 = vld [vmem:[%s358_s1 + $0x10] sm:$0xff]  }
   0x2   :  { %261 = vmatprep.subr.bf16.mxu0 %v281_v0  ;;  %v284_v3 = vld [vmem:[%s358_s1 + $0x18] sm:$0xff]   ;;  %v289_v4 = vld [vmem:[%s359_s0] sm:$0xff]   ;;  %v286_v6 = vld [vmem:[%s358_s1 + $0x28] sm:$0xff]  }
   0x3   :  { %262 = vmatpush3.bf16.msra.mxu0 %v281_v0  ;;  %277 = vmatprep.mubr.bf16.mxu0 %v289_v4  ;;  %v285_v5 = vld [vmem:[%s358_s1 + $0x20] sm:$0xff]   ;;  %v287_v7 = vld [vmem:[%s358_s1 + $0x30] sm:$0xff]   ;;  %v288_v8 = vld [vmem:[%s358_s1 + $0x38] sm:$0xff]  }
   0x4   :  { %263 = vmatprep.subr.bf16.mxu0 %v282_v1  ;;  %v290_v9 = vld [vmem:[%s359_s0 + $0x8] sm:$0xff]   ;;  %v230_v10 = vld [vmem:[%s360_s2] ss:$0 sm:$0xff] }
   0x5   :  { %v231_v14 = vld [vmem:[%s361_s3] ss:$0 sm:$0xff] }
   0x7   :  { %264 = vmatpush3.bf16.msra.mxu0 %v282_v1 }
   0x8   :  { %265 = vmatprep.subr.bf16.mxu0 %v283_v2 }
   0xb   :  { %266 = vmatpush3.bf16.msra.mxu0 %v283_v2 }
   0xc   :  { %267 = vmatprep.subr.bf16.mxu0 %v284_v3 }
   0xf   :  { %268 = vmatpush3.bf16.msra.mxu0 %v284_v3 }
  0x10   :  { %269 = vmatprep.subr.bf16.mxu0 %v285_v5 }
  0x13   :  { %270 = vmatpush3.bf16.msra.mxu0 %v285_v5 }
  0x14   :  { %271 = vmatprep.subr.bf16.mxu0 %v286_v6 }
  0x17   :  { %272 = vmatpush3.bf16.msra.mxu0 %v286_v6 }
  0x18   :  { %273 = vmatprep.subr.bf16.mxu0 %v287_v7 }
  0x1b   :  { %274 = vmatpush3.bf16.msra.mxu0 %v287_v7 }
  0x1c   :  { %275 = vmatprep.subr.bf16.mxu0 %v288_v8 }
  0x1f   :  { %276 = vmatpush3.bf16.msra.mxu0 %v288_v8 }
  0x22   :  { %278 = vmatmul.mubr.bf16.vlgmr.msra.gmra.mrb[0].mxu0 %v290_v9 }
  0xf5   :  { %v279_v11 = vpop.f32.mrb[0].mxu0 }
  0xf6   :  { %v183_v12 = vmul.f32 %v279_v11, %v230_v10  ;;  %v144_v13 = vpop.f32.mrb[1].mxu0 }
  0xf7   :  { %v181_v15 = vmul.f32 %v230_v10, %v144_v13  ;;  %v280_v16 = vpop.f32.mrb[2].mxu0 }
  0xf8   :  { %v184_v17 = vmul.f32 %v280_v16, %v230_v10  ;;  %v147_v18 = vpop.f32.mrb[3].mxu0  ;;  %v194_v20 = vadd.f32 %v231_v14, %v183_v12 }
  0xf9   :  { %v182_v19 = vmul.f32 %v230_v10, %v147_v18  ;;  %v192_v22 = vadd.f32 %v231_v14, %v181_v15 }
  0xfa   :  { %v195_v21 = vadd.f32 %v231_v14, %v184_v17 }
  0xfb   :  { %v193_v23 = vadd.f32 %v231_v14, %v182_v19 }
  0xfc   :  { %v248_v24 = vpack.c.bf16 %v195_v21, %v194_v20 }
  0xfd   :  { %v243_v25 = vpack.c.bf16 %v193_v23, %v192_v22 }
  0xfe   :  { %250 = vst [vmem:[%s362_s4 + $0x8] sm:$0xff] %v248_v24  }
  0xff   :  { %244 = vst [vmem:[%s362_s4] sm:$0xff] %v243_v25  }

// kernel: new_model_forward.31
= control target key start
LH: loop header
LB: loop body
LE: loop exit
PB: predicated region body
PF: predicated region fallthrough
CT: control target
= control target key end

     0   :  { %s397_s1 = inlined_call_operand.vmem [shape: bf16[1,128,128], index: 1, kind: input, shape index: {}]   ;;  %s398_s0 = inlined_call_operand.vmem [shape: bf16[1,32,128], index: 0, kind: input, shape index: {}]   ;;  %s399_s2 = inlined_call_operand.vmem [shape: f32[1,128], index: 2, kind: input, shape index: {}]   ;;  %s400_s4 = inlined_call_operand.vmem [shape: bf16[32,128], index: 4, kind: input, shape index: {}]   ;;  %s401_s3 = inlined_call_operand.vmem [shape: f32[1,128], index: 3, kind: input, shape index: {}]   ;;  %s402_s5 = inlined_call_operand.vmem [shape: bf16[32,128], index: 5, kind: output, shape index: {}]  }
   0x1   :  { %v309_v0 = vld [vmem:[%s397_s1] sm:$0xff]   ;;  %v310_v1 = vld [vmem:[%s397_s1 + $0x8] sm:$0xff]   ;;  %v311_v2 = vld [vmem:[%s397_s1 + $0x10] sm:$0xff]  }
   0x2   :  { %289 = vmatprep.subr.bf16.mxu0 %v309_v0  ;;  %v312_v3 = vld [vmem:[%s397_s1 + $0x18] sm:$0xff]   ;;  %v317_v4 = vld [vmem:[%s398_s0] sm:$0xff]   ;;  %v314_v6 = vld [vmem:[%s397_s1 + $0x28] sm:$0xff]  }
   0x3   :  { %290 = vmatpush3.bf16.msra.mxu0 %v309_v0  ;;  %305 = vmatprep.mubr.bf16.mxu0 %v317_v4  ;;  %v313_v5 = vld [vmem:[%s397_s1 + $0x20] sm:$0xff]   ;;  %v315_v7 = vld [vmem:[%s397_s1 + $0x30] sm:$0xff]   ;;  %v316_v8 = vld [vmem:[%s397_s1 + $0x38] sm:$0xff]  }
   0x4   :  { %291 = vmatprep.subr.bf16.mxu0 %v310_v1  ;;  %v318_v9 = vld [vmem:[%s398_s0 + $0x8] sm:$0xff]   ;;  %v249_v10 = vld [vmem:[%s399_s2] ss:$0 sm:$0xff] }
   0x5   :  { %v277_v11 = vld [vmem:[%s400_s4 + $0x8] sm:$0xff]   ;;  %v260_v12 = vld [vmem:[%s400_s4] sm:$0xff]  }
   0x6   :  { %v250_v14 = vld [vmem:[%s401_s3] ss:$0 sm:$0xff]  ;;  %v265_v16 = vunpack.c.l.bf16 %v277_v11  ;;  %v261_v19 = vunpack.c.l.bf16 %v260_v12  ;;  %v266_v23 = vunpack.c.h.bf16 %v277_v11  ;;  %v262_v27 = vunpack.c.h.bf16 %v260_v12 }
   0x7   :  { %292 = vmatpush3.bf16.msra.mxu0 %v310_v1 }
   0x8   :  { %293 = vmatprep.subr.bf16.mxu0 %v311_v2 }
   0xb   :  { %294 = vmatpush3.bf16.msra.mxu0 %v311_v2 }
   0xc   :  { %295 = vmatprep.subr.bf16.mxu0 %v312_v3 }
   0xf   :  { %296 = vmatpush3.bf16.msra.mxu0 %v312_v3 }
  0x10   :  { %297 = vmatprep.subr.bf16.mxu0 %v313_v5 }
  0x13   :  { %298 = vmatpush3.bf16.msra.mxu0 %v313_v5 }
  0x14   :  { %299 = vmatprep.subr.bf16.mxu0 %v314_v6 }
  0x17   :  { %300 = vmatpush3.bf16.msra.mxu0 %v314_v6 }
  0x18   :  { %301 = vmatprep.subr.bf16.mxu0 %v315_v7 }
  0x1b   :  { %302 = vmatpush3.bf16.msra.mxu0 %v315_v7 }
  0x1c   :  { %303 = vmatprep.subr.bf16.mxu0 %v316_v8 }
  0x1f   :  { %304 = vmatpush3.bf16.msra.mxu0 %v316_v8 }
  0x22   :  { %306 = vmatmul.mubr.bf16.vlgmr.msra.gmra.mrb[0].mxu0 %v318_v9 }
  0xf5   :  { %v307_v13 = vpop.f32.mrb[0].mxu0 }
  0xf6   :  { %v186_v15 = vmul.f32 %v307_v13, %v249_v10  ;;  %v147_v17 = vpop.f32.mrb[1].mxu0 }
  0xf7   :  { %v184_v18 = vmul.f32 %v249_v10, %v147_v17  ;;  %v308_v20 = vpop.f32.mrb[2].mxu0 }
  0xf8   :  { %v197_v21 = vadd.f32 %v250_v14, %v186_v15  ;;  %v187_v22 = vmul.f32 %v308_v20, %v249_v10  ;;  %v150_v24 = vpop.f32.mrb[3].mxu0 }
  0xf9   :  { %v195_v25 = vadd.f32 %v250_v14, %v184_v18  ;;  %v185_v26 = vmul.f32 %v249_v10, %v150_v24 }
  0xfa   :  { %v209_v28 = vadd.f32 %v265_v16, %v197_v21  ;;  %v198_v29 = vadd.f32 %v250_v14, %v187_v22 }
  0xfb   :  { %v207_v30 = vadd.f32 %v261_v19, %v195_v25  ;;  %v196_v31 = vadd.f32 %v250_v14, %v185_v26 }
  0xfc   :  { %v210_v32 = vadd.f32 %v266_v23, %v198_v29  ;;  %v213_v34 = vmax.f32 %v209_v28, 0.0 }
  0xfd   :  { %v208_v33 = vadd.f32 %v262_v27, %v196_v31  ;;  %v211_v36 = vmax.f32 %v207_v30, 0.0 }
  0xfe   :  { %v214_v35 = vmax.f32 %v210_v32, 0.0 }
  0xff   :  { %v212_v37 = vmax.f32 %v208_v33, 0.0 }
 0x100   :  { %v275_v38 = vpack.c.bf16 %v214_v35, %v213_v34 }
 0x101   :  { %v270_v39 = vpack.c.bf16 %v212_v37, %v211_v36 }
 0x102   :  { %278 = vst [vmem:[%s402_s5 + $0x8] sm:$0xff] %v275_v38  }
 0x103   :  { %271 = vst [vmem:[%s402_s5] sm:$0xff] %v270_v39  }

// kernel: new_model_forward.32
= control target key start
LH: loop header
LB: loop body
LE: loop exit
PB: predicated region body
PF: predicated region fallthrough
CT: control target
= control target key end

     0   :  { %s362_s1 = inlined_call_operand.vmem [shape: bf16[1,128,128], index: 1, kind: input, shape index: {}]   ;;  %s363_s0 = inlined_call_operand.vmem [shape: bf16[1,32,128], index: 0, kind: input, shape index: {}]   ;;  %s364_s2 = inlined_call_operand.vmem [shape: f32[1,128], index: 2, kind: input, shape index: {}]   ;;  %s365_s3 = inlined_call_operand.vmem [shape: f32[1,128], index: 3, kind: input, shape index: {}]   ;;  %s366_s4 = inlined_call_operand.vmem [shape: bf16[32,128], index: 4, kind: output, shape index: {}]  }
   0x1   :  { %v285_v0 = vld [vmem:[%s362_s1] sm:$0xff]   ;;  %v286_v1 = vld [vmem:[%s362_s1 + $0x8] sm:$0xff]   ;;  %v287_v2 = vld [vmem:[%s362_s1 + $0x10] sm:$0xff]  }
   0x2   :  { %265 = vmatprep.subr.bf16.mxu0 %v285_v0  ;;  %v288_v3 = vld [vmem:[%s362_s1 + $0x18] sm:$0xff]   ;;  %v293_v4 = vld [vmem:[%s363_s0] sm:$0xff]   ;;  %v290_v6 = vld [vmem:[%s362_s1 + $0x28] sm:$0xff]  }
   0x3   :  { %266 = vmatpush3.bf16.msra.mxu0 %v285_v0  ;;  %281 = vmatprep.mubr.bf16.mxu0 %v293_v4  ;;  %v289_v5 = vld [vmem:[%s362_s1 + $0x20] sm:$0xff]   ;;  %v291_v7 = vld [vmem:[%s362_s1 + $0x30] sm:$0xff]   ;;  %v292_v8 = vld [vmem:[%s362_s1 + $0x38] sm:$0xff]  }
   0x4   :  { %267 = vmatprep.subr.bf16.mxu0 %v286_v1  ;;  %v294_v9 = vld [vmem:[%s363_s0 + $0x8] sm:$0xff]   ;;  %v234_v10 = vld [vmem:[%s364_s2] ss:$0 sm:$0xff] }
   0x5   :  { %v235_v12 = vld [vmem:[%s365_s3] ss:$0 sm:$0xff] }
   0x7   :  { %268 = vmatpush3.bf16.msra.mxu0 %v286_v1 }
   0x8   :  { %269 = vmatprep.subr.bf16.mxu0 %v287_v2 }
   0xb   :  { %270 = vmatpush3.bf16.msra.mxu0 %v287_v2 }
   0xc   :  { %271 = vmatprep.subr.bf16.mxu0 %v288_v3 }
   0xf   :  { %272 = vmatpush3.bf16.msra.mxu0 %v288_v3 }
  0x10   :  { %273 = vmatprep.subr.bf16.mxu0 %v289_v5 }
  0x13   :  { %274 = vmatpush3.bf16.msra.mxu0 %v289_v5 }
  0x14   :  { %275 = vmatprep.subr.bf16.mxu0 %v290_v6 }
  0x17   :  { %276 = vmatpush3.bf16.msra.mxu0 %v290_v6 }
  0x18   :  { %277 = vmatprep.subr.bf16.mxu0 %v291_v7 }
  0x1b   :  { %278 = vmatpush3.bf16.msra.mxu0 %v291_v7 }
  0x1c   :  { %279 = vmatprep.subr.bf16.mxu0 %v292_v8 }
  0x1f   :  { %280 = vmatpush3.bf16.msra.mxu0 %v292_v8 }
  0x22   :  { %282 = vmatmul.mubr.bf16.vlgmr.msra.gmra.mrb[0].mxu0 %v294_v9 }
  0xf5   :  { %v283_v11 = vpop.f32.mrb[0].mxu0 }
  0xf6   :  { %v183_v13 = vmul.f32 %v283_v11, %v234_v10  ;;  %v144_v14 = vpop.f32.mrb[1].mxu0 }
  0xf7   :  { %v181_v15 = vmul.f32 %v234_v10, %v144_v14  ;;  %v284_v16 = vpop.f32.mrb[2].mxu0 }
  0xf8   :  { %v194_v17 = vadd.f32 %v235_v12, %v183_v13  ;;  %v184_v18 = vmul.f32 %v284_v16, %v234_v10  ;;  %v147_v19 = vpop.f32.mrb[3].mxu0 }
  0xf9   :  { %v192_v20 = vadd.f32 %v235_v12, %v181_v15  ;;  %v182_v21 = vmul.f32 %v234_v10, %v147_v19 }
  0xfa   :  { %v195_v22 = vadd.f32 %v235_v12, %v184_v18  ;;  %v198_v24 = vmax.f32 %v194_v17, 0.0 }
  0xfb   :  { %v193_v23 = vadd.f32 %v235_v12, %v182_v21  ;;  %v196_v26 = vmax.f32 %v192_v20, 0.0 }
  0xfc   :  { %v199_v25 = vmax.f32 %v195_v22, 0.0 }
  0xfd   :  { %v197_v27 = vmax.f32 %v193_v23, 0.0 }
  0xfe   :  { %v252_v28 = vpack.c.bf16 %v199_v25, %v198_v24 }
  0xff   :  { %v247_v29 = vpack.c.bf16 %v197_v27, %v196_v26 }
 0x100   :  { %254 = vst [vmem:[%s366_s4 + $0x8] sm:$0xff] %v252_v28  }
 0x101   :  { %248 = vst [vmem:[%s366_s4] sm:$0xff] %v247_v29  }

// kernel: new_model_forward.37
= control target key start
LH: loop header
LB: loop body
LE: loop exit
PB: predicated region body
PF: predicated region fallthrough
CT: control target
= control target key end

     0   :  { %s587_s15 = smov 0   ;;  %s589_s16 = smov 0   ;;  %s638_s0 = inlined_call_operand.vmem [shape: bf16[9,8,128], index: 0, kind: input, shape index: {}]   ;;  %s639_s1 = inlined_call_operand.vmem [shape: bf16[9,128,128], index: 1, kind: input, shape index: {}]   ;;  %s640_s2 = inlined_call_operand.vmem [shape: f32[1,128], index: 2, kind: input, shape index: {}]   ;;  %s641_s3 = inlined_call_operand.vmem [shape: f32[1,128], index: 3, kind: input, shape index: {}]   ;;  %s642_s4 = inlined_call_operand.vmem [shape: bf16[8,128], index: 4, kind: output, shape index: {}]  }
   0x1   :  { %s591_s17 = smov 0  }
   0x2 LB: > { %s23_s18 = sadd.s32 1, %s553_s16  ;;  %p451_p0 = scmp.ge.s32.totalorder %s557_s17, 1  ;;  %s557_s17 = sphi %s591_s17, %s14_s17   ;;  %s553_s16 = sphi %s589_s16, %s644_s16   ;;  %s549_s15 = sphi %s587_s15, %s643_s15  }
   0x3   : > { %p24_p1 = scmp.ge.s32.totalorder %s23_s18, 9  ;;  %p188_p2 = scmp.lt.s32.totalorder %s557_s17, 10 }
   0x5   : > { %s646_s18 = smov (%p24_p1, %s23_s18), 0  ;;  %p189_p3 = pnand %p451_p0, %p188_p2 }
   0x6   : > { %p220_p4 = scmp.lt.s32.totalorder (!%p189_p3), %s549_s15, 8  ;;  %p455_p5 = scmp.ne.s32.totalorder (!%p189_p3), %s549_s15, 0 }
   0x7   : > { %192 = sbr.rel (%p189_p3) target bundleno = 286 (0x11e), region = 36 }
   0xe   : > { %s221_s19 = scalar_select %p220_p4, %s549_s15, 8 }
   0xf   : > { %240 = sbr.rel (%p455_p5) target bundleno = 22 (0x16), region = 40  ;;  %v559_v0 = vmov (!%p455_p5), 0.0  }
  0x10   : > { %s452_s20 = sshll.u32 %s221_s19, 2  ;;  %s470_s21 = sshll.u32 %s221_s19, 6  ;;  %241 = vst [vmem:[#allocation2] sm:$0xff] (!%p455_p5), %v559_v0 }
  0x11   : > { %s612_s24 = scalar_lea.vmem %s638_s0, %s452_s20  ;;  %s231_s27 = scalar_lea.vmem %s639_s1, %s470_s21 }
  0x16 PF: > { %v527_v1 = vld [vmem:[%s231_s27] sm:$0xff]   ;;  %v560_v2 = vmov 0.0   ;;  %v528_v3 = vld [vmem:[%s231_s27 + $0x8] sm:$0xff]   ;;  %vm561_vm0 = vmmov 0   ;;  %v529_v4 = vld [vmem:[%s231_s27 + $0x10] sm:$0xff]   ;;  %p464_p6 = scmp.ne.s32.totalorder %s549_s15, 8 }
  0x17   : > { %480 = vmatprep.subr.bf16.mxu0 %v560_v2  ;;  %496 = vmatprep.mubr.msk.bf16.mxu0 %vm561_vm0, %v560_v2  ;;  %v530_v5 = vld [vmem:[%s231_s27 + $0x18] sm:$0xff]   ;;  %v531_v6 = vld [vmem:[%s231_s27 + $0x20] sm:$0xff]   ;;  %v532_v7 = vld [vmem:[%s231_s27 + $0x28] sm:$0xff]  }
  0x18   : > { %481 = vmatpush3.bf16.msra.mxu0 %v527_v1  ;;  %v533_v8 = vld [vmem:[%s231_s27 + $0x30] sm:$0xff]   ;;  %v534_v9 = vld [vmem:[%s231_s27 + $0x38] sm:$0xff]   ;;  %v243_v10 = vld [vmem:[%s612_s24] sm:$0xf] }
  0x19   : > { %482 = vmatprep.subr.bf16.mxu0 %v560_v2  ;;  %v242_v11 = vld [vmem:[#allocation2] sm:$0xff] }
  0x1a   : > { %v465_v18 = vld [vmem:[%s640_s2] ss:$0 sm:$0xff] (!%p464_p6) }
  0x1b   : > { %v466_v19 = vld [vmem:[%s641_s3] ss:$0 sm:$0xff] (!%p464_p6) }
  0x1c   : > { %483 = vmatpush3.bf16.msra.mxu0 %v528_v3 }
  0x1d   : > { %484 = vmatprep.subr.bf16.mxu0 %v560_v2 }
  0x20   : > { %485 = vmatpush3.bf16.msra.mxu0 %v529_v4 }
  0x21   : > { %486 = vmatprep.subr.bf16.mxu0 %v560_v2 }
  0x24   : > { %487 = vmatpush3.bf16.msra.mxu0 %v530_v5 }
  0x25   : > { %488 = vmatprep.subr.bf16.mxu0 %v560_v2 }
  0x28   : > { %489 = vmatpush3.bf16.msra.mxu0 %v531_v6 }
  0x29   : > { %490 = vmatprep.subr.bf16.mxu0 %v560_v2 }
  0x2c   : > { %491 = vmatpush3.bf16.msra.mxu0 %v532_v7 }
  0x2d   : > { %492 = vmatprep.subr.bf16.mxu0 %v560_v2 }
  0x30   : > { %493 = vmatpush3.bf16.msra.mxu0 %v533_v8 }
  0x31   : > { %494 = vmatprep.subr.bf16.mxu0 %v560_v2 }
  0x34   : > { %495 = vmatpush3.bf16.msra.mxu0 %v534_v9 }
  0x37   : > { %497 = vmatmul.mubr.bf16.vlgmr.msra.gmra.mrb[0].mxu0 %v243_v10 }
 0x107   : > { %353 = sbr.rel (%p464_p6) target bundleno = 286 (0x11e), region = 44 }
 0x10a   : > { %v342_v12 = vpop.f32.mrb[0].mxu0 }
 0x10b   : > { %v348_v13 = vadd.f32 %v342_v12, %v242_v11  ;;  %v498_v14 = vpop.f32.mrb[1].mxu0 }
 0x10c   : > { %v345_v15 = vpop.f32.mrb[2].mxu0 }
 0x10d   : > { %349 = vst [vmem:[#allocation2] sm:$0xff] %v348_v13  ;;  %v499_v16 = vpop.f32.mrb[3].mxu0 }
 0x114   : > { %v354_v17 = vld [vmem:[#allocation2] sm:$0xff] }
 0x115   : > { %v362_v20 = vmul.f32 %v465_v18, %v354_v17 }
 0x117   : > { %v370_v21 = vadd.f32 %v466_v19, %v362_v20 }
 0x119   : > { %v371_v22 = vmax.f32 %v370_v21, 0.0 }
 0x11b   : > { %v372_v23 = vpack.c.bf16 %v371_v22, %v371_v22 }
 0x11d   : > { %373 = vst [vmem:[%s642_s4] sm:$0xf] %v372_v23 }
 0x11e PF: > { %s14_s17 = sadd.s32 1, %s557_s17   ;;  %s643_s15 = smov %s553_s16 }
 0x11f   : > { %p11_p7 = scmp.ge.s32.totalorder %s14_s17, 11   ;;  %s644_s16 = smov %s646_s18 }
 0x121   :  { %13 = sbr.rel (!%p11_p7) target bundleno = 2 (0x2), region = 77 }

// kernel: new_model_forward.35
= control target key start
LH: loop header
LB: loop body
LE: loop exit
PB: predicated region body
PF: predicated region fallthrough
CT: control target
= control target key end

     0   :  { %v206_v0 = vmov 0.0   ;;  %vm207_vm0 = vmmov 0   ;;  %s269_s1 = inlined_call_operand.vmem [shape: bf16[1,128,128], index: 1, kind: input, shape index: {}]   ;;  %s270_s0 = inlined_call_operand.vmem [shape: bf16[1,8,128], index: 0, kind: input, shape index: {}]   ;;  %s271_s2 = inlined_call_operand.vmem [shape: f32[1,128], index: 2, kind: input, shape index: {}]   ;;  %s272_s3 = inlined_call_operand.vmem [shape: f32[1,128], index: 3, kind: input, shape index: {}]   ;;  %s273_s4 = inlined_call_operand.vmem [shape: bf16[8,128], index: 4, kind: output, shape index: {}]  }
   0x1   :  { %176 = vmatprep.subr.bf16.mxu0 %v206_v0  ;;  %v198_v1 = vld [vmem:[%s269_s1] sm:$0xff]   ;;  %192 = vmatprep.mubr.msk.bf16.mxu0 %vm207_vm0, %v206_v0  ;;  %v199_v2 = vld [vmem:[%s269_s1 + $0x8] sm:$0xff]   ;;  %v200_v3 = vld [vmem:[%s269_s1 + $0x10] sm:$0xff]  }
   0x2   :  { %177 = vmatpush3.bf16.msra.mxu0 %v198_v1  ;;  %v201_v4 = vld [vmem:[%s269_s1 + $0x18] sm:$0xff]   ;;  %v202_v5 = vld [vmem:[%s269_s1 + $0x20] sm:$0xff]   ;;  %v203_v6 = vld [vmem:[%s269_s1 + $0x28] sm:$0xff]  }
   0x3   :  { %178 = vmatprep.subr.bf16.mxu0 %v206_v0  ;;  %v204_v7 = vld [vmem:[%s269_s1 + $0x30] sm:$0xff]   ;;  %v205_v8 = vld [vmem:[%s269_s1 + $0x38] sm:$0xff]   ;;  %v24_v9 = vld [vmem:[%s270_s0] sm:$0xf] }
   0x4   :  { %v165_v10 = vld [vmem:[%s271_s2] ss:$0 sm:$0xff] }
   0x5   :  { %v166_v12 = vld [vmem:[%s272_s3] ss:$0 sm:$0xff] }
   0x6   :  { %179 = vmatpush3.bf16.msra.mxu0 %v199_v2 }
   0x7   :  { %180 = vmatprep.subr.bf16.mxu0 %v206_v0 }
   0xa   :  { %181 = vmatpush3.bf16.msra.mxu0 %v200_v3 }
   0xb   :  { %182 = vmatprep.subr.bf16.mxu0 %v206_v0 }
   0xe   :  { %183 = vmatpush3.bf16.msra.mxu0 %v201_v4 }
   0xf   :  { %184 = vmatprep.subr.bf16.mxu0 %v206_v0 }
  0x12   :  { %185 = vmatpush3.bf16.msra.mxu0 %v202_v5 }
  0x13   :  { %186 = vmatprep.subr.bf16.mxu0 %v206_v0 }
  0x16   :  { %187 = vmatpush3.bf16.msra.mxu0 %v203_v6 }
  0x17   :  { %188 = vmatprep.subr.bf16.mxu0 %v206_v0 }
  0x1a   :  { %189 = vmatpush3.bf16.msra.mxu0 %v204_v7 }
  0x1b   :  { %190 = vmatprep.subr.bf16.mxu0 %v206_v0 }
  0x1e   :  { %191 = vmatpush3.bf16.msra.mxu0 %v205_v8 }
  0x21   :  { %193 = vmatmul.mubr.bf16.vlgmr.msra.gmra.mrb[0].mxu0 %v24_v9 }
  0xf4   :  { %v123_v11 = vpop.f32.mrb[0].mxu0 }
  0xf5   :  { %v142_v13 = vmul.f32 %v165_v10, %v123_v11  ;;  %v194_v14 = vpop.f32.mrb[1].mxu0 }
  0xf6   :  { %v126_v15 = vpop.f32.mrb[2].mxu0 }
  0xf7   :  { %v150_v16 = vadd.f32 %v166_v12, %v142_v13  ;;  %v195_v17 = vpop.f32.mrb[3].mxu0 }
  0xf9   :  { %v151_v18 = vpack.c.bf16 %v150_v16, %v150_v16 }
  0xfb   :  { %152 = vst [vmem:[%s273_s4] sm:$0xf] %v151_v18 }

// kernel: new_model_forward.38
= control target key start
LH: loop header
LB: loop body
LE: loop exit
PB: predicated region body
PF: predicated region fallthrough
CT: control target
= control target key end

     0   :  { %v213_v0 = vmov 0.0   ;;  %vm214_vm0 = vmmov 0   ;;  %s284_s1 = inlined_call_operand.vmem [shape: bf16[1,128,128], index: 1, kind: input, shape index: {}]   ;;  %s285_s0 = inlined_call_operand.vmem [shape: bf16[1,8,128], index: 0, kind: input, shape index: {}]   ;;  %s286_s2 = inlined_call_operand.vmem [shape: f32[1,128], index: 2, kind: input, shape index: {}]   ;;  %s287_s4 = inlined_call_operand.vmem [shape: bf16[8,128], index: 4, kind: input, shape index: {}]   ;;  %s288_s3 = inlined_call_operand.vmem [shape: f32[1,128], index: 3, kind: input, shape index: {}]   ;;  %s289_s5 = inlined_call_operand.vmem [shape: bf16[8,128], index: 5, kind: output, shape index: {}]  }
   0x1   :  { %183 = vmatprep.subr.bf16.mxu0 %v213_v0  ;;  %v205_v1 = vld [vmem:[%s284_s1] sm:$0xff]   ;;  %199 = vmatprep.mubr.msk.bf16.mxu0 %vm214_vm0, %v213_v0  ;;  %v206_v2 = vld [vmem:[%s284_s1 + $0x8] sm:$0xff]   ;;  %v207_v3 = vld [vmem:[%s284_s1 + $0x10] sm:$0xff]  }
   0x2   :  { %184 = vmatpush3.bf16.msra.mxu0 %v205_v1  ;;  %v208_v4 = vld [vmem:[%s284_s1 + $0x18] sm:$0xff]   ;;  %v209_v5 = vld [vmem:[%s284_s1 + $0x20] sm:$0xff]   ;;  %v210_v6 = vld [vmem:[%s284_s1 + $0x28] sm:$0xff]  }
   0x3   :  { %185 = vmatprep.subr.bf16.mxu0 %v213_v0  ;;  %v211_v7 = vld [vmem:[%s284_s1 + $0x30] sm:$0xff]   ;;  %v212_v8 = vld [vmem:[%s284_s1 + $0x38] sm:$0xff]   ;;  %v27_v9 = vld [vmem:[%s285_s0] sm:$0xf] }
   0x4   :  { %v172_v10 = vld [vmem:[%s286_s2] ss:$0 sm:$0xff] }
   0x5   :  { %v154_v11 = vld [vmem:[%s287_s4] sm:$0xf] }
   0x6   :  { %186 = vmatpush3.bf16.msra.mxu0 %v206_v2  ;;  %v173_v13 = vld [vmem:[%s288_s3] ss:$0 sm:$0xff]  ;;  %v155_v15 = vunpack.c.l.bf16 %v154_v11 }
   0x7   :  { %187 = vmatprep.subr.bf16.mxu0 %v213_v0 }
   0xa   :  { %188 = vmatpush3.bf16.msra.mxu0 %v207_v3 }
   0xb   :  { %189 = vmatprep.subr.bf16.mxu0 %v213_v0 }
   0xe   :  { %190 = vmatpush3.bf16.msra.mxu0 %v208_v4 }
   0xf   :  { %191 = vmatprep.subr.bf16.mxu0 %v213_v0 }
  0x12   :  { %192 = vmatpush3.bf16.msra.mxu0 %v209_v5 }
  0x13   :  { %193 = vmatprep.subr.bf16.mxu0 %v213_v0 }
  0x16   :  { %194 = vmatpush3.bf16.msra.mxu0 %v210_v6 }
  0x17   :  { %195 = vmatprep.subr.bf16.mxu0 %v213_v0 }
  0x1a   :  { %196 = vmatpush3.bf16.msra.mxu0 %v211_v7 }
  0x1b   :  { %197 = vmatprep.subr.bf16.mxu0 %v213_v0 }
  0x1e   :  { %198 = vmatpush3.bf16.msra.mxu0 %v212_v8 }
  0x21   :  { %200 = vmatmul.mubr.bf16.vlgmr.msra.gmra.mrb[0].mxu0 %v27_v9 }
  0xf4   :  { %v126_v12 = vpop.f32.mrb[0].mxu0 }
  0xf5   :  { %v145_v14 = vmul.f32 %v172_v10, %v126_v12  ;;  %v201_v16 = vpop.f32.mrb[1].mxu0 }
  0xf6   :  { %v129_v17 = vpop.f32.mrb[2].mxu0 }
  0xf7   :  { %v153_v18 = vadd.f32 %v173_v13, %v145_v14  ;;  %v202_v19 = vpop.f32.mrb[3].mxu0 }
  0xf9   :  { %v156_v20 = vadd.f32 %v155_v15, %v153_v18 }
  0xfb   :  { %v157_v21 = vmax.f32 %v156_v20, 0.0 }
  0xfd   :  { %v158_v22 = vpack.c.bf16 %v157_v21, %v157_v21 }
  0xff   :  { %159 = vst [vmem:[%s289_s5] sm:$0xf] %v158_v22 }

// kernel: new_model_forward.40
= control target key start
LH: loop header
LB: loop body
LE: loop exit
PB: predicated region body
PF: predicated region fallthrough
CT: control target
= control target key end

     0   :  { %v207_v0 = vmov 0.0   ;;  %vm208_vm0 = vmmov 0   ;;  %s270_s1 = inlined_call_operand.vmem [shape: bf16[1,128,128], index: 1, kind: input, shape index: {}]   ;;  %s271_s0 = inlined_call_operand.vmem [shape: bf16[1,8,128], index: 0, kind: input, shape index: {}]   ;;  %s272_s2 = inlined_call_operand.vmem [shape: f32[1,128], index: 2, kind: input, shape index: {}]   ;;  %s273_s3 = inlined_call_operand.vmem [shape: f32[1,128], index: 3, kind: input, shape index: {}]   ;;  %s274_s4 = inlined_call_operand.vmem [shape: bf16[8,128], index: 4, kind: output, shape index: {}]  }
   0x1   :  { %177 = vmatprep.subr.bf16.mxu0 %v207_v0  ;;  %v199_v1 = vld [vmem:[%s270_s1] sm:$0xff]   ;;  %193 = vmatprep.mubr.msk.bf16.mxu0 %vm208_vm0, %v207_v0  ;;  %v200_v2 = vld [vmem:[%s270_s1 + $0x8] sm:$0xff]   ;;  %v201_v3 = vld [vmem:[%s270_s1 + $0x10] sm:$0xff]  }
   0x2   :  { %178 = vmatpush3.bf16.msra.mxu0 %v199_v1  ;;  %v202_v4 = vld [vmem:[%s270_s1 + $0x18] sm:$0xff]   ;;  %v203_v5 = vld [vmem:[%s270_s1 + $0x20] sm:$0xff]   ;;  %v204_v6 = vld [vmem:[%s270_s1 + $0x28] sm:$0xff]  }
   0x3   :  { %179 = vmatprep.subr.bf16.mxu0 %v207_v0  ;;  %v205_v7 = vld [vmem:[%s270_s1 + $0x30] sm:$0xff]   ;;  %v206_v8 = vld [vmem:[%s270_s1 + $0x38] sm:$0xff]   ;;  %v24_v9 = vld [vmem:[%s271_s0] sm:$0xf] }
   0x4   :  { %v166_v10 = vld [vmem:[%s272_s2] ss:$0 sm:$0xff] }
   0x5   :  { %v167_v12 = vld [vmem:[%s273_s3] ss:$0 sm:$0xff] }
   0x6   :  { %180 = vmatpush3.bf16.msra.mxu0 %v200_v2 }
   0x7   :  { %181 = vmatprep.subr.bf16.mxu0 %v207_v0 }
   0xa   :  { %182 = vmatpush3.bf16.msra.mxu0 %v201_v3 }
   0xb   :  { %183 = vmatprep.subr.bf16.mxu0 %v207_v0 }
   0xe   :  { %184 = vmatpush3.bf16.msra.mxu0 %v202_v4 }
   0xf   :  { %185 = vmatprep.subr.bf16.mxu0 %v207_v0 }
  0x12   :  { %186 = vmatpush3.bf16.msra.mxu0 %v203_v5 }
  0x13   :  { %187 = vmatprep.subr.bf16.mxu0 %v207_v0 }
  0x16   :  { %188 = vmatpush3.bf16.msra.mxu0 %v204_v6 }
  0x17   :  { %189 = vmatprep.subr.bf16.mxu0 %v207_v0 }
  0x1a   :  { %190 = vmatpush3.bf16.msra.mxu0 %v205_v7 }
  0x1b   :  { %191 = vmatprep.subr.bf16.mxu0 %v207_v0 }
  0x1e   :  { %192 = vmatpush3.bf16.msra.mxu0 %v206_v8 }
  0x21   :  { %194 = vmatmul.mubr.bf16.vlgmr.msra.gmra.mrb[0].mxu0 %v24_v9 }
  0xf4   :  { %v123_v11 = vpop.f32.mrb[0].mxu0 }
  0xf5   :  { %v142_v13 = vmul.f32 %v166_v10, %v123_v11  ;;  %v195_v14 = vpop.f32.mrb[1].mxu0 }
  0xf6   :  { %v126_v15 = vpop.f32.mrb[2].mxu0 }
  0xf7   :  { %v150_v16 = vadd.f32 %v167_v12, %v142_v13  ;;  %v196_v17 = vpop.f32.mrb[3].mxu0 }
  0xf9   :  { %v151_v18 = vmax.f32 %v150_v16, 0.0 }
  0xfb   :  { %v152_v19 = vpack.c.bf16 %v151_v18, %v151_v18 }
  0xfd   :  { %153 = vst [vmem:[%s274_s4] sm:$0xf] %v152_v19 }

// kernel: new_model_forward.41
= control target key start
LH: loop header
LB: loop body
LE: loop exit
PB: predicated region body
PF: predicated region fallthrough
CT: control target
= control target key end

     0   :  { %s572_s15 = smov 0   ;;  %s574_s16 = smov 0   ;;  %s629_s0 = inlined_call_operand.vmem [shape: bf16[9,2,128], index: 0, kind: input, shape index: {}]   ;;  %s630_s1 = inlined_call_operand.vmem [shape: bf16[9,128,128], index: 1, kind: input, shape index: {}]   ;;  %s631_s2 = inlined_call_operand.vmem [shape: f32[1,128], index: 2, kind: input, shape index: {}]   ;;  %s632_s3 = inlined_call_operand.vmem [shape: f32[1,128], index: 3, kind: input, shape index: {}]   ;;  %s633_s4 = inlined_call_operand.vmem [shape: bf16[2,128], index: 4, kind: output, shape index: {}]  }
   0x1   :  { %s576_s17 = smov 0  }
   0x2 LB: > { %s23_s18 = sadd.s32 1, %s538_s16  ;;  %p437_p0 = scmp.ge.s32.totalorder %s542_s17, 1  ;;  %s542_s17 = sphi %s576_s17, %s14_s17   ;;  %s538_s16 = sphi %s574_s16, %s635_s16   ;;  %s534_s15 = sphi %s572_s15, %s634_s15  }
   0x3   : > { %p24_p1 = scmp.ge.s32.totalorder %s23_s18, 9  ;;  %p187_p2 = scmp.lt.s32.totalorder %s542_s17, 10 }
   0x5   : > { %s637_s18 = smov (%p24_p1, %s23_s18), 0  ;;  %p188_p3 = pnand %p437_p0, %p187_p2 }
   0x6   : > { %p217_p4 = scmp.lt.s32.totalorder (!%p188_p3), %s534_s15, 8  ;;  %p440_p5 = scmp.ne.s32.totalorder (!%p188_p3), %s534_s15, 0 }
   0x7   : > { %191 = sbr.rel (%p188_p3) target bundleno = 286 (0x11e), region = 36 }
   0xe   : > { %s594_s19 = scalar_select %p217_p4, %s534_s15, 8 }
   0xf   : > { %235 = sbr.rel (%p440_p5) target bundleno = 22 (0x16), region = 40  ;;  %v544_v0 = vmov (!%p440_p5), 0.0  }
  0x10   : > { %s222_s22 = scalar_lea.vmem %s629_s0, %s594_s19  ;;  %s455_s23 = sshll.u32 %s594_s19, 6  ;;  %236 = vst [vmem:[#allocation2] sm:$0x3] (!%p440_p5), %v544_v0 }
  0x11   : > { %s227_s26 = scalar_lea.vmem %s630_s1, %s455_s23 }
  0x16 PF: > { %v512_v1 = vld [vmem:[%s227_s26] sm:$0xff]   ;;  %v545_v2 = vmov 0.0   ;;  %v513_v3 = vld [vmem:[%s227_s26 + $0x8] sm:$0xff]   ;;  %vm546_vm0 = vmmov 0   ;;  %v514_v4 = vld [vmem:[%s227_s26 + $0x10] sm:$0xff]   ;;  %p449_p6 = scmp.ne.s32.totalorder %s534_s15, 8 }
  0x17   : > { %465 = vmatprep.subr.bf16.mxu0 %v545_v2  ;;  %481 = vmatprep.mubr.msk.bf16.mxu0 %vm546_vm0, %v545_v2  ;;  %v515_v5 = vld [vmem:[%s227_s26 + $0x18] sm:$0xff]   ;;  %v516_v6 = vld [vmem:[%s227_s26 + $0x20] sm:$0xff]   ;;  %v517_v7 = vld [vmem:[%s227_s26 + $0x28] sm:$0xff]  }
  0x18   : > { %466 = vmatpush3.bf16.msra.mxu0 %v512_v1  ;;  %v518_v8 = vld [vmem:[%s227_s26 + $0x30] sm:$0xff]   ;;  %v519_v9 = vld [vmem:[%s227_s26 + $0x38] sm:$0xff]   ;;  %v238_v10 = vld [vmem:[%s222_s22] sm:$0x1] }
  0x19   : > { %467 = vmatprep.subr.bf16.mxu0 %v545_v2  ;;  %v237_v11 = vld [vmem:[#allocation2] sm:$0x3] }
  0x1a   : > { %v450_v18 = vld [vmem:[%s631_s2] ss:$0 sm:$0xff] (!%p449_p6) }
  0x1b   : > { %v451_v19 = vld [vmem:[%s632_s3] ss:$0 sm:$0xff] (!%p449_p6) }
  0x1c   : > { %468 = vmatpush3.bf16.msra.mxu0 %v513_v3 }
  0x1d   : > { %469 = vmatprep.subr.bf16.mxu0 %v545_v2 }
  0x20   : > { %470 = vmatpush3.bf16.msra.mxu0 %v514_v4 }
  0x21   : > { %471 = vmatprep.subr.bf16.mxu0 %v545_v2 }
  0x24   : > { %472 = vmatpush3.bf16.msra.mxu0 %v515_v5 }
  0x25   : > { %473 = vmatprep.subr.bf16.mxu0 %v545_v2 }
  0x28   : > { %474 = vmatpush3.bf16.msra.mxu0 %v516_v6 }
  0x29   : > { %475 = vmatprep.subr.bf16.mxu0 %v545_v2 }
  0x2c   : > { %476 = vmatpush3.bf16.msra.mxu0 %v517_v7 }
  0x2d   : > { %477 = vmatprep.subr.bf16.mxu0 %v545_v2 }
  0x30   : > { %478 = vmatpush3.bf16.msra.mxu0 %v518_v8 }
  0x31   : > { %479 = vmatprep.subr.bf16.mxu0 %v545_v2 }
  0x34   : > { %480 = vmatpush3.bf16.msra.mxu0 %v519_v9 }
  0x37   : > { %482 = vmatmul.mubr.bf16.vlgmr.msra.gmra.mrb[0].mxu0 %v238_v10 }
 0x107   : > { %348 = sbr.rel (%p449_p6) target bundleno = 286 (0x11e), region = 44 }
 0x10a   : > { %v337_v12 = vpop.f32.mrb[0].mxu0 }
 0x10b   : > { %v343_v13 = vadd.f32 %v337_v12, %v237_v11  ;;  %v483_v14 = vpop.f32.mrb[1].mxu0 }
 0x10c   : > { %v340_v15 = vpop.f32.mrb[2].mxu0 }
 0x10d   : > { %344 = vst [vmem:[#allocation2] sm:$0x3] %v343_v13  ;;  %v484_v16 = vpop.f32.mrb[3].mxu0 }
 0x114   : > { %v349_v17 = vld [vmem:[#allocation2] sm:$0x3] }
 0x115   : > { %v357_v20 = vmul.f32 %v450_v18, %v349_v17 }
 0x117   : > { %v365_v21 = vadd.f32 %v451_v19, %v357_v20 }
 0x119   : > { %v366_v22 = vmax.f32 %v365_v21, 0.0 }
 0x11b   : > { %v367_v23 = vpack.c.bf16 %v366_v22, %v366_v22 }
 0x11d   : > { %368 = vst [vmem:[%s633_s4] sm:$0x1] %v367_v23 }
 0x11e PF: > { %s14_s17 = sadd.s32 1, %s542_s17   ;;  %s634_s15 = smov %s538_s16 }
 0x11f   : > { %p11_p7 = scmp.ge.s32.totalorder %s14_s17, 11   ;;  %s635_s16 = smov %s637_s18 }
 0x121   :  { %13 = sbr.rel (!%p11_p7) target bundleno = 2 (0x2), region = 77 }

// kernel: new_model_forward.39
= control target key start
LH: loop header
LB: loop body
LE: loop exit
PB: predicated region body
PF: predicated region fallthrough
CT: control target
= control target key end

     0   :  { %v301_v1 = vmov 0   ;;  %v302_v18 = vmov 0.0   ;;  %v303_v19 = vmov 1983009808   ;;  %v168_v21 = vlaneseq  ;;  %s390_s1 = inlined_call_operand.vmem [shape: bf16[1,128,256], index: 1, kind: input, shape index: {}]   ;;  %s391_s0 = inlined_call_operand.vmem [shape: bf16[1,2,128], index: 0, kind: input, shape index: {}]   ;;  %s392_s2 = inlined_call_operand.vmem [shape: f32[1,256], index: 2, kind: input, shape index: {}]   ;;  %s393_s3 = inlined_call_operand.vmem [shape: f32[1,256], index: 3, kind: input, shape index: {}]   ;;  %s394_s4 = inlined_call_operand.vmem [shape: bf16[2,256], index: 4, kind: output, shape index: {}]  }
   0x1   :  { %v277_v0 = vld [vmem:[%s390_s1 + $0x4] ss:$8 sps:$4 sm:$0xff]   ;;  %153 = vmatprep.mubr.bf16.mxu0 %v301_v1  ;;  %v279_v2 = vld [vmem:[%s390_s1] ss:$8 sps:$4 sm:$0xff]   ;;  %v280_v3 = vld [vmem:[%s390_s1 + $0x14] ss:$8 sps:$4 sm:$0xff]   ;;  %v166_v20 = vunpack.c.l.s4 %v303_v19 }
   0x2   :  { %121 = vmatprep.subr.bf16.mxu0 %v277_v0  ;;  %v282_v4 = vld [vmem:[%s390_s1 + $0x10] ss:$8 sps:$4 sm:$0xff]   ;;  %v283_v5 = vld [vmem:[%s390_s1 + $0x24] ss:$8 sps:$4 sm:$0xff]   ;;  %v285_v6 = vld [vmem:[%s390_s1 + $0x20] ss:$8 sps:$4 sm:$0xff]  }
   0x3   :  { %122 = vmatpush1.bf16.msra.mxu0 %v279_v2  ;;  %v286_v7 = vld [vmem:[%s390_s1 + $0x34] ss:$8 sps:$4 sm:$0xff]   ;;  %v288_v8 = vld [vmem:[%s390_s1 + $0x30] ss:$8 sps:$4 sm:$0xff]   ;;  %v289_v9 = vld [vmem:[%s390_s1 + $0x44] ss:$8 sps:$4 sm:$0xff]   ;;  %v167_v22 = vunpack.c.0.s8 %v166_v20 }
   0x4   :  { %123 = vmatprep.subr.bf16.mxu0 %v280_v3  ;;  %v291_v10 = vld [vmem:[%s390_s1 + $0x40] ss:$8 sps:$4 sm:$0xff]   ;;  %v292_v11 = vld [vmem:[%s390_s1 + $0x54] ss:$8 sps:$4 sm:$0xff]   ;;  %v294_v12 = vld [vmem:[%s390_s1 + $0x50] ss:$8 sps:$4 sm:$0xff]  }
   0x5   :  { %v295_v13 = vld [vmem:[%s390_s1 + $0x64] ss:$8 sps:$4 sm:$0xff]   ;;  %v297_v14 = vld [vmem:[%s390_s1 + $0x60] ss:$8 sps:$4 sm:$0xff]   ;;  %v298_v15 = vld [vmem:[%s390_s1 + $0x74] ss:$8 sps:$4 sm:$0xff]  }
   0x6   :  { %v300_v16 = vld [vmem:[%s390_s1 + $0x70] ss:$8 sps:$4 sm:$0xff]   ;;  %v24_v17 = vld [vmem:[%s391_s0] sm:$0x1]  ;;  %22 = vst [vmem:[#allocation2] sm:$0xf] %v302_v18 }
   0x7   :  { %124 = vmatpush1.bf16.msra.mxu0 %v282_v4  ;;  %v169_v23 = vshrl.u32 %v168_v21, 7  ;;  %v179_v29 = vld [vmem:[%s392_s2] sm:$0x3]  ;;  %v304_v45 = vmov 1966171168  }
   0x8   :  { %125 = vmatprep.subr.bf16.mxu0 %v283_v5  ;;  %v199_v33 = vld [vmem:[%s393_s3] sm:$0x3]  ;;  %v236_v46 = vunpack.c.l.s4 %v304_v45 }
   0x9   :  { %v170_v25 = vsub.s32 %v167_v22, %v169_v23  ;;  %v183_v26 = vsub.s32 0, %v169_v23  ;;  %v187_v27 = vsub.s32 1, %v169_v23 }
   0xa   :  { %v237_v50 = vunpack.c.0.s8 %v236_v46 }
   0xb   :  { %126 = vmatpush1.bf16.msra.mxu0 %v285_v6  ;;  %v184_v36 = vrot.slane %v179_v29, %v183_v26  ;;  %v188_v37 = vrot.slane %v179_v29, %v187_v27  ;;  %v204_v39 = vrot.slane %v199_v33, %v183_v26  ;;  %v208_v40 = vrot.slane %v199_v33, %v187_v27 }
   0xc   :  { %127 = vmatprep.subr.bf16.mxu0 %v286_v7  ;;  %v240_v53 = vsub.s32 %v237_v50, %v169_v23 }
   0xd   :  { %v23_v32 = vld [vmem:[#allocation2] sm:$0xf]  ;;  %v189_v41 = vcombine.low %v184_v36, %v188_v37  ;;  %v209_v42 = vcombine.low %v204_v39, %v208_v40 }
   0xf   :  { %128 = vmatpush1.bf16.msra.mxu0 %v288_v8  ;;  %v196_v43 = vrot.slane %v189_v41, %v170_v25  ;;  %v216_v44 = vrot.slane %v209_v42, %v170_v25 }
  0x10   :  { %129 = vmatprep.subr.bf16.mxu0 %v289_v9 }
  0x13   :  { %130 = vmatpush1.bf16.msra.mxu0 %v291_v10 }
  0x14   :  { %131 = vmatprep.subr.bf16.mxu0 %v292_v11 }
  0x17   :  { %132 = vmatpush1.bf16.msra.mxu0 %v294_v12 }
  0x18   :  { %133 = vmatprep.subr.bf16.mxu0 %v295_v13 }
  0x1b   :  { %134 = vmatpush1.bf16.msra.mxu0 %v297_v14 }
  0x1c   :  { %135 = vmatprep.subr.bf16.mxu0 %v298_v15 }
  0x1f   :  { %136 = vmatpush1.bf16.msra.mxu0 %v300_v16 }
  0x22   :  { %154 = vmatmul.mubr.bf16.vlgmr.msra.gmra.mrb[0].mxu0 %v24_v17 }
  0xf5   :  { %v155_v24 = vpop.f32.mrb[0].mxu0 }
  0xf6   :  { %v157_v28 = vpop.f32.mrb[1].mxu0 }
  0xf7   :  { %v164_v30 = vcombine.low %v155_v24, %v157_v28  ;;  %v159_v31 = vpop.f32.mrb[2].mxu0 }
  0xf8   :  { %v160_v34 = vpop.f32.mrb[3].mxu0 }
  0xf9   :  { %v171_v35 = vrot.slane %v164_v30, %v170_v25 }
  0xfb   :  { %v173_v38 = vadd.f32 %v171_v35, %v23_v32 }
  0xfd   :  { %174 = vst [vmem:[#allocation2] sm:$0xf] %v173_v38 }
 0x104   :  { %v178_v47 = vld [vmem:[#allocation2] sm:$0xf] }
 0x105   :  { %v198_v48 = vmul.f32 %v196_v43, %v178_v47 }
 0x107   :  { %v218_v49 = vadd.f32 %v216_v44, %v198_v48 }
 0x109   :  { %v226_v51 = vrot.slane %v218_v49, %v170_v25 }
 0x10b   :  { %v227_v52 = vcombine.high %v226_v51, %v226_v51 }
 0x10d   :  { %v271_v54 = vpack.c.bf16 %v227_v52, %v226_v51 }
 0x10f   :  { %v241_v55 = vrot.slane %v271_v54, %v240_v53 }
 0x111   :  { %272 = vst.sshfl [vmem:[%s394_s4] sm:$0x5 pattern:$0x73625140] %v241_v55 }

// kernel: new_model_forward.43
= control target key start
LH: loop header
LB: loop body
LE: loop exit
PB: predicated region body
PF: predicated region fallthrough
CT: control target
= control target key end

     0   :  { %vm21_vm0 = vcmask 1041409   ;;  %vm23_vm1 = vcmask 1043459   ;;  %vm25_vm2 = vcmask 1045509   ;;  %vm27_vm3 = vcmask 1047559   ;;  %s54_s0 = inlined_call_operand.vmem [shape: bf16[2,1,256], index: 0, kind: input, shape index: {}]   ;;  %s55_s1 = inlined_call_operand.vmem [shape: f32[2,256], index: 1, kind: output, shape index: {}]  }
   0x1   :  { %v8_v0 = vld [vmem:[%s54_s0] sm:$0x3]  ;;  %v9_v1 = vld [vmem:[%s54_s0 + $0x2] sm:$0x3] }
   0x2   :  { %v10_v2 = vunpack.c.l.bf16 %v8_v0  ;;  %v11_v3 = vunpack.c.l.bf16 %v9_v1 }
   0x4   :  { %v20_v4 = vrot.slane %v11_v3, 7 }
   0x6   :  { %v22_v5 = vsel %vm21_vm0, %v20_v4, %v10_v2 }
   0x7   :  { %v24_v6 = vsel %vm23_vm1, %v20_v4, %v22_v5 }
   0x8   :  { %v26_v7 = vsel %vm25_vm2, %v20_v4, %v24_v6 }
   0x9   :  { %v28_v8 = vsel %vm27_vm3, %v20_v4, %v26_v7 }
   0xa   :  { %30 = vst [vmem:[%s55_s1] sm:$0xf] %v28_v8 }

// kernel: new_model_forward.42
= control target key start
LH: loop header
LB: loop body
LE: loop exit
PB: predicated region body
PF: predicated region fallthrough
CT: control target
= control target key end

     0   :  { %v308_v1 = vmov 0   ;;  %v309_v18 = vmov 0.0   ;;  %v310_v19 = vmov 1983009808   ;;  %v171_v21 = vlaneseq  ;;  %s405_s1 = inlined_call_operand.vmem [shape: bf16[1,128,256], index: 1, kind: input, shape index: {}]   ;;  %s406_s0 = inlined_call_operand.vmem [shape: bf16[1,2,128], index: 0, kind: input, shape index: {}]   ;;  %s407_s2 = inlined_call_operand.vmem [shape: f32[1,256], index: 2, kind: input, shape index: {}]   ;;  %s408_s3 = inlined_call_operand.vmem [shape: f32[1,256], index: 3, kind: input, shape index: {}]   ;;  %s409_s4 = inlined_call_operand.vmem [shape: bf16[2,256], index: 4, kind: input, shape index: {}]   ;;  %s410_s5 = inlined_call_operand.vmem [shape: bf16[2,256], index: 5, kind: output, shape index: {}]  }
   0x1   :  { %v284_v0 = vld [vmem:[%s405_s1 + $0x4] ss:$8 sps:$4 sm:$0xff]   ;;  %156 = vmatprep.mubr.bf16.mxu0 %v308_v1  ;;  %v286_v2 = vld [vmem:[%s405_s1] ss:$8 sps:$4 sm:$0xff]   ;;  %v287_v3 = vld [vmem:[%s405_s1 + $0x14] ss:$8 sps:$4 sm:$0xff]   ;;  %v169_v20 = vunpack.c.l.s4 %v310_v19 }
   0x2   :  { %124 = vmatprep.subr.bf16.mxu0 %v284_v0  ;;  %v289_v4 = vld [vmem:[%s405_s1 + $0x10] ss:$8 sps:$4 sm:$0xff]   ;;  %v290_v5 = vld [vmem:[%s405_s1 + $0x24] ss:$8 sps:$4 sm:$0xff]   ;;  %v292_v6 = vld [vmem:[%s405_s1 + $0x20] ss:$8 sps:$4 sm:$0xff]  }
   0x3   :  { %125 = vmatpush1.bf16.msra.mxu0 %v286_v2  ;;  %v293_v7 = vld [vmem:[%s405_s1 + $0x34] ss:$8 sps:$4 sm:$0xff]   ;;  %v295_v8 = vld [vmem:[%s405_s1 + $0x30] ss:$8 sps:$4 sm:$0xff]   ;;  %v296_v9 = vld [vmem:[%s405_s1 + $0x44] ss:$8 sps:$4 sm:$0xff]   ;;  %v170_v22 = vunpack.c.0.s8 %v169_v20 }
   0x4   :  { %126 = vmatprep.subr.bf16.mxu0 %v287_v3  ;;  %v298_v10 = vld [vmem:[%s405_s1 + $0x40] ss:$8 sps:$4 sm:$0xff]   ;;  %v299_v11 = vld [vmem:[%s405_s1 + $0x54] ss:$8 sps:$4 sm:$0xff]   ;;  %v301_v12 = vld [vmem:[%s405_s1 + $0x50] ss:$8 sps:$4 sm:$0xff]  }
   0x5   :  { %v302_v13 = vld [vmem:[%s405_s1 + $0x64] ss:$8 sps:$4 sm:$0xff]   ;;  %v304_v14 = vld [vmem:[%s405_s1 + $0x60] ss:$8 sps:$4 sm:$0xff]   ;;  %v305_v15 = vld [vmem:[%s405_s1 + $0x74] ss:$8 sps:$4 sm:$0xff]  }
   0x6   :  { %v307_v16 = vld [vmem:[%s405_s1 + $0x70] ss:$8 sps:$4 sm:$0xff]   ;;  %v27_v17 = vld [vmem:[%s406_s0] sm:$0x1]  ;;  %25 = vst [vmem:[#allocation2] sm:$0xf] %v309_v18 }
   0x7   :  { %127 = vmatpush1.bf16.msra.mxu0 %v289_v4  ;;  %v172_v23 = vshrl.u32 %v171_v21, 7  ;;  %v182_v29 = vld [vmem:[%s407_s2] sm:$0x3]  ;;  %v311_v50 = vmov 1966171168  }
   0x8   :  { %128 = vmatprep.subr.bf16.mxu0 %v290_v5  ;;  %v202_v33 = vld [vmem:[%s408_s3] sm:$0x3]  ;;  %v243_v51 = vunpack.c.l.s4 %v311_v50 }
   0x9   :  { %v173_v25 = vsub.s32 %v170_v22, %v172_v23  ;;  %v186_v26 = vsub.s32 0, %v172_v23  ;;  %v190_v27 = vsub.s32 1, %v172_v23  ;;  %v222_v44 = vld [vmem:[%s409_s4] sm:$0x3] }
   0xa   :  { %v223_v48 = vunpack.c.l.bf16 %v222_v44  ;;  %v244_v54 = vunpack.c.0.s8 %v243_v51 }
   0xb   :  { %129 = vmatpush1.bf16.msra.mxu0 %v292_v6  ;;  %v187_v36 = vrot.slane %v182_v29, %v186_v26  ;;  %v191_v37 = vrot.slane %v182_v29, %v190_v27  ;;  %v207_v39 = vrot.slane %v202_v33, %v186_v26  ;;  %v211_v40 = vrot.slane %v202_v33, %v190_v27 }
   0xc   :  { %130 = vmatprep.subr.bf16.mxu0 %v293_v7  ;;  %v247_v57 = vsub.s32 %v244_v54, %v172_v23 }
   0xd   :  { %v26_v32 = vld [vmem:[#allocation2] sm:$0xf]  ;;  %v192_v41 = vcombine.low %v187_v36, %v191_v37  ;;  %v212_v42 = vcombine.low %v207_v39, %v211_v40 }
   0xf   :  { %131 = vmatpush1.bf16.msra.mxu0 %v295_v8  ;;  %v199_v43 = vrot.slane %v192_v41, %v173_v25  ;;  %v219_v45 = vrot.slane %v212_v42, %v173_v25 }
  0x10   :  { %132 = vmatprep.subr.bf16.mxu0 %v296_v9 }
  0x13   :  { %133 = vmatpush1.bf16.msra.mxu0 %v298_v10 }
  0x14   :  { %134 = vmatprep.subr.bf16.mxu0 %v299_v11 }
  0x17   :  { %135 = vmatpush1.bf16.msra.mxu0 %v301_v12 }
  0x18   :  { %136 = vmatprep.subr.bf16.mxu0 %v302_v13 }
  0x1b   :  { %137 = vmatpush1.bf16.msra.mxu0 %v304_v14 }
  0x1c   :  { %138 = vmatprep.subr.bf16.mxu0 %v305_v15 }
  0x1f   :  { %139 = vmatpush1.bf16.msra.mxu0 %v307_v16 }
  0x22   :  { %157 = vmatmul.mubr.bf16.vlgmr.msra.gmra.mrb[0].mxu0 %v27_v17 }
  0xf5   :  { %v158_v24 = vpop.f32.mrb[0].mxu0 }
  0xf6   :  { %v160_v28 = vpop.f32.mrb[1].mxu0 }
  0xf7   :  { %v167_v30 = vcombine.low %v158_v24, %v160_v28  ;;  %v162_v31 = vpop.f32.mrb[2].mxu0 }
  0xf8   :  { %v163_v34 = vpop.f32.mrb[3].mxu0 }
  0xf9   :  { %v174_v35 = vrot.slane %v167_v30, %v173_v25 }
  0xfb   :  { %v176_v38 = vadd.f32 %v174_v35, %v26_v32 }
  0xfd   :  { %177 = vst [vmem:[#allocation2] sm:$0xf] %v176_v38 }
 0x104   :  { %v181_v46 = vld [vmem:[#allocation2] sm:$0xf] }
 0x105   :  { %v201_v47 = vmul.f32 %v199_v43, %v181_v46 }
 0x107   :  { %v221_v49 = vadd.f32 %v219_v45, %v201_v47 }
 0x109   :  { %v224_v52 = vadd.f32 %v223_v48, %v221_v49 }
 0x10b   :  { %v225_v53 = vmax.f32 %v224_v52, 0.0 }
 0x10d   :  { %v233_v55 = vrot.slane %v225_v53, %v173_v25 }
 0x10f   :  { %v234_v56 = vcombine.high %v233_v55, %v233_v55 }
 0x111   :  { %v278_v58 = vpack.c.bf16 %v234_v56, %v233_v55 }
 0x113   :  { %v248_v59 = vrot.slane %v278_v58, %v247_v57 }
 0x115   :  { %279 = vst.sshfl [vmem:[%s410_s5] sm:$0x5 pattern:$0x73625140] %v248_v59 }

</bundles_post_ra>
